<compile_context>
chip_gen: v6e
topology: v6e:2x2x1
jax: 0.10.0
libtpu: 0.0.40
codegen_flags: <defaults>
</compile_context>

<pallas_src>
import functools

import jax
import jax.numpy as jnp
from jax.experimental import pallas as pl
from jax.experimental.pallas import tpu as pltpu


# ----------------------------------------------------------------------------
# Parameter folding helpers (plain JAX, runs under the same jit as the kernel).
# ----------------------------------------------------------------------------
def monarch_dense(mp):
    """Dense d x d equivalent of one MonarchMatrix: monarch(x) == x @ M."""
    L, R = mp['L'], mp['R']
    s = L.shape[0]
    # M[m*s + k, r*s + q] = L[k, q, m] * R[q, r, k]
    M = jnp.einsum('kqm,qrk->mkrq', L, R)
    return M.reshape(s * s, s * s)


def _group_norm_scale_shift(x, gamma, beta, num_groups, eps=1e-5):
    """Fold GroupNorm(num_groups, C) into per-(b, c) scale/shift (f32)."""
    B, C, H, W = x.shape
    xg = x.reshape(B, num_groups, -1).astype(jnp.float32)
    mean = jnp.mean(xg, axis=-1)                       # (B, G)
    var = jnp.var(xg, axis=-1)                         # (B, G)
    rstd = jax.lax.rsqrt(var + eps)
    cpg = C // num_groups
    mean_c = jnp.repeat(mean, cpg, axis=1)             # (B, C)
    rstd_c = jnp.repeat(rstd, cpg, axis=1)             # (B, C)
    scale = rstd_c * gamma[None, :].astype(jnp.float32)
    shift = beta[None, :].astype(jnp.float32) - mean_c * scale
    return scale, shift


def _pick_h_block(H, d, max_lanes=512):
    """Largest divisor h of H with (h*d) % 128 == 0 and h*d <= max_lanes; else
    the smallest 128-aligned divisor; else the full H extent (block == array)."""
    ok = [h for h in range(1, H + 1) if H % h == 0 and (h * d) % 128 == 0]
    if not ok:
        return H
    small = [h for h in ok if h * d <= max_lanes]
    return max(small) if small else min(ok)


# ----------------------------------------------------------------------------
# Fused Pallas kernel: (GN-folded) QKV+residual matmul -> segmented LayerNorm
# -> gate matmul -> V*g -> 1x1 channel-mix matmul [-> + residual columns]
# ----------------------------------------------------------------------------
def _mgc_kernel(x_ref, gs_ref, gb_ref, wall_ref, csum_ref, avg_ref, bcast_ref,
                lnw_ref, lnb_ref, mgate_ref, convw_ref, convb_ref, o_ref, *,
                hd, compute_dtype, use_res):
    C = x_ref.shape[1]
    d3 = 3 * hd
    stat_prec = jax.lax.Precision.HIGHEST
    mm_prec = (jax.lax.Precision.HIGHEST
               if compute_dtype == jnp.float32 else None)

    x_cm = x_ref[...].reshape(C, hd)                    # raw x, channel-major, f32

    # One fused MXU pass over the block-diagonal [Mq | Mk | Mv (| Mres)] weights.
    y = jnp.dot(x_cm.astype(compute_dtype), wall_ref[...],
                precision=mm_prec, preferred_element_type=jnp.float32)

    # GroupNorm is a per-(b, c) affine (scale s, shift t); folded through the
    # matmul: (s*x + t) @ W == s*(x@W) + t*colsum(W).  The residual columns
    # (beyond 3*hd) intentionally keep the raw (un-normalized) x.
    s = gs_ref[...].reshape(C, 1)
    t = gb_ref[...].reshape(C, 1)
    yq = s * y[:, :d3] + t * csum_ref[...]              # (C, 3*hd) f32

    # LayerNorm over every length-d segment (one per (c, h, {Q,K,V})); stats via
    # tiny f32 segment-average / segment-broadcast matmuls (lane-dense).
    mu = jnp.dot(jnp.dot(yq, avg_ref[...], precision=stat_prec,
                         preferred_element_type=jnp.float32),
                 bcast_ref[...], precision=stat_prec,
                 preferred_element_type=jnp.float32)
    zc = yq - mu
    var = jnp.dot(jnp.dot(zc * zc, avg_ref[...], precision=stat_prec,
                          preferred_element_type=jnp.float32),
                  bcast_ref[...], precision=stat_prec,
                  preferred_element_type=jnp.float32)
    norm = zc * jax.lax.rsqrt(var + 1e-5) * lnw_ref[...] + lnb_ref[...]

    q = norm[:, 0:hd]                                   # 128-aligned slices
    k = norm[:, hd:2 * hd]
    v = norm[:, 2 * hd:d3]

    # gate = m2(d_kernel * m1(Q*K)), pre-folded & block-diagonal over positions.
    g = jnp.dot((q * k).astype(compute_dtype), mgate_ref[...],
                precision=mm_prec, preferred_element_type=jnp.float32)
    hidden = v * g                                      # (C, hd) f32

    # proj_out 1x1 conv == a single (C, Cn) @ (Cn, hd) channel-mix matmul.
    out = jnp.dot(convw_ref[...], hidden.astype(compute_dtype),
                  precision=mm_prec, preferred_element_type=jnp.float32)
    out = out + convb_ref[...]

    if use_res:
        out = out + y[:, d3:d3 + hd]

    o_ref[...] = out.reshape(1, C, hd).astype(o_ref.dtype)


# ----------------------------------------------------------------------------
# Wrapper (jitted end-to-end: folding + GN stats + pallas_call)
# ----------------------------------------------------------------------------
@functools.partial(jax.jit,
                   static_argnames=('res', 'num_heads', 'num_groups',
                                    'compute_dtype', 'h_block'))
def monarch_gated_conv_pallas(x, params, *, res=True, num_heads=1, num_groups=32,
                              compute_dtype=jnp.bfloat16, h_block=None):
    assert num_heads == 1, "TODO(synk): num_heads > 1 channel tiling not wired in"
    B, C, H, W = x.shape
    d = W
    Cn = num_heads * C
    assert Cn % num_groups == 0, "GroupNorm32 needs channels % num_groups == 0"
    cdt = compute_dtype
    hi = jax.lax.Precision.HIGHEST

    hb = _pick_h_block(H, d) if h_block is None else int(h_block)
    assert H % hb == 0, "h_block must divide H"
    assert hb == H or (hb * d) % 128 == 0, "h_block*W must be a multiple of 128"
    hd = hb * d

    # ---- fold Monarch chains into tiny dense d x d maps (f32, HIGHEST) --------
    mq = jnp.dot(monarch_dense(params['q']['m3']),
                 monarch_dense(params['q']['m4']), precision=hi)
    mk = jnp.dot(monarch_dense(params['k']['m3']),
                 monarch_dense(params['k']['m4']), precision=hi)
    mv = jnp.dot(monarch_dense(params['v']['m3']),
                 monarch_dense(params['v']['m4']), precision=hi)
    m_gate = jnp.dot(monarch_dense(params['m1']),
                     params['d_kernel'].reshape(d, 1) * monarch_dense(params['m2']),
                     precision=hi)

    # ---- expand to block-diagonal channel-major weights (one block per h) -----
    eye_h = jnp.eye(hb, dtype=jnp.float32)
    blocks = [jnp.kron(eye_h, mq), jnp.kron(eye_h, mk), jnp.kron(eye_h, mv)]
    if res:
        m_res = jnp.dot(monarch_dense(params['m8']),
                        params['d_kernel_bi'].reshape(d, 1) * monarch_dense(params['m9']),
                        precision=hi)
        blocks.append(jnp.kron(eye_h, m_res))
    w_all_f32 = jnp.concatenate(blocks, axis=1)                    # (hd, 3hd[+hd])
    csum = jnp.sum(w_all_f32[:, :3 * hd], axis=0, keepdims=True)   # (1, 3hd) f32
    w_all = w_all_f32.astype(cdt)
    m_gate_bd = jnp.kron(eye_h, m_gate).astype(cdt)                # (hd, hd)

    # segment-average / segment-broadcast matrices for the per-(c, h) LayerNorms
    seg_avg = jnp.kron(jnp.eye(3 * hb, dtype=jnp.float32),
                       jnp.full((d, 1), 1.0 / d, jnp.float32))     # (3hd, 3hb)
    seg_bcast = jnp.kron(jnp.eye(3 * hb, dtype=jnp.float32),
                         jnp.ones((1, d), jnp.float32))            # (3hb, 3hd)

    def tiled(vec):
        return jnp.tile(vec.astype(jnp.float32), hb)
    lnw_bd = jnp.concatenate([tiled(params['q']['ln_w']), tiled(params['k']['ln_w']),
                              tiled(params['v']['ln_w'])]).reshape(1, 3 * hd)
    lnb_bd = jnp.concatenate([tiled(params['q']['ln_b']), tiled(params['k']['ln_b']),
                              tiled(params['v']['ln_b'])]).reshape(1, 3 * hd)

    conv_w = params['conv_w'].astype(cdt)                          # (C, Cn)
    conv_b = params['conv_b'].reshape(C, 1).astype(jnp.float32)    # (C, 1)

    # GroupNorm statistics (tiny cross-row reduction) -> per-(b, c) scale/shift.
    gscale, gshift = _group_norm_scale_shift(x, params['gn_w'], params['gn_b'],
                                             num_groups)
    gscale = gscale.reshape(B, C, 1)
    gshift = gshift.reshape(B, C, 1)

    # NCHW-native, lane-dense view: (B, C, H*W) is a free reshape (no transpose).
    x3 = x.reshape(B, C, H * d)

    grid = (B, H // hb)
    nb = B * (H // hb)
    flops = nb * (2 * C * hd * w_all.shape[1]          # fused qkv(+res) matmul
                  + 4 * 2 * C * (3 * hd) * (3 * hb)    # LN stat matmuls
                  + 2 * C * hd * hd                    # gate matmul
                  + 2 * C * Cn * hd)                   # 1x1 conv channel mix
    transcendentals = nb * C * 3 * hd
    wbytes = jnp.dtype(cdt).itemsize
    bytes_accessed = ((x3.size + B * C * H * d) * x.dtype.itemsize
                      + (w_all.size + m_gate_bd.size + conv_w.size) * wbytes
                      + (csum.size + seg_avg.size + seg_bcast.size + lnw_bd.size
                         + lnb_bd.size + conv_b.size + gscale.size + gshift.size) * 4)

    kernel = functools.partial(_mgc_kernel, hd=hd, compute_dtype=cdt, use_res=res)

    def const_spec(arr):
        zeros = (0,) * arr.ndim
        return pl.BlockSpec(arr.shape, lambda b, h: zeros)

    out3 = pl.pallas_call(
        kernel,
        out_shape=jax.ShapeDtypeStruct((B, C, H * d), x.dtype),
        grid_spec=pltpu.PrefetchScalarGridSpec(
            num_scalar_prefetch=0,
            grid=grid,
            in_specs=[
                pl.BlockSpec((1, C, hd), lambda b, h: (b, 0, h)),   # x (streamed)
                pl.BlockSpec((1, C, 1), lambda b, h: (b, 0, 0)),    # GN scale
                pl.BlockSpec((1, C, 1), lambda b, h: (b, 0, 0)),    # GN shift
                const_spec(w_all), const_spec(csum),
                const_spec(seg_avg), const_spec(seg_bcast),
                const_spec(lnw_bd), const_spec(lnb_bd),
                const_spec(m_gate_bd), const_spec(conv_w), const_spec(conv_b),
            ],
            out_specs=pl.BlockSpec((1, C, hd), lambda b, h: (b, 0, h)),
        ),
        compiler_params=pltpu.CompilerParams(
            dimension_semantics=("parallel", "parallel")),
        cost_estimate=pl.CostEstimate(flops=flops,
                                      transcendentals=transcendentals,
                                      bytes_accessed=bytes_accessed),
    )(x3, gscale, gshift, w_all, csum, seg_avg, seg_bcast,
      lnw_bd, lnb_bd, m_gate_bd, conv_w, conv_b)

    return out3.reshape(B, C, H, d)


# ----------------------------------------------------------------------------
# Pure-JAX reference, mirroring the PyTorch rearrange/blockdiag path exactly.
# ----------------------------------------------------------------------------
def _blockdiag_matmul_ref(x, w):
    s = w.shape[0]
    xb = x.reshape(*x.shape[:-1], s, w.shape[-1])
    out = jnp.einsum('bnm,...bm->...bn', w, xb, precision=jax.lax.Precision.HIGHEST)
    return out.reshape(x.shape)


def _monarch_ref(x, L, R):
    s = L.shape[0]

    def swap_mn(v):  # rearrange '... (m n) -> ... (n m)', n = s
        shp = v.shape
        return v.reshape(*shp[:-1], s, s).swapaxes(-1, -2).reshape(shp)

    x = swap_mn(x)
    x = _blockdiag_matmul_ref(x, L)
    x = swap_mn(x)
    x = _blockdiag_matmul_ref(x, R)
    return swap_mn(x)


def _layer_norm_ref(x, w, b, eps=1e-5):
    mu = jnp.mean(x, axis=-1, keepdims=True)
    var = jnp.mean((x - mu) ** 2, axis=-1, keepdims=True)
    return (x - mu) * jax.lax.rsqrt(var + eps) * w + b


def _group_norm_ref(x, gamma, beta, num_groups, eps=1e-5):
    B, C, H, W = x.shape
    xg = x.reshape(B, num_groups, -1)
    mu = jnp.mean(xg, axis=-1, keepdims=True)
    var = jnp.var(xg, axis=-1, keepdims=True)
    xn = ((xg - mu) * jax.lax.rsqrt(var + eps)).reshape(B, C, H, W)
    return xn * gamma[None, :, None, None] + beta[None, :, None, None]


def monarch_gated_conv_ref(x, params, *, res=True, num_heads=1, num_groups=32):
    qkv = jnp.concatenate([x] * num_heads, axis=1)
    qkv = _group_norm_ref(qkv, params['gn_w'], params['gn_b'], num_groups)

    def monarch_linear(v, p):
        y = _monarch_ref(v, p['m3']['L'], p['m3']['R'])
        y = _monarch_ref(y, p['m4']['L'], p['m4']['R'])
        return _layer_norm_ref(y, p['ln_w'], p['ln_b'])

    Q = monarch_linear(qkv, params['q'])
    K = monarch_linear(qkv, params['k'])
    V = monarch_linear(qkv, params['v'])

    t = _monarch_ref(Q * K, params['m1']['L'], params['m1']['R'])
    t = params['d_kernel'] * t
    t = _monarch_ref(t, params['m2']['L'], params['m2']['R'])
    hidden = V * t

    conv = jnp.einsum('oc,bchw->bohw', params['conv_w'], hidden,
                      precision=jax.lax.Precision.HIGHEST)
    conv = conv + params['conv_b'][None, :, None, None]
    if not res:
        return conv
    r = _monarch_ref(x, params['m8']['L'], params['m8']['R'])
    r = params['d_kernel_bi'] * r
    r = _monarch_ref(r, params['m9']['L'], params['m9']['R'])
    return r + conv


# ----------------------------------------------------------------------------
if __name__ == "__main__":
    key = jax.random.PRNGKey(0)
    B, C, H = 2, 32, 8          # channels must be a multiple of 32 (GroupNorm32)
    s = 4                        # sqrt_d == sqrt_n
    d = s * s                    # W axis, mixed by the Monarch matrices
    NH = 1

    keys = iter(jax.random.split(key, 64))
    nk = lambda: next(keys)

    def monarch_params():
        return {'L': jax.random.normal(nk(), (s, s, s), jnp.float32),
                'R': jax.random.normal(nk(), (s, s, s), jnp.float32)}

    def monarch_linear_params():
        return {'m3': monarch_params(), 'm4': monarch_params(),
                'ln_w': 1.0 + 0.1 * jax.random.normal(nk(), (d,), jnp.float32),
                'ln_b': 0.1 * jax.random.normal(nk(), (d,), jnp.float32)}

    params = {
        'q': monarch_linear_params(),
        'k': monarch_linear_params(),
        'v': monarch_linear_params(),
        'm1': monarch_params(), 'm2': monarch_params(),
        'm8': monarch_params(), 'm9': monarch_params(),
        'd_kernel': jax.random.normal(nk(), (1, d), jnp.float32),
        'd_kernel_bi': jax.random.normal(nk(), (1, d), jnp.float32),
        'gn_w': 1.0 + 0.1 * jax.random.normal(nk(), (NH * C,), jnp.float32),
        'gn_b': 0.1 * jax.random.normal(nk(), (NH * C,), jnp.float32),
        # PyTorch zero-initialises proj_out (zero_module); small random weights
        # are used here so the conv path is actually exercised by the check.
        'conv_w': jax.random.normal(nk(), (C, NH * C), jnp.float32) / float(NH * C) ** 0.5,
        'conv_b': 0.1 * jax.random.normal(nk(), (C,), jnp.float32),
    }

    x = jax.random.normal(nk(), (B, C, H, d), jnp.float32)

    ref = monarch_gated_conv_ref(x, params, res=True, num_heads=NH)
    ref_scale = float(jnp.max(jnp.abs(ref)))

    # f32 compute path: tighter check of the layout / Monarch-fold logic.
    out32 = jax.block_until_ready(
        monarch_gated_conv_pallas(x, params, res=True, num_heads=NH,
                                  compute_dtype=jnp.float32))
    assert out32.shape == x.shape, (out32.shape, x.shape)
    rel32 = float(jnp.linalg.norm(out32 - ref) / (jnp.linalg.norm(ref) + 1e-12))
    if rel32 > 3e-2:
        raise AssertionError(f"Pallas f32 path mismatch: rel_fro={rel32:.5f}")

    # bf16 fast path: loose check (bf16 MXU operands over a chain of unnormalised
    # randn Monarch folds amplify rounding to the ~1-3% level; real permutation
    # or fold bugs produce O(100%)).
    out = jax.block_until_ready(
        monarch_gated_conv_pallas(x, params, res=True, num_heads=NH,
                                  compute_dtype=jnp.bfloat16))
    assert out.shape == x.shape, (out.shape, x.shape)
    max_err = float(jnp.max(jnp.abs(out - ref)))
    rel_fro = float(jnp.linalg.norm(out - ref) / (jnp.linalg.norm(ref) + 1e-12))
    if not (max_err <= 0.1 * max(1.0, ref_scale) and rel_fro <= 0.1):
        raise AssertionError(
            f"Pallas bf16 output mismatch: max_abs_err={max_err:.4f}, "
            f"rel_fro={rel_fro:.4f}, ref_scale={ref_scale:.2f}")
    print("KERNEL_OK")
</pallas_src>

<mosaic_0001>
module attributes {stable_mosaic.version = 11 : i64} {
  func.func @_mgc_kernel(%arg0: i32, %arg1: i32, %arg2: memref<1x32x128xf32, #tpu.memory_space<vmem>>, %arg3: memref<1x32x1xf32, #tpu.memory_space<vmem>>, %arg4: memref<1x32x1xf32, #tpu.memory_space<vmem>>, %arg5: memref<128x512xf32, #tpu.memory_space<vmem>>, %arg6: memref<1x384xf32, #tpu.memory_space<vmem>>, %arg7: memref<384x24xf32, #tpu.memory_space<vmem>>, %arg8: memref<24x384xf32, #tpu.memory_space<vmem>>, %arg9: memref<1x384xf32, #tpu.memory_space<vmem>>, %arg10: memref<1x384xf32, #tpu.memory_space<vmem>>, %arg11: memref<128x128xf32, #tpu.memory_space<vmem>>, %arg12: memref<32x32xf32, #tpu.memory_space<vmem>>, %arg13: memref<32x1xf32, #tpu.memory_space<vmem>>, %arg14: memref<1x32x128xf32, #tpu.memory_space<vmem>>) attributes {dimension_semantics = [#tpu.dimension_semantics<parallel>, #tpu.dimension_semantics<parallel>], iteration_bounds = array<i64: 2, 1>, scalar_prefetch = 0 : i64, scratch_operands = 0 : i64, tpu.core_type = #tpu.core_type<tc>, window_params = [{transform_indices = @transform_0, window_bounds = array<i64: 1, 32, 128>}, {transform_indices = @transform_1, window_bounds = array<i64: 1, 32, 1>}, {transform_indices = @transform_2, window_bounds = array<i64: 1, 32, 1>}, {pipeline_mode = #tpu.pipeline_mode<synchronous>, transform_indices = @transform_3, window_bounds = array<i64: 128, 512>}, {pipeline_mode = #tpu.pipeline_mode<synchronous>, transform_indices = @transform_4, window_bounds = array<i64: 1, 384>}, {pipeline_mode = #tpu.pipeline_mode<synchronous>, transform_indices = @transform_5, window_bounds = array<i64: 384, 24>}, {pipeline_mode = #tpu.pipeline_mode<synchronous>, transform_indices = @transform_6, window_bounds = array<i64: 24, 384>}, {pipeline_mode = #tpu.pipeline_mode<synchronous>, transform_indices = @transform_7, window_bounds = array<i64: 1, 384>}, {pipeline_mode = #tpu.pipeline_mode<synchronous>, transform_indices = @transform_8, window_bounds = array<i64: 1, 384>}, {pipeline_mode = #tpu.pipeline_mode<synchronous>, transform_indices = @transform_9, window_bounds = array<i64: 128, 128>}, {pipeline_mode = #tpu.pipeline_mode<synchronous>, transform_indices = @transform_10, window_bounds = array<i64: 32, 32>}, {pipeline_mode = #tpu.pipeline_mode<synchronous>, transform_indices = @transform_11, window_bounds = array<i64: 32, 1>}, {transform_indices = @transform_12, window_bounds = array<i64: 1, 32, 128>}]} {
    %c0 = arith.constant 0 : index
    %c0_0 = arith.constant 0 : index
    %c0_1 = arith.constant 0 : index
    %0 = vector.load %arg2[%c0, %c0_0, %c0_1] : memref<1x32x128xf32, #tpu.memory_space<vmem>>, vector<1x32x128xf32>
    %1 = vector.shape_cast %0 : vector<1x32x128xf32> to vector<32x128xf32>
    %c0_2 = arith.constant 0 : index
    %c0_3 = arith.constant 0 : index
    %2 = vector.load %arg5[%c0_2, %c0_3] : memref<128x512xf32, #tpu.memory_space<vmem>>, vector<128x512xf32>
    %cst = arith.constant dense<0.000000e+00> : vector<32x512xf32>
    %3 = tpu.matmul %1, %2, %cst {dimension_numbers = #tpu.dot_dimension_numbers<[1], [0], [0], [1], [0, 0, 1, 1], [], []>, precision = #tpu.contract_precision<fp32>} : vector<32x128xf32>, vector<128x512xf32>, vector<32x512xf32> -> vector<32x512xf32>
    %c0_4 = arith.constant 0 : index
    %c0_5 = arith.constant 0 : index
    %c0_6 = arith.constant 0 : index
    %4 = vector.load %arg3[%c0_4, %c0_5, %c0_6] : memref<1x32x1xf32, #tpu.memory_space<vmem>>, vector<1x32x1xf32>
    %5 = vector.shape_cast %4 : vector<1x32x1xf32> to vector<32x1xf32>
    %c0_7 = arith.constant 0 : index
    %c0_8 = arith.constant 0 : index
    %c0_9 = arith.constant 0 : index
    %6 = vector.load %arg4[%c0_7, %c0_8, %c0_9] : memref<1x32x1xf32, #tpu.memory_space<vmem>>, vector<1x32x1xf32>
    %7 = vector.shape_cast %6 : vector<1x32x1xf32> to vector<32x1xf32>
    %8 = vector.extract_strided_slice %3 {offsets = [0, 0], sizes = [32, 384], strides = [1, 1]} : vector<32x512xf32> to vector<32x384xf32>
    %9 = vector.broadcast %5 : vector<32x1xf32> to vector<32x384xf32>
    %10 = arith.mulf %9, %8 : vector<32x384xf32>
    %c0_10 = arith.constant 0 : index
    %c0_11 = arith.constant 0 : index
    %11 = vector.load %arg6[%c0_10, %c0_11] : memref<1x384xf32, #tpu.memory_space<vmem>>, vector<1x384xf32>
    %12 = vector.broadcast %7 : vector<32x1xf32> to vector<32x384xf32>
    %13 = vector.broadcast %11 : vector<1x384xf32> to vector<32x384xf32>
    %14 = arith.mulf %12, %13 : vector<32x384xf32>
    %15 = arith.addf %10, %14 : vector<32x384xf32>
    %c0_12 = arith.constant 0 : index
    %c0_13 = arith.constant 0 : index
    %16 = vector.load %arg7[%c0_12, %c0_13] : memref<384x24xf32, #tpu.memory_space<vmem>>, vector<384x24xf32>
    %cst_14 = arith.constant dense<0.000000e+00> : vector<32x24xf32>
    %17 = tpu.matmul %15, %16, %cst_14 {dimension_numbers = #tpu.dot_dimension_numbers<[1], [0], [0], [1], [0, 0, 1, 1], [], []>, precision = #tpu.contract_precision<fp32>} : vector<32x384xf32>, vector<384x24xf32>, vector<32x24xf32> -> vector<32x24xf32>
    %c0_15 = arith.constant 0 : index
    %c0_16 = arith.constant 0 : index
    %18 = vector.load %arg8[%c0_15, %c0_16] : memref<24x384xf32, #tpu.memory_space<vmem>>, vector<24x384xf32>
    %cst_17 = arith.constant dense<0.000000e+00> : vector<32x384xf32>
    %19 = tpu.matmul %17, %18, %cst_17 {dimension_numbers = #tpu.dot_dimension_numbers<[1], [0], [0], [1], [0, 0, 1, 1], [], []>, precision = #tpu.contract_precision<fp32>} : vector<32x24xf32>, vector<24x384xf32>, vector<32x384xf32> -> vector<32x384xf32>
    %20 = arith.subf %15, %19 : vector<32x384xf32>
    %21 = arith.mulf %20, %20 : vector<32x384xf32>
    %c0_18 = arith.constant 0 : index
    %c0_19 = arith.constant 0 : index
    %22 = vector.load %arg7[%c0_18, %c0_19] : memref<384x24xf32, #tpu.memory_space<vmem>>, vector<384x24xf32>
    %cst_20 = arith.constant dense<0.000000e+00> : vector<32x24xf32>
    %23 = tpu.matmul %21, %22, %cst_20 {dimension_numbers = #tpu.dot_dimension_numbers<[1], [0], [0], [1], [0, 0, 1, 1], [], []>, precision = #tpu.contract_precision<fp32>} : vector<32x384xf32>, vector<384x24xf32>, vector<32x24xf32> -> vector<32x24xf32>
    %c0_21 = arith.constant 0 : index
    %c0_22 = arith.constant 0 : index
    %24 = vector.load %arg8[%c0_21, %c0_22] : memref<24x384xf32, #tpu.memory_space<vmem>>, vector<24x384xf32>
    %cst_23 = arith.constant dense<0.000000e+00> : vector<32x384xf32>
    %25 = tpu.matmul %23, %24, %cst_23 {dimension_numbers = #tpu.dot_dimension_numbers<[1], [0], [0], [1], [0, 0, 1, 1], [], []>, precision = #tpu.contract_precision<fp32>} : vector<32x24xf32>, vector<24x384xf32>, vector<32x384xf32> -> vector<32x384xf32>
    %cst_24 = arith.constant 9.99999974E-6 : f32
    %26 = vector.broadcast %cst_24 : f32 to vector<32x384xf32>
    %27 = arith.addf %25, %26 : vector<32x384xf32>
    %28 = math.rsqrt %27 : vector<32x384xf32>
    %29 = arith.mulf %20, %28 : vector<32x384xf32>
    %c0_25 = arith.constant 0 : index
    %c0_26 = arith.constant 0 : index
    %30 = vector.load %arg9[%c0_25, %c0_26] : memref<1x384xf32, #tpu.memory_space<vmem>>, vector<1x384xf32>
    %31 = vector.broadcast %30 : vector<1x384xf32> to vector<32x384xf32>
    %32 = arith.mulf %29, %31 : vector<32x384xf32>
    %c0_27 = arith.constant 0 : index
    %c0_28 = arith.constant 0 : index
    %33 = vector.load %arg10[%c0_27, %c0_28] : memref<1x384xf32, #tpu.memory_space<vmem>>, vector<1x384xf32>
    %34 = vector.broadcast %33 : vector<1x384xf32> to vector<32x384xf32>
    %35 = arith.addf %32, %34 : vector<32x384xf32>
    %36 = vector.extract_strided_slice %35 {offsets = [0, 0], sizes = [32, 128], strides = [1, 1]} : vector<32x384xf32> to vector<32x128xf32>
    %37 = vector.extract_strided_slice %35 {offsets = [0, 128], sizes = [32, 128], strides = [1, 1]} : vector<32x384xf32> to vector<32x128xf32>
    %38 = vector.extract_strided_slice %35 {offsets = [0, 256], sizes = [32, 128], strides = [1, 1]} : vector<32x384xf32> to vector<32x128xf32>
    %39 = arith.mulf %36, %37 : vector<32x128xf32>
    %c0_29 = arith.constant 0 : index
    %c0_30 = arith.constant 0 : index
    %40 = vector.load %arg11[%c0_29, %c0_30] : memref<128x128xf32, #tpu.memory_space<vmem>>, vector<128x128xf32>
    %cst_31 = arith.constant dense<0.000000e+00> : vector<32x128xf32>
    %41 = tpu.matmul %39, %40, %cst_31 {dimension_numbers = #tpu.dot_dimension_numbers<[1], [0], [0], [1], [0, 0, 1, 1], [], []>, precision = #tpu.contract_precision<fp32>} : vector<32x128xf32>, vector<128x128xf32>, vector<32x128xf32> -> vector<32x128xf32>
    %42 = arith.mulf %38, %41 : vector<32x128xf32>
    %c0_32 = arith.constant 0 : index
    %c0_33 = arith.constant 0 : index
    %43 = vector.load %arg12[%c0_32, %c0_33] : memref<32x32xf32, #tpu.memory_space<vmem>>, vector<32x32xf32>
    %cst_34 = arith.constant dense<0.000000e+00> : vector<32x128xf32>
    %44 = tpu.matmul %43, %42, %cst_34 {dimension_numbers = #tpu.dot_dimension_numbers<[1], [0], [0], [1], [0, 0, 1, 1], [], []>, precision = #tpu.contract_precision<fp32>} : vector<32x32xf32>, vector<32x128xf32>, vector<32x128xf32> -> vector<32x128xf32>
    %c0_35 = arith.constant 0 : index
    %c0_36 = arith.constant 0 : index
    %45 = vector.load %arg13[%c0_35, %c0_36] : memref<32x1xf32, #tpu.memory_space<vmem>>, vector<32x1xf32>
    %46 = vector.broadcast %45 : vector<32x1xf32> to vector<32x128xf32>
    %47 = arith.addf %44, %46 : vector<32x128xf32>
    %48 = vector.extract_strided_slice %3 {offsets = [0, 384], sizes = [32, 128], strides = [1, 1]} : vector<32x512xf32> to vector<32x128xf32>
    %49 = arith.addf %47, %48 : vector<32x128xf32>
    %50 = vector.shape_cast %49 : vector<32x128xf32> to vector<1x32x128xf32>
    %c0_37 = arith.constant 0 : index
    %c0_38 = arith.constant 0 : index
    %c0_39 = arith.constant 0 : index
    %51 = vector.load %arg14[%c0_37, %c0_38, %c0_39] : memref<1x32x128xf32, #tpu.memory_space<vmem>>, vector<1x32x128xf32>
    tpu.vector_store %arg14[%c0_37, %c0_38, %c0_39], %50 {strides = array<i32>} : memref<1x32x128xf32, #tpu.memory_space<vmem>>, vector<1x32x128xf32>,
    return
  }
  func.func @transform_0(%arg0: i32, %arg1: i32) -> (i32, i32, i32) {
    %c0_i32 = arith.constant 0 : i32
    %c0_i32_0 = arith.constant 0 : i32
    return %arg0, %c0_i32, %arg1 : i32, i32, i32
  }
  func.func @transform_1(%arg0: i32, %arg1: i32) -> (i32, i32, i32) {
    %c0_i32 = arith.constant 0 : i32
    %c0_i32_0 = arith.constant 0 : i32
    %c0_i32_1 = arith.constant 0 : i32
    return %arg0, %c0_i32, %c0_i32_0 : i32, i32, i32
  }
  func.func @transform_2(%arg0: i32, %arg1: i32) -> (i32, i32, i32) {
    %c0_i32 = arith.constant 0 : i32
    %c0_i32_0 = arith.constant 0 : i32
    %c0_i32_1 = arith.constant 0 : i32
    return %arg0, %c0_i32, %c0_i32_0 : i32, i32, i32
  }
  func.func @transform_3(%arg0: i32, %arg1: i32) -> (i32, i32) {
    %c0_i32 = arith.constant 0 : i32
    %c0_i32_0 = arith.constant 0 : i32
    %c0_i32_1 = arith.constant 0 : i32
    return %c0_i32, %c0_i32_0 : i32, i32
  }
  func.func @transform_4(%arg0: i32, %arg1: i32) -> (i32, i32) {
    %c0_i32 = arith.constant 0 : i32
    %c0_i32_0 = arith.constant 0 : i32
    %c0_i32_1 = arith.constant 0 : i32
    return %c0_i32, %c0_i32_0 : i32, i32
  }
  func.func @transform_5(%arg0: i32, %arg1: i32) -> (i32, i32) {
    %c0_i32 = arith.constant 0 : i32
    %c0_i32_0 = arith.constant 0 : i32
    %c0_i32_1 = arith.constant 0 : i32
    return %c0_i32, %c0_i32_0 : i32, i32
  }
  func.func @transform_6(%arg0: i32, %arg1: i32) -> (i32, i32) {
    %c0_i32 = arith.constant 0 : i32
    %c0_i32_0 = arith.constant 0 : i32
    %c0_i32_1 = arith.constant 0 : i32
    return %c0_i32, %c0_i32_0 : i32, i32
  }
  func.func @transform_7(%arg0: i32, %arg1: i32) -> (i32, i32) {
    %c0_i32 = arith.constant 0 : i32
    %c0_i32_0 = arith.constant 0 : i32
    %c0_i32_1 = arith.constant 0 : i32
    return %c0_i32, %c0_i32_0 : i32, i32
  }
  func.func @transform_8(%arg0: i32, %arg1: i32) -> (i32, i32) {
    %c0_i32 = arith.constant 0 : i32
    %c0_i32_0 = arith.constant 0 : i32
    %c0_i32_1 = arith.constant 0 : i32
    return %c0_i32, %c0_i32_0 : i32, i32
  }
  func.func @transform_9(%arg0: i32, %arg1: i32) -> (i32, i32) {
    %c0_i32 = arith.constant 0 : i32
    %c0_i32_0 = arith.constant 0 : i32
    %c0_i32_1 = arith.constant 0 : i32
    return %c0_i32, %c0_i32_0 : i32, i32
  }
  func.func @transform_10(%arg0: i32, %arg1: i32) -> (i32, i32) {
    %c0_i32 = arith.constant 0 : i32
    %c0_i32_0 = arith.constant 0 : i32
    %c0_i32_1 = arith.constant 0 : i32
    return %c0_i32, %c0_i32_0 : i32, i32
  }
  func.func @transform_11(%arg0: i32, %arg1: i32) -> (i32, i32) {
    %c0_i32 = arith.constant 0 : i32
    %c0_i32_0 = arith.constant 0 : i32
    %c0_i32_1 = arith.constant 0 : i32
    return %c0_i32, %c0_i32_0 : i32, i32
  }
  func.func @transform_12(%arg0: i32, %arg1: i32) -> (i32, i32, i32) {
    %c0_i32 = arith.constant 0 : i32
    %c0_i32_0 = arith.constant 0 : i32
    return %arg0, %c0_i32, %arg1 : i32, i32, i32
  }
}

</mosaic_0001>

<bundles_post_ra>
// kernel: tile.33
= control target key start
LH: loop header
LB: loop body
LE: loop exit
PB: predicated region body
PF: predicated region fallthrough
CT: control target
= control target key end

     0   :  { %s22_s0 = inlined_call_operand.vmem [shape: f32[16], index: 0, kind: input, shape index: {}]   ;;  %s23_s1 = inlined_call_operand.vmem [shape: f32[8,16], index: 1, kind: output, shape index: {}]  }
   0x1   :  { %v4_v0 = vld [vmem:[%s22_s0] ss:$0 sm:$0xff] }
   0x2   :  { %5 = vst [vmem:[%s23_s1] sm:$0xff] %v4_v0 }

// kernel: tile.34
= control target key start
LH: loop header
LB: loop body
LE: loop exit
PB: predicated region body
PF: predicated region fallthrough
CT: control target
= control target key end

     0   :  { %s69_s10 = smov 112   ;;  %s70_s11 = smov 80   ;;  %vm3_vm0 = vcmask 130048   ;;  %vm9_vm1 = vcmask 1048448   ;;  %vm15_vm2 = vcmask 917248   ;;  %vm21_vm3 = vcmask 786048   ;;  %s113_s0 = inlined_call_operand.vmem [shape: f32[8,16], index: 0, kind: input, shape index: {}]   ;;  %s114_s1 = inlined_call_operand.vmem [shape: f32[128], index: 1, kind: output, shape index: {}]  }
   0x1   :  { %v55_v0 = vld [vmem:[%s113_s0 + $0x7] sm:$0x1]   ;;  %v57_v1 = vld [vmem:[%s113_s0 + $0x5] sm:$0x1]   ;;  %v56_v2 = vld [vmem:[%s113_s0 + $0x6] sm:$0x1]  }
   0x2   :  { %7 = vrot.lane.b32.xlu0 %v55_v0, %s69_s10  ;;  %19 = vrot.lane.b32.xlu1 %v57_v1, %s70_s11  ;;  %v58_v3 = vld [vmem:[%s113_s0 + $0x4] sm:$0x1]   ;;  %v2_v4 = vld [vmem:[%s113_s0] sm:$0x1]   ;;  %s71_s18 = smov 96   ;;  %s72_s19 = smov 64  }
   0x3   :  { %4 = vst.msk [vmem:[#allocation0] sm:$0x1] %vm3_vm0, %v2_v4   ;;  %v59_v5 = vld [vmem:[%s113_s0 + $0x3] sm:$0x1]   ;;  %v60_v6 = vld [vmem:[%s113_s0 + $0x2] sm:$0x1]  }
   0x4   :  { %s73_s24 = smov 48   ;;  %s74_s25 = smov 32   ;;  %v61_v7 = vld [vmem:[%s113_s0 + $0x1] sm:$0x1]   ;;  %vm27_vm4 = vcmask 654848   ;;  %vm33_vm5 = vcmask 523648  }
   0x5   :  { %s75_s0 = smov 16   ;;  %vm39_vm6 = vcmask 392448   ;;  %vm45_vm7 = vcmask 261248  }
   0x6   :  { %13 = vrot.lane.b32.xlu0 %v56_v2, %s71_s18  ;;  %25 = vrot.lane.b32.xlu1 %v58_v3, %s72_s19 }
   0xa   :  { %31 = vrot.lane.b32.xlu0 %v59_v5, %s73_s24  ;;  %37 = vrot.lane.b32.xlu1 %v60_v6, %s74_s25 }
   0xe   :  { %43 = vrot.lane.b32.xlu0 %v61_v7, %s75_s0 }
  0x74   :  { %v8_v8 = vpop.permute.xlu0 %7   ;;  %v20_v9 = vpop.permute.xlu1 %19  }
  0x75   :  { %10 = vst.msk [vmem:[#allocation0] sm:$0x1] %vm9_vm1, %v8_v8  }
  0x78   :  { %v14_v10 = vpop.permute.xlu0 %13   ;;  %v26_v11 = vpop.permute.xlu1 %25  }
  0x79   :  { %16 = vst.msk [vmem:[#allocation0] sm:$0x1] %vm15_vm2, %v14_v10  }
  0x7a   :  { %22 = vst.msk [vmem:[#allocation0] sm:$0x1] %vm21_vm3, %v20_v9  }
  0x7b   :  { %28 = vst.msk [vmem:[#allocation0] sm:$0x1] %vm27_vm4, %v26_v11  }
  0x7c   :  { %v32_v12 = vpop.permute.xlu0 %31   ;;  %v38_v13 = vpop.permute.xlu1 %37  }
  0x7d   :  { %34 = vst.msk [vmem:[#allocation0] sm:$0x1] %vm33_vm5, %v32_v12  }
  0x7e   :  { %40 = vst.msk [vmem:[#allocation0] sm:$0x1] %vm39_vm6, %v38_v13  }
  0x80   :  { %v44_v14 = vpop.permute.xlu0 %43  }
  0x81   :  { %46 = vst.msk [vmem:[#allocation0] sm:$0x1] %vm45_vm7, %v44_v14  }
  0x88   :  { %v51_v15 = vld [vmem:[#allocation0] sm:$0x1] }
  0x89   :  { %54 = vst [vmem:[%s114_s1] sm:$0x1] %v51_v15 }

// kernel: monarch_gated_conv_pallas.1
= control target key start
LH: loop header
LB: loop body
LE: loop exit
PB: predicated region body
PF: predicated region fallthrough
CT: control target
= control target key end

     0   :  { %s12634_s21 = smov 0   ;;  %s12636_s22 = smov 0   ;;  %s17485_s0 = inlined_call_operand.vmem [shape: f32[2,32,128], index: 0, kind: input, shape index: {}]   ;;  %s17486_s1 = inlined_call_operand.vmem [shape: f32[2,32,1], index: 1, kind: input, shape index: {}]   ;;  %s17487_s2 = inlined_call_operand.vmem [shape: f32[2,32,1], index: 2, kind: input, shape index: {}]   ;;  %s17488_s3 = inlined_call_operand.vmem [shape: f32[128,512], index: 3, kind: input, shape index: {}]   ;;  %s17489_s4 = inlined_call_operand.vmem [shape: f32[1,384], index: 4, kind: input, shape index: {}]   ;;  %s17490_s5 = inlined_call_operand.vmem [shape: f32[384,24], index: 5, kind: input, shape index: {}]   ;;  %s17491_s6 = inlined_call_operand.vmem [shape: f32[24,384], index: 6, kind: input, shape index: {}]   ;;  %s17492_s7 = inlined_call_operand.vmem [shape: f32[1,384], index: 7, kind: input, shape index: {}]   ;;  %s17493_s8 = inlined_call_operand.vmem [shape: f32[1,384], index: 8, kind: input, shape index: {}]   ;;  %s17494_s9 = inlined_call_operand.vmem [shape: f32[128,128], index: 9, kind: input, shape index: {}]   ;;  %s17495_s10 = inlined_call_operand.vmem [shape: f32[32,32], index: 10, kind: input, shape index: {}]   ;;  %s17496_s11 = inlined_call_operand.vmem [shape: f32[32,1], index: 11, kind: input, shape index: {}]   ;;  %s17497_s12 = inlined_call_operand.vmem [shape: f32[2,32,128], index: 12, kind: output, shape index: {}]  }
   0x1   :  { %s12638_s23 = smov 0  }
   0x2 LB: > { %s34_s24 = sadd.s32 1, %s12561_s22  ;;  %p10544_p0 = scmp.ge.s32.totalorder %s12565_s23, 1  ;;  %s12565_s23 = sphi %s12638_s23, %s22_s23   ;;  %s12561_s22 = sphi %s12636_s22, %s19231_s22   ;;  %s12557_s21 = sphi %s12634_s21, %s19230_s21  }
   0x3   : > { %p36_p1 = scmp.ge.s32.totalorder %s34_s24, 2  ;;  %p401_p2 = scmp.lt.s32.totalorder %s12565_s23, 3 }
   0x5   : > { %s19233_s24 = smov (%p36_p1, %s34_s24), 0  ;;  %p402_p3 = pnand %p10544_p0, %p401_p2 }
   0x7   : > { %405 = sbr.rel (%p402_p3) target bundleno = 2191 (0x88f), region = 68 }
   0xc   : > { %v550_v0 = vld [vmem:[%s17488_s3 + $0x1e8] sm:$0xff]  ;;  %v549_v1 = vld [vmem:[%s17488_s3 + $0x1e0] sm:$0xff]  ;;  %v17512_v9 = vmov 0.0   ;;  %p459_p4 = scmp.lt.s32.totalorder %s12557_s21, 1  ;;  %vm4515_vm0 = vcmask 195584   ;;  %vm9798_vm1 = vcmask 261120  }
   0xd   : > { %v546_v2 = vld [vmem:[%s17488_s3 + $0x1c8] sm:$0xff]  ;;  %v12663_v3 = vand.u32 4294901760, %v550_v0  ;;  %v12665_v4 = vand.u32 4294901760, %v549_v1  ;;  %v545_v6 = vld [vmem:[%s17488_s3 + $0x1c0] sm:$0xff]  ;;  %649 = vmatprep.mubr.f32.mxu0 %v17512_v9  ;;  %918 = vmatprep.mubr.f32.mxu1 %v17512_v9 }
   0xe   : > { %v12667_v5 = vand.u32 4294901760, %v546_v2  ;;  %v542_v7 = vld [vmem:[%s17488_s3 + $0x1a8] sm:$0xff]  ;;  %v541_v8 = vld [vmem:[%s17488_s3 + $0x1a0] sm:$0xff]  ;;  %v12680_v10 = vand.u32 4294901760, %v545_v6  ;;  %s19235_s21 = smov (!%p459_p4, %s12557_s21), 1 }
   0xf   : > { %v12682_v11 = vand.u32 4294901760, %v542_v7  ;;  %v12684_v12 = vand.u32 4294901760, %v541_v8  ;;  %v538_v13 = vld [vmem:[%s17488_s3 + $0x188] sm:$0xff]  ;;  %v537_v14 = vld [vmem:[%s17488_s3 + $0x180] sm:$0xff]  ;;  %554 = vmatprep.subr.mxu0 %v12663_v3  ;;  %v12703_v19 = vsub.f32 %v550_v0, %v12663_v3  ;;  %v12725_v24 = vsub.f32 %v549_v1, %v12665_v4  ;;  %s13004_s27 = sshll.u32 %s19235_s21, 5 }
  0x10   : > { %v534_v15 = vld [vmem:[%s17488_s3 + $0x168] sm:$0xff]  ;;  %v12696_v16 = vand.u32 4294901760, %v538_v13  ;;  %v12698_v17 = vand.u32 4294901760, %v537_v14  ;;  %v12708_v20 = vld [vmem:[%s17488_s3 + $0x160] sm:$0xff]  ;;  %556 = vmatpush1.msra.mxu0 %v12665_v4  ;;  %v12731_v26 = vsub.f32 %v546_v2, %v12667_v5  ;;  %v12754_v32 = vsub.f32 %v545_v6, %v12680_v10  ;;  %s13050_s15 = scalar_lea.vmem %s17485_s0, %s13004_s27  ;;  %s13931_s14 = scalar_lea.vmem %s17486_s1, %s13004_s27 }
  0x11   : > { %v12700_v18 = vand.u32 4294901760, %v534_v15  ;;  %v12713_v21 = vld [vmem:[%s17488_s3 + $0x148] sm:$0xff]  ;;  %v12718_v22 = vld [vmem:[%s17488_s3 + $0x140] sm:$0xff]  ;;  %v12722_v23 = vand.u32 4294901760, %v12708_v20  ;;  %558 = vmatprep.subr.mxu0 %v12667_v5  ;;  %v17511_v30 = vand.u32 4294901760, %v12703_v19  ;;  %v17509_v34 = vand.u32 4294901760, %v12725_v24  ;;  %s13951_s17 = scalar_lea.vmem %s17487_s2, %s13004_s27 }
  0x12   : > { %v12728_v25 = vand.u32 4294901760, %v12713_v21  ;;  %v12736_v27 = vld [vmem:[%s17488_s3 + $0x128] sm:$0xff]  ;;  %v12741_v28 = vld [vmem:[%s17488_s3 + $0x120] sm:$0xff]  ;;  %v12751_v31 = vand.u32 4294901760, %v12718_v22  ;;  %560 = vmatpush1.msra.mxu0 %v12680_v10  ;;  %v17508_v35 = vand.u32 4294901760, %v12731_v26  ;;  %v12763_v36 = vsub.f32 %v542_v7, %v12682_v11 }
  0x13   : > { %v12746_v29 = vld [vmem:[%s17488_s3 + $0x108] sm:$0xff]  ;;  %v12757_v33 = vand.u32 4294901760, %v12736_v27  ;;  %v12766_v37 = vand.u32 4294901760, %v12741_v28  ;;  %v12771_v38 = vld [vmem:[%s17488_s3 + $0x100] sm:$0xff]  ;;  %562 = vmatprep.subr.mxu0 %v12682_v11  ;;  %v697_v39 = vsub.f32 %v12703_v19, %v17511_v30  ;;  %v17506_v40 = vand.u32 4294901760, %v12754_v32 }
  0x14   : > { %18208 = vst [vmem:[#allocation2_spill] sm:$0xff] %v12728_v25  ;;  %18209 = vst [vmem:[#allocation3_spill] sm:$0xff] %v12751_v31  ;;  %v12779_v41 = vsub.f32 %v541_v8, %v12684_v12  ;;  %v12782_v42 = vand.u32 4294901760, %v12746_v29  ;;  %564 = vmatpush1.msra.mxu0 %v12684_v12  ;;  %v703_v43 = vsub.f32 %v12725_v24, %v17509_v34  ;;  %v17504_v45 = vand.u32 4294901760, %v12763_v36  ;;  %v12798_v47 = vld [vmem:[%s17488_s3 + $0xe8] sm:$0xff]  ;;  %v12811_v52 = vld [vmem:[%s17488_s3 + $0xe0] sm:$0xff] }
  0x15   : > { %18210 = vst [vmem:[#allocation4_spill] sm:$0xff] %v12757_v33  ;;  %18211 = vst [vmem:[#allocation5_spill] sm:$0xff] %v12766_v37  ;;  %v709_v44 = vsub.f32 %v12731_v26, %v17508_v35  ;;  %v12793_v46 = vsub.f32 %v538_v13, %v12696_v16  ;;  %566 = vmatprep.subr.mxu0 %v12696_v16  ;;  %v698_v48 = vand.u32 4294901760, %v697_v39  ;;  %v12806_v51 = vand.u32 4294901760, %v12771_v38  ;;  %v12821_v57 = vld [vmem:[%s17488_s3 + $0xc8] sm:$0xff]  ;;  %v12836_v62 = vld [vmem:[%s17488_s3 + $0xc0] sm:$0xff] }
  0x16   : > { %18212 = vst [vmem:[#allocation6_spill] sm:$0xff] %v12782_v42  ;;  %v715_v49 = vsub.f32 %v12754_v32, %v17506_v40  ;;  %v17503_v50 = vand.u32 4294901760, %v12779_v41  ;;  %568 = vmatpush1.msra.mxu0 %v12698_v17  ;;  %v704_v53 = vand.u32 4294901760, %v703_v43  ;;  %v721_v55 = vsub.f32 %v12763_v36, %v17504_v45  ;;  %v12851_v6 = vld [vmem:[%s17488_s3 + $0xa8] sm:$0xff]  ;;  %v12945_v45 = vld [vmem:[%s17488_s3 + $0x60] sm:$0xff] }
  0x17   : > { %18213 = vst [vmem:[#allocation7_spill] sm:$0xff] %v12806_v51  ;;  %v710_v54 = vand.u32 4294901760, %v709_v44  ;;  %v17501_v56 = vand.u32 4294901760, %v12793_v46  ;;  %570 = vmatprep.subr.mxu0 %v12700_v18  ;;  %699 = vmatprep.subr.mxu1 %v698_v48  ;;  %v12828_v60 = vsub.f32 %v537_v14, %v12698_v17  ;;  %v12831_v61 = vand.u32 4294901760, %v12798_v47  ;;  %v12964_v40 = vld [vmem:[%s17488_s3 + $0x48] sm:$0xff] }
  0x18   : > { %v716_v58 = vand.u32 4294901760, %v715_v49  ;;  %v727_v59 = vsub.f32 %v12779_v41, %v17503_v50  ;;  %572 = vmatpush1.msra.mxu0 %v12722_v23  ;;  %705 = vmatpush1.msra.mxu1 %v704_v53  ;;  %v722_v63 = vand.u32 4294901760, %v721_v55  ;;  %v12843_v1 = vsub.f32 %v534_v15, %v12700_v18  ;;  %v12865_v15 = vld [vmem:[%s17488_s3 + $0xa0] sm:$0xff]  ;;  %v12991_v30 = vld [vmem:[%s17488_s3 + $0x28] sm:$0xff] }
  0x19   : > { %18214 = vst [vmem:[#allocation8_spill] sm:$0xff] %v12831_v61  ;;  %v733_v0 = vsub.f32 %v12793_v46, %v17501_v56  ;;  %v12846_v2 = vand.u32 4294901760, %v12811_v52  ;;  %574 = vmatprep.subr.mxu0 %v12728_v25  ;;  %711 = vmatprep.subr.mxu1 %v710_v54  ;;  %v17500_v8 = vand.u32 4294901760, %v12828_v60  ;;  %v12857_v13 = vsub.f32 %v12708_v20, %v12722_v23 }
  0x1a   : > { %v728_v7 = vand.u32 4294901760, %v727_v59  ;;  %v12860_v14 = vand.u32 4294901760, %v12821_v57  ;;  %576 = vmatpush1.msra.mxu0 %v12751_v31  ;;  %717 = vmatpush1.msra.mxu1 %v716_v58  ;;  %v17498_v43 = vand.u32 4294901760, %v12843_v1  ;;  %v12871_v44 = vsub.f32 %v12713_v21, %v12728_v25  ;;  %v12891_v21 = vld [vmem:[%s17488_s3 + $0x88] sm:$0xff] }
  0x1b   : > { %18215 = vst [vmem:[#allocation9_spill] sm:$0xff] %v12846_v2  ;;  %v734_v39 = vand.u32 4294901760, %v733_v0  ;;  %v12874_v20 = vand.u32 4294901760, %v12836_v62  ;;  %578 = vmatprep.subr.mxu0 %v12757_v33  ;;  %723 = vmatprep.subr.mxu1 %v722_v63  ;;  %v739_v48 = vsub.f32 %v12828_v60, %v17500_v8  ;;  %v17499_v49 = vand.u32 4294901760, %v12857_v13 }
  0x1c   : > { %18216 = vst [vmem:[#allocation10_spill] sm:$0xff] %v12860_v14  ;;  %v12883_v53 = vsub.f32 %v12718_v22, %v12751_v31  ;;  %v12886_v54 = vand.u32 4294901760, %v12851_v6  ;;  %580 = vmatpush1.msra.mxu0 %v12766_v37  ;;  %729 = vmatpush1.msra.mxu1 %v728_v7  ;;  %v745_v55 = vsub.f32 %v12843_v1, %v17498_v43  ;;  %v17502_v58 = vand.u32 4294901760, %v12871_v44 }
  0x1d   : > { %18217 = vst [vmem:[#allocation11_spill] sm:$0xff] %v12874_v20  ;;  %v12901_v22 = vsub.f32 %v12736_v27, %v12757_v33  ;;  %v12904_v59 = vand.u32 4294901760, %v12865_v15  ;;  %582 = vmatprep.subr.mxu0 %v12782_v42  ;;  %735 = vmatprep.subr.mxu1 %v734_v39  ;;  %v740_v63 = vand.u32 4294901760, %v739_v48  ;;  %v751_v0 = vsub.f32 %v12857_v13, %v17499_v49  ;;  %v12918_v27 = vld [vmem:[%s17488_s3 + $0x80] sm:$0xff] }
  0x1e   : > { %18218 = vst [vmem:[#allocation12_spill] sm:$0xff] %v12886_v54  ;;  %v17505_v7 = vand.u32 4294901760, %v12883_v53  ;;  %v12913_v43 = vsub.f32 %v12741_v28, %v12766_v37  ;;  %584 = vmatpush1.msra.mxu0 %v12806_v51  ;;  %v746_v39 = vand.u32 4294901760, %v745_v55  ;;  %v757_v48 = vsub.f32 %v12871_v44, %v17502_v58  ;;  %v12931_v28 = vld [vmem:[%s17488_s3 + $0x68] sm:$0xff]  ;;  %v485_v33 = vld [vmem:[%s13050_s15] sm:$0xff] }
  0x1f   : > { %18219 = vst [vmem:[#allocation13_spill] sm:$0xff] %v12904_v59  ;;  %v17507_v49 = vand.u32 4294901760, %v12901_v22  ;;  %v12926_v8 = vand.u32 4294901760, %v12891_v21  ;;  %741 = vmatpush1.msra.mxu1 %v740_v63  ;;  %586 = vmatprep.subr.mxu0 %v12831_v61  ;;  %v752_v56 = vand.u32 4294901760, %v751_v0  ;;  %v12940_v50 = vsub.f32 %v12746_v29, %v12782_v42 }
  0x20   : > { %v763_v55 = vsub.f32 %v12883_v53, %v17505_v7  ;;  %v17510_v58 = vand.u32 4294901760, %v12913_v43  ;;  %747 = vmatprep.subr.mxu1 %v746_v39  ;;  %588 = vmatpush1.msra.mxu0 %v12846_v2  ;;  %v758_v63 = vand.u32 4294901760, %v757_v48  ;;  %v12955_v7 = vand.u32 4294901760, %v12918_v27 }
  0x21   : > { %18220 = vst [vmem:[#allocation14_spill] sm:$0xff] %v12926_v8  ;;  %v769_v0 = vsub.f32 %v12901_v22, %v17507_v49  ;;  %v12959_v29 = vsub.f32 %v12771_v38, %v12806_v51  ;;  %753 = vmatpush1.msra.mxu1 %v752_v56  ;;  %590 = vmatprep.subr.mxu0 %v12860_v14  ;;  %v17514_v49 = vand.u32 4294901760, %v12940_v50  ;;  %v12972_v35 = vand.u32 4294901760, %v12931_v28  ;;  %v12977_v38 = vld [vmem:[%s17488_s3 + $0x40] sm:$0xff] }
  0x22   : > { %18221 = vst [vmem:[#allocation15_spill] sm:$0xff] %v12955_v7  ;;  %v764_v39 = vand.u32 4294901760, %v763_v55  ;;  %v775_v48 = vsub.f32 %v12913_v43, %v17510_v58  ;;  %759 = vmatprep.subr.mxu1 %v758_v63  ;;  %592 = vmatpush1.msra.mxu0 %v12874_v20  ;;  %v12983_v34 = vsub.f32 %v12798_v47, %v12831_v61  ;;  %v12986_v58 = vand.u32 4294901760, %v12945_v45 }
  0x23   : > { %18222 = vst [vmem:[#allocation16_spill] sm:$0xff] %v12972_v35  ;;  %v770_v56 = vand.u32 4294901760, %v769_v0  ;;  %v17517_v55 = vand.u32 4294901760, %v12959_v29  ;;  %594 = vmatprep.subr.mxu0 %v12886_v54  ;;  %v781_v0 = vsub.f32 %v12940_v50, %v17514_v49  ;;  %v12999_v47 = vsub.f32 %v12811_v52, %v12846_v2 }
  0x24   : > { %765 = vmatpush1.msra.mxu1 %v764_v39  ;;  %v776_v63 = vand.u32 4294901760, %v775_v48  ;;  %v13002_v9 = vand.u32 4294901760, %v12964_v40  ;;  %596 = vmatpush1.msra.mxu0 %v12904_v59  ;;  %v13013_v49 = vsub.f32 %v12821_v57, %v12860_v14  ;;  %v13016_v52 = vand.u32 4294901760, %v12977_v38  ;;  %v13035_v14 = vld [vmem:[%s17488_s3 + $0x8] sm:$0xff] }
  0x25   : > { %771 = vmatprep.subr.mxu1 %v770_v56  ;;  %v787_v39 = vsub.f32 %v12959_v29, %v17517_v55  ;;  %v13021_v56 = vld [vmem:[%s17488_s3 + $0x20] sm:$0xff]  ;;  %598 = vmatprep.subr.mxu0 %v12926_v8  ;;  %v782_v2 = vand.u32 4294901760, %v781_v0  ;;  %v13027_v48 = vsub.f32 %v12836_v62, %v12874_v20  ;;  %v13030_v57 = vand.u32 4294901760, %v12991_v30 }
  0x26   : > { %18223 = vst [vmem:[#allocation17_spill] sm:$0xff] %v13002_v9  ;;  %18224 = vst [vmem:[#allocation18_spill] sm:$0xff] %v13013_v49  ;;  %777 = vmatpush1.msra.mxu1 %v776_v63  ;;  %600 = vmatpush1.msra.mxu0 %v12955_v7  ;;  %v18227_v61 = vand.u32 4294901760, %v12983_v34  ;;  %v13044_v62 = vsub.f32 %v12851_v6, %v12886_v54  ;;  %v13058_v55 = vand.u32 4294901760, %v13021_v56  ;;  %v13075_v42 = vand.u32 4294901760, %v13035_v14 }
  0x27   : > { %18225 = vst [vmem:[#allocation19_spill] sm:$0xff] %v13016_v52  ;;  %18226 = vst [vmem:[#allocation20_spill] sm:$0xff] %v13030_v57  ;;  %v788_v63 = vand.u32 4294901760, %v787_v39  ;;  %783 = vmatprep.subr.mxu1 %v782_v2  ;;  %602 = vmatprep.subr.mxu0 %v12972_v35  ;;  %v18228_v39 = vand.u32 4294901760, %v12999_v47  ;;  %v13062_v6 = vsub.f32 %v12865_v15, %v12904_v59  ;;  %v13067_v2 = vld [vmem:[%s17488_s3] sm:$0xff]  ;;  %v18231_v59 = vand.u32 4294901760, %v13027_v48 }
  0x28   : > { %v793_v0 = vsub.f32 %v12983_v34, %v18227_v61  ;;  %18229 = vst [vmem:[#allocation21_spill] sm:$0xff] %v13058_v55  ;;  %604 = vmatpush1.msra.mxu0 %v12986_v58  ;;  %v17538_v51 = vand.u32 4294901760, %v13044_v62  ;;  %v13092_v31 = vand.u32 4294901760, %v13067_v2 }
  0x29   : > { %v799_v20 = vsub.f32 %v12999_v47, %v18228_v39  ;;  %789 = vmatpush1.msra.mxu1 %v788_v63  ;;  %v18230_v39 = vand.u32 4294901760, %v13013_v49  ;;  %606 = vmatprep.subr.mxu0 %v13002_v9  ;;  %v811_v37 = vsub.f32 %v13027_v48, %v18231_v59  ;;  %v13096_v59 = vsub.f32 %v12918_v27, %v12955_v7 }
  0x2a   : > { %v794_v54 = vand.u32 4294901760, %v793_v0  ;;  %v13084_v0 = vsub.f32 %v12891_v21, %v12926_v8  ;;  %608 = vmatpush1.msra.mxu0 %v13016_v52 }
  0x2b   : > { %v805_v61 = vsub.f32 %v13013_v49, %v18230_v39  ;;  %v800_v15 = vand.u32 4294901760, %v799_v20  ;;  %v817_v20 = vsub.f32 %v13044_v62, %v17538_v51  ;;  %18233 = vst [vmem:[#allocation23_spill] sm:$0xff] %v13096_v59  ;;  %v812_v63 = vand.u32 4294901760, %v811_v37  ;;  %610 = vmatprep.subr.mxu0 %v13030_v57 }
  0x2c   : > { %18232 = vst [vmem:[#allocation22_spill] sm:$0xff] %v13084_v0  ;;  %795 = vmatprep.subr.mxu1 %v794_v54  ;;  %v18234_v54 = vand.u32 4294901760, %v13062_v6  ;;  %v13105_v51 = vsub.f32 %v12931_v28, %v12972_v35  ;;  %612 = vmatpush1.msra.mxu0 %v13058_v55  ;;  %v17544_v27 = vand.u32 4294901760, %v13096_v59  ;;  %v13113_v37 = vsub.f32 %v12945_v45, %v12986_v58 }
  0x2d   : > { %v806_v39 = vand.u32 4294901760, %v805_v61  ;;  %801 = vmatpush1.msra.mxu1 %v800_v15  ;;  %v17541_v61 = vand.u32 4294901760, %v13084_v0  ;;  %v818_v8 = vand.u32 4294901760, %v817_v20  ;;  %v13109_v15 = vand.u32 4294901760, %v485_v33  ;;  %614 = vmatprep.subr.mxu0 %v13075_v42 }
  0x2e   : > { %v823_v21 = vsub.f32 %v13062_v6, %v18234_v54  ;;  %v13122_v20 = vsub.f32 %v12964_v40, %v13002_v9  ;;  %616 = vmatpush1.msra.mxu0 %v13092_v31  ;;  %v835_v45 = vsub.f32 %v13096_v59, %v17544_v27  ;;  %v18237_v40 = vand.u32 4294901760, %v13105_v51 }
  0x2f   : > { %807 = vmatprep.subr.mxu1 %v806_v39  ;;  %18235 = vst [vmem:[#allocation24_spill] sm:$0xff] %v13109_v15  ;;  %v829_v28 = vsub.f32 %v13084_v0, %v17541_v61  ;;  %v13134_v61 = vsub.f32 %v12977_v38, %v13016_v52  ;;  %949 = vmatprep.subr.mxu0 %v12703_v19  ;;  %v18239_v38 = vand.u32 4294901760, %v13113_v37 }
  0x30   : > { %813 = vmatpush1.msra.mxu1 %v812_v63  ;;  %v824_v54 = vand.u32 4294901760, %v823_v21  ;;  %v13129_v63 = vsub.f32 %v485_v33, %v13109_v15  ;;  %v17549_v9 = vand.u32 4294901760, %v13122_v20  ;;  %v13143_v33 = vsub.f32 %v12991_v30, %v13030_v57 }
  0x31   : > { %819 = vmatprep.subr.mxu1 %v818_v8  ;;  %v830_v39 = vand.u32 4294901760, %v829_v28  ;;  %v841_v8 = vsub.f32 %v13105_v51, %v18237_v40  ;;  %v836_v27 = vand.u32 4294901760, %v835_v45  ;;  %v17554_v28 = vand.u32 4294901760, %v13134_v61 }
  0x32   : > { %18236 = vst [vmem:[#allocation25_spill] sm:$0xff] %v13129_v63  ;;  %825 = vmatpush1.msra.mxu1 %v824_v54  ;;  %v13146_v21 = vand.u32 4294901760, %v13129_v63  ;;  %v847_v54 = vsub.f32 %v13113_v37, %v18239_v38  ;;  %v853_v52 = vsub.f32 %v13122_v20, %v17549_v9  ;;  %v17555_v30 = vand.u32 4294901760, %v13143_v33 }
  0x33   : > { %831 = vmatprep.subr.mxu1 %v830_v39  ;;  %v842_v40 = vand.u32 4294901760, %v841_v8  ;;  %v13158_v45 = vsub.f32 %v13021_v56, %v13058_v55  ;;  %v859_v39 = vsub.f32 %v13134_v61, %v17554_v28  ;;  %v13167_v8 = vsub.f32 %v13035_v14, %v13075_v42 }
  0x34   : > { %18238 = vst [vmem:[#allocation26_spill] sm:$0xff] %v13146_v21  ;;  %837 = vmatpush1.msra.mxu1 %v836_v27  ;;  %v653_v57 = vsub.f32 %v13129_v63, %v13146_v21  ;;  %v848_v38 = vand.u32 4294901760, %v847_v54  ;;  %v854_v9 = vand.u32 4294901760, %v853_v52  ;;  %v865_v56 = vsub.f32 %v13143_v33, %v17555_v30  ;;  %v486_v54 = vld [vmem:[%s13050_s15 + $0x8] sm:$0xff] }
  0x35   : > { %843 = vmatprep.subr.mxu1 %v842_v40  ;;  %v17558_v27 = vand.u32 4294901760, %v13158_v45  ;;  %v13175_v21 = vsub.f32 %v13067_v2, %v13092_v31  ;;  %v860_v28 = vand.u32 4294901760, %v859_v39  ;;  %v17556_v14 = vand.u32 4294901760, %v13167_v8  ;;  %v487_v39 = vld [vmem:[%s13050_s15 + $0x10] sm:$0xff] }
  0x36   : > { %v13178_v55 = vand.u32 4294901760, %v653_v57  ;;  %849 = vmatpush1.msra.mxu1 %v848_v38  ;;  %v866_v52 = vand.u32 4294901760, %v865_v56  ;;  %v13189_v2 = vand.u32 4294901760, %v486_v54 }
  0x37   : > { %18240 = vst [vmem:[#allocation27_spill] sm:$0xff] %v13175_v21  ;;  %855 = vmatprep.subr.mxu1 %v854_v9  ;;  %v871_v40 = vsub.f32 %v13158_v45, %v17558_v27  ;;  %v17557_v30 = vand.u32 4294901760, %v13175_v21  ;;  %v877_v57 = vsub.f32 %v13167_v8, %v17556_v14 }
  0x38   : > { %18241 = vst [vmem:[#allocation28_spill] sm:$0xff] %v13178_v55  ;;  %655 = vmatmul.mubr.f32.vlgmr.msra.gmra.mxu0 %v13178_v55  ;;  %861 = vmatpush1.msra.mxu1 %v860_v28  ;;  %18242 = vst [vmem:[#allocation29_spill] sm:$0xff] %v13189_v2  ;;  %v18243_v28 = vmov 0.0  }
  0x39   : > { %952 = vmatpush1.msra.mxu0 %v12725_v24  ;;  %867 = vmatprep.subr.mxu1 %v866_v52  ;;  %v872_v9 = vand.u32 4294901760, %v871_v40  ;;  %v883_v38 = vsub.f32 %v13175_v21, %v17557_v30  ;;  %v878_v56 = vand.u32 4294901760, %v877_v57  ;;  %v13201_v52 = vsub.f32 %v486_v54, %v13189_v2  ;;  %v488_v57 = vld [vmem:[%s13050_s15 + $0x18] sm:$0xff] }
  0x3a   : > { %955 = vmatprep.subr.mxu0 %v12731_v26  ;;  %660 = vmatprep.mubr.f32.mxu0 %v18243_v28  ;;  %v13203_v40 = vand.u32 4294901760, %v487_v39 }
  0x3b   : > { %958 = vmatpush1.msra.mxu0 %v12754_v32  ;;  %873 = vmatpush1.msra.mxu1 %v872_v9  ;;  %v884_v14 = vand.u32 4294901760, %v883_v38  ;;  %18244 = vst [vmem:[#allocation30_spill] sm:$0xff] %v13201_v52  ;;  %v13214_v54 = vand.u32 4294901760, %v13201_v52 }
  0x3c   : > { %961 = vmatprep.subr.mxu0 %v12763_v36  ;;  %879 = vmatprep.subr.mxu1 %v878_v56  ;;  %18245 = vst [vmem:[#allocation31_spill] sm:$0xff] %v13203_v40  ;;  %v13217_v9 = vsub.f32 %v487_v39, %v13203_v40 }
  0x3d   : > { %964 = vmatpush1.msra.mxu0 %v12779_v41  ;;  %885 = vmatpush1.msra.mxu1 %v884_v14  ;;  %18246 = vst [vmem:[#allocation32_spill] sm:$0xff] %v13214_v54  ;;  %v13223_v14 = vand.u32 4294901760, %v488_v57  ;;  %v664_v38 = vsub.f32 %v13201_v52, %v13214_v54 }
  0x3e   : > { %967 = vmatprep.subr.mxu0 %v12793_v46  ;;  %920 = vmatmul.mubr.f32.vlgmr.msra.gmra.mxu1 %v13109_v15  ;;  %18247 = vst [vmem:[#allocation33_spill] sm:$0xff] %v13217_v9  ;;  %v13232_v39 = vand.u32 4294901760, %v13217_v9  ;;  %v18254_v15 = vld [vmem:[#allocation4_spill] sm:$0xff] }
  0x3f   : > { %970 = vmatpush1.msra.mxu0 %v12828_v60  ;;  %1109 = vmatprep.subr.mxu1 %v12663_v3  ;;  %18248 = vst [vmem:[#allocation34_spill] sm:$0xff] %v13223_v14  ;;  %v13239_v56 = vsub.f32 %v488_v57, %v13223_v14  ;;  %v13245_v30 = vand.u32 4294901760, %v664_v38  ;;  %v18252_v57 = vld [vmem:[#allocation3_spill] sm:$0xff] }
  0x40   : > { %973 = vmatprep.subr.mxu0 %v12843_v1  ;;  %1111 = vmatpush1.msra.mxu1 %v12665_v4  ;;  %18249 = vst [vmem:[#allocation35_spill] sm:$0xff] %v13232_v39  ;;  %v675_v27 = vsub.f32 %v13217_v9, %v13232_v39 }
  0x41   : > { %976 = vmatpush1.msra.mxu0 %v12857_v13  ;;  %1113 = vmatprep.subr.mxu1 %v12667_v5  ;;  %18250 = vst [vmem:[#allocation36_spill] sm:$0xff] %v13239_v56  ;;  %18251 = vst [vmem:[#allocation37_spill] sm:$0xff] %v13245_v30  ;;  %v13254_v55 = vand.u32 4294901760, %v13239_v56 }
  0x42   : > { %979 = vmatprep.subr.mxu0 %v12871_v44  ;;  %1115 = vmatpush1.msra.mxu1 %v12680_v10  ;;  %v13260_v38 = vand.u32 4294901760, %v675_v27  ;;  %v18259_v27 = vld [vmem:[#allocation8_spill] sm:$0xff] }
  0x43   : > { %982 = vmatpush1.msra.mxu0 %v12883_v53  ;;  %1117 = vmatprep.subr.mxu1 %v12682_v11  ;;  %18253 = vst [vmem:[#allocation38_spill] sm:$0xff] %v13254_v55 }
  0x44   : > { %985 = vmatprep.subr.mxu0 %v12901_v22  ;;  %1119 = vmatpush1.msra.mxu1 %v12684_v12  ;;  %18255 = vst [vmem:[#allocation4_spill] sm:$0xff] %v13260_v38 }
  0x45   : > { %988 = vmatpush1.msra.mxu0 %v12913_v43  ;;  %1121 = vmatprep.subr.mxu1 %v12696_v16 }
  0x46   : > { %991 = vmatprep.subr.mxu0 %v12940_v50  ;;  %1123 = vmatpush1.msra.mxu1 %v12698_v17 }
  0x47   : > { %994 = vmatpush1.msra.mxu0 %v12959_v29  ;;  %1125 = vmatprep.subr.mxu1 %v12700_v18 }
  0x48   : > { %997 = vmatprep.subr.mxu0 %v12983_v34  ;;  %1127 = vmatpush1.msra.mxu1 %v12722_v23 }
  0x49   : > { %1000 = vmatpush1.msra.mxu0 %v12999_v47  ;;  %1129 = vmatprep.subr.mxu1 %v12728_v25  ;;  %v18256_v25 = vld [vmem:[#allocation5_spill] sm:$0xff] }
  0x4a   : > { %1003 = vmatprep.subr.mxu0 %v13013_v49  ;;  %1131 = vmatpush1.msra.mxu1 %v18252_v57  ;;  %v18257_v57 = vld [vmem:[#allocation6_spill] sm:$0xff]  ;;  %v686_v49 = vsub.f32 %v13239_v56, %v13254_v55 }
  0x4b   : > { %1006 = vmatpush1.msra.mxu0 %v13027_v48  ;;  %1133 = vmatprep.subr.mxu1 %v18254_v15 }
  0x4c   : > { %666 = vmatmul.mubr.f32.gmra.mxu0 %v13245_v30  ;;  %1009 = vmatprep.subr.mxu0 %v13044_v62  ;;  %v18258_v30 = vld [vmem:[#allocation7_spill] sm:$0xff] }
  0x4d   : > { %1012 = vmatpush1.msra.mxu0 %v13062_v6  ;;  %1135 = vmatpush1.msra.mxu1 %v18256_v25 }
  0x4e   : > { %1015 = vmatprep.subr.mxu0 %v13084_v0  ;;  %1137 = vmatprep.subr.mxu1 %v18257_v57  ;;  %v13276_v57 = vand.u32 4294901760, %v686_v49  ;;  %v18261_v0 = vld [vmem:[#allocation9_spill] sm:$0xff]  ;;  %v18264_v49 = vld [vmem:[#allocation12_spill] sm:$0xff] }
  0x4f   : > { %671 = vmatprep.mubr.f32.mxu0 %v18243_v28  ;;  %1018 = vmatpush1.msra.mxu0 %v13096_v59  ;;  %v18262_v59 = vld [vmem:[#allocation10_spill] sm:$0xff] }
  0x50   : > { %1139 = vmatpush1.msra.mxu1 %v18258_v30  ;;  %677 = vmatmul.mubr.f32.gmra.mxu0 %v13260_v38  ;;  %18260 = vst [vmem:[#allocation5_spill] sm:$0xff] %v13276_v57  ;;  %v18263_v38 = vld [vmem:[#allocation11_spill] sm:$0xff] }
  0x51   : > { %925 = vmatprep.mubr.f32.mxu1 %v18243_v28  ;;  %1021 = vmatprep.subr.mxu0 %v13105_v51 }
  0x52   : > { %1141 = vmatprep.subr.mxu1 %v18259_v27  ;;  %927 = vmatmul.mubr.f32.gmra.mxu1 %v13189_v2  ;;  %v18265_v2 = vld [vmem:[#allocation13_spill] sm:$0xff] }
  0x53   : > { %1024 = vmatpush1.msra.mxu0 %v13113_v37  ;;  %1143 = vmatpush1.msra.mxu1 %v18261_v0 }
  0x54   : > { %1027 = vmatprep.subr.mxu0 %v13122_v20  ;;  %1145 = vmatprep.subr.mxu1 %v18262_v59  ;;  %v18266_v59 = vld [vmem:[#allocation14_spill] sm:$0xff] }
  0x55   : > { %682 = vmatprep.mubr.f32.mxu0 %v18243_v28  ;;  %1030 = vmatpush1.msra.mxu0 %v13134_v61 }
  0x56   : > { %1147 = vmatpush1.msra.mxu1 %v18263_v38  ;;  %688 = vmatmul.mubr.f32.gmra.mxu0 %v13276_v57  ;;  %v18267_v57 = vand.u32 4294901760, %v12703_v19  ;;  %v18273_v19 = vld [vmem:[#allocation20_spill] sm:$0xff] }
  0x57   : > { %932 = vmatprep.mubr.f32.mxu1 %v18243_v28  ;;  %1033 = vmatprep.subr.mxu0 %v13143_v33 }
  0x58   : > { %1149 = vmatprep.subr.mxu1 %v18264_v49  ;;  %934 = vmatmul.mubr.f32.gmra.mxu1 %v13203_v40  ;;  %v18268_v40 = vand.u32 4294901760, %v12725_v24  ;;  %v18275_v24 = vld [vmem:[#allocation21_spill] sm:$0xff] }
  0x59   : > { %1036 = vmatpush1.msra.mxu0 %v13158_v45  ;;  %1151 = vmatpush1.msra.mxu1 %v18265_v2 }
  0x5a   : > { %1039 = vmatprep.subr.mxu0 %v13167_v8  ;;  %1153 = vmatprep.subr.mxu1 %v18266_v59 }
  0x5b   : > { %1042 = vmatpush1.msra.mxu0 %v13175_v21  ;;  %1075 = vmatprep.mubr.f32.mxu0 %v18243_v28  ;;  %v18269_v21 = vld [vmem:[#allocation17_spill] sm:$0xff] }
  0x5c   : > { %1155 = vmatpush1.msra.mxu1 %v12955_v7  ;;  %939 = vmatprep.mubr.f32.mxu1 %v18243_v28  ;;  %v18270_v7 = vand.u32 4294901760, %v12731_v26  ;;  %v18277_v26 = vand.u32 4294901760, %v12793_v46  ;;  %v18282_v46 = vand.u32 4294901760, %v12871_v44  ;;  %v18297_v44 = vld [vmem:[#allocation22_spill] sm:$0xff] }
  0x5d   : > { %1078 = vmatmul.mubr.f32.vlgmr.msra.gmra.mxu0 %v13129_v63  ;;  %1157 = vmatprep.subr.mxu1 %v12972_v35  ;;  %v18271_v63 = vld [vmem:[#allocation19_spill] sm:$0xff]  ;;  %v18272_v35 = vand.u32 4294901760, %v12754_v32  ;;  %v18278_v32 = vand.u32 4294901760, %v12828_v60  ;;  %v18283_v60 = vand.u32 4294901760, %v12883_v53  ;;  %v18298_v53 = vand.u32 4294901760, %v18297_v44 }
  0x5e   : > { %1244 = vmatprep.subr.mxu0 %v18267_v57  ;;  %941 = vmatmul.mubr.f32.gmra.mxu1 %v13223_v14  ;;  %v18274_v57 = vand.u32 4294901760, %v12763_v36  ;;  %v18280_v36 = vand.u32 4294901760, %v12843_v1  ;;  %v18288_v1 = vand.u32 4294901760, %v12983_v34  ;;  %v18294_v34 = vld [vmem:[#allocation3_spill] sm:$0xff] }
  0x5f   : > { %1159 = vmatpush1.msra.mxu1 %v12986_v58  ;;  %1248 = vmatpush1.msra.mxu0 %v18268_v40  ;;  %v18276_v40 = vand.u32 4294901760, %v12779_v41  ;;  %v18281_v41 = vand.u32 4294901760, %v12857_v13  ;;  %v18295_v13 = vand.u32 4294901760, %v13044_v62  ;;  %v18302_v62 = vand.u32 4294901760, %v13105_v51 }
  0x60   : > { %1161 = vmatprep.subr.mxu1 %v18269_v21  ;;  %1252 = vmatprep.subr.mxu0 %v18270_v7  ;;  %v18300_v7 = vld [vmem:[#allocation23_spill] sm:$0xff] }
  0x61   : > { %1083 = vmatprep.mubr.f32.mxu0 %v18243_v28  ;;  %1163 = vmatpush1.msra.mxu1 %v18271_v63 }
  0x62   : > { %1256 = vmatpush1.msra.mxu0 %v18272_v35  ;;  %1165 = vmatprep.subr.mxu1 %v18273_v19  ;;  %v18279_v35 = vld [vmem:[#allocation26_spill] sm:$0xff] }
  0x63   : > { %1086 = vmatmul.mubr.f32.gmra.mxu0 %v13201_v52  ;;  %1260 = vmatprep.subr.mxu0 %v18274_v57  ;;  %v18304_v57 = vand.u32 4294901760, %v13122_v20  ;;  %v539_v20 = vld [vmem:[%s17488_s3 + $0x190] sm:$0xff] }
  0x64   : > { %1167 = vmatpush1.msra.mxu1 %v18275_v24  ;;  %1264 = vmatpush1.msra.mxu0 %v18276_v40  ;;  %v18305_v40 = vld [vmem:[#allocation10_spill] sm:$0xff] }
  0x65   : > { %1169 = vmatprep.subr.mxu1 %v13075_v42  ;;  %1268 = vmatprep.subr.mxu0 %v18277_v26 }
  0x66   : > { %1091 = vmatprep.mubr.f32.mxu0 %v18243_v28  ;;  %1171 = vmatpush1.msra.mxu1 %v13092_v31 }
  0x67   : > { %1204 = vmatprep.mubr.f32.mxu1 %v18243_v28  ;;  %1272 = vmatpush1.msra.mxu0 %v18278_v32  ;;  %v18307_v32 = vand.u32 4294901760, %v13143_v33  ;;  %v536_v33 = vld [vmem:[%s17488_s3 + $0x178] sm:$0xff] }
  0x68   : > { %1094 = vmatmul.mubr.f32.gmra.mxu0 %v13217_v9  ;;  %1208 = vmatmul.mubr.f32.vlgmr.msra.gmra.mxu1 %v18279_v35  ;;  %v508_v9 = vld [vmem:[%s17488_s3 + $0x98] sm:$0xff] }
  0x69   : > { %1276 = vmatprep.subr.mxu0 %v18280_v36  ;;  %1431 = vmatprep.subr.mxu1 %v12663_v3  ;;  %v18284_v3 = vand.u32 4294901760, %v12901_v22  ;;  %v18299_v22 = vld [vmem:[#allocation6_spill] sm:$0xff] }
  0x6a   : > { %1280 = vmatpush1.msra.mxu0 %v18281_v41  ;;  %1433 = vmatpush1.msra.mxu1 %v12665_v4  ;;  %v18285_v4 = vand.u32 4294901760, %v12913_v43  ;;  %v552_v43 = vld [vmem:[%s17488_s3 + $0x1f8] sm:$0xff]  ;;  %v18308_v41 = vand.u32 4294901760, %v13158_v45  ;;  %v535_v45 = vld [vmem:[%s17488_s3 + $0x170] sm:$0xff] }
  0x6b   : > { %1284 = vmatprep.subr.mxu0 %v18282_v46  ;;  %1435 = vmatprep.subr.mxu1 %v12667_v5  ;;  %v18286_v5 = vand.u32 4294901760, %v12940_v50  ;;  %v18292_v50 = vld [vmem:[#allocation2_spill] sm:$0xff] }
  0x6c   : > { %1099 = vmatprep.mubr.f32.mxu0 %v18243_v28  ;;  %1213 = vmatprep.mubr.f32.mxu1 %v18243_v28 }
  0x6d   : > { %1288 = vmatpush1.msra.mxu0 %v18283_v60  ;;  %1437 = vmatpush1.msra.mxu1 %v12680_v10  ;;  %v18287_v10 = vand.u32 4294901760, %v12959_v29  ;;  %v18301_v29 = vand.u32 4294901760, %v18300_v7 }
  0x6e   : > { %1102 = vmatmul.mubr.f32.gmra.mxu0 %v13239_v56  ;;  %1217 = vmatmul.mubr.f32.gmra.mxu1 %v13214_v54 }
  0x6f   : > { %1292 = vmatprep.subr.mxu0 %v18284_v3  ;;  %1439 = vmatprep.subr.mxu1 %v12682_v11  ;;  %v18289_v11 = vand.u32 4294901760, %v12999_v47  ;;  %v13455_v3 = vand.u32 4294901760, %v539_v20 }
  0x70   : > { %1296 = vmatpush1.msra.mxu0 %v18285_v4  ;;  %1441 = vmatpush1.msra.mxu1 %v12684_v12  ;;  %v18290_v12 = vld [vmem:[#allocation18_spill] sm:$0xff]  ;;  %v18311_v4 = vld [vmem:[#allocation27_spill] sm:$0xff] }
  0x71   : > { %1300 = vmatprep.subr.mxu0 %v18286_v5  ;;  %1443 = vmatprep.subr.mxu1 %v12696_v16  ;;  %v18291_v16 = vand.u32 4294901760, %v18290_v12  ;;  %18310 = vst [vmem:[#allocation7_spill] sm:$0xff] %v13455_v3  ;;  %v18312_v5 = vand.u32 4294901760, %v18311_v4 }
  0x72   : > { %1222 = vmatprep.mubr.f32.mxu1 %v18243_v28  ;;  %1304 = vmatpush1.msra.mxu0 %v18287_v10  ;;  %v18314_v10 = vld [vmem:[#allocation15_spill] sm:$0xff] }
  0x73   : > { %1445 = vmatpush1.msra.mxu1 %v12698_v17  ;;  %1308 = vmatprep.subr.mxu0 %v18288_v1  ;;  %v18293_v17 = vand.u32 4294901760, %v13027_v48  ;;  %v547_v48 = vld [vmem:[%s17488_s3 + $0x1d0] sm:$0xff] }
  0x74   : > { %1226 = vmatmul.mubr.f32.gmra.mxu1 %v13232_v39  ;;  %1447 = vmatprep.subr.mxu1 %v12700_v18  ;;  %v551_v18 = vld [vmem:[%s17488_s3 + $0x1f0] sm:$0xff]  ;;  %v13416_v26 = vand.u32 4294901760, %v547_v48 }
  0x75   : > { %1312 = vmatpush1.msra.mxu0 %v18289_v11  ;;  %1449 = vmatpush1.msra.mxu1 %v12722_v23  ;;  %v18296_v23 = vand.u32 4294901760, %v13062_v6  ;;  %v13392_v47 = vand.u32 4294901760, %v551_v18  ;;  %v13403_v6 = vand.u32 4294901760, %v552_v43  ;;  %v18315_v1 = vld [vmem:[#allocation24_spill] sm:$0xff]  ;;  %v13471_v11 = vand.u32 4294901760, %v536_v33 }
  0x76   : > { %1316 = vmatprep.subr.mxu0 %v18291_v16  ;;  %1451 = vmatprep.subr.mxu1 %v18292_v50  ;;  %v13453_v60 = vsub.f32 %v547_v48, %v13416_v26  ;;  %v532_v16 = vld [vmem:[%s17488_s3 + $0x158] sm:$0xff]  ;;  %v531_v50 = vld [vmem:[%s17488_s3 + $0x150] sm:$0xff] }
  0x77   : > { %1231 = vmatprep.mubr.f32.mxu1 %v18243_v28  ;;  %1320 = vmatpush1.msra.mxu0 %v18293_v17  ;;  %18316 = vst [vmem:[#allocation9_spill] sm:$0xff] %v13471_v11  ;;  %v13509_v7 = vand.u32 4294901760, %v531_v50 }
  0x78   : > { %1453 = vmatpush1.msra.mxu1 %v18294_v34  ;;  %1324 = vmatprep.subr.mxu0 %v18295_v13  ;;  %v18317_v34 = vld [vmem:[#allocation16_spill] sm:$0xff]  ;;  %v17579_v44 = vand.u32 4294901760, %v13453_v60 }
  0x79   : > { %1235 = vmatmul.mubr.f32.gmra.mxu1 %v13254_v55  ;;  %1455 = vmatprep.subr.mxu1 %v18254_v15  ;;  %v18303_v15 = vand.u32 4294901760, %v13113_v37  ;;  %v543_v37 = vld [vmem:[%s17488_s3 + $0x1b0] sm:$0xff]  ;;  %18320 = vst [vmem:[#allocation13_spill] sm:$0xff] %v13509_v7 }
  0x7a   : > { %1328 = vmatpush1.msra.mxu0 %v18296_v23  ;;  %1457 = vmatpush1.msra.mxu1 %v18256_v25  ;;  %v548_v25 = vld [vmem:[%s17488_s3 + $0x1d8] sm:$0xff]  ;;  %v13444_v46 = vand.u32 4294901760, %v543_v37  ;;  %v13493_v23 = vsub.f32 %v539_v20, %v13455_v3  ;;  %v523_v20 = vld [vmem:[%s17488_s3 + $0x110] sm:$0xff] }
  0x7b   : > { %1332 = vmatprep.subr.mxu0 %v18298_v53  ;;  %1459 = vmatprep.subr.mxu1 %v18299_v22  ;;  %v13414_v51 = vand.u32 4294901760, %v548_v25  ;;  %v528_v53 = vld [vmem:[%s17488_s3 + $0x138] sm:$0xff]  ;;  %v13507_v22 = vand.u32 4294901760, %v532_v16 }
  0x7c   : > { %1336 = vmatpush1.msra.mxu0 %v18301_v29  ;;  %1461 = vmatpush1.msra.mxu1 %v18258_v30  ;;  %v544_v30 = vld [vmem:[%s17488_s3 + $0x1b8] sm:$0xff]  ;;  %v13486_v13 = vsub.f32 %v543_v37, %v13444_v46  ;;  %v527_v29 = vld [vmem:[%s17488_s3 + $0x130] sm:$0xff] }
  0x7d   : > { %1340 = vmatprep.subr.mxu0 %v18302_v62  ;;  %1463 = vmatprep.subr.mxu1 %v18259_v27  ;;  %v18306_v27 = vand.u32 4294901760, %v13134_v61  ;;  %v13433_v36 = vand.u32 4294901760, %v544_v30  ;;  %v540_v61 = vld [vmem:[%s17488_s3 + $0x198] sm:$0xff]  ;;  %18319 = vst [vmem:[#allocation12_spill] sm:$0xff] %v13507_v22  ;;  %v13524_v62 = vsub.f32 %v536_v33, %v13471_v11  ;;  %v13560_v33 = vsub.f32 %v531_v50, %v13509_v7 }
  0x7e   : > { %1344 = vmatpush1.msra.mxu0 %v18303_v15  ;;  %1465 = vmatpush1.msra.mxu1 %v18261_v0  ;;  %v13425_v0 = vsub.f32 %v551_v18, %v13392_v47  ;;  %v13488_v18 = vand.u32 4294901760, %v535_v45  ;;  %v520_v50 = vld [vmem:[%s17488_s3 + $0xf8] sm:$0xff] }
  0x7f   : > { %1348 = vmatprep.subr.mxu0 %v18304_v57  ;;  %1467 = vmatprep.subr.mxu1 %v18305_v40  ;;  %v13481_v17 = vsub.f32 %v544_v30, %v13433_v36  ;;  %v13531_v30 = vand.u32 4294901760, %v528_v53  ;;  %v524_v57 = vld [vmem:[%s17488_s3 + $0x118] sm:$0xff]  ;;  %v18334_v54 = vand.u32 4294901760, %v13560_v33 }
  0x80   : > { %1352 = vmatpush1.msra.mxu0 %v18306_v27  ;;  %1469 = vmatpush1.msra.mxu1 %v18263_v38  ;;  %v13439_v38 = vsub.f32 %v552_v43, %v13403_v6  ;;  %18318 = vst [vmem:[#allocation11_spill] sm:$0xff] %v13488_v18  ;;  %v13529_v15 = vsub.f32 %v535_v45, %v13488_v18  ;;  %v18322_v40 = vld [vmem:[#allocation29_spill] sm:$0xff]  ;;  %v13547_v27 = vand.u32 4294901760, %v527_v29 }
  0x81   : > { %1356 = vmatprep.subr.mxu0 %v18307_v32  ;;  %1471 = vmatprep.subr.mxu1 %v18264_v49  ;;  %v18309_v49 = vand.u32 4294901760, %v13167_v8  ;;  %v13466_v8 = vand.u32 4294901760, %v540_v61  ;;  %v17578_v48 = vand.u32 4294901760, %v13481_v17  ;;  %18321 = vst [vmem:[#allocation14_spill] sm:$0xff] %v13531_v30  ;;  %v17581_v32 = vand.u32 4294901760, %v13493_v23 }
  0x82   : > { %1360 = vmatpush1.msra.mxu0 %v18308_v41  ;;  %1473 = vmatpush1.msra.mxu1 %v18265_v2  ;;  %v13461_v2 = vsub.f32 %v548_v25, %v13414_v51  ;;  %v17584_v12 = vand.u32 4294901760, %v13439_v38  ;;  %18323 = vst [vmem:[#allocation17_spill] sm:$0xff] %v13547_v27  ;;  %v13564_v45 = vsub.f32 %v532_v16, %v13507_v22  ;;  %v13583_v16 = vand.u32 4294901760, %v523_v20 }
  0x83   : > { %1364 = vmatprep.subr.mxu0 %v18309_v49  ;;  %1475 = vmatprep.subr.mxu1 %v18266_v59  ;;  %18313 = vst [vmem:[#allocation8_spill] sm:$0xff] %v13466_v8  ;;  %v17582_v59 = vand.u32 4294901760, %v13425_v0  ;;  %v13515_v25 = vsub.f32 %v540_v61, %v13466_v8  ;;  %v519_v61 = vld [vmem:[%s17488_s3 + $0xf0] sm:$0xff]  ;;  %v13669_v56 = vsub.f32 %v13560_v33, %v18334_v54 }
  0x84   : > { %1368 = vmatpush1.msra.mxu0 %v18312_v5  ;;  %1401 = vmatprep.mubr.f32.mxu0 %v18243_v28  ;;  %v17580_v43 = vand.u32 4294901760, %v13461_v2  ;;  %v13573_v5 = vand.u32 4294901760, %v524_v57  ;;  %18325 = vst [vmem:[#allocation20_spill] sm:$0xff] %v13583_v16  ;;  %v503_v54 = vld [vmem:[%s17488_s3 + $0x70] sm:$0xff] }
  0x85   : > { %1477 = vmatpush1.msra.mxu1 %v18314_v10  ;;  %1403 = vmatmul.mubr.f32.vlgmr.msra.gmra.mxu0 %v18315_v1  ;;  %v17583_v49 = vand.u32 4294901760, %v13515_v25  ;;  %v17586_v10 = vand.u32 4294901760, %v13524_v62 }
  0x86   : > { %1479 = vmatprep.subr.mxu1 %v18317_v34  ;;  %1556 = vmatprep.subr.mxu0 %v13403_v6  ;;  %v1711_v37 = vsub.f32 %v13461_v2, %v17580_v43  ;;  %18324 = vst [vmem:[#allocation19_spill] sm:$0xff] %v13573_v5  ;;  %v13588_v34 = vand.u32 4294901760, %v519_v61 }
  0x87   : > { %1481 = vmatpush1.msra.mxu1 %v12986_v58  ;;  %1558 = vmatpush1.msra.mxu0 %v13392_v47  ;;  %v13505_v58 = vsub.f32 %v13425_v0, %v17582_v59  ;;  %v1735_v43 = vsub.f32 %v13515_v25, %v17583_v49  ;;  %v13616_v59 = vsub.f32 %v528_v53, %v13531_v30 }
  0x88   : > { %1483 = vmatprep.subr.mxu1 %v18269_v21  ;;  %1560 = vmatprep.subr.mxu0 %v13414_v51  ;;  %v1699_v21 = vsub.f32 %v13439_v38, %v17584_v12  ;;  %18326 = vst [vmem:[#allocation21_spill] sm:$0xff] %v13588_v34  ;;  %v13620_v12 = vand.u32 4294901760, %v520_v50 }
  0x89   : > { %1408 = vmatprep.mubr.f32.mxu0 %v18243_v28  ;;  %1485 = vmatpush1.msra.mxu1 %v18271_v63  ;;  %v17577_v63 = vand.u32 4294901760, %v13486_v13  ;;  %v1706_v41 = vand.u32 4294901760, %v13505_v58  ;;  %v13628_v58 = vsub.f32 %v524_v57, %v13573_v5  ;;  %v512_v57 = vld [vmem:[%s17488_s3 + $0xb8] sm:$0xff] }
  0x8a   : > { %1562 = vmatpush1.msra.mxu0 %v13416_v26  ;;  %1487 = vmatprep.subr.mxu1 %v18273_v19  ;;  %v13545_v19 = vsub.f32 %v13453_v60, %v17579_v44  ;;  %v1700_v4 = vand.u32 4294901760, %v1699_v21  ;;  %v18327_v44 = vld [vmem:[#allocation31_spill] sm:$0xff]  ;;  %18328 = vst [vmem:[#allocation18_spill] sm:$0xff] %v13620_v12  ;;  %v13677_v35 = vand.u32 4294901760, %v512_v57  ;;  %v13681_v52 = vsub.f32 %v520_v50, %v13620_v12  ;;  %v504_v50 = vld [vmem:[%s17488_s3 + $0x78] sm:$0xff] }
  0x8b   : > { %1410 = vmatmul.mubr.f32.gmra.mxu0 %v18322_v40  ;;  %1564 = vmatprep.subr.mxu0 %v13433_v36 }
  0x8c   : > { %1489 = vmatpush1.msra.mxu1 %v18275_v24  ;;  %1566 = vmatpush1.msra.mxu0 %v13444_v46  ;;  %v13571_v24 = vsub.f32 %v13481_v17, %v17578_v48  ;;  %v1718_v21 = vand.u32 4294901760, %v13545_v19  ;;  %v13600_v48 = vsub.f32 %v13493_v23, %v17581_v32  ;;  %v515_v19 = vld [vmem:[%s17488_s3 + $0xd0] sm:$0xff]  ;;  %v13633_v32 = vsub.f32 %v523_v20, %v13583_v16 }
  0x8d   : > { %1491 = vmatprep.subr.mxu1 %v13075_v42  ;;  %1568 = vmatprep.subr.mxu0 %v13466_v8  ;;  %v13581_v42 = vsub.f32 %v13486_v13, %v17577_v63  ;;  %v13595_v63 = vsub.f32 %v527_v29, %v13547_v27  ;;  %v13625_v29 = vsub.f32 %v13524_v62, %v17586_v10  ;;  %v13650_v20 = vand.u32 4294901760, %v515_v19  ;;  %v507_v10 = vld [vmem:[%s17488_s3 + $0x90] sm:$0xff] }
  0x8e   : > { %1415 = vmatprep.mubr.f32.mxu0 %v18243_v28  ;;  %1493 = vmatpush1.msra.mxu1 %v13092_v31  ;;  %v1712_v31 = vand.u32 4294901760, %v1711_v37  ;;  %v516_v37 = vld [vmem:[%s17488_s3 + $0xd8] sm:$0xff]  ;;  %v1724_v49 = vand.u32 4294901760, %v13571_v24  ;;  %v18330_v24 = vand.u32 4294901760, %v13529_v15  ;;  %18335 = vst [vmem:[#allocation6_spill] sm:$0xff] %v13677_v35  ;;  %18336 = vst [vmem:[#allocation23_spill] sm:$0xff] %v13681_v52 }
  0x8f   : > { %1526 = vmatprep.mubr.f32.mxu1 %v18243_v28  ;;  %1570 = vmatpush1.msra.mxu0 %v13455_v3  ;;  %v1730_v53 = vand.u32 4294901760, %v13581_v42  ;;  %v13648_v42 = vand.u32 4294901760, %v516_v37  ;;  %18332 = vst [vmem:[#allocation22_spill] sm:$0xff] %v13650_v20  ;;  %v495_v8 = vld [vmem:[%s17488_s3 + $0x30] sm:$0xff] }
  0x90   : > { %1417 = vmatmul.mubr.f32.gmra.mxu0 %v18327_v44  ;;  %1528 = vmatmul.mubr.f32.vlgmr.msra.gmra.mxu1 %v18315_v1  ;;  %v13641_v55 = vsub.f32 %v13529_v15, %v18330_v24 }
  0x91   : > { %1572 = vmatprep.subr.mxu0 %v13471_v11  ;;  %1701 = vmatprep.subr.mxu1 %v1700_v4  ;;  %v13636_v4 = vsub.f32 %v519_v61, %v13588_v34  ;;  %18331 = vst [vmem:[#allocation3_spill] sm:$0xff] %v13648_v42  ;;  %v511_v61 = vld [vmem:[%s17488_s3 + $0xb0] sm:$0xff]  ;;  %v13717_v11 = vand.u32 4294901760, %v503_v54 }
  0x92   : > { %1574 = vmatpush1.msra.mxu0 %v13488_v18  ;;  %1707 = vmatpush1.msra.mxu1 %v1706_v41  ;;  %v1742_v41 = vand.u32 4294901760, %v13600_v48  ;;  %v18333_v48 = vand.u32 4294901760, %v13564_v45  ;;  %v1754_v24 = vand.u32 4294901760, %v13641_v55  ;;  %v13709_v18 = vsub.f32 %v516_v37, %v13648_v42 }
  0x93   : > { %18329 = vst [vmem:[#allocation2_spill] sm:$0xff] %v13636_v4  ;;  %1576 = vmatprep.subr.mxu0 %v13507_v22  ;;  %1713 = vmatprep.subr.mxu1 %v1712_v31  ;;  %v1736_v31 = vand.u32 4294901760, %v1735_v43  ;;  %v1748_v43 = vand.u32 4294901760, %v13625_v29  ;;  %v13691_v29 = vand.u32 4294901760, %v507_v10  ;;  %v13706_v22 = vand.u32 4294901760, %v508_v9 }
  0x94   : > { %1422 = vmatprep.mubr.f32.mxu0 %v18243_v28  ;;  %1533 = vmatprep.mubr.f32.mxu1 %v18243_v28  ;;  %v13664_v39 = vsub.f32 %v13564_v45, %v18333_v48  ;;  %v13699_v48 = vsub.f32 %v515_v19, %v13650_v20  ;;  %18340 = vst [vmem:[#allocation15_spill] sm:$0xff] %v13709_v18  ;;  %v18341_v19 = vand.u32 4294901760, %v13616_v59  ;;  %v18342_v37 = vand.u32 4294901760, %v13628_v58 }
  0x95   : > { %1578 = vmatpush1.msra.mxu0 %v13509_v7  ;;  %1719 = vmatpush1.msra.mxu1 %v1718_v21  ;;  %v13689_v21 = vand.u32 4294901760, %v511_v61  ;;  %18337 = vst [vmem:[#allocation10_spill] sm:$0xff] %v13691_v29  ;;  %18339 = vst [vmem:[#allocation27_spill] sm:$0xff] %v13706_v22 }
  0x96   : > { %1424 = vmatmul.mubr.f32.gmra.mxu0 %v13223_v14  ;;  %1535 = vmatmul.mubr.f32.gmra.mxu1 %v18322_v40  ;;  %v18338_v40 = vand.u32 4294901760, %v13595_v63  ;;  %v1760_v7 = vand.u32 4294901760, %v13664_v39  ;;  %v13728_v39 = vand.u32 4294901760, %v504_v50 }
  0x97   : > { %1580 = vmatprep.subr.mxu0 %v13531_v30  ;;  %1725 = vmatprep.subr.mxu1 %v1724_v49  ;;  %v1766_v49 = vand.u32 4294901760, %v13669_v56  ;;  %v1771_v30 = vsub.f32 %v13616_v59, %v18341_v19  ;;  %v500_v19 = vld [vmem:[%s17488_s3 + $0x58] sm:$0xff] }
  0x98   : > { %v13704_v55 = vsub.f32 %v13595_v63, %v18338_v40  ;;  %1582 = vmatpush1.msra.mxu0 %v13547_v27  ;;  %1731 = vmatpush1.msra.mxu1 %v1730_v53  ;;  %v499_v40 = vld [vmem:[%s17488_s3 + $0x50] sm:$0xff]  ;;  %v13726_v53 = vsub.f32 %v13628_v58, %v18342_v37  ;;  %v13735_v27 = vsub.f32 %v512_v57, %v13677_v35  ;;  %v13764_v3 = vand.u32 4294901760, %v500_v19 }
  0x99   : > { %1584 = vmatprep.subr.mxu0 %v13573_v5  ;;  %1737 = vmatprep.subr.mxu1 %v1736_v31  ;;  %v13740_v31 = vsub.f32 %v511_v61, %v13689_v21  ;;  %v13743_v37 = vsub.f32 %v507_v10, %v13691_v29  ;;  %v18343_v5 = vand.u32 4294901760, %v13633_v32  ;;  %v496_v10 = vld [vmem:[%s17488_s3 + $0x38] sm:$0xff]  ;;  %v13758_v61 = vsub.f32 %v508_v9, %v13706_v22 }
  0x9a   : > { %1540 = vmatprep.mubr.f32.mxu1 %v18243_v28  ;;  %1586 = vmatpush1.msra.mxu0 %v13583_v16  ;;  %v1778_v57 = vand.u32 4294901760, %v13704_v55  ;;  %v13752_v16 = vand.u32 4294901760, %v499_v40  ;;  %v1784_v9 = vand.u32 4294901760, %v13726_v53  ;;  %v13780_v55 = vsub.f32 %v504_v50, %v13728_v39 }
  0x9b   : > { %v1789_v56 = vsub.f32 %v13633_v32, %v18343_v5  ;;  %1743 = vmatpush1.msra.mxu1 %v1742_v41  ;;  %1588 = vmatprep.subr.mxu0 %v13620_v12  ;;  %18344 = vst [vmem:[#allocation16_spill] sm:$0xff] %v13758_v61  ;;  %v1772_v5 = vand.u32 4294901760, %v1771_v30  ;;  %v13762_v41 = vsub.f32 %v503_v54, %v13717_v11  ;;  %v492_v54 = vld [vmem:[%s17488_s3 + $0x18] sm:$0xff]  ;;  %v13786_v12 = vand.u32 4294901760, %v496_v10 }
  0x9c   : > { %1542 = vmatmul.mubr.f32.gmra.mxu1 %v18327_v44  ;;  %1749 = vmatprep.subr.mxu1 %v1748_v43  ;;  %v18345_v44 = vand.u32 4294901760, %v13681_v52  ;;  %v491_v43 = vld [vmem:[%s17488_s3 + $0x10] sm:$0xff]  ;;  %v18347_v50 = vand.u32 4294901760, %v13709_v18 }
  0x9d   : > { %1590 = vmatpush1.msra.mxu0 %v13588_v34  ;;  %1755 = vmatpush1.msra.mxu1 %v1754_v24  ;;  %v1790_v34 = vand.u32 4294901760, %v1789_v56  ;;  %v18346_v24 = vand.u32 4294901760, %v13636_v4  ;;  %v13798_v56 = vsub.f32 %v499_v40, %v13752_v16 }
  0x9e   : > { %v1795_v30 = vsub.f32 %v13681_v52, %v18345_v44  ;;  %1592 = vmatprep.subr.mxu0 %v13648_v42  ;;  %1761 = vmatprep.subr.mxu1 %v1760_v7  ;;  %v1807_v7 = vsub.f32 %v13709_v18, %v18347_v50  ;;  %v18348_v44 = vand.u32 4294901760, %v13699_v48  ;;  %v13807_v52 = vand.u32 4294901760, %v492_v54 }
  0x9f   : > { %v1801_v53 = vsub.f32 %v13636_v4, %v18346_v24  ;;  %1547 = vmatprep.mubr.f32.mxu1 %v18243_v28  ;;  %1594 = vmatpush1.msra.mxu0 %v13650_v20  ;;  %v13800_v24 = vand.u32 4294901760, %v495_v8  ;;  %v13811_v50 = vsub.f32 %v500_v19, %v13764_v3  ;;  %v18350_v42 = vand.u32 4294901760, %v13735_v27 }
  0xa0   : > { %1767 = vmatpush1.msra.mxu1 %v1766_v49  ;;  %1596 = vmatprep.subr.mxu0 %v13677_v35  ;;  %v1813_v4 = vsub.f32 %v13699_v48, %v18348_v44  ;;  %v1796_v40 = vand.u32 4294901760, %v1795_v30  ;;  %v13817_v35 = vand.u32 4294901760, %v491_v43  ;;  %v18351_v20 = vand.u32 4294901760, %v13740_v31 }
  0xa1   : > { %18349 = vst [vmem:[#allocation39_spill] sm:$0xff] %v13811_v50  ;;  %1549 = vmatmul.mubr.f32.gmra.mxu1 %v13223_v14  ;;  %1773 = vmatprep.subr.mxu1 %v1772_v5  ;;  %v1819_v49 = vsub.f32 %v13735_v27, %v18350_v42  ;;  %v1802_v44 = vand.u32 4294901760, %v1801_v53  ;;  %v13825_v14 = vsub.f32 %v496_v10, %v13786_v12  ;;  %v1808_v5 = vand.u32 4294901760, %v1807_v7 }
  0xa2   : > { %1598 = vmatpush1.msra.mxu0 %v13689_v21  ;;  %1779 = vmatpush1.msra.mxu1 %v1778_v57  ;;  %v1825_v19 = vsub.f32 %v13740_v31, %v18351_v20  ;;  %v13829_v42 = vsub.f32 %v495_v8, %v13800_v24  ;;  %v18352_v30 = vand.u32 4294901760, %v13758_v61  ;;  %v1814_v20 = vand.u32 4294901760, %v1813_v4 }
  0xa3   : > { %1600 = vmatprep.subr.mxu0 %v13706_v22  ;;  %1785 = vmatprep.subr.mxu1 %v1784_v9  ;;  %v18353_v10 = vand.u32 4294901760, %v13743_v37  ;;  %v13841_v7 = vsub.f32 %v492_v54, %v13807_v52  ;;  %v1820_v8 = vand.u32 4294901760, %v1819_v49  ;;  %v18355_v57 = vand.u32 4294901760, %v13780_v55 }
  0xa4   : > { %v1831_v18 = vsub.f32 %v13758_v61, %v18352_v30  ;;  %1602 = vmatpush1.msra.mxu0 %v13691_v29  ;;  %1791 = vmatpush1.msra.mxu1 %v1790_v34  ;;  %v13845_v30 = vsub.f32 %v491_v43, %v13817_v35  ;;  %v17634_v54 = vand.u32 4294901760, %v13825_v14  ;;  %v18356_v49 = vand.u32 4294901760, %v13762_v41 }
  0xa5   : > { %v1837_v53 = vsub.f32 %v13743_v37, %v18353_v10  ;;  %18354 = vst [vmem:[#allocation40_spill] sm:$0xff] %v13841_v7  ;;  %1604 = vmatprep.subr.mxu0 %v13728_v39  ;;  %1797 = vmatprep.subr.mxu1 %v1796_v40  ;;  %v1843_v34 = vsub.f32 %v13780_v55, %v18355_v57  ;;  %v1826_v10 = vand.u32 4294901760, %v1825_v19  ;;  %v18357_v4 = vand.u32 4294901760, %v13811_v50 }
  0xa6   : > { %1606 = vmatpush1.msra.mxu0 %v13717_v11  ;;  %1803 = vmatpush1.msra.mxu1 %v1802_v44  ;;  %v1832_v40 = vand.u32 4294901760, %v1831_v18  ;;  %v1849_v43 = vsub.f32 %v13762_v41, %v18356_v49  ;;  %v17633_v19 = vand.u32 4294901760, %v13841_v7  ;;  %v17632_v9 = vand.u32 4294901760, %v13845_v30 }
  0xa7   : > { %1608 = vmatprep.subr.mxu0 %v13764_v3  ;;  %1809 = vmatprep.subr.mxu1 %v1808_v5  ;;  %v1838_v57 = vand.u32 4294901760, %v1837_v53  ;;  %v1855_v44 = vsub.f32 %v13811_v50, %v18357_v4  ;;  %v1844_v18 = vand.u32 4294901760, %v1843_v34  ;;  %v18358_v5 = vand.u32 4294901760, %v13798_v56 }
  0xa8   : > { %1610 = vmatpush1.msra.mxu0 %v13752_v16  ;;  %1815 = vmatpush1.msra.mxu1 %v1814_v20  ;;  %v1867_v20 = vsub.f32 %v13825_v14, %v17634_v54  ;;  %v1850_v53 = vand.u32 4294901760, %v1849_v43  ;;  %v18360_v43 = vld [vmem:[#allocation28_spill] sm:$0xff]  ;;  %v18376_v54 = vld [vmem:[#allocation18_spill] sm:$0xff] }
  0xa9   : > { %1612 = vmatprep.subr.mxu0 %v13786_v12  ;;  %1821 = vmatprep.subr.mxu1 %v1820_v8  ;;  %v1861_v49 = vsub.f32 %v13798_v56, %v18358_v5  ;;  %v18359_v8 = vand.u32 4294901760, %v13829_v42  ;;  %v1856_v4 = vand.u32 4294901760, %v1855_v44 }
  0xaa   : > { %1614 = vmatpush1.msra.mxu0 %v13800_v24  ;;  %1827 = vmatpush1.msra.mxu1 %v1826_v10  ;;  %v1879_v10 = vsub.f32 %v13841_v7, %v17633_v19  ;;  %v2557_v19 = vld [vmem:[%s13931_s14] sm:$0xff] }
  0xab   : > { %1616 = vmatprep.subr.mxu0 %v13807_v52  ;;  %1833 = vmatprep.subr.mxu1 %v1832_v40  ;;  %v1873_v34 = vsub.f32 %v13829_v42, %v18359_v8  ;;  %v1862_v5 = vand.u32 4294901760, %v1861_v49  ;;  %v1885_v40 = vsub.f32 %v13845_v30, %v17632_v9  ;;  %v1868_v8 = vand.u32 4294901760, %v1867_v20  ;;  %v18361_v49 = vld [vmem:[#allocation8_spill] sm:$0xff]  ;;  %v18362_v20 = vld [vmem:[#allocation7_spill] sm:$0xff] }
  0xac   : > { %1618 = vmatpush1.msra.mxu0 %v13817_v35  ;;  %1839 = vmatpush1.msra.mxu1 %v1838_v57  ;;  %v1880_v44 = vand.u32 4294901760, %v1879_v10  ;;  %v18366_v10 = vld [vmem:[#allocation11_spill] sm:$0xff]  ;;  %v18375_v9 = vld [vmem:[#allocation4_spill] sm:$0xff] }
  0xad   : > { %1651 = vmatprep.mubr.f32.mxu0 %v18243_v28  ;;  %1845 = vmatprep.subr.mxu1 %v1844_v18  ;;  %v1874_v57 = vand.u32 4294901760, %v1873_v34  ;;  %v1886_v18 = vand.u32 4294901760, %v1885_v40  ;;  %v18364_v34 = vld [vmem:[#allocation9_spill] sm:$0xff]  ;;  %v18368_v40 = vld [vmem:[#allocation12_spill] sm:$0xff] }
  0xae   : > { %1951 = vmatprep.subr.mxu0 %v13439_v38  ;;  %1657 = vmatmul.mubr.f32.vlgmr.msra.gmra.mxu0 %v18360_v43  ;;  %v18369_v43 = vld [vmem:[#allocation13_spill] sm:$0xff] }
  0xaf   : > { %1851 = vmatpush1.msra.mxu1 %v1850_v53  ;;  %1954 = vmatpush1.msra.mxu0 %v13425_v0  ;;  %v18363_v53 = vld [vmem:[#allocation23_spill] sm:$0xff] }
  0xb0   : > { %1857 = vmatprep.subr.mxu1 %v1856_v4  ;;  %1957 = vmatprep.subr.mxu0 %v13461_v2  ;;  %v18365_v4 = vld [vmem:[#allocation2_spill] sm:$0xff] }
  0xb1   : > { %1863 = vmatpush1.msra.mxu1 %v1862_v5  ;;  %1960 = vmatpush1.msra.mxu0 %v13453_v60  ;;  %v18367_v5 = vld [vmem:[#allocation15_spill] sm:$0xff] }
  0xb2   : > { %1869 = vmatprep.subr.mxu1 %v1868_v8  ;;  %1963 = vmatprep.subr.mxu0 %v13481_v17  ;;  %v18370_v8 = vld [vmem:[#allocation37_spill] sm:$0xff] }
  0xb3   : > { %1875 = vmatpush1.msra.mxu1 %v1874_v57  ;;  %1966 = vmatpush1.msra.mxu0 %v13486_v13  ;;  %v18371_v57 = vld [vmem:[#allocation14_spill] sm:$0xff] }
  0xb4   : > { %1881 = vmatprep.subr.mxu1 %v1880_v44  ;;  %1969 = vmatprep.subr.mxu0 %v13515_v25  ;;  %v18372_v44 = vld [vmem:[#allocation17_spill] sm:$0xff] }
  0xb5   : > { %1887 = vmatpush1.msra.mxu1 %v1886_v18  ;;  %1920 = vmatprep.mubr.f32.mxu1 %v18243_v28  ;;  %v18373_v18 = vld [vmem:[#allocation19_spill] sm:$0xff] }
  0xb6   : > { %1972 = vmatpush1.msra.mxu0 %v13493_v23  ;;  %1922 = vmatmul.mubr.f32.vlgmr.msra.gmra.mxu1 %v18315_v1  ;;  %v17637_v1 = vmov 0  }
  0xb7   : > { %1975 = vmatprep.subr.mxu0 %v13524_v62  ;;  %2111 = vmatprep.subr.mxu1 %v13403_v6 }
  0xb8   : > { %1978 = vmatpush1.msra.mxu0 %v13529_v15  ;;  %2113 = vmatpush1.msra.mxu1 %v13392_v47 }
  0xb9   : > { %1981 = vmatprep.subr.mxu0 %v13564_v45  ;;  %2115 = vmatprep.subr.mxu1 %v13414_v51 }
  0xba   : > { %1984 = vmatpush1.msra.mxu0 %v13560_v33  ;;  %2117 = vmatpush1.msra.mxu1 %v13416_v26 }
  0xbb   : > { %1987 = vmatprep.subr.mxu0 %v13616_v59  ;;  %2119 = vmatprep.subr.mxu1 %v13433_v36 }
  0xbc   : > { %1990 = vmatpush1.msra.mxu0 %v13595_v63  ;;  %2121 = vmatpush1.msra.mxu1 %v13444_v46 }
  0xbd   : > { %1993 = vmatprep.subr.mxu0 %v13628_v58  ;;  %2123 = vmatprep.subr.mxu1 %v18361_v49 }
  0xbe   : > { %1996 = vmatpush1.msra.mxu0 %v13633_v32  ;;  %2125 = vmatpush1.msra.mxu1 %v18362_v20 }
  0xbf   : > { %1999 = vmatprep.subr.mxu0 %v18363_v53  ;;  %2127 = vmatprep.subr.mxu1 %v18364_v34 }
  0xc0   : > { %2002 = vmatpush1.msra.mxu0 %v18365_v4  ;;  %2129 = vmatpush1.msra.mxu1 %v18366_v10 }
  0xc1   : > { %2005 = vmatprep.subr.mxu0 %v18367_v5  ;;  %2131 = vmatprep.subr.mxu1 %v18368_v40 }
  0xc2   : > { %1662 = vmatprep.mubr.f32.mxu0 %v18243_v28  ;;  %2008 = vmatpush1.msra.mxu0 %v13699_v48 }
  0xc3   : > { %2133 = vmatpush1.msra.mxu1 %v18369_v43  ;;  %1668 = vmatmul.mubr.f32.gmra.mxu0 %v18370_v8  ;;  %v18374_v8 = vld [vmem:[#allocation20_spill] sm:$0xff] }
  0xc4   : > { %2011 = vmatprep.subr.mxu0 %v13735_v27  ;;  %2135 = vmatprep.subr.mxu1 %v18371_v57 }
  0xc5   : > { %2014 = vmatpush1.msra.mxu0 %v13740_v31  ;;  %2137 = vmatpush1.msra.mxu1 %v18372_v44 }
  0xc6   : > { %2017 = vmatprep.subr.mxu0 %v13758_v61  ;;  %2139 = vmatprep.subr.mxu1 %v18373_v18  ;;  %v18377_v18 = vld [vmem:[#allocation29_spill] sm:$0xff] }
  0xc7   : > { %1673 = vmatprep.mubr.f32.mxu0 %v18243_v28  ;;  %2020 = vmatpush1.msra.mxu0 %v13743_v37  ;;  %v18378_v61 = vld [vmem:[#allocation21_spill] sm:$0xff] }
  0xc8   : > { %2141 = vmatpush1.msra.mxu1 %v18374_v8  ;;  %1679 = vmatmul.mubr.f32.gmra.mxu0 %v18375_v9  ;;  %v18379_v9 = vld [vmem:[#allocation3_spill] sm:$0xff] }
  0xc9   : > { %1927 = vmatprep.mubr.f32.mxu1 %v18243_v28  ;;  %2023 = vmatprep.subr.mxu0 %v13780_v55 }
  0xca   : > { %2143 = vmatprep.subr.mxu1 %v18376_v54  ;;  %12517 = vset.pattern.permute.xlu0 %v17637_v1  ;;  %v18380_v1 = vld [vmem:[#allocation22_spill] sm:$0xff] }
  0xcb   : > { %1929 = vmatmul.mubr.f32.gmra.mxu1 %v18377_v18  ;;  %2026 = vmatpush1.msra.mxu0 %v13762_v41  ;;  %v18381_v18 = vld [vmem:[#allocation5_spill] sm:$0xff] }
  0xcc   : > { %2145 = vmatpush1.msra.mxu1 %v18378_v61  ;;  %2567 = vperm.xlu0 %12517, %v2557_v19   ;;  %v2561_v19 = vld [vmem:[%s13951_s17] sm:$0xff] }
  0xcd   : > { %2029 = vmatprep.subr.mxu0 %v13811_v50  ;;  %2147 = vmatprep.subr.mxu1 %v18379_v9  ;;  %v18382_v9 = vld [vmem:[#allocation6_spill] sm:$0xff]  ;;  %v18383_v50 = vld [vmem:[#allocation31_spill] sm:$0xff] }
  0xce   : > { %1684 = vmatprep.mubr.f32.mxu0 %v18243_v28  ;;  %2032 = vmatpush1.msra.mxu0 %v13798_v56 }
  0xcf   : > { %2149 = vmatpush1.msra.mxu1 %v18380_v1  ;;  %1690 = vmatmul.mubr.f32.gmra.mxu0 %v18381_v18  ;;  %v18384_v18 = vld [vmem:[#allocation25_spill] sm:$0xff] }
  0xd0   : > { %1934 = vmatprep.mubr.f32.mxu1 %v18243_v28  ;;  %2035 = vmatprep.subr.mxu0 %v13825_v14 }
  0xd1   : > { %2151 = vmatprep.subr.mxu1 %v18382_v9  ;;  %1936 = vmatmul.mubr.f32.gmra.mxu1 %v18383_v50  ;;  %v2559_v50 = vld [vmem:[%s13931_s14 + $0x10] sm:$0xff] }
  0xd2   : > { %2038 = vmatpush1.msra.mxu0 %v13829_v42  ;;  %2153 = vmatpush1.msra.mxu1 %v13689_v21 }
  0xd3   : > { %2600 = vperm.xlu0 %12517, %v2561_v19   ;;  %2041 = vmatprep.subr.mxu0 %v13841_v7  ;;  %v18385_v19 = vand.u32 4294901760, %v13439_v38  ;;  %v18386_v7 = vld [vmem:[#allocation34_spill] sm:$0xff]  ;;  %v18389_v38 = vand.u32 4294901760, %v13453_v60  ;;  %v18394_v60 = vand.u32 4294901760, %v13493_v23  ;;  %v18399_v23 = vand.u32 4294901760, %v13564_v45 }
  0xd4   : > { %2155 = vmatprep.subr.mxu1 %v13706_v22  ;;  %2044 = vmatpush1.msra.mxu0 %v13845_v30  ;;  %v18387_v22 = vand.u32 4294901760, %v13425_v0  ;;  %v18390_v0 = vld [vmem:[#allocation30_spill] sm:$0xff]  ;;  %v18403_v45 = vand.u32 4294901760, %v13616_v59  ;;  %v2562_v59 = vld [vmem:[%s13951_s17 + $0x8] sm:$0xff] }
  0xd5   : > { %2077 = vmatprep.mubr.f32.mxu0 %v18243_v28  ;;  %2157 = vmatpush1.msra.mxu1 %v13691_v29  ;;  %v18388_v29 = vand.u32 4294901760, %v13461_v2  ;;  %v18392_v2 = vand.u32 4294901760, %v13486_v13  ;;  %v9774_v13 = vld [vmem:[%s17496_s11] sm:$0xff] }
  0xd6   : > { %1941 = vmatprep.mubr.f32.mxu1 %v18243_v28  ;;  %2080 = vmatmul.mubr.f32.vlgmr.msra.gmra.mxu0 %v18384_v18  ;;  %v2560_v18 = vld [vmem:[%s13931_s14 + $0x18] sm:$0xff] }
  0xd7   : > { %2159 = vmatprep.subr.mxu1 %v13728_v39  ;;  %2246 = vmatprep.subr.mxu0 %v18385_v19  ;;  %v18398_v19 = vand.u32 4294901760, %v13529_v15  ;;  %v18402_v15 = vld [vmem:[#allocation32_spill] sm:$0xff] }
  0xd8   : > { %1943 = vmatmul.mubr.f32.gmra.mxu1 %v18386_v7  ;;  %2250 = vmatpush1.msra.mxu0 %v18387_v22  ;;  %v18391_v22 = vand.u32 4294901760, %v13481_v17  ;;  %v18395_v17 = vld [vmem:[#allocation26_spill] sm:$0xff] }
  0xd9   : > { %2161 = vmatpush1.msra.mxu1 %v13717_v11  ;;  %2577 = vperm.xlu0 %12517, %v2559_v50   ;;  %v18396_v50 = vld [vmem:[#allocation33_spill] sm:$0xff] }
  0xda   : > { %2163 = vmatprep.subr.mxu1 %v13764_v3  ;;  %2254 = vmatprep.subr.mxu0 %v18388_v29  ;;  %v18393_v29 = vand.u32 4294901760, %v13515_v25  ;;  %v18397_v25 = vand.u32 4294901760, %v13524_v62  ;;  %v18400_v62 = vand.u32 4294901760, %v13560_v33  ;;  %v18405_v33 = vand.u32 4294901760, %v13595_v63  ;;  %v18408_v63 = vld [vmem:[#allocation35_spill] sm:$0xff] }
  0xdb   : > { %2085 = vmatprep.mubr.f32.mxu0 %v18243_v28  ;;  %2165 = vmatpush1.msra.mxu1 %v13752_v16 }
  0xdc   : > { %2258 = vmatpush1.msra.mxu0 %v18389_v38  ;;  %2167 = vmatprep.subr.mxu1 %v13786_v12  ;;  %v18404_v38 = vmov 0  }
  0xdd   : > { %2088 = vmatmul.mubr.f32.gmra.mxu0 %v18390_v0  ;;  %2262 = vmatprep.subr.mxu0 %v18391_v22  ;;  %v18420_v0 = vand.u32 4294901760, %v13743_v37  ;;  %v2671_v37 = vld [vmem:[%s17490_s5 + $0x68] sm:$0xff] }
  0xde   : > { %2169 = vmatpush1.msra.mxu1 %v13800_v24  ;;  %2266 = vmatpush1.msra.mxu0 %v18392_v2  ;;  %v18422_v2 = vand.u32 4294901760, %v13780_v55  ;;  %v2686_v55 = vld [vmem:[%s17490_s5 + $0xe0] sm:$0xff] }
  0xdf   : > { %2582 = vperm.xlu0 %12517, %v2560_v18   ;;  %2171 = vmatprep.subr.mxu1 %v13807_v52  ;;  %v18419_v18 = vld [vmem:[#allocation19_spill] sm:$0xff] }
  0xe0   : > { %2270 = vmatprep.subr.mxu0 %v18393_v29  ;;  %2093 = vmatprep.mubr.f32.mxu0 %v18243_v28 }
  0xe1   : > { %2173 = vmatpush1.msra.mxu1 %v13817_v35  ;;  %2206 = vmatprep.mubr.f32.mxu1 %v18243_v28 }
  0xe2   : > { %2274 = vmatpush1.msra.mxu0 %v18394_v60  ;;  %2210 = vmatmul.mubr.f32.vlgmr.msra.gmra.mxu1 %v18395_v17  ;;  %v18425_v17 = vand.u32 4294901760, %v13762_v41  ;;  %v18430_v41 = vld [vmem:[#allocation3_spill] sm:$0xff] }
  0xe3   : > { %2096 = vmatmul.mubr.f32.gmra.mxu0 %v18396_v50  ;;  %2278 = vmatprep.subr.mxu0 %v18397_v25  ;;  %v2670_v50 = vld [vmem:[%s17490_s5 + $0x60] sm:$0xff]  ;;  %v18428_v25 = vld [vmem:[#allocation39_spill] sm:$0xff] }
  0xe4   : > { %2433 = vmatprep.subr.mxu1 %v13403_v6  ;;  %2282 = vmatpush1.msra.mxu0 %v18398_v19  ;;  %v18401_v6 = vld [vmem:[#allocation36_spill] sm:$0xff] }
  0xe5   : > { %2435 = vmatpush1.msra.mxu1 %v13392_v47  ;;  %9780 = vperm.xlu0 %12517, %v9774_v13   ;;  %v2558_v47 = vld [vmem:[%s13931_s14 + $0x8] sm:$0xff] }
  0xe6   : > { %2286 = vmatprep.subr.mxu0 %v18399_v23  ;;  %2437 = vmatprep.subr.mxu1 %v13414_v51  ;;  %v9776_v51 = vld [vmem:[%s17496_s11 + $0x10] sm:$0xff]  ;;  %v14120_v23 = vand.u32 4294901760, %v2671_v37 }
  0xe7   : > { %2101 = vmatprep.mubr.f32.mxu0 %v18243_v28  ;;  %2215 = vmatprep.mubr.f32.mxu1 %v18243_v28 }
  0xe8   : > { %2290 = vmatpush1.msra.mxu0 %v18400_v62  ;;  %2439 = vmatpush1.msra.mxu1 %v13416_v26  ;;  %v18406_v26 = vand.u32 4294901760, %v13628_v58  ;;  %v18410_v58 = vand.u32 4294901760, %v18365_v4  ;;  %v18414_v4 = vld [vmem:[#allocation38_spill] sm:$0xff]  ;;  %18432 = vst [vmem:[#allocation15_spill] sm:$0xff] %v14120_v23  ;;  %v18433_v62 = vand.u32 4294901760, %v13798_v56  ;;  %v18437_v56 = vand.u32 4294901760, %v13825_v14 }
  0xe9   : > { %2104 = vmatmul.mubr.f32.gmra.mxu0 %v18401_v6  ;;  %2219 = vmatmul.mubr.f32.gmra.mxu1 %v18402_v15  ;;  %v9775_v6 = vld [vmem:[%s17496_s11 + $0x8] sm:$0xff] }
  0xea   : > { %2294 = vmatprep.subr.mxu0 %v18403_v45  ;;  %2441 = vmatprep.subr.mxu1 %v13433_v36  ;;  %v18407_v36 = vand.u32 4294901760, %v13633_v32  ;;  %v18411_v32 = vand.u32 4294901760, %v18367_v5  ;;  %v2673_v5 = vld [vmem:[%s17490_s5 + $0x78] sm:$0xff]  ;;  %v14137_v45 = vand.u32 4294901760, %v2686_v55 }
  0xeb   : > { %12518 = vset.pattern.permute.xlu1 %v18404_v38  ;;  %2298 = vmatpush1.msra.mxu0 %v18405_v33  ;;  %v14084_v22 = vand.u32 4294901760, %v2673_v5  ;;  %v14148_v38 = vand.u32 4294901760, %v2670_v50  ;;  %v2684_v33 = vld [vmem:[%s17490_s5 + $0xd0] sm:$0xff] }
  0xec   : > { %2443 = vmatpush1.msra.mxu1 %v13444_v46  ;;  %2572 = vperm.xlu1 %12518, %v2558_v47   ;;  %v18409_v46 = vand.u32 4294901760, %v18363_v53  ;;  %v18413_v53 = vand.u32 4294901760, %v13735_v27  ;;  %v2688_v27 = vld [vmem:[%s17490_s5 + $0xf0] sm:$0xff]  ;;  %18436 = vst [vmem:[#allocation37_spill] sm:$0xff] %v14137_v45 }
  0xed   : > { %9790 = vperm.xlu0 %12517, %v9776_v51   ;;  %2302 = vmatprep.subr.mxu0 %v18406_v26  ;;  %18421 = vst [vmem:[#allocation8_spill] sm:$0xff] %v14084_v22  ;;  %v14095_v60 = vand.u32 4294901760, %v2688_v27  ;;  %v14118_v19 = vsub.f32 %v2673_v5, %v14084_v22  ;;  %v2669_v51 = vld [vmem:[%s17490_s5 + $0x58] sm:$0xff]  ;;  %18439 = vst [vmem:[#allocation17_spill] sm:$0xff] %v14148_v38  ;;  %v18440_v26 = vand.u32 4294901760, %v13829_v42  ;;  %v14191_v5 = vand.u32 4294901760, %v2684_v33 }
  0xee   : > { %2445 = vmatprep.subr.mxu1 %v18361_v49  ;;  %2224 = vmatprep.mubr.f32.mxu1 %v18243_v28  ;;  %v2689_v49 = vld [vmem:[%s17490_s5 + $0xf8] sm:$0xff]  ;;  %v14170_v42 = vsub.f32 %v2671_v37, %v14120_v23 }
  0xef   : > { %2306 = vmatpush1.msra.mxu0 %v18407_v36  ;;  %2447 = vmatpush1.msra.mxu1 %v18362_v20  ;;  %v18412_v20 = vand.u32 4294901760, %v13699_v48  ;;  %v18416_v48 = vand.u32 4294901760, %v13740_v31  ;;  %v2564_v31 = vld [vmem:[%s13951_s17 + $0x18] sm:$0xff]  ;;  %18424 = vst [vmem:[#allocation23_spill] sm:$0xff] %v14095_v60  ;;  %18431 = vst [vmem:[#allocation11_spill] sm:$0xff] %v14118_v19  ;;  %v14135_v47 = vsub.f32 %v2688_v27, %v14095_v60 }
  0xf0   : > { %2228 = vmatmul.mubr.f32.gmra.mxu1 %v18408_v63  ;;  %2310 = vmatprep.subr.mxu0 %v18409_v46  ;;  %v14167_v46 = vand.u32 4294901760, %v14118_v19  ;;  %18446 = vst [vmem:[#allocation21_spill] sm:$0xff] %v14170_v42  ;;  %18452 = vst [vmem:[#allocation25_spill] sm:$0xff] %v14191_v5 }
  0xf1   : > { %2449 = vmatprep.subr.mxu1 %v18364_v34  ;;  %2314 = vmatpush1.msra.mxu0 %v18410_v58  ;;  %v2563_v34 = vld [vmem:[%s13951_s17 + $0x10] sm:$0xff]  ;;  %18435 = vst [vmem:[#allocation13_spill] sm:$0xff] %v14135_v47  ;;  %v2683_v58 = vld [vmem:[%s17490_s5 + $0xc8] sm:$0xff]  ;;  %s484_s17 = scalar_lea.vmem %s17497_s12, %s13004_s27 }
  0xf2   : > { %2451 = vmatpush1.msra.mxu1 %v18366_v10  ;;  %2605 = vperm.xlu1 %12518, %v2562_v59   ;;  %v14064_v10 = vand.u32 4294901760, %v2689_v49  ;;  %v18443_v59 = vld [vmem:[#allocation40_spill] sm:$0xff]  ;;  %18445 = vst [vmem:[#allocation18_spill] sm:$0xff] %v14167_v46 }
  0xf3   : > { %2318 = vmatprep.subr.mxu0 %v18411_v32  ;;  %2453 = vmatprep.subr.mxu1 %v18368_v40  ;;  %v18417_v40 = vld [vmem:[#allocation16_spill] sm:$0xff]  ;;  %v18444_v63 = vand.u32 4294901760, %v18443_v59  ;;  %v18448_v32 = vld [vmem:[#allocation27_spill] sm:$0xff] }
  0xf4   : > { %2233 = vmatprep.mubr.f32.mxu1 %v18243_v28  ;;  %2322 = vmatpush1.msra.mxu0 %v18412_v20  ;;  %18415 = vst [vmem:[#allocation28_spill] sm:$0xff] %v14064_v10  ;;  %v14093_v29 = vsub.f32 %v2689_v49, %v14064_v10  ;;  %v18449_v49 = vand.u32 4294901760, %v13845_v30  ;;  %v9777_v20 = vld [vmem:[%s17496_s11 + $0x18] sm:$0xff]  ;;  %v2667_v30 = vld [vmem:[%s17490_s5 + $0x48] sm:$0xff] }
  0xf5   : > { %2455 = vmatpush1.msra.mxu1 %v18369_v43  ;;  %2326 = vmatprep.subr.mxu0 %v18413_v53  ;;  %v18418_v43 = vand.u32 4294901760, %v18417_v40  ;;  %v14202_v40 = vsub.f32 %v2670_v50, %v14148_v38 }
  0xf6   : > { %2237 = vmatmul.mubr.f32.gmra.mxu1 %v18414_v4  ;;  %2457 = vmatprep.subr.mxu1 %v18371_v57  ;;  %v2672_v57 = vld [vmem:[%s17490_s5 + $0x70] sm:$0xff]  ;;  %18423 = vst [vmem:[#allocation7_spill] sm:$0xff] %v14093_v29  ;;  %v14132_v15 = vand.u32 4294901760, %v14093_v29  ;;  %v14189_v4 = vsub.f32 %v2686_v55, %v14137_v45  ;;  %v2666_v55 = vld [vmem:[%s17490_s5 + $0x40] sm:$0xff] }
  0xf7   : > { %2330 = vmatpush1.msra.mxu0 %v18416_v48  ;;  %2459 = vmatpush1.msra.mxu1 %v18372_v44  ;;  %v2687_v44 = vld [vmem:[%s17490_s5 + $0xe8] sm:$0xff]  ;;  %v14103_v13 = vand.u32 4294901760, %v2672_v57  ;;  %v18453_v48 = vld [vmem:[#allocation10_spill] sm:$0xff]  ;;  %18455 = vst [vmem:[#allocation30_spill] sm:$0xff] %v14202_v40 }
  0xf8   : > { %2610 = vperm.xlu1 %12518, %v2563_v34   ;;  %2334 = vmatprep.subr.mxu0 %v18418_v43  ;;  %18434 = vst [vmem:[#allocation12_spill] sm:$0xff] %v14132_v15  ;;  %v2979_v53 = vsub.f32 %v14093_v29, %v14132_v15  ;;  %v14186_v34 = vand.u32 4294901760, %v14135_v47  ;;  %18451 = vst [vmem:[#allocation6_spill] sm:$0xff] %v14189_v4 }
  0xf9   : > { %2461 = vmatprep.subr.mxu1 %v18419_v18  ;;  %2338 = vmatpush1.msra.mxu0 %v18420_v0  ;;  %18426 = vst [vmem:[#allocation9_spill] sm:$0xff] %v14103_v13 }
  0xfa   : > { %2463 = vmatpush1.msra.mxu1 %v18374_v8  ;;  %2342 = vmatprep.subr.mxu0 %v18422_v2  ;;  %v14109_v8 = vand.u32 4294901760, %v2687_v44  ;;  %18450 = vst [vmem:[#allocation5_spill] sm:$0xff] %v14186_v34  ;;  %v2867_v2 = vsub.f32 %v14118_v19, %v14167_v46  ;;  %v2986_v50 = vsub.f32 %v14135_v47, %v14186_v34  ;;  %v2663_v46 = vld [vmem:[%s17490_s5 + $0x28] sm:$0xff]  ;;  %v2674_v47 = vld [vmem:[%s17490_s5 + $0x80] sm:$0xff] }
  0xfb   : > { %2465 = vmatprep.subr.mxu1 %v18376_v54  ;;  %2346 = vmatpush1.msra.mxu0 %v18425_v17  ;;  %v18429_v54 = vand.u32 4294901760, %v18428_v25  ;;  %v14228_v17 = vand.u32 4294901760, %v2667_v30  ;;  %v14240_v25 = vand.u32 4294901760, %v14189_v4 }
  0xfc   : > { %2467 = vmatpush1.msra.mxu1 %v18378_v61  ;;  %2615 = vperm.xlu1 %12518, %v2564_v31   ;;  %18427 = vst [vmem:[#allocation2_spill] sm:$0xff] %v14109_v8  ;;  %v2685_v61 = vld [vmem:[%s17490_s5 + $0xd8] sm:$0xff]  ;;  %v14157_v36 = vsub.f32 %v2687_v44, %v14109_v8  ;;  %v14214_v31 = vand.u32 4294901760, %v2683_v58  ;;  %v2682_v44 = vld [vmem:[%s17490_s5 + $0xc0] sm:$0xff] }
  0xfd   : > { %2350 = vmatprep.subr.mxu0 %v18429_v54  ;;  %2469 = vmatprep.subr.mxu1 %v18430_v41  ;;  %v14159_v14 = vand.u32 4294901760, %v2685_v61  ;;  %18463 = vst [vmem:[#allocation16_spill] sm:$0xff] %v14228_v17  ;;  %18465 = vst [vmem:[#allocation39_spill] sm:$0xff] %v14240_v25  ;;  %v14243_v54 = vsub.f32 %v2684_v33, %v14191_v5  ;;  %v14250_v41 = vand.u32 4294901760, %v14202_v40 }
  0xfe   : > { %2354 = vmatpush1.msra.mxu0 %v18433_v62  ;;  %2471 = vmatpush1.msra.mxu1 %v18380_v1  ;;  %v14146_v1 = vsub.f32 %v2672_v57, %v14103_v13  ;;  %18441 = vst [vmem:[#allocation20_spill] sm:$0xff] %v14157_v36  ;;  %v18457_v57 = vld [vmem:[#allocation24_spill] sm:$0xff]  ;;  %v14209_v18 = vand.u32 4294901760, %v14157_v36  ;;  %18460 = vst [vmem:[#allocation32_spill] sm:$0xff] %v14214_v31  ;;  %v14255_v62 = vand.u32 4294901760, %v2682_v44 }
  0xff   : > { %2358 = vmatprep.subr.mxu0 %v18437_v56  ;;  %2473 = vmatprep.subr.mxu1 %v18382_v9  ;;  %18442 = vst [vmem:[#allocation4_spill] sm:$0xff] %v14159_v14  ;;  %v2668_v9 = vld [vmem:[%s17490_s5 + $0x50] sm:$0xff]  ;;  %v14212_v0 = vsub.f32 %v2685_v61, %v14159_v14  ;;  %18466 = vst [vmem:[#allocation3_spill] sm:$0xff] %v14243_v54  ;;  %v14268_v33 = vsub.f32 %v2683_v58, %v14214_v31  ;;  %v14285_v58 = vand.u32 4294901760, %v2986_v50  ;;  %v18483_v50 = vld [vmem:[#allocation31_spill] sm:$0xff] }
 0x100   : > { %18438 = vst [vmem:[#allocation14_spill] sm:$0xff] %v14146_v1  ;;  %2362 = vmatpush1.msra.mxu0 %v18440_v26  ;;  %2475 = vmatpush1.msra.mxu1 %v13689_v21  ;;  %v14172_v21 = vand.u32 4294901760, %v2669_v51  ;;  %v14199_v27 = vand.u32 4294901760, %v14146_v1  ;;  %v14204_v43 = vand.u32 4294901760, %v2668_v9  ;;  %18458 = vst [vmem:[#allocation33_spill] sm:$0xff] %v14209_v18  ;;  %v14270_v26 = vand.u32 4294901760, %v2666_v55 }
 0x101   : > { %9785 = vperm.xlu1 %12518, %v9775_v6   ;;  %2366 = vmatprep.subr.mxu0 %v18444_v63  ;;  %18459 = vst [vmem:[#allocation36_spill] sm:$0xff] %v14212_v0  ;;  %18467 = vst [vmem:[#allocation40_spill] sm:$0xff] %v14250_v41  ;;  %v2681_v6 = vld [vmem:[%s17490_s5 + $0xb8] sm:$0xff]  ;;  %v14265_v56 = vand.u32 4294901760, %v14212_v0  ;;  %v14282_v63 = vsub.f32 %v2667_v30, %v14228_v17 }
 0x102   : > { %18447 = vst [vmem:[#allocation22_spill] sm:$0xff] %v14172_v21  ;;  %2477 = vmatprep.subr.mxu1 %v18448_v32  ;;  %2370 = vmatpush1.msra.mxu0 %v18449_v49  ;;  %18454 = vst [vmem:[#allocation34_spill] sm:$0xff] %v14199_v27  ;;  %v14226_v37 = vsub.f32 %v2669_v51, %v14172_v21  ;;  %v14253_v61 = vsub.f32 %v2668_v9, %v14204_v43  ;;  %v18470_v51 = vld [vmem:[#allocation29_spill] sm:$0xff]  ;;  %v14274_v9 = vand.u32 4294901760, %v2867_v2  ;;  %v2680_v2 = vld [vmem:[%s17490_s5 + $0xb0] sm:$0xff] }
 0x103   : > { %2403 = vmatprep.mubr.f32.mxu0 %v18243_v28  ;;  %2479 = vmatpush1.msra.mxu1 %v18453_v48  ;;  %18456 = vst [vmem:[#allocation26_spill] sm:$0xff] %v14204_v43  ;;  %18469 = vst [vmem:[#allocation10_spill] sm:$0xff] %v14255_v62  ;;  %v14291_v32 = vand.u32 4294901760, %v14243_v54  ;;  %v14293_v49 = vand.u32 4294901760, %v2681_v6  ;;  %v14308_v48 = vsub.f32 %v2682_v44, %v14255_v62  ;;  %v2664_v44 = vld [vmem:[%s17490_s5 + $0x30] sm:$0xff]  ;;  %v14353_v34 = vand.u32 4294901760, %v2680_v2 }
 0x104   : > { %2405 = vmatmul.mubr.f32.vlgmr.msra.gmra.mxu0 %v18457_v57  ;;  %2481 = vmatprep.subr.mxu1 %v13728_v39  ;;  %v14223_v39 = vand.u32 4294901760, %v14170_v42  ;;  %18462 = vst [vmem:[#allocation38_spill] sm:$0xff] %v14226_v37  ;;  %18468 = vst [vmem:[#allocation27_spill] sm:$0xff] %v14253_v61  ;;  %v14279_v59 = vand.u32 4294901760, %v14226_v37  ;;  %v14305_v30 = vand.u32 4294901760, %v14253_v61 }
 0x105   : > { %2483 = vmatpush1.msra.mxu1 %v13717_v11  ;;  %9795 = vperm.xlu1 %12518, %v9777_v20   ;;  %v14235_v11 = vand.u32 4294901760, %v2979_v53  ;;  %18471 = vst [vmem:[#allocation24_spill] sm:$0xff] %v14265_v56  ;;  %18472 = vst [vmem:[#allocation29_spill] sm:$0xff] %v14268_v33  ;;  %v2665_v20 = vld [vmem:[%s17490_s5 + $0x38] sm:$0xff] }
 0x106   : > { %18461 = vst [vmem:[#allocation35_spill] sm:$0xff] %v14223_v39  ;;  %2485 = vmatprep.subr.mxu1 %v13764_v3  ;;  %2410 = vmatprep.mubr.f32.mxu0 %v18243_v28  ;;  %v2874_v3 = vsub.f32 %v14146_v1, %v14199_v27  ;;  %18473 = vst [vmem:[#allocation41_spill] sm:$0xff] %v14270_v26  ;;  %v2659_v1 = vld [vmem:[%s17490_s5 + $0x8] sm:$0xff] }
 0x107   : > { %18464 = vst [vmem:[#allocation19_spill] sm:$0xff] %v14235_v11  ;;  %2487 = vmatpush1.msra.mxu1 %v13752_v16  ;;  %2528 = vmatprep.mubr.f32.mxu1 %v18243_v28  ;;  %v2993_v16 = vsub.f32 %v14157_v36, %v14209_v18  ;;  %18474 = vst [vmem:[#allocation42_spill] sm:$0xff] %v14274_v9  ;;  %v14342_v18 = vpop.f32.mrf.mxu0 }
 0x108   : > { %2412 = vmatmul.mubr.f32.gmra.mxu0 %v18470_v51  ;;  %2489 = vmatprep.subr.mxu1 %v13786_v12  ;;  %v2881_v12 = vsub.f32 %v14170_v42, %v14223_v39  ;;  %18475 = vst [vmem:[#allocation43_spill] sm:$0xff] %v14279_v59  ;;  %18476 = vst [vmem:[#allocation44_spill] sm:$0xff] %v14282_v63  ;;  %v14299_v53 = vand.u32 4294901760, %v2874_v3  ;;  %v3007_v3 = vsub.f32 %v14212_v0, %v14265_v56 }
 0x109   : > { %2491 = vmatpush1.msra.mxu1 %v13800_v24  ;;  %2417 = vmatprep.mubr.f32.mxu0 %v18243_v28  ;;  %18477 = vst [vmem:[#allocation45_spill] sm:$0xff] %v14285_v58  ;;  %v3000_v24 = vsub.f32 %v14189_v4, %v14240_v25  ;;  %18478 = vst [vmem:[#allocation46_spill] sm:$0xff] %v14291_v32  ;;  %v14323_v25 = vsub.f32 %v2666_v55, %v14270_v26  ;;  %v14335_v56 = vand.u32 4294901760, %v14282_v63  ;;  %v2679_v55 = vld [vmem:[%s17490_s5 + $0xa8] sm:$0xff]  ;;  %v14400_v0 = vpop.f32.mrf.mxu0  ;;  %v2676_v4 = vld [vmem:[%s17490_s5 + $0x90] sm:$0xff] }
 0x10a   : > { %2493 = vmatprep.subr.mxu1 %v13807_v52  ;;  %10559 = vmatprep.subr.mxu0 %v14064_v10  ;;  %18479 = vst [vmem:[#allocation47_spill] sm:$0xff] %v14293_v49  ;;  %18480 = vst [vmem:[#allocation48_spill] sm:$0xff] %v14299_v53  ;;  %v2888_v52 = vsub.f32 %v14202_v40, %v14250_v41  ;;  %v14320_v41 = vand.u32 4294901760, %v14268_v33  ;;  %v14337_v39 = vand.u32 4294901760, %v2665_v20 }
 0x10b   : > { %2495 = vmatpush1.msra.mxu1 %v13817_v35  ;;  %10560 = vmatpush3.msra.mxu0 %v14084_v22  ;;  %18481 = vst [vmem:[#allocation49_spill] sm:$0xff] %v14305_v30  ;;  %18482 = vst [vmem:[#allocation50_spill] sm:$0xff] %v14308_v48  ;;  %v14315_v35 = vand.u32 4294901760, %v2993_v16  ;;  %v2895_v16 = vsub.f32 %v14226_v37, %v14279_v59  ;;  %v14345_v27 = vand.u32 4294901760, %v3000_v24 }
 0x10c   : > { %2419 = vmatmul.mubr.f32.gmra.mxu0 %v18483_v50  ;;  %2530 = vmatmul.mubr.f32.vlgmr.msra.gmra.mxu1 %v18457_v57  ;;  %18485 = vst [vmem:[#allocation51_spill] sm:$0xff] %v14320_v41  ;;  %18486 = vst [vmem:[#allocation52_spill] sm:$0xff] %v14323_v25  ;;  %v14330_v57 = vand.u32 4294901760, %v2881_v12  ;;  %v3014_v12 = vsub.f32 %v14243_v54, %v14291_v32  ;;  %v14351_v59 = vsub.f32 %v2681_v6, %v14293_v49  ;;  %v2678_v32 = vld [vmem:[%s17490_s5 + $0xa0] sm:$0xff]  ;;  %v14432_v42 = vpop.f32.mrf.mxu0 }
 0x10d   : > { %18484 = vst [vmem:[#allocation31_spill] sm:$0xff] %v14315_v35  ;;  %2424 = vmatprep.mubr.f32.mxu0 %v18243_v28  ;;  %2535 = vmatprep.mubr.f32.mxu1 %v18243_v28  ;;  %18488 = vst [vmem:[#allocation54_spill] sm:$0xff] %v14335_v56  ;;  %v14359_v15 = vand.u32 4294901760, %v2888_v52  ;;  %v2902_v24 = vsub.f32 %v14253_v61, %v14305_v30  ;;  %v14367_v6 = vand.u32 4294901760, %v2664_v44  ;;  %v14374_v52 = vand.u32 4294901760, %v3007_v3  ;;  %v2662_v54 = vld [vmem:[%s17490_s5 + $0x20] sm:$0xff] }
 0x10e   : > { %18487 = vst [vmem:[#allocation53_spill] sm:$0xff] %v14330_v57  ;;  %18489 = vst [vmem:[#allocation55_spill] sm:$0xff] %v14337_v39  ;;  %10603 = vmatprep.subr.mxu1 %v14235_v11  ;;  %10561 = vmatprep.subr.mxu0 %v14095_v60  ;;  %v14365_v11 = vand.u32 4294901760, %v14308_v48  ;;  %v14379_v30 = vand.u32 4294901760, %v14323_v25  ;;  %v14381_v61 = vand.u32 4294901760, %v2679_v55  ;;  %v14388_v37 = vand.u32 4294901760, %v2895_v16  ;;  %v14495_v19 = vpop.f32.mrf.mxu0 }
 0x10f   : > { %18490 = vst [vmem:[#allocation56_spill] sm:$0xff] %v14345_v27  ;;  %18491 = vst [vmem:[#allocation57_spill] sm:$0xff] %v14351_v59  ;;  %10604 = vmatpush3.msra.mxu1 %v14274_v9  ;;  %10562 = vmatpush3.msra.mxu0 %v14103_v13  ;;  %v3021_v9 = vsub.f32 %v14268_v33, %v14320_v41  ;;  %v14393_v3 = vsub.f32 %v2665_v20, %v14337_v39  ;;  %v14395_v41 = vand.u32 4294901760, %v2663_v46  ;;  %v2677_v33 = vld [vmem:[%s17490_s5 + $0x98] sm:$0xff] }
 0x110   : > { %18492 = vst [vmem:[#allocation58_spill] sm:$0xff] %v14353_v34  ;;  %18493 = vst [vmem:[#allocation59_spill] sm:$0xff] %v14359_v15  ;;  %2426 = vmatmul.mubr.f32.gmra.mxu0 %v18386_v7  ;;  %2537 = vmatmul.mubr.f32.gmra.mxu1 %v18470_v51  ;;  %v2909_v51 = vsub.f32 %v14282_v63, %v14335_v56  ;;  %v14403_v40 = vand.u32 4294901760, %v3014_v12  ;;  %v14407_v16 = vand.u32 4294901760, %v14351_v59  ;;  %v2661_v56 = vld [vmem:[%s17490_s5 + $0x18] sm:$0xff]  ;;  %v14418_v63 = vand.u32 4294901760, %v2902_v24 }
 0x111   : > { %18494 = vst [vmem:[#allocation60_spill] sm:$0xff] %v14365_v11  ;;  %18495 = vst [vmem:[#allocation61_spill] sm:$0xff] %v14367_v6  ;;  %2542 = vmatprep.mubr.f32.mxu1 %v18243_v28  ;;  %10605 = vmatprep.subr.mxu1 %v14285_v58  ;;  %v14410_v20 = vsub.f32 %v2680_v2, %v14353_v34  ;;  %v14412_v58 = vand.u32 4294901760, %v2678_v32  ;;  %v3028_v12 = vsub.f32 %v14308_v48, %v14365_v11  ;;  %v2660_v48 = vld [vmem:[%s17490_s5 + $0x10] sm:$0xff] }
 0x112   : > { %18496 = vst [vmem:[#allocation62_spill] sm:$0xff] %v14374_v52  ;;  %18497 = vst [vmem:[#allocation63_spill] sm:$0xff] %v14379_v30  ;;  %10606 = vmatpush3.msra.mxu1 %v14299_v53  ;;  %10563 = vmatprep.subr.mxu0 %v14109_v8  ;;  %v14424_v53 = vsub.f32 %v2664_v44, %v14367_v6  ;;  %v14426_v2 = vand.u32 4294901760, %v2662_v54  ;;  %v14434_v24 = vand.u32 4294901760, %v3021_v9  ;;  %v14442_v11 = vand.u32 4294901760, %v2677_v33 }
 0x113   : > { %18498 = vst [vmem:[#allocation64_spill] sm:$0xff] %v14381_v61  ;;  %18499 = vst [vmem:[#allocation65_spill] sm:$0xff] %v14388_v37  ;;  %10607 = vmatprep.subr.mxu1 %v14315_v35  ;;  %10564 = vmatpush3.msra.mxu0 %v14120_v23  ;;  %v2916_v35 = vsub.f32 %v14323_v25, %v14379_v30  ;;  %v14440_v44 = vsub.f32 %v2679_v55, %v14381_v61  ;;  %v14451_v9 = vand.u32 4294901760, %v2909_v51  ;;  %v2675_v25 = vld [vmem:[%s17490_s5 + $0x88] sm:$0xff] }
 0x114   : > { %18500 = vst [vmem:[#allocation66_spill] sm:$0xff] %v14393_v3  ;;  %18501 = vst [vmem:[#allocation67_spill] sm:$0xff] %v14395_v41  ;;  %2544 = vmatmul.mubr.f32.gmra.mxu1 %v18483_v50  ;;  %10565 = vmatprep.subr.mxu0 %v14137_v45  ;;  %v14448_v50 = vpop.f32.mrf.mxu1  ;;  %v14454_v36 = vand.u32 4294901760, %v14393_v3  ;;  %v14457_v55 = vsub.f32 %v2663_v46, %v14395_v41  ;;  %v14459_v30 = vand.u32 4294901760, %v2661_v56  ;;  %v14474_v46 = vand.u32 4294901760, %v2676_v4 }
 0x115   : > { %18502 = vst [vmem:[#allocation68_spill] sm:$0xff] %v14403_v40  ;;  %18503 = vst [vmem:[#allocation69_spill] sm:$0xff] %v14407_v16  ;;  %2549 = vmatprep.mubr.f32.mxu1 %v18243_v28  ;;  %10608 = vmatpush3.msra.mxu1 %v14330_v57  ;;  %v3035_v51 = vsub.f32 %v14351_v59, %v14407_v16  ;;  %v14469_v57 = vand.u32 4294901760, %v14410_v20  ;;  %v14472_v28 = vsub.f32 %v2678_v32, %v14412_v58 }
 0x116   : > { %18504 = vst [vmem:[#allocation70_spill] sm:$0xff] %v14410_v20  ;;  %18505 = vst [vmem:[#allocation71_spill] sm:$0xff] %v14412_v58  ;;  %10609 = vmatprep.subr.mxu1 %v14345_v27  ;;  %10566 = vmatpush3.msra.mxu0 %v14148_v38  ;;  %v14480_v27 = vand.u32 4294901760, %v3028_v12  ;;  %v14484_v16 = vand.u32 4294901760, %v14424_v53  ;;  %v14487_v59 = vsub.f32 %v2662_v54, %v14426_v2  ;;  %v14489_v32 = vand.u32 4294901760, %v2660_v48  ;;  %v2658_v38 = vld [vmem:[%s17490_s5] sm:$0xff]  ;;  %v14511_v45 = vpop.f32.mrf.mxu1 }
 0x117   : > { %18506 = vst [vmem:[#allocation72_spill] sm:$0xff] %v14418_v63  ;;  %18507 = vst [vmem:[#allocation73_spill] sm:$0xff] %v14424_v53  ;;  %10610 = vmatpush3.msra.mxu1 %v14359_v15  ;;  %10567 = vmatprep.subr.mxu0 %v14159_v14  ;;  %v14498_v12 = vand.u32 4294901760, %v2916_v35  ;;  %v14501_v15 = vand.u32 4294901760, %v14440_v44  ;;  %v14504_v54 = vsub.f32 %v2677_v33, %v14442_v11  ;;  %v14506_v14 = vand.u32 4294901760, %v2675_v25 }
 0x118   : > { %18508 = vst [vmem:[#allocation74_spill] sm:$0xff] %v14426_v2  ;;  %18509 = vst [vmem:[#allocation75_spill] sm:$0xff] %v14434_v24  ;;  %2551 = vmatmul.mubr.f32.gmra.mxu1 %v18386_v7  ;;  %10611 = vmatprep.subr.mxu1 %v14374_v52  ;;  %v2923_v7 = vsub.f32 %v14393_v3, %v14454_v36  ;;  %v14518_v35 = vand.u32 4294901760, %v14457_v55  ;;  %v14521_v33 = vsub.f32 %v2661_v56, %v14459_v30  ;;  %v14537_v23 = vpop.f32.mrf.mxu1 }
 0x119   : > { %18510 = vst [vmem:[#allocation76_spill] sm:$0xff] %v14440_v44  ;;  %18511 = vst [vmem:[#allocation77_spill] sm:$0xff] %v14442_v11  ;;  %10612 = vmatpush3.msra.mxu1 %v14388_v37  ;;  %10568 = vmatpush3.msra.mxu0 %v14172_v21  ;;  %v14523_v52 = vand.u32 4294901760, %v2659_v1  ;;  %v3042_v37 = vsub.f32 %v14410_v20, %v14469_v57  ;;  %v14530_v21 = vand.u32 4294901760, %v14472_v28  ;;  %v14535_v3 = vand.u32 4294901760, %v2674_v47 }
 0x11a   : > { %18512 = vst [vmem:[#allocation78_spill] sm:$0xff] %v14451_v9  ;;  %18513 = vst [vmem:[#allocation79_spill] sm:$0xff] %v14454_v36  ;;  %10613 = vmatprep.subr.mxu1 %v14403_v40  ;;  %10569 = vmatprep.subr.mxu0 %v14191_v5  ;;  %v14533_v36 = vsub.f32 %v2676_v4, %v14474_v46  ;;  %v2930_v56 = vsub.f32 %v14424_v53, %v14484_v16  ;;  %v14544_v40 = vand.u32 4294901760, %v14487_v59  ;;  %v14551_v4 = vpop.f32.mrf.mxu0 }
 0x11b   : > { %18514 = vst [vmem:[#allocation80_spill] sm:$0xff] %v14457_v55  ;;  %18515 = vst [vmem:[#allocation81_spill] sm:$0xff] %v14459_v30  ;;  %10614 = vmatpush3.msra.mxu1 %v14418_v63  ;;  %10570 = vmatpush3.msra.mxu0 %v14204_v43  ;;  %v14549_v20 = vand.u32 4294901760, %v2658_v38  ;;  %v14554_v5 = vand.u32 4294901760, %v3035_v51  ;;  %v3049_v63 = vsub.f32 %v14440_v44, %v14501_v15  ;;  %v14578_v44 = vand.u32 4294901760, %v3042_v37 }
 0x11c   : > { %18516 = vst [vmem:[#allocation82_spill] sm:$0xff] %v14469_v57  ;;  %18517 = vst [vmem:[#allocation83_spill] sm:$0xff] %v14472_v28  ;;  %v14547_v57 = vsub.f32 %v2660_v48, %v14489_v32  ;;  %10615 = vmatprep.subr.mxu1 %v14434_v24  ;;  %10571 = vmatprep.subr.mxu0 %v14214_v31  ;;  %v14563_v53 = vsub.f32 %v2675_v25, %v14506_v14  ;;  %v14566_v48 = vand.u32 4294901760, %v2923_v7 }
 0x11d   : > { %18518 = vst [vmem:[#allocation84_spill] sm:$0xff] %v14474_v46  ;;  %18519 = vst [vmem:[#allocation85_spill] sm:$0xff] %v14480_v27  ;;  %10616 = vmatpush3.msra.mxu1 %v14451_v9  ;;  %10572 = vmatpush3.msra.mxu0 %v14228_v17  ;;  %v2937_v51 = vsub.f32 %v14457_v55, %v14518_v35  ;;  %v14572_v24 = vand.u32 4294901760, %v14521_v33  ;;  %v3056_v25 = vsub.f32 %v14472_v28, %v14530_v21  ;;  %v14603_v28 = vpop.f32.mrf.mxu0 }
 0x11e   : > { %18520 = vst [vmem:[#allocation86_spill] sm:$0xff] %v14484_v16  ;;  %18521 = vst [vmem:[#allocation87_spill] sm:$0xff] %v14487_v59  ;;  %v14560_v16 = vand.u32 4294901760, %v14504_v54  ;;  %10617 = vmatprep.subr.mxu1 %v14480_v27  ;;  %10573 = vmatprep.subr.mxu0 %v14255_v62  ;;  %v14584_v7 = vand.u32 4294901760, %v14533_v36  ;;  %v14587_v9 = vsub.f32 %v2674_v47, %v14535_v3  ;;  %v14598_v27 = vand.u32 4294901760, %v14547_v57 }
 0x11f   : > { %18522 = vst [vmem:[#allocation88_spill] sm:$0xff] %v14489_v32  ;;  %18523 = vst [vmem:[#allocation89_spill] sm:$0xff] %v14498_v12  ;;  %10618 = vmatpush3.msra.mxu1 %v14498_v12  ;;  %10574 = vmatpush3.msra.mxu0 %v14270_v26  ;;  %v2944_v37 = vsub.f32 %v14487_v59, %v14544_v40  ;;  %v14606_v47 = vand.u32 4294901760, %v3049_v63  ;;  %v14612_v12 = vand.u32 4294901760, %v14563_v53 }
 0x120   : > { %18524 = vst [vmem:[#allocation90_spill] sm:$0xff] %v14501_v15  ;;  %18525 = vst [vmem:[#allocation91_spill] sm:$0xff] %v14504_v54  ;;  %v14575_v15 = vsub.f32 %v2659_v1, %v14523_v52  ;;  %v14592_v1 = vand.u32 4294901760, %v2930_v56  ;;  %10619 = vmatprep.subr.mxu1 %v14554_v5  ;;  %10575 = vmatprep.subr.mxu0 %v14293_v49  ;;  %v3063_v56 = vsub.f32 %v14504_v54, %v14560_v16 }
 0x121   : > { %18526 = vst [vmem:[#allocation92_spill] sm:$0xff] %v14506_v14  ;;  %18527 = vst [vmem:[#allocation93_spill] sm:$0xff] %v14518_v35  ;;  %v14589_v35 = vpop.f32.mrf.mxu1  ;;  %10620 = vmatpush3.msra.mxu1 %v14566_v48  ;;  %10576 = vmatpush3.msra.mxu0 %v14337_v39  ;;  %v924_v59 = vadd.f32 %v14511_v45, %v14400_v0 }
 0x122   : > { %18528 = vst [vmem:[#allocation94_spill] sm:$0xff] %v14521_v33  ;;  %18529 = vst [vmem:[#allocation95_spill] sm:$0xff] %v14523_v52  ;;  %v14621_v63 = vand.u32 4294901760, %v14575_v15  ;;  %10621 = vmatprep.subr.mxu1 %v14578_v44  ;;  %10577 = vmatprep.subr.mxu0 %v14353_v34 }
 0x123   : > { %18530 = vst [vmem:[#allocation96_spill] sm:$0xff] %v14530_v21  ;;  %18531 = vst [vmem:[#allocation97_spill] sm:$0xff] %v14533_v36  ;;  %v14601_v21 = vsub.f32 %v2658_v38, %v14549_v20  ;;  %v2951_v38 = vsub.f32 %v14521_v33, %v14572_v24  ;;  %10622 = vmatpush3.msra.mxu1 %v14592_v1  ;;  %10578 = vmatpush3.msra.mxu0 %v14367_v6  ;;  %v14643_v33 = vpop.f32.mrf.mxu0 }
 0x124   : > { %18532 = vst [vmem:[#allocation98_spill] sm:$0xff] %v14535_v3  ;;  %18533 = vst [vmem:[#allocation99_spill] sm:$0xff] %v14544_v40  ;;  %v14615_v40 = vand.u32 4294901760, %v2937_v51  ;;  %v14630_v51 = vand.u32 4294901760, %v14587_v9  ;;  %10623 = vmatprep.subr.mxu1 %v14606_v47  ;;  %10579 = vmatprep.subr.mxu0 %v14381_v61 }
 0x125   : > { %18534 = vst [vmem:[#allocation100_spill] sm:$0xff] %v14547_v57  ;;  %18535 = vst [vmem:[#allocation101_spill] sm:$0xff] %v14549_v20  ;;  %10580 = vmatpush3.msra.mxu0 %v14395_v41 }
 0x126   : > { %18536 = vst [vmem:[#allocation102_spill] sm:$0xff] %v14554_v5  ;;  %18537 = vst [vmem:[#allocation103_spill] sm:$0xff] %v14560_v16  ;;  %v14624_v5 = vand.u32 4294901760, %v3056_v25  ;;  %v3070_v16 = vsub.f32 %v14533_v36, %v14584_v7  ;;  %v2958_v25 = vsub.f32 %v14547_v57, %v14598_v27  ;;  %10624 = vmatpush3.msra.mxu1 %v14615_v40  ;;  %10581 = vmatprep.subr.mxu0 %v14412_v58  ;;  %v2597_v36 = vld [vmem:[%s17489_s4] sm:$0x7] }
 0x127   : > { %18538 = vst [vmem:[#allocation104_spill] sm:$0xff] %v14563_v53  ;;  %18539 = vst [vmem:[#allocation105_spill] sm:$0xff] %v14566_v48  ;;  %v14632_v48 = vpop.f32.mrf.mxu1  ;;  %10582 = vmatpush3.msra.mxu0 %v14426_v2 }
 0x128   : > { %18540 = vst [vmem:[#allocation106_spill] sm:$0xff] %v14572_v24  ;;  %18541 = vst [vmem:[#allocation107_spill] sm:$0xff] %v14575_v15  ;;  %v14635_v24 = vand.u32 4294901760, %v2944_v37  ;;  %v3077_v37 = vsub.f32 %v14563_v53, %v14612_v12  ;;  %10625 = vmatprep.subr.mxu1 %v14624_v5  ;;  %v14658_v57 = vand.u32 4294901760, %v3070_v16  ;;  %10583 = vmatprep.subr.mxu0 %v14442_v11 }
 0x129   : > { %18542 = vst [vmem:[#allocation108_spill] sm:$0xff] %v14578_v44  ;;  %18543 = vst [vmem:[#allocation109_spill] sm:$0xff] %v14584_v7  ;;  %v14641_v44 = vand.u32 4294901760, %v14601_v21  ;;  %v14646_v7 = vand.u32 4294901760, %v3063_v56  ;;  %v3084_v56 = vsub.f32 %v14587_v9, %v14630_v51  ;;  %10584 = vmatpush3.msra.mxu0 %v14459_v30 }
 0x12a   : > { %18544 = vst [vmem:[#allocation110_spill] sm:$0xff] %v14587_v9  ;;  %18545 = vst [vmem:[#allocation111_spill] sm:$0xff] %v14592_v1  ;;  %v14652_v1 = vand.u32 4294901760, %v2951_v38  ;;  %10626 = vmatpush3.msra.mxu1 %v14635_v24  ;;  %v14666_v38 = vand.u32 4294901760, %v2958_v25  ;;  %v14674_v16 = vand.u32 4294901760, %v3077_v37  ;;  %10585 = vmatprep.subr.mxu0 %v14474_v46 }
 0x12b   : > { %18546 = vst [vmem:[#allocation112_spill] sm:$0xff] %v14598_v27  ;;  %18547 = vst [vmem:[#allocation113_spill] sm:$0xff] %v14601_v21  ;;  %v2965_v27 = vsub.f32 %v14575_v15, %v14621_v63  ;;  %10627 = vmatprep.subr.mxu1 %v14646_v7  ;;  %v14682_v25 = vand.u32 4294901760, %v3084_v56  ;;  %10586 = vmatpush3.msra.mxu0 %v14489_v32 }
 0x12c   : > { %18548 = vst [vmem:[#allocation114_spill] sm:$0xff] %v14606_v47  ;;  %18549 = vst [vmem:[#allocation115_spill] sm:$0xff] %v14612_v12  ;;  %v14663_v47 = vpop.f32.mrf.mxu1  ;;  %10628 = vmatpush3.msra.mxu1 %v14652_v1  ;;  %10587 = vmatprep.subr.mxu0 %v14506_v14 }
 0x12d   : > { %18550 = vst [vmem:[#allocation116_spill] sm:$0xff] %v14615_v40  ;;  %18551 = vst [vmem:[#allocation117_spill] sm:$0xff] %v14621_v63  ;;  %v2972_v40 = vsub.f32 %v14601_v21, %v14641_v44  ;;  %v14671_v63 = vpop.f32.mrf.mxu0  ;;  %10629 = vmatprep.subr.mxu1 %v14658_v57  ;;  %10588 = vmatpush3.msra.mxu0 %v14523_v52 }
 0x12e   : > { %18552 = vst [vmem:[#allocation118_spill] sm:$0xff] %v14624_v5  ;;  %18553 = vst [vmem:[#allocation119_spill] sm:$0xff] %v14630_v51  ;;  %v14678_v5 = vand.u32 4294901760, %v2965_v27  ;;  %10630 = vmatpush3.msra.mxu1 %v14666_v38  ;;  %10589 = vmatprep.subr.mxu0 %v14535_v3 }
 0x12f   : > { %18554 = vst [vmem:[#allocation120_spill] sm:$0xff] %v14635_v24  ;;  %18555 = vst [vmem:[#allocation121_spill] sm:$0xff] %v14641_v44  ;;  %v14685_v24 = vpop.f32.mrf.mxu1  ;;  %v14688_v37 = vand.u32 4294901760, %v2972_v40  ;;  %10631 = vmatprep.subr.mxu1 %v14674_v16  ;;  %10590 = vmatpush3.msra.mxu0 %v14549_v20 }
 0x130   : > { %18556 = vst [vmem:[#allocation122_spill] sm:$0xff] %v14646_v7  ;;  %18557 = vst [vmem:[#allocation123_spill] sm:$0xff] %v14652_v1  ;;  %v1079_v7 = vpop.f32.mrf.mxu0  ;;  %10632 = vmatpush3.msra.mxu1 %v14678_v5  ;;  %10647 = vmatprep.subr.mxu0 %v14093_v29 }
 0x131   : > { %18558 = vst [vmem:[#allocation124_spill] sm:$0xff] %v14658_v57  ;;  %18559 = vst [vmem:[#allocation125_spill] sm:$0xff] %v14666_v38  ;;  %10633 = vmatprep.subr.mxu1 %v14682_v25  ;;  %v14697_v27 = vpop.f32.mrf.mxu1 }
 0x132   : > { %18560 = vst [vmem:[#allocation126_spill] sm:$0xff] %v14674_v16  ;;  %18561 = vst [vmem:[#allocation127_spill] sm:$0xff] %v14678_v5  ;;  %10634 = vmatpush3.msra.mxu1 %v14688_v37  ;;  %v1081_v40 = vpop.f32.mrf.mxu0 }
 0x133   : > { %18562 = vst [vmem:[#allocation128_spill] sm:$0xff] %v14682_v25  ;;  %18563 = vst [vmem:[#allocation129_spill] sm:$0xff] %v14688_v37  ;;  %10691 = vmatprep.subr.mxu1 %v14064_v10  ;;  %v1209_v56 = vpop.f32.mrf.mxu1  ;;  %v2619_v37 = vlaneseq  ;;  %v922_v10 = vadd.f32 %v14448_v50, %v14342_v18  ;;  %v1082_v55 = vadd.f32 %v1081_v40, %v924_v59 }
 0x134   : > { %v14703_v16 = vpop.f32.mrf.mxu0 }
 0x135   : > { %v1211_v5 = vpop.f32.mrf.mxu1  ;;  %v2620_v12 = vshrl.u32 %v2619_v37, 7  ;;  %v1080_v3 = vadd.f32 %v1079_v7, %v922_v10 }
 0x136   : > { %v14705_v38 = vpop.f32.mrf.mxu0  ;;  %v1212_v11 = vadd.f32 %v1211_v5, %v1082_v55 }
 0x137   : > { %v14707_v25 = vpop.f32.mrf.mxu1  ;;  %v14721_v9 = vsub.s32 2, %v2620_v12  ;;  %v14734_v37 = vsub.s32 0, %v2620_v12  ;;  %v1210_v14 = vadd.f32 %v1209_v56, %v1080_v3  ;;  %v14746_v18 = vsub.s32 1, %v2620_v12 }
 0x138   : > { %v14709_v57 = vpop.f32.mrf.mxu0 }
 0x139   : > { %v14711_v1 = vpop.f32.mrf.mxu1  ;;  %18564 = vst [vmem:[#allocation130_spill] sm:$0xff] %v14721_v9  ;;  %18566 = vst [vmem:[#allocation132_spill] sm:$0xff] %v14734_v37  ;;  %v14739_v52 = vrot.slane %v2597_v36, %v14721_v9  ;;  %v14744_v46 = vrot.slane %v2597_v36, %v14734_v37  ;;  %v14752_v0 = vrot.slane %v2597_v36, %v14746_v18 }
 0x13a   : > { %v14713_v44 = vpop.f32.mrf.mxu0  ;;  %18567 = vst [vmem:[#allocation133_spill] sm:$0xff] %v14746_v18 }
 0x13b   : > { %v14715_v51 = vpop.f32.mrf.mxu1 }
 0x13c   : > { %v14717_v21 = vpop.f32.mrf.mxu0 }
 0x13d   : > { %v14719_v29 = vpop.f32.mrf.mxu1 }
 0x13e   : > { %v14723_v15 = vpop.f32.mrf.mxu0 }
 0x13f   : > { %v14732_v54 = vpop.f32.mrf.mxu1 }
 0x141   : > { %v14741_v32 = vpop.f32.mrf.mxu1 }
 0x145   : > { %v1404_v20 = vpop.f32.mrf.mxu0 }
 0x146   : > { %v1405_v45 = vadd.f32 %v1404_v20, %v1210_v14 }
 0x147   : > { %v14725_v53 = vpop.permute.xlu0 %2567  ;;  %v1406_v30 = vpop.f32.mrf.mxu0 }
 0x148   : > { %18565 = vst [vmem:[#allocation131_spill] sm:$0xff] %v14725_v53  ;;  %v1407_v3 = vadd.f32 %v1406_v30, %v1212_v11 }
 0x14b   : > { %v1411_v36 = vpop.f32.mrf.mxu0 }
 0x14e   : > { %v2601_v50 = vpop.permute.xlu0 %2600 }
 0x14f   : > { %v14749_v2 = vmul.f32 %v14739_v52, %v2601_v50  ;;  %v2634_v59 = vmul.f32 %v14744_v46, %v2601_v50  ;;  %v2635_v9 = vmul.f32 %v14752_v0, %v2601_v50 }
 0x150   : > { %v1529_v10 = vpop.f32.mrf.mxu1 }
 0x151   : > { %18568 = vst [vmem:[#allocation134_spill] sm:$0xff] %v14749_v2  ;;  %v1530_v7 = vadd.f32 %v1529_v10, %v1405_v45 }
 0x152   : > { %v1531_v40 = vpop.f32.mrf.mxu1 }
 0x153   : > { %v2585_v56 = vmul.f32 %v14725_v53, %v1530_v7  ;;  %v1532_v12 = vadd.f32 %v1531_v40, %v1407_v3  ;;  %v929_v40 = vadd.f32 %v14537_v23, %v14432_v42  ;;  %v18574_v42 = vld [vmem:[#allocation4_spill] sm:$0xff] }
 0x155   : > { %v14757_v37 = vadd.f32 %v2634_v59, %v2585_v56  ;;  %v2586_v5 = vmul.f32 %v14725_v53, %v1532_v12  ;;  %v931_v56 = vadd.f32 %v14589_v35, %v14495_v19  ;;  %v18573_v53 = vld [vmem:[#allocation17_spill] sm:$0xff]  ;;  %v936_v35 = vadd.f32 %v14632_v48, %v14551_v4  ;;  %v18579_v48 = vld [vmem:[#allocation14_spill] sm:$0xff] }
 0x156   : > { %v1536_v50 = vpop.f32.mrf.mxu1 }
 0x157   : > { %18569 = vst [vmem:[#allocation135_spill] sm:$0xff] %v14757_v37  ;;  %v14761_v14 = vand.u32 4294901760, %v14757_v37  ;;  %v14763_v20 = vadd.f32 %v2635_v9, %v2586_v5  ;;  %v1413_v9 = vpop.f32.mrf.mxu0  ;;  %v18571_v5 = vld [vmem:[#allocation15_spill] sm:$0xff] }
 0x158   : > { %v1538_v3 = vpop.f32.mrf.mxu1 }
 0x159   : > { %18570 = vst [vmem:[#allocation136_spill] sm:$0xff] %v14763_v20  ;;  %v14767_v11 = vsub.f32 %v14757_v37, %v14761_v14  ;;  %v14770_v30 = vand.u32 4294901760, %v14763_v20  ;;  %v1418_v12 = vpop.f32.mrf.mxu0  ;;  %v18572_v37 = vld [vmem:[#allocation37_spill] sm:$0xff] }
 0x15b   : > { %v17840_v55 = vand.u32 4294901760, %v14767_v11  ;;  %3088 = vmatprep.mubr.f32.mxu1 %v14770_v30  ;;  %v14776_v45 = vsub.f32 %v14763_v20, %v14770_v30  ;;  %v1090_v20 = vadd.f32 %v14705_v38, %v931_v56  ;;  %v938_v38 = vadd.f32 %v14663_v47, %v14603_v28  ;;  %v18577_v56 = vld [vmem:[#allocation13_spill] sm:$0xff] }
 0x15c   : > { %3090 = vmatmul.mubr.f32.vlgmr.msra.gmra.mxu1 %v14761_v14  ;;  %v943_v28 = vadd.f32 %v14685_v24, %v14643_v33  ;;  %v18582_v33 = vld [vmem:[#allocation6_spill] sm:$0xff] }
 0x15d   : > { %10692 = vmatpush3.msra.mxu1 %v14084_v22  ;;  %v17843_v10 = vand.u32 4294901760, %v14776_v45  ;;  %v2811_v59 = vsub.f32 %v14767_v11, %v17840_v55  ;;  %v1088_v55 = vadd.f32 %v14703_v16, %v929_v40  ;;  %v1221_v19 = vadd.f32 %v14711_v1, %v1090_v20  ;;  %v1420_v16 = vpop.f32.mrf.mxu0 }
 0x15e   : > { %10693 = vmatprep.subr.mxu1 %v14095_v60  ;;  %v1096_v1 = vadd.f32 %v14709_v57, %v936_v35  ;;  %v945_v57 = vadd.f32 %v14697_v27, %v14671_v63  ;;  %v1104_v24 = vadd.f32 %v14717_v21, %v943_v28  ;;  %v18583_v27 = vld [vmem:[#allocation30_spill] sm:$0xff]  ;;  %v18584_v21 = vld [vmem:[#allocation36_spill] sm:$0xff] }
 0x15f   : > { %10694 = vmatpush3.msra.mxu1 %v14103_v13  ;;  %v2805_v7 = vsub.f32 %v14776_v45, %v17843_v10  ;;  %v2812_v2 = vand.u32 4294901760, %v2811_v59  ;;  %v1543_v10 = vpop.f32.mrf.mxu1  ;;  %v1219_v23 = vadd.f32 %v14707_v25, %v1088_v55  ;;  %v18576_v59 = vld [vmem:[#allocation22_spill] sm:$0xff]  ;;  %v18578_v25 = vld [vmem:[#allocation25_spill] sm:$0xff]  ;;  %v18580_v55 = vld [vmem:[#allocation20_spill] sm:$0xff] }
 0x160   : > { %10695 = vmatprep.subr.mxu1 %v14109_v8 }
 0x161   : > { %10696 = vmatpush3.msra.mxu1 %v18571_v5  ;;  %v2806_v18 = vand.u32 4294901760, %v2805_v7  ;;  %v18575_v7 = vld [vmem:[#allocation11_spill] sm:$0xff]  ;;  %v1412_v40 = vadd.f32 %v1411_v36, %v1219_v23  ;;  %v1545_v4 = vpop.f32.mrf.mxu1  ;;  %v1425_v23 = vpop.f32.mrf.mxu0 }
 0x162   : > { %10697 = vmatprep.subr.mxu1 %v18572_v37 }
 0x163   : > { %10698 = vmatpush3.msra.mxu1 %v18573_v53  ;;  %2807 = vmatprep.mubr.f32.mxu0 %v2806_v18  ;;  %v1414_v18 = vadd.f32 %v1413_v9, %v1221_v19  ;;  %v1537_v47 = vadd.f32 %v1536_v50, %v1412_v40  ;;  %v18581_v19 = vld [vmem:[#allocation21_spill] sm:$0xff]  ;;  %v1106_v50 = vadd.f32 %v14723_v15, %v945_v57  ;;  %v1550_v63 = vpop.f32.mrf.mxu1 }
 0x164   : > { %10699 = vmatprep.subr.mxu1 %v18574_v42  ;;  %2813 = vmatmul.mubr.f32.vlgmr.msra.gmra.mxu0 %v2812_v2  ;;  %v1098_v2 = vadd.f32 %v14713_v44, %v938_v38  ;;  %v1228_v44 = vadd.f32 %v14715_v51, %v1096_v1  ;;  %v18585_v1 = vld [vmem:[#allocation38_spill] sm:$0xff] }
 0x165   : > { %10648 = vmatpush3.msra.mxu0 %v18575_v7  ;;  %10700 = vmatpush3.msra.mxu1 %v18576_v59  ;;  %v1539_v36 = vadd.f32 %v1538_v3, %v1414_v18  ;;  %v1239_v40 = vadd.f32 %v14741_v32, %v1106_v50  ;;  %v18618_v7 = vld [vmem:[#allocation98_spill] sm:$0xff] }
 0x166   : > { %10649 = vmatprep.subr.mxu0 %v18577_v56  ;;  %10701 = vmatprep.subr.mxu1 %v18578_v25  ;;  %v1230_v9 = vadd.f32 %v14719_v29, %v1098_v2  ;;  %v1419_v3 = vadd.f32 %v1418_v12, %v1228_v44  ;;  %v1237_v29 = vadd.f32 %v14732_v54, %v1104_v24  ;;  %v1427_v12 = vpop.f32.mrf.mxu0  ;;  %v14840_v2 = vpop.permute.xlu0 %2577  ;;  %v18592_v24 = vld [vmem:[#allocation29_spill] sm:$0xff]  ;;  %v18617_v56 = vld [vmem:[#allocation83_spill] sm:$0xff] }
 0x167   : > { %v14812_v20 = vpop.permute.xlu1 %2572  ;;  %10650 = vmatpush3.msra.mxu0 %v18579_v48  ;;  %10702 = vmatpush3.msra.mxu1 %v14204_v43  ;;  %18586 = vst [vmem:[#allocation137_spill] sm:$0xff] %v14840_v2  ;;  %v1428_v44 = vadd.f32 %v1427_v12, %v1239_v40  ;;  %v18594_v40 = vld [vmem:[#allocation50_spill] sm:$0xff]  ;;  %v18595_v12 = vld [vmem:[#allocation52_spill] sm:$0xff]  ;;  %v18616_v48 = vld [vmem:[#allocation95_spill] sm:$0xff] }
 0x168   : > { %10651 = vmatprep.subr.mxu0 %v18580_v55  ;;  %10703 = vmatprep.subr.mxu1 %v14214_v31  ;;  %v1421_v35 = vadd.f32 %v1420_v16, %v1230_v9  ;;  %v2588_v51 = vmul.f32 %v14812_v20, %v1537_v47  ;;  %v2589_v38 = vmul.f32 %v14812_v20, %v1539_v36  ;;  %v18588_v36 = vld [vmem:[#allocation3_spill] sm:$0xff] }
 0x169   : > { %10652 = vmatpush3.msra.mxu0 %v18581_v19  ;;  %10704 = vmatpush3.msra.mxu1 %v14228_v17  ;;  %v1544_v16 = vadd.f32 %v1543_v10, %v1419_v3  ;;  %v1426_v32 = vadd.f32 %v1425_v23, %v1237_v29  ;;  %v1552_v10 = vpop.f32.mrf.mxu1  ;;  %v18614_v19 = vld [vmem:[#allocation92_spill] sm:$0xff] }
 0x16a   : > { %10653 = vmatprep.subr.mxu0 %v18582_v33  ;;  %10705 = vmatprep.subr.mxu1 %v14255_v62  ;;  %v1546_v18 = vadd.f32 %v1545_v4, %v1421_v35  ;;  %v18589_v4 = vld [vmem:[#allocation27_spill] sm:$0xff]  ;;  %v18593_v35 = vld [vmem:[#allocation44_spill] sm:$0xff]  ;;  %v1553_v29 = vadd.f32 %v1552_v10, %v1428_v44 }
 0x16b   : > { %10654 = vmatpush3.msra.mxu0 %v18583_v27  ;;  %10706 = vmatpush3.msra.mxu1 %v14270_v26  ;;  %v2591_v50 = vmul.f32 %v14840_v2, %v1544_v16  ;;  %v1551_v3 = vadd.f32 %v1550_v63, %v1426_v32  ;;  %v18596_v63 = vld [vmem:[#allocation74_spill] sm:$0xff]  ;;  %v14871_v16 = vpop.permute.xlu0 %2582 }
 0x16c   : > { %10655 = vmatprep.subr.mxu0 %v18584_v21  ;;  %10707 = vmatprep.subr.mxu1 %v14293_v49  ;;  %v2592_v23 = vmul.f32 %v14840_v2, %v1546_v18  ;;  %18597 = vst [vmem:[#allocation141_spill] sm:$0xff] %v14871_v16  ;;  %v18604_v21 = vld [vmem:[#allocation81_spill] sm:$0xff]  ;;  %v18605_v27 = vld [vmem:[#allocation70_spill] sm:$0xff] }
 0x16d   : > { %v2606_v15 = vpop.permute.xlu1 %2605  ;;  %10656 = vmatpush3.msra.mxu0 %v18585_v1  ;;  %10708 = vmatpush3.msra.mxu1 %v14337_v39  ;;  %v2594_v10 = vmul.f32 %v14871_v16, %v1551_v3  ;;  %v18624_v2 = vld [vmem:[#allocation94_spill] sm:$0xff] }
 0x16e   : > { %v2637_v54 = vmul.f32 %v14744_v46, %v2606_v15  ;;  %v2638_v28 = vmul.f32 %v14752_v0, %v2606_v15  ;;  %v14845_v47 = vmul.f32 %v14739_v52, %v2606_v15  ;;  %10657 = vmatprep.subr.mxu0 %v18588_v36  ;;  %10709 = vmatprep.subr.mxu1 %v14353_v34  ;;  %v18603_v36 = vld [vmem:[#allocation66_spill] sm:$0xff] }
 0x16f   : > { %10658 = vmatpush3.msra.mxu0 %v18589_v4  ;;  %10710 = vmatpush3.msra.mxu1 %v14367_v6  ;;  %v18602_v4 = vld [vmem:[#allocation77_spill] sm:$0xff] }
 0x170   : > { %18587 = vst [vmem:[#allocation138_spill] sm:$0xff] %v14845_v47  ;;  %v14851_v57 = vadd.f32 %v2637_v54, %v2588_v51  ;;  %v14853_v9 = vadd.f32 %v2638_v28, %v2589_v38  ;;  %10659 = vmatprep.subr.mxu0 %v18592_v24  ;;  %10711 = vmatprep.subr.mxu1 %v14381_v61  ;;  %v18626_v47 = vld [vmem:[#allocation97_spill] sm:$0xff] }
 0x171   : > { %10660 = vmatpush3.msra.mxu0 %v18593_v35  ;;  %10712 = vmatpush3.msra.mxu1 %v14395_v41  ;;  %v2595_v35 = vmul.f32 %v14871_v16, %v1553_v29  ;;  %v18622_v16 = vld [vmem:[#allocation91_spill] sm:$0xff] }
 0x172   : > { %18590 = vst [vmem:[#allocation139_spill] sm:$0xff] %v14851_v57  ;;  %18591 = vst [vmem:[#allocation140_spill] sm:$0xff] %v14853_v9  ;;  %v14862_v51 = vand.u32 4294901760, %v14853_v9  ;;  %v14865_v38 = vand.u32 4294901760, %v14851_v57  ;;  %10661 = vmatprep.subr.mxu0 %v18594_v40  ;;  %10713 = vmatprep.subr.mxu1 %v14412_v58 }
 0x173   : > { %v2611_v15 = vpop.permute.xlu1 %2610  ;;  %10662 = vmatpush3.msra.mxu0 %v18595_v12  ;;  %10714 = vmatpush3.msra.mxu1 %v18596_v63  ;;  %v18599_v12 = vld [vmem:[#allocation57_spill] sm:$0xff] }
 0x174   : > { %v2640_v18 = vmul.f32 %v14744_v46, %v2611_v15  ;;  %v2641_v54 = vmul.f32 %v14752_v0, %v2611_v15  ;;  %v14876_v28 = vmul.f32 %v14739_v52, %v2611_v15  ;;  %3095 = vmatprep.mubr.f32.mxu1 %v14862_v51  ;;  %v14881_v32 = vsub.f32 %v14853_v9, %v14862_v51 }
 0x175   : > { %3097 = vmatmul.mubr.f32.gmra.mxu1 %v14865_v38  ;;  %v14887_v44 = vsub.f32 %v14851_v57, %v14865_v38  ;;  %10663 = vmatprep.subr.mxu0 %v18599_v12 }
 0x176   : > { %18598 = vst [vmem:[#allocation142_spill] sm:$0xff] %v14876_v28  ;;  %v14890_v40 = vadd.f32 %v2640_v18, %v2591_v50  ;;  %v14892_v15 = vadd.f32 %v2641_v54, %v2592_v23  ;;  %v2819_v24 = vand.u32 4294901760, %v14881_v32  ;;  %10715 = vmatprep.subr.mxu1 %v18602_v4  ;;  %10664 = vmatpush3.msra.mxu0 %v18603_v36  ;;  %v18607_v54 = vld [vmem:[#allocation84_spill] sm:$0xff]  ;;  %v18608_v36 = vld [vmem:[#allocation73_spill] sm:$0xff] }
 0x177   : > { %v2616_v3 = vpop.permute.xlu1 %2615  ;;  %10716 = vmatpush3.msra.mxu1 %v18604_v21  ;;  %10665 = vmatprep.subr.mxu0 %v18605_v27  ;;  %v18609_v27 = vand.u32 4294901760, %v14887_v44 }
 0x178   : > { %18600 = vst [vmem:[#allocation143_spill] sm:$0xff] %v14890_v40  ;;  %18601 = vst [vmem:[#allocation144_spill] sm:$0xff] %v14892_v15  ;;  %v2643_v50 = vmul.f32 %v14744_v46, %v2616_v3  ;;  %v2644_v23 = vmul.f32 %v14752_v0, %v2616_v3  ;;  %v14904_v18 = vmul.f32 %v14739_v52, %v2616_v3  ;;  %v14907_v29 = vand.u32 4294901760, %v14892_v15  ;;  %v18610_v0 = vld [vmem:[#allocation88_spill] sm:$0xff] }
 0x179   : > { %10717 = vmatprep.subr.mxu1 %v18607_v54  ;;  %10666 = vmatpush3.msra.mxu0 %v18608_v36  ;;  %v14912_v1 = vand.u32 4294901760, %v14890_v40  ;;  %v2820_v12 = vsub.f32 %v14881_v32, %v2819_v24  ;;  %v2826_v46 = vsub.f32 %v14887_v44, %v18609_v27  ;;  %v18611_v52 = vld [vmem:[#allocation76_spill] sm:$0xff] }
 0x17a   : > { %18606 = vst [vmem:[#allocation145_spill] sm:$0xff] %v14904_v18  ;;  %10718 = vmatpush3.msra.mxu1 %v18610_v0  ;;  %10667 = vmatprep.subr.mxu0 %v18611_v52  ;;  %v14920_v3 = vadd.f32 %v2643_v50, %v2594_v10  ;;  %v14922_v33 = vadd.f32 %v2644_v23, %v2595_v35  ;;  %v18615_v52 = vld [vmem:[#allocation80_spill] sm:$0xff] }
 0x17b   : > { %3102 = vmatprep.mubr.f32.mxu1 %v14907_v29  ;;  %v14927_v36 = vsub.f32 %v14892_v15, %v14907_v29  ;;  %10719 = vmatprep.subr.mxu1 %v18614_v19  ;;  %v2821_v55 = vand.u32 4294901760, %v2820_v12  ;;  %v14933_v27 = vsub.f32 %v14890_v40, %v14912_v1  ;;  %v2827_v10 = vand.u32 4294901760, %v2826_v46 }
 0x17c   : > { %18612 = vst [vmem:[#allocation146_spill] sm:$0xff] %v14920_v3  ;;  %18613 = vst [vmem:[#allocation147_spill] sm:$0xff] %v14922_v33  ;;  %3104 = vmatmul.mubr.f32.gmra.mxu1 %v14912_v1  ;;  %10668 = vmatpush3.msra.mxu0 %v18615_v52  ;;  %v14937_v35 = vand.u32 4294901760, %v14922_v33  ;;  %v14940_v50 = vand.u32 4294901760, %v14920_v3  ;;  %v18620_v40 = vand.u32 4294901760, %v14776_v45 }
 0x17d   : > { %v2834_v23 = vand.u32 4294901760, %v14927_v36  ;;  %10720 = vmatpush3.msra.mxu1 %v18616_v48  ;;  %10669 = vmatprep.subr.mxu0 %v18617_v56  ;;  %v2840_v12 = vand.u32 4294901760, %v14933_v27  ;;  %v18619_v56 = vld [vmem:[#allocation87_spill] sm:$0xff] }
 0x17e   : > { %2822 = vmatprep.mubr.f32.mxu0 %v2821_v55  ;;  %10721 = vmatprep.subr.mxu1 %v18618_v7  ;;  %v14951_v46 = vsub.f32 %v14922_v33, %v14937_v35  ;;  %v14955_v15 = vsub.f32 %v14920_v3, %v14940_v50  ;;  %v18621_v33 = vld [vmem:[#allocation101_spill] sm:$0xff]  ;;  %v18623_v3 = vld [vmem:[#allocation28_spill] sm:$0xff] }
 0x17f   : > { %3109 = vmatprep.mubr.f32.mxu1 %v14937_v35  ;;  %2828 = vmatmul.mubr.f32.gmra.mxu0 %v2827_v10  ;;  %v2835_v52 = vsub.f32 %v14927_v36, %v2834_v23  ;;  %v2841_v55 = vsub.f32 %v14933_v27, %v2840_v12 }
 0x180   : > { %3111 = vmatmul.mubr.f32.gmra.mxu1 %v14940_v50  ;;  %10670 = vmatpush3.msra.mxu0 %v18619_v56  ;;  %v2849_v9 = vand.u32 4294901760, %v14951_v46  ;;  %v2855_v57 = vand.u32 4294901760, %v14955_v15 }
 0x181   : > { %3380 = vmatprep.mubr.f32.mxu1 %v18620_v40  ;;  %v2836_v10 = vand.u32 4294901760, %v2835_v52  ;;  %10722 = vmatpush3.msra.mxu1 %v18621_v33  ;;  %v2842_v18 = vand.u32 4294901760, %v2841_v55  ;;  %v18625_v40 = vand.u32 4294901760, %v14767_v11 }
 0x182   : > { %10671 = vmatprep.subr.mxu0 %v18622_v16  ;;  %10779 = vmatprep.subr.mxu1 %v18623_v3  ;;  %v2850_v28 = vsub.f32 %v14951_v46, %v2849_v9  ;;  %v2856_v56 = vsub.f32 %v14955_v15, %v2855_v57 }
 0x183   : > { %2837 = vmatprep.mubr.f32.mxu0 %v2836_v10  ;;  %10672 = vmatpush3.msra.mxu0 %v18624_v2  ;;  %v18627_v10 = vld [vmem:[#allocation100_spill] sm:$0xff]  ;;  %v14977_v2 = vpop.f32.mrf.mxu0 }
 0x184   : > { %2843 = vmatmul.mubr.f32.gmra.mxu0 %v2842_v18  ;;  %3384 = vmatmul.mubr.f32.vlgmr.msra.gmra.mxu1 %v18625_v40  ;;  %v2851_v52 = vand.u32 4294901760, %v2850_v28  ;;  %v2857_v55 = vand.u32 4294901760, %v2856_v56  ;;  %v18628_v18 = vld [vmem:[#allocation104_spill] sm:$0xff]  ;;  %v18630_v56 = vld [vmem:[#allocation107_spill] sm:$0xff]  ;;  %v18631_v28 = vld [vmem:[#allocation110_spill] sm:$0xff] }
 0x185   : > { %3391 = vmatprep.mubr.f32.mxu1 %v2819_v24  ;;  %10780 = vmatpush3.msra.mxu1 %v14084_v22  ;;  %v18629_v24 = vand.u32 4294901760, %v14887_v44  ;;  %v14987_v40 = vpop.f32.mrf.mxu0 }
 0x186   : > { %10673 = vmatprep.subr.mxu0 %v18626_v47  ;;  %10781 = vmatprep.subr.mxu1 %v14095_v60  ;;  %18632 = vst [vmem:[#allocation148_spill] sm:$0xff] %v14987_v40  ;;  %v15001_v40 = vpop.f32.mrf.mxu1  ;;  %v2700_v47 = vld [vmem:[%s17490_s5 + $0x150] sm:$0xff] }
 0x187   : > { %2852 = vmatprep.mubr.f32.mxu0 %v2851_v52  ;;  %10674 = vmatpush3.msra.mxu0 %v18627_v10  ;;  %v18633_v52 = vld [vmem:[#allocation113_spill] sm:$0xff] }
 0x188   : > { %2858 = vmatmul.mubr.f32.gmra.mxu0 %v2857_v55  ;;  %10782 = vmatpush3.msra.mxu1 %v14103_v13  ;;  %v18634_v55 = vld [vmem:[#allocation12_spill] sm:$0xff]  ;;  %v18663_v10 = vld [vmem:[#allocation69_spill] sm:$0xff] }
 0x189   : > { %3246 = vmatprep.mubr.f32.mxu0 %v14776_v45  ;;  %10675 = vmatprep.subr.mxu0 %v18628_v18  ;;  %v14993_v45 = vpop.f32.mrf.mxu0 }
 0x18a   : > { %3395 = vmatmul.mubr.f32.gmra.mxu1 %v18629_v24  ;;  %10783 = vmatprep.subr.mxu1 %v14109_v8  ;;  %v18636_v24 = vld [vmem:[#allocation5_spill] sm:$0xff] }
 0x18b   : > { %10676 = vmatpush3.msra.mxu0 %v18630_v56  ;;  %3402 = vmatprep.mubr.f32.mxu1 %v2834_v23  ;;  %v18635_v23 = vld [vmem:[#allocation18_spill] sm:$0xff] }
 0x18c   : > { %10784 = vmatpush3.msra.mxu1 %v18571_v5  ;;  %10677 = vmatprep.subr.mxu0 %v18631_v28  ;;  %v18656_v28 = vld [vmem:[#allocation54_spill] sm:$0xff] }
 0x18d   : > { %10785 = vmatprep.subr.mxu1 %v18572_v37  ;;  %10678 = vmatpush3.msra.mxu0 %v18633_v52  ;;  %v15003_v52 = vpop.f32.mrf.mxu0  ;;  %v18707_v37 = vld [vmem:[#allocation121_spill] sm:$0xff] }
 0x18e   : > { %10786 = vmatpush3.msra.mxu1 %v18573_v53  ;;  %3249 = vmatmul.mubr.f32.vlgmr.msra.gmra.mxu0 %v14767_v11  ;;  %18637 = vst [vmem:[#allocation149_spill] sm:$0xff] %v15003_v52  ;;  %v18638_v11 = vld [vmem:[#allocation34_spill] sm:$0xff]  ;;  %v18641_v52 = vld [vmem:[#allocation35_spill] sm:$0xff] }
 0x18f   : > { %3406 = vmatmul.mubr.f32.gmra.mxu1 %v2840_v12  ;;  %10735 = vmatprep.subr.mxu0 %v18634_v55  ;;  %v15014_v12 = vpop.f32.mrf.mxu0  ;;  %v18705_v53 = vld [vmem:[#allocation119_spill] sm:$0xff] }
 0x190   : > { %10787 = vmatprep.subr.mxu1 %v18574_v42  ;;  %3255 = vmatprep.mubr.f32.mxu0 %v14881_v32  ;;  %v15012_v32 = vpop.f32.mrf.mxu1 }
 0x191   : > { %3413 = vmatprep.mubr.f32.mxu1 %v2849_v9  ;;  %10736 = vmatpush3.msra.mxu0 %v18635_v23  ;;  %v18639_v9 = vld [vmem:[#allocation33_spill] sm:$0xff]  ;;  %18640 = vst [vmem:[#allocation150_spill] sm:$0xff] %v15012_v32  ;;  %v2704_v32 = vld [vmem:[%s17490_s5 + $0x170] sm:$0xff]  ;;  %v2703_v23 = vld [vmem:[%s17490_s5 + $0x168] sm:$0xff] }
 0x192   : > { %10788 = vmatpush3.msra.mxu1 %v18576_v59  ;;  %10737 = vmatprep.subr.mxu0 %v18636_v24  ;;  %v18646_v24 = vld [vmem:[#allocation24_spill] sm:$0xff] }
 0x193   : > { %10789 = vmatprep.subr.mxu1 %v18578_v25  ;;  %10738 = vmatpush3.msra.mxu0 %v18638_v11  ;;  %v2705_v11 = vld [vmem:[%s17490_s5 + $0x178] sm:$0xff] }
 0x194   : > { %10790 = vmatpush3.msra.mxu1 %v14204_v43  ;;  %3258 = vmatmul.mubr.f32.gmra.mxu0 %v14887_v44  ;;  %v15023_v44 = vpop.f32.mrf.mxu1  ;;  %v18696_v43 = vld [vmem:[#allocation115_spill] sm:$0xff] }
 0x195   : > { %3417 = vmatmul.mubr.f32.gmra.mxu1 %v2855_v57  ;;  %10739 = vmatprep.subr.mxu0 %v18639_v9  ;;  %v18642_v57 = vld [vmem:[#allocation39_spill] sm:$0xff]  ;;  %v15034_v9 = vpop.f32.mrf.mxu0 }
 0x196   : > { %10791 = vmatprep.subr.mxu1 %v14214_v31  ;;  %3264 = vmatprep.mubr.f32.mxu0 %v14927_v36  ;;  %v18643_v36 = vld [vmem:[#allocation40_spill] sm:$0xff]  ;;  %18645 = vst [vmem:[#allocation152_spill] sm:$0xff] %v15034_v9  ;;  %v15045_v55 = vpop.f32.mrf.mxu1  ;;  %v18651_v9 = vld [vmem:[#allocation49_spill] sm:$0xff] }
 0x197   : > { %10740 = vmatpush3.msra.mxu0 %v18641_v52  ;;  %10792 = vmatpush3.msra.mxu1 %v14228_v17  ;;  %v15032_v52 = vand.u32 4294901760, %v2705_v11  ;;  %18649 = vst [vmem:[#allocation154_spill] sm:$0xff] %v15045_v55  ;;  %v15061_v55 = vand.u32 4294901760, %v2703_v23 }
 0x198   : > { %3708 = vmatprep.mubr.f32.mxu1 %v14770_v30  ;;  %10741 = vmatprep.subr.mxu0 %v18642_v57  ;;  %v18647_v57 = vld [vmem:[#allocation43_spill] sm:$0xff] }
 0x199   : > { %10793 = vmatprep.subr.mxu1 %v14255_v62  ;;  %10742 = vmatpush3.msra.mxu0 %v18643_v36  ;;  %18644 = vst [vmem:[#allocation151_spill] sm:$0xff] %v15032_v52  ;;  %v15040_v36 = vand.u32 4294901760, %v2704_v32  ;;  %18653 = vst [vmem:[#allocation156_spill] sm:$0xff] %v15061_v55 }
 0x19a   : > { %10794 = vmatpush3.msra.mxu1 %v14270_v26  ;;  %3267 = vmatmul.mubr.f32.gmra.mxu0 %v14933_v27  ;;  %v18650_v27 = vld [vmem:[#allocation46_spill] sm:$0xff] }
 0x19b   : > { %10743 = vmatprep.subr.mxu0 %v18646_v24  ;;  %10795 = vmatprep.subr.mxu1 %v14293_v49  ;;  %18648 = vst [vmem:[#allocation153_spill] sm:$0xff] %v15040_v36  ;;  %v15057_v24 = vpop.f32.mrf.mxu0  ;;  %v18690_v49 = vld [vmem:[#allocation109_spill] sm:$0xff] }
 0x19c   : > { %3273 = vmatprep.mubr.f32.mxu0 %v14951_v46  ;;  %10744 = vmatpush3.msra.mxu0 %v18647_v57  ;;  %v15052_v46 = vsub.f32 %v2705_v11, %v15032_v52  ;;  %v2702_v57 = vld [vmem:[%s17490_s5 + $0x160] sm:$0xff]  ;;  %v15068_v11 = vpop.f32.mrf.mxu1 }
 0x19d   : > { %10796 = vmatpush3.msra.mxu1 %v14337_v39  ;;  %10745 = vmatprep.subr.mxu0 %v18650_v27  ;;  %v18654_v27 = vld [vmem:[#allocation51_spill] sm:$0xff]  ;;  %v15072_v56 = vand.u32 4294901760, %v2702_v57 }
 0x19e   : > { %10797 = vmatprep.subr.mxu1 %v14353_v34  ;;  %10746 = vmatpush3.msra.mxu0 %v18651_v9  ;;  %18652 = vst [vmem:[#allocation155_spill] sm:$0xff] %v15052_v46  ;;  %v15066_v9 = vsub.f32 %v2704_v32, %v15040_v36  ;;  %v15077_v18 = vand.u32 4294901760, %v15052_v46  ;;  %v2701_v32 = vld [vmem:[%s17490_s5 + $0x158] sm:$0xff]  ;;  %v15097_v16 = vpop.f32.mrf.mxu1 }
 0x19f   : > { %10798 = vmatpush3.msra.mxu1 %v14367_v6  ;;  %3276 = vmatmul.mubr.f32.gmra.mxu0 %v14955_v15  ;;  %18657 = vst [vmem:[#allocation158_spill] sm:$0xff] %v15072_v56  ;;  %v18658_v15 = vld [vmem:[#allocation60_spill] sm:$0xff]  ;;  %18665 = vst [vmem:[#allocation163_spill] sm:$0xff] %v15097_v16  ;;  %v18670_v16 = vld [vmem:[#allocation86_spill] sm:$0xff] }
 0x1a0   : > { %10747 = vmatprep.subr.mxu0 %v18654_v27  ;;  %10799 = vmatprep.subr.mxu1 %v14381_v61  ;;  %18655 = vst [vmem:[#allocation157_spill] sm:$0xff] %v15066_v9  ;;  %18659 = vst [vmem:[#allocation159_spill] sm:$0xff] %v15077_v18  ;;  %v15082_v27 = vpop.f32.mrf.mxu0 }
 0x1a1   : > { %10748 = vmatpush3.msra.mxu0 %v18656_v28  ;;  %3583 = vmatprep.mubr.f32.mxu0 %v14770_v30  ;;  %18660 = vst [vmem:[#allocation160_spill] sm:$0xff] %v15082_v27  ;;  %v18661_v28 = vld [vmem:[#allocation63_spill] sm:$0xff]  ;;  %v15087_v30 = vsub.f32 %v2703_v23, %v15061_v55  ;;  %v15102_v23 = vsub.f32 %v2702_v57, %v15072_v56  ;;  %v15117_v57 = vand.u32 4294901760, %v2700_v47 }
 0x1a2   : > { %10800 = vmatpush3.msra.mxu1 %v14395_v41  ;;  %10749 = vmatprep.subr.mxu0 %v18658_v15  ;;  %v15092_v15 = vand.u32 4294901760, %v15066_v9  ;;  %v18666_v27 = vld [vmem:[#allocation79_spill] sm:$0xff]  ;;  %v15126_v41 = vpop.f32.mrf.mxu1 }
 0x1a3   : > { %10801 = vmatprep.subr.mxu1 %v14412_v58  ;;  %10750 = vmatpush3.msra.mxu0 %v18661_v28  ;;  %18662 = vst [vmem:[#allocation161_spill] sm:$0xff] %v15087_v30  ;;  %18667 = vst [vmem:[#allocation164_spill] sm:$0xff] %v15102_v23  ;;  %v15104_v28 = vand.u32 4294901760, %v2701_v32  ;;  %v15110_v58 = vpop.f32.mrf.mxu0  ;;  %v15152_v39 = vsub.f32 %v2700_v47, %v15117_v57 }
 0x1a4   : > { %10802 = vmatpush3.msra.mxu1 %v18596_v63  ;;  %10751 = vmatprep.subr.mxu0 %v18663_v10  ;;  %18664 = vst [vmem:[#allocation162_spill] sm:$0xff] %v15092_v15  ;;  %v18669_v10 = vld [vmem:[#allocation82_spill] sm:$0xff]  ;;  %v3861_v63 = vsub.f32 %v15052_v46, %v15077_v18  ;;  %18672 = vst [vmem:[#allocation167_spill] sm:$0xff] %v15117_v57 }
 0x1a5   : > { %10803 = vmatprep.subr.mxu1 %v18602_v4  ;;  %10752 = vmatpush3.msra.mxu0 %v18666_v27  ;;  %18668 = vst [vmem:[#allocation165_spill] sm:$0xff] %v15104_v28  ;;  %v15115_v27 = vand.u32 4294901760, %v15087_v30  ;;  %v3868_v4 = vsub.f32 %v15066_v9, %v15092_v15  ;;  %v15134_v61 = vsub.f32 %v2701_v32, %v15104_v28  ;;  %18682 = vst [vmem:[#allocation173_spill] sm:$0xff] %v15152_v39 }
 0x1a6   : > { %10804 = vmatpush3.msra.mxu1 %v18604_v21  ;;  %10753 = vmatprep.subr.mxu0 %v18669_v10  ;;  %v2699_v21 = vld [vmem:[%s17490_s5 + $0x148] sm:$0xff]  ;;  %v18673_v10 = vld [vmem:[#allocation90_spill] sm:$0xff]  ;;  %v15141_v6 = vand.u32 4294901760, %v3861_v63  ;;  %v15189_v62 = vand.u32 4294901760, %v15152_v39 }
 0x1a7   : > { %10805 = vmatprep.subr.mxu1 %v18607_v54  ;;  %10754 = vmatpush3.msra.mxu0 %v18670_v16  ;;  %18671 = vst [vmem:[#allocation166_spill] sm:$0xff] %v15115_v27  ;;  %v18674_v16 = vld [vmem:[#allocation93_spill] sm:$0xff]  ;;  %v15131_v54 = vand.u32 4294901760, %v15102_v23  ;;  %18676 = vst [vmem:[#allocation169_spill] sm:$0xff] %v15134_v61  ;;  %v15143_v34 = vand.u32 4294901760, %v2699_v21  ;;  %v3875_v32 = vsub.f32 %v15087_v30, %v15115_v27  ;;  %v15156_v63 = vand.u32 4294901760, %v3868_v4 }
 0x1a8   : > { %10806 = vmatpush3.msra.mxu1 %v18610_v0  ;;  %10755 = vmatprep.subr.mxu0 %v18673_v10  ;;  %v2698_v0 = vld [vmem:[%s17490_s5 + $0x140] sm:$0xff]  ;;  %v18677_v10 = vld [vmem:[#allocation96_spill] sm:$0xff]  ;;  %18678 = vst [vmem:[#allocation170_spill] sm:$0xff] %v15141_v6  ;;  %18692 = vst [vmem:[#allocation180_spill] sm:$0xff] %v15189_v62 }
 0x1a9   : > { %10807 = vmatprep.subr.mxu1 %v18614_v19  ;;  %10756 = vmatpush3.msra.mxu0 %v18674_v16  ;;  %18675 = vst [vmem:[#allocation168_spill] sm:$0xff] %v15131_v54  ;;  %18679 = vst [vmem:[#allocation171_spill] sm:$0xff] %v15143_v34  ;;  %v15145_v19 = vpop.f32.mrf.mxu0  ;;  %v18681_v16 = vld [vmem:[#allocation99_spill] sm:$0xff]  ;;  %v3882_v47 = vsub.f32 %v15102_v23, %v15131_v54  ;;  %v15175_v4 = vsub.f32 %v2699_v21, %v15143_v34  ;;  %v15186_v26 = vand.u32 4294901760, %v3875_v32  ;;  %v18694_v21 = vld [vmem:[#allocation112_spill] sm:$0xff] }
 0x1aa   : > { %10808 = vmatpush3.msra.mxu1 %v18616_v48  ;;  %10757 = vmatprep.subr.mxu0 %v18677_v10  ;;  %18680 = vst [vmem:[#allocation172_spill] sm:$0xff] %v15145_v19  ;;  %v18683_v48 = vld [vmem:[#allocation103_spill] sm:$0xff]  ;;  %18684 = vst [vmem:[#allocation174_spill] sm:$0xff] %v15156_v63  ;;  %v15158_v10 = vand.u32 4294901760, %v2698_v0  ;;  %v2697_v19 = vld [vmem:[%s17490_s5 + $0x138] sm:$0xff] }
 0x1ab   : > { %10809 = vmatprep.subr.mxu1 %v18618_v7  ;;  %10758 = vmatpush3.msra.mxu0 %v18681_v16  ;;  %v15163_v7 = vpop.f32.mrf.mxu1  ;;  %v18687_v16 = vld [vmem:[#allocation106_spill] sm:$0xff]  ;;  %18689 = vst [vmem:[#allocation178_spill] sm:$0xff] %v15175_v4  ;;  %18691 = vst [vmem:[#allocation179_spill] sm:$0xff] %v15186_v26  ;;  %v15191_v17 = vand.u32 4294901760, %v2697_v19  ;;  %v15203_v32 = vand.u32 4294901760, %v3882_v47 }
 0x1ac   : > { %10810 = vmatpush3.msra.mxu1 %v18621_v33  ;;  %10759 = vmatprep.subr.mxu0 %v18683_v48  ;;  %18685 = vst [vmem:[#allocation175_spill] sm:$0xff] %v15158_v10  ;;  %18686 = vst [vmem:[#allocation176_spill] sm:$0xff] %v15163_v7  ;;  %v15170_v33 = vand.u32 4294901760, %v15134_v61  ;;  %v2696_v7 = vld [vmem:[%s17490_s5 + $0x130] sm:$0xff]  ;;  %v15180_v48 = vpop.f32.mrf.mxu0  ;;  %v15196_v31 = vsub.f32 %v2698_v0, %v15158_v10  ;;  %v15212_v0 = vand.u32 4294901760, %v15175_v4 }
 0x1ad   : > { %3710 = vmatmul.mubr.f32.vlgmr.msra.gmra.mxu1 %v14761_v14  ;;  %10760 = vmatpush3.msra.mxu0 %v18687_v16  ;;  %v15182_v16 = vpop.f32.mrf.mxu1  ;;  %18693 = vst [vmem:[#allocation181_spill] sm:$0xff] %v15191_v17  ;;  %18697 = vst [vmem:[#allocation183_spill] sm:$0xff] %v15203_v32  ;;  %v15207_v25 = vand.u32 4294901760, %v2696_v7 }
 0x1ae   : > { %18688 = vst [vmem:[#allocation177_spill] sm:$0xff] %v15170_v33  ;;  %3715 = vmatprep.mubr.f32.mxu1 %v14862_v51  ;;  %11617 = vmatprep.subr.mxu1 %v15141_v6  ;;  %18695 = vst [vmem:[#allocation182_spill] sm:$0xff] %v15196_v31  ;;  %v15217_v59 = vpop.f32.mrf.mxu0 }
 0x1af   : > { %10761 = vmatprep.subr.mxu0 %v18690_v49  ;;  %11618 = vmatpush3.msra.mxu1 %v15141_v6  ;;  %v2695_v49 = vld [vmem:[%s17490_s5 + $0x128] sm:$0xff]  ;;  %v3889_v6 = vsub.f32 %v15134_v61, %v15170_v33  ;;  %18698 = vst [vmem:[#allocation184_spill] sm:$0xff] %v15207_v25  ;;  %18700 = vst [vmem:[#allocation185_spill] sm:$0xff] %v15212_v0  ;;  %v15219_v47 = vpop.f32.mrf.mxu1 }
 0x1b0   : > { %10762 = vmatpush3.msra.mxu0 %v18694_v21  ;;  %11619 = vmatprep.subr.mxu1 %v15156_v63  ;;  %v18699_v21 = vld [vmem:[#allocation117_spill] sm:$0xff]  ;;  %18701 = vst [vmem:[#allocation186_spill] sm:$0xff] %v15217_v59  ;;  %18702 = vst [vmem:[#allocation187_spill] sm:$0xff] %v15219_v47  ;;  %v15228_v42 = vand.u32 4294901760, %v2695_v49  ;;  %v15233_v59 = vand.u32 4294901760, %v15196_v31 }
 0x1b1   : > { %10763 = vmatprep.subr.mxu0 %v18696_v43  ;;  %3717 = vmatmul.mubr.f32.gmra.mxu1 %v14865_v38  ;;  %v2694_v43 = vld [vmem:[%s17490_s5 + $0x120] sm:$0xff]  ;;  %v2693_v47 = vld [vmem:[%s17490_s5 + $0x118] sm:$0xff]  ;;  %v15240_v5 = vand.u32 4294901760, %v3889_v6  ;;  %v15256_v6 = vpop.f32.mrf.mxu1 }
 0x1b2   : > { %11620 = vmatpush3.msra.mxu1 %v15156_v63  ;;  %10764 = vmatpush3.msra.mxu0 %v18699_v21  ;;  %v3896_v63 = vsub.f32 %v15152_v39, %v15189_v62  ;;  %v15226_v21 = vsub.f32 %v2697_v19, %v15191_v17  ;;  %18704 = vst [vmem:[#allocation189_spill] sm:$0xff] %v15228_v42  ;;  %18706 = vst [vmem:[#allocation190_spill] sm:$0xff] %v15233_v59  ;;  %v15245_v8 = vand.u32 4294901760, %v2694_v43 }
 0x1b3   : > { %3722 = vmatprep.mubr.f32.mxu1 %v14907_v29  ;;  %11621 = vmatprep.subr.mxu1 %v15186_v26  ;;  %18708 = vst [vmem:[#allocation191_spill] sm:$0xff] %v15240_v5  ;;  %v15243_v19 = vsub.f32 %v2696_v7, %v15207_v25  ;;  %v15266_v13 = vsub.f32 %v2695_v49, %v15228_v42  ;;  %v15268_v60 = vand.u32 4294901760, %v2693_v47  ;;  %v15296_v62 = vpop.f32.mrf.mxu1 }
 0x1b4   : > { %18703 = vst [vmem:[#allocation188_spill] sm:$0xff] %v15226_v21  ;;  %10765 = vmatprep.subr.mxu0 %v18705_v53  ;;  %11622 = vmatpush3.msra.mxu1 %v15186_v26  ;;  %18710 = vst [vmem:[#allocation193_spill] sm:$0xff] %v15245_v8  ;;  %v3903_v53 = vsub.f32 %v15175_v4, %v15212_v0  ;;  %v15254_v26 = vpop.f32.mrf.mxu0  ;;  %v15260_v7 = vand.u32 4294901760, %v3896_v63  ;;  %v3910_v22 = vsub.f32 %v15196_v31, %v15233_v59  ;;  %v2690_v59 = vld [vmem:[%s17490_s5 + $0x100] sm:$0xff] }
 0x1b5   : > { %10766 = vmatpush3.msra.mxu0 %v18707_v37  ;;  %11623 = vmatprep.subr.mxu1 %v15203_v32  ;;  %18709 = vst [vmem:[#allocation192_spill] sm:$0xff] %v15243_v19  ;;  %v2692_v37 = vld [vmem:[%s17490_s5 + $0x110] sm:$0xff]  ;;  %18713 = vst [vmem:[#allocation196_spill] sm:$0xff] %v15266_v13  ;;  %v15280_v49 = vand.u32 4294901760, %v15243_v19  ;;  %v15283_v63 = vsub.f32 %v2694_v43, %v15245_v8 }
 0x1b6   : > { %3585 = vmatmul.mubr.f32.vlgmr.msra.gmra.mxu0 %v14761_v14  ;;  %3724 = vmatmul.mubr.f32.gmra.mxu1 %v14912_v1  ;;  %18711 = vst [vmem:[#allocation194_spill] sm:$0xff] %v15260_v7  ;;  %v15263_v14 = vand.u32 4294901760, %v15226_v21  ;;  %18714 = vst [vmem:[#allocation197_spill] sm:$0xff] %v15268_v60  ;;  %v15289_v3 = vand.u32 4294901760, %v3903_v53  ;;  %v15294_v0 = vpop.f32.mrf.mxu0  ;;  %v15306_v53 = vsub.f32 %v2693_v47, %v15268_v60 }
 0x1b7   : > { %11624 = vmatpush3.msra.mxu1 %v15203_v32  ;;  %3590 = vmatprep.mubr.f32.mxu0 %v14862_v51  ;;  %v2691_v51 = vld [vmem:[%s17490_s5 + $0x108] sm:$0xff]  ;;  %18715 = vst [vmem:[#allocation198_spill] sm:$0xff] %v15280_v49  ;;  %18716 = vst [vmem:[#allocation199_spill] sm:$0xff] %v15283_v63  ;;  %v15285_v32 = vand.u32 4294901760, %v2692_v37 }
 0x1b8   : > { %18712 = vst [vmem:[#allocation195_spill] sm:$0xff] %v15263_v14  ;;  %3729 = vmatprep.mubr.f32.mxu1 %v14937_v35  ;;  %11579 = vmatprep.subr.mxu0 %v15032_v52  ;;  %18718 = vst [vmem:[#allocation201_spill] sm:$0xff] %v15289_v3  ;;  %v3917_v43 = vsub.f32 %v15226_v21, %v15263_v14  ;;  %v15308_v33 = vand.u32 4294901760, %v2691_v51  ;;  %v15324_v14 = vand.u32 4294901760, %v2690_v59 }
 0x1b9   : > { %11625 = vmatprep.subr.mxu1 %v15240_v5  ;;  %11580 = vmatpush3.msra.mxu0 %v15032_v52  ;;  %18717 = vst [vmem:[#allocation200_spill] sm:$0xff] %v15285_v32  ;;  %18719 = vst [vmem:[#allocation202_spill] sm:$0xff] %v15294_v0  ;;  %v15312_v0 = vand.u32 4294901760, %v3910_v22  ;;  %v15322_v47 = vsub.f32 %v2692_v37, %v15285_v32  ;;  %v15328_v22 = vpop.f32.mrf.mxu0 }
 0x1ba   : > { %11626 = vmatpush3.msra.mxu1 %v15240_v5  ;;  %11581 = vmatprep.subr.mxu0 %v15040_v36  ;;  %18720 = vst [vmem:[#allocation203_spill] sm:$0xff] %v15296_v62  ;;  %v15303_v5 = vand.u32 4294901760, %v15266_v13  ;;  %18722 = vst [vmem:[#allocation205_spill] sm:$0xff] %v15306_v53  ;;  %v15319_v62 = vand.u32 4294901760, %v15283_v63  ;;  %v15342_v54 = vsub.f32 %v2691_v51, %v15308_v33 }
 0x1bb   : > { %11627 = vmatprep.subr.mxu1 %v15260_v7  ;;  %3592 = vmatmul.mubr.f32.gmra.mxu0 %v14865_v38  ;;  %18723 = vst [vmem:[#allocation206_spill] sm:$0xff] %v15308_v33  ;;  %18724 = vst [vmem:[#allocation207_spill] sm:$0xff] %v15312_v0  ;;  %v3924_v38 = vsub.f32 %v15243_v19, %v15280_v49  ;;  %v15339_v49 = vand.u32 4294901760, %v15306_v53  ;;  %v15356_v27 = vsub.f32 %v2690_v59, %v15324_v14  ;;  %v15360_v51 = vpop.f32.mrf.mxu0 }
 0x1bc   : > { %18721 = vst [vmem:[#allocation204_spill] sm:$0xff] %v15303_v5  ;;  %3731 = vmatmul.mubr.f32.gmra.mxu1 %v14940_v50  ;;  %11582 = vmatpush3.msra.mxu0 %v15040_v36  ;;  %18725 = vst [vmem:[#allocation208_spill] sm:$0xff] %v15319_v62  ;;  %v3931_v37 = vsub.f32 %v15266_v13, %v15303_v5  ;;  %v15353_v5 = vand.u32 4294901760, %v15322_v47  ;;  %v15371_v59 = vand.u32 4294901760, %v15342_v54 }
 0x1bd   : > { %11628 = vmatpush3.msra.mxu1 %v15260_v7  ;;  %3597 = vmatprep.mubr.f32.mxu0 %v14907_v29  ;;  %18726 = vst [vmem:[#allocation209_spill] sm:$0xff] %v15322_v47  ;;  %18727 = vst [vmem:[#allocation210_spill] sm:$0xff] %v15324_v14  ;;  %v15330_v7 = vpop.f32.mrf.mxu1  ;;  %v15334_v29 = vand.u32 4294901760, %v3917_v43  ;;  %v3938_v43 = vsub.f32 %v15283_v63, %v15319_v62 }
 0x1be   : > { %11583 = vmatprep.subr.mxu0 %v15061_v55  ;;  %11629 = vmatprep.subr.mxu1 %v15289_v3  ;;  %18729 = vst [vmem:[#allocation212_spill] sm:$0xff] %v15339_v49  ;;  %18730 = vst [vmem:[#allocation213_spill] sm:$0xff] %v15342_v54 }
 0x1bf   : > { %11584 = vmatpush3.msra.mxu0 %v15061_v55  ;;  %11630 = vmatpush3.msra.mxu1 %v15289_v3  ;;  %18728 = vst [vmem:[#allocation211_spill] sm:$0xff] %v15334_v29  ;;  %v15348_v3 = vand.u32 4294901760, %v3924_v38  ;;  %18732 = vst [vmem:[#allocation215_spill] sm:$0xff] %v15353_v5  ;;  %v15366_v38 = vand.u32 4294901760, %v3931_v37  ;;  %v3952_v37 = vsub.f32 %v15322_v47, %v15353_v5 }
 0x1c0   : > { %11585 = vmatprep.subr.mxu0 %v15072_v56  ;;  %11631 = vmatprep.subr.mxu1 %v15312_v0  ;;  %18733 = vst [vmem:[#allocation216_spill] sm:$0xff] %v15356_v27  ;;  %18734 = vst [vmem:[#allocation217_spill] sm:$0xff] %v15360_v51  ;;  %v15382_v51 = vand.u32 4294901760, %v15356_v27  ;;  %v3959_v5 = vsub.f32 %v15342_v54, %v15371_v59 }
 0x1c1   : > { %3599 = vmatmul.mubr.f32.gmra.mxu0 %v14912_v1  ;;  %11632 = vmatpush3.msra.mxu1 %v15312_v0  ;;  %18731 = vst [vmem:[#allocation214_spill] sm:$0xff] %v15348_v3  ;;  %v15362_v1 = vpop.f32.mrf.mxu1  ;;  %18736 = vst [vmem:[#allocation219_spill] sm:$0xff] %v15366_v38  ;;  %v3945_v0 = vsub.f32 %v15306_v53, %v15339_v49  ;;  %v1924_v49 = vadd.f32 %v15001_v40, %v14977_v2 }
 0x1c2   : > { %11586 = vmatpush3.msra.mxu0 %v15072_v56  ;;  %3604 = vmatprep.mubr.f32.mxu0 %v14937_v35  ;;  %18735 = vst [vmem:[#allocation218_spill] sm:$0xff] %v15362_v1  ;;  %18737 = vst [vmem:[#allocation220_spill] sm:$0xff] %v15371_v59  ;;  %v15377_v1 = vand.u32 4294901760, %v3938_v43  ;;  %v3966_v40 = vsub.f32 %v15356_v27, %v15382_v51 }
 0x1c3   : > { %11587 = vmatprep.subr.mxu0 %v15104_v28  ;;  %11633 = vmatprep.subr.mxu1 %v15334_v29  ;;  %18739 = vst [vmem:[#allocation222_spill] sm:$0xff] %v15382_v51  ;;  %v15394_v43 = vand.u32 4294901760, %v3945_v0  ;;  %v2082_v15 = vadd.f32 %v15110_v58, %v1924_v49  ;;  %v1931_v0 = vadd.f32 %v15023_v44, %v14993_v45 }
 0x1c4   : > { %11588 = vmatpush3.msra.mxu0 %v15104_v28  ;;  %11634 = vmatpush3.msra.mxu1 %v15334_v29  ;;  %v2406_v35 = vpop.f32.mrf.mxu0  ;;  %18738 = vst [vmem:[#allocation221_spill] sm:$0xff] %v15377_v1  ;;  %v15388_v29 = vpop.f32.mrf.mxu1  ;;  %v15425_v44 = vand.u32 4294901760, %v3966_v40  ;;  %v18748_v40 = vld [vmem:[#allocation131_spill] sm:$0xff] }
 0x1c5   : > { %11589 = vmatprep.subr.mxu0 %v15117_v57  ;;  %11635 = vmatprep.subr.mxu1 %v15348_v3  ;;  %18741 = vst [vmem:[#allocation224_spill] sm:$0xff] %v15394_v43 }
 0x1c6   : > { %3606 = vmatmul.mubr.f32.gmra.mxu0 %v14940_v50  ;;  %11636 = vmatpush3.msra.mxu1 %v15348_v3  ;;  %v15390_v62 = vpop.f32.mrf.mxu0  ;;  %v15403_v50 = vand.u32 4294901760, %v3952_v37  ;;  %v15412_v58 = vpop.f32.mrf.mxu1  ;;  %v15418_v37 = vand.u32 4294901760, %v3959_v5  ;;  %18746 = vst [vmem:[#allocation229_spill] sm:$0xff] %v15425_v44 }
 0x1c7   : > { %18740 = vst [vmem:[#allocation223_spill] sm:$0xff] %v15390_v62  ;;  %11590 = vmatpush3.msra.mxu0 %v15117_v57  ;;  %11637 = vmatprep.subr.mxu1 %v15366_v38  ;;  %v2212_v62 = vadd.f32 %v15182_v16, %v2082_v15  ;;  %18743 = vst [vmem:[#allocation226_spill] sm:$0xff] %v15412_v58  ;;  %v1938_v15 = vadd.f32 %v15068_v11, %v15014_v12 }
 0x1c8   : > { %11591 = vmatprep.subr.mxu0 %v15143_v34  ;;  %11638 = vmatpush3.msra.mxu1 %v15366_v38  ;;  %v2413_v2 = vpop.f32.mrf.mxu0  ;;  %18742 = vst [vmem:[#allocation225_spill] sm:$0xff] %v15403_v50  ;;  %18745 = vst [vmem:[#allocation228_spill] sm:$0xff] %v15418_v37  ;;  %v2090_v38 = vadd.f32 %v15180_v48, %v1931_v0 }
 0x1c9   : > { %11592 = vmatpush3.msra.mxu0 %v15143_v34  ;;  %11639 = vmatprep.subr.mxu1 %v15377_v1  ;;  %v2407_v3 = vadd.f32 %v2406_v35, %v2212_v62  ;;  %v2098_v48 = vadd.f32 %v15254_v26, %v1938_v15  ;;  %v18750_v26 = vld [vmem:[#allocation134_spill] sm:$0xff] }
 0x1ca   : > { %11593 = vmatprep.subr.mxu0 %v15158_v10  ;;  %11640 = vmatpush3.msra.mxu1 %v15377_v1  ;;  %v15414_v49 = vpop.f32.mrf.mxu0  ;;  %v2221_v5 = vadd.f32 %v15256_v6, %v2090_v38 }
 0x1cb   : > { %18744 = vst [vmem:[#allocation227_spill] sm:$0xff] %v15414_v49  ;;  %11594 = vmatpush3.msra.mxu0 %v15158_v10  ;;  %11641 = vmatprep.subr.mxu1 %v15394_v43  ;;  %v2230_v6 = vadd.f32 %v15330_v7, %v2098_v48  ;;  %v4512_v49 = vld [vmem:[%s17491_s6 + $0x30] sm:$0xff] }
 0x1cc   : > { %11595 = vmatprep.subr.mxu0 %v15191_v17  ;;  %11642 = vmatpush3.msra.mxu1 %v15394_v43  ;;  %v2420_v16 = vpop.f32.mrf.mxu0  ;;  %v2531_v45 = vpop.f32.mrf.mxu1  ;;  %v2414_v35 = vadd.f32 %v2413_v2, %v2221_v5 }
 0x1cd   : > { %11596 = vmatpush3.msra.mxu0 %v15191_v17  ;;  %11643 = vmatprep.subr.mxu1 %v15403_v50  ;;  %v2532_v58 = vadd.f32 %v2531_v45, %v2407_v3  ;;  %v1945_v3 = vadd.f32 %v15126_v41, %v15057_v24  ;;  %v2421_v24 = vadd.f32 %v2420_v16, %v2230_v6 }
 0x1ce   : > { %11597 = vmatprep.subr.mxu0 %v15207_v25  ;;  %11644 = vmatpush3.msra.mxu1 %v15403_v50  ;;  %v15432_v62 = vpop.f32.mrf.mxu1  ;;  %v15442_v12 = vpop.f32.mrf.mxu0 }
 0x1cf   : > { %18747 = vst [vmem:[#allocation230_spill] sm:$0xff] %v15432_v62  ;;  %11598 = vmatpush3.msra.mxu0 %v15207_v25  ;;  %11645 = vmatprep.subr.mxu1 %v15418_v37  ;;  %v2587_v0 = vmul.f32 %v18748_v40, %v2532_v58  ;;  %18749 = vst [vmem:[#allocation131_spill] sm:$0xff] %v15442_v12  ;;  %v2106_v58 = vadd.f32 %v15328_v22, %v1945_v3  ;;  %v18753_v22 = vld [vmem:[#allocation138_spill] sm:$0xff]  ;;  %v18756_v3 = vld [vmem:[#allocation137_spill] sm:$0xff]  ;;  %v18776_v12 = vmov 0.0  }
 0x1d0   : > { %11599 = vmatprep.subr.mxu0 %v15228_v42  ;;  %11646 = vmatpush3.msra.mxu1 %v15418_v37  ;;  %v2538_v11 = vpop.f32.mrf.mxu1  ;;  %v2427_v5 = vpop.f32.mrf.mxu0  ;;  %v4513_v62 = vld [vmem:[%s17491_s6 + $0x38] sm:$0xff] }
 0x1d1   : > { %11600 = vmatpush3.msra.mxu0 %v15228_v42  ;;  %11647 = vmatprep.subr.mxu1 %v15425_v44  ;;  %v15448_v38 = vadd.f32 %v18750_v26, %v2587_v0  ;;  %v2539_v2 = vadd.f32 %v2538_v11, %v2414_v35  ;;  %v2239_v15 = vadd.f32 %v15388_v29, %v2106_v58  ;;  %v18757_v58 = vld [vmem:[#allocation142_spill] sm:$0xff] }
 0x1d2   : > { %11601 = vmatprep.subr.mxu0 %v15245_v8  ;;  %11648 = vmatpush3.msra.mxu1 %v15425_v44  ;;  %v15453_v41 = vpop.f32.mrf.mxu1 }
 0x1d3   : > { %18751 = vst [vmem:[#allocation134_spill] sm:$0xff] %v15448_v38  ;;  %18752 = vst [vmem:[#allocation231_spill] sm:$0xff] %v15453_v41  ;;  %11602 = vmatpush3.msra.mxu0 %v15245_v8  ;;  %11693 = vmatprep.subr.mxu1 %v15032_v52  ;;  %v2590_v45 = vmul.f32 %v14812_v20, %v2539_v2  ;;  %v15459_v7 = vand.u32 4294901760, %v15448_v38  ;;  %v2428_v29 = vadd.f32 %v2427_v5, %v2239_v15 }
 0x1d4   : > { %11603 = vmatprep.subr.mxu0 %v15268_v60  ;;  %v2545_v48 = vpop.f32.mrf.mxu1  ;;  %v15672_v41 = vand.u32 4294901760, %v4513_v62 }
 0x1d5   : > { %11604 = vmatpush3.msra.mxu0 %v15268_v60  ;;  %v15465_v35 = vadd.f32 %v18753_v22, %v2590_v45  ;;  %v2546_v40 = vadd.f32 %v2545_v48, %v2421_v24  ;;  %11649 = vmatprep.mubr.f32.mxu1 %v15459_v7  ;;  %v15471_v20 = vsub.f32 %v15448_v38, %v15459_v7  ;;  %v18759_v48 = vld [vmem:[#allocation141_spill] sm:$0xff] }
 0x1d6   : > { %11605 = vmatprep.subr.mxu0 %v15285_v32  ;;  %v15473_v16 = vpop.f32.mrf.mxu1  ;;  %18777 = vst [vmem:[#allocation141_spill] sm:$0xff] %v15672_v41 }
 0x1d7   : > { %18754 = vst [vmem:[#allocation138_spill] sm:$0xff] %v15465_v35  ;;  %18755 = vst [vmem:[#allocation232_spill] sm:$0xff] %v15473_v16  ;;  %11606 = vmatpush3.msra.mxu0 %v15285_v32  ;;  %v15477_v0 = vand.u32 4294901760, %v15465_v35  ;;  %v2593_v11 = vmul.f32 %v18756_v3, %v2546_v40  ;;  %v3819_v6 = vand.u32 4294901760, %v15471_v20  ;;  %v18760_v3 = vld [vmem:[#allocation145_spill] sm:$0xff]  ;;  %v18775_v16 = vld [vmem:[#allocation215_spill] sm:$0xff] }
 0x1d8   : > { %11607 = vmatprep.subr.mxu0 %v15308_v33  ;;  %v2552_v26 = vpop.f32.mrf.mxu1 }
 0x1d9   : > { %11608 = vmatpush3.msra.mxu0 %v15308_v33  ;;  %v15485_v2 = vsub.f32 %v15465_v35, %v15477_v0  ;;  %v15488_v24 = vadd.f32 %v18757_v58, %v2593_v11  ;;  %v2553_v45 = vadd.f32 %v2552_v26, %v2428_v29  ;;  %11650 = vmatmul.mubr.f32.vlgmr.msra.gmra.mxu1 %v15477_v0 }
 0x1da   : > { %v3820_v15 = vsub.f32 %v15471_v20, %v3819_v6  ;;  %11694 = vmatpush3.msra.mxu1 %v15032_v52  ;;  %11609 = vmatprep.subr.mxu0 %v15324_v14 }
 0x1db   : > { %18758 = vst [vmem:[#allocation137_spill] sm:$0xff] %v15488_v24  ;;  %v3829_v5 = vand.u32 4294901760, %v15485_v2  ;;  %v2596_v22 = vmul.f32 %v18759_v48, %v2553_v45  ;;  %11695 = vmatprep.subr.mxu1 %v15040_v36  ;;  %11610 = vmatpush3.msra.mxu0 %v15324_v14  ;;  %v15500_v29 = vand.u32 4294901760, %v15488_v24 }
 0x1dc   : > { %v3821_v40 = vand.u32 4294901760, %v3820_v15  ;;  %11696 = vmatpush3.msra.mxu1 %v15040_v36  ;;  %11655 = vmatprep.subr.mxu0 %v15052_v46 }
 0x1dd   : > { %v15504_v11 = vadd.f32 %v18760_v3, %v2596_v22  ;;  %11697 = vmatprep.subr.mxu1 %v15061_v55  ;;  %v3830_v26 = vsub.f32 %v15485_v2, %v3829_v5  ;;  %11652 = vmatprep.mubr.f32.mxu1 %v15500_v29  ;;  %v15514_v58 = vsub.f32 %v15488_v24, %v15500_v29 }
 0x1de   : > { %11611 = vmatprep.mubr.f32.mxu0 %v3821_v40  ;;  %11698 = vmatpush3.msra.mxu1 %v15061_v55 }
 0x1df   : > { %18761 = vst [vmem:[#allocation142_spill] sm:$0xff] %v15504_v11  ;;  %11699 = vmatprep.subr.mxu1 %v15072_v56  ;;  %v3831_v45 = vand.u32 4294901760, %v3830_v26  ;;  %v15518_v15 = vand.u32 4294901760, %v15504_v11  ;;  %v17948_v48 = vand.u32 4294901760, %v15514_v58 }
 0x1e0   : > { %11700 = vmatpush3.msra.mxu1 %v15072_v56 }
 0x1e1   : > { %11701 = vmatprep.subr.mxu1 %v15104_v28  ;;  %11612 = vmatmul.mubr.f32.vlgmr.msra.gmra.mxu0 %v3831_v45  ;;  %v15525_v22 = vsub.f32 %v15504_v11, %v15518_v15  ;;  %v3840_v40 = vsub.f32 %v15514_v58, %v17948_v48 }
 0x1e2   : > { %11653 = vmatmul.mubr.f32.gmra.mxu1 %v15518_v15  ;;  %11656 = vmatpush3.msra.mxu0 %v15052_v46 }
 0x1e3   : > { %11702 = vmatpush3.msra.mxu1 %v15104_v28  ;;  %11657 = vmatprep.subr.mxu0 %v15066_v9  ;;  %v3849_v3 = vand.u32 4294901760, %v15525_v22  ;;  %v3841_v26 = vand.u32 4294901760, %v3840_v40  ;;  %v18770_v40 = vld [vmem:[#allocation195_spill] sm:$0xff] }
 0x1e4   : > { %11703 = vmatprep.subr.mxu1 %v15117_v57  ;;  %11725 = vmatprep.mubr.f32.mxu1 %v3819_v6  ;;  %v18763_v6 = vld [vmem:[#allocation162_spill] sm:$0xff] }
 0x1e5   : > { %11658 = vmatpush3.msra.mxu0 %v15066_v9  ;;  %11704 = vmatpush3.msra.mxu1 %v15117_v57  ;;  %v3850_v45 = vsub.f32 %v15525_v22, %v3849_v3 }
 0x1e6   : > { %11659 = vmatprep.subr.mxu0 %v15087_v30  ;;  %11705 = vmatprep.subr.mxu1 %v15143_v34 }
 0x1e7   : > { %11614 = vmatprep.mubr.f32.mxu0 %v3841_v26  ;;  %11660 = vmatpush3.msra.mxu0 %v15087_v30  ;;  %v3851_v48 = vand.u32 4294901760, %v3850_v45  ;;  %v18772_v26 = vld [vmem:[#allocation204_spill] sm:$0xff] }
 0x1e8   : > { %11706 = vmatpush3.msra.mxu1 %v15143_v34  ;;  %11661 = vmatprep.subr.mxu0 %v15102_v23  ;;  %v18773_v45 = vld [vmem:[#allocation208_spill] sm:$0xff] }
 0x1e9   : > { %11707 = vmatprep.subr.mxu1 %v15158_v10  ;;  %11662 = vmatpush3.msra.mxu0 %v15102_v23 }
 0x1ea   : > { %11708 = vmatpush3.msra.mxu1 %v15158_v10  ;;  %11663 = vmatprep.subr.mxu0 %v15134_v61 }
 0x1eb   : > { %11709 = vmatprep.subr.mxu1 %v15191_v17  ;;  %11615 = vmatmul.mubr.f32.gmra.mxu0 %v3851_v48  ;;  %v18767_v48 = vld [vmem:[#allocation180_spill] sm:$0xff] }
 0x1ec   : > { %11664 = vmatpush3.msra.mxu0 %v15134_v61  ;;  %11710 = vmatpush3.msra.mxu1 %v15191_v17 }
 0x1ed   : > { %11665 = vmatprep.subr.mxu0 %v15152_v39  ;;  %11687 = vmatprep.mubr.f32.mxu0 %v15471_v20  ;;  %v18762_v20 = vand.u32 4294901760, %v15514_v58 }
 0x1ee   : > { %11711 = vmatprep.subr.mxu1 %v15207_v25  ;;  %11666 = vmatpush3.msra.mxu0 %v15152_v39 }
 0x1ef   : > { %11712 = vmatpush3.msra.mxu1 %v15207_v25  ;;  %11667 = vmatprep.subr.mxu0 %v15175_v4 }
 0x1f0   : > { %11713 = vmatprep.subr.mxu1 %v15228_v42  ;;  %11668 = vmatpush3.msra.mxu0 %v15175_v4 }
 0x1f1   : > { %11714 = vmatpush3.msra.mxu1 %v15228_v42  ;;  %11669 = vmatprep.subr.mxu0 %v15196_v31 }
 0x1f2   : > { %11715 = vmatprep.subr.mxu1 %v15245_v8  ;;  %11670 = vmatpush3.msra.mxu0 %v15196_v31 }
 0x1f3   : > { %11716 = vmatpush3.msra.mxu1 %v15245_v8  ;;  %11671 = vmatprep.subr.mxu0 %v15226_v21 }
 0x1f4   : > { %11717 = vmatprep.subr.mxu1 %v15268_v60  ;;  %11672 = vmatpush3.msra.mxu0 %v15226_v21 }
 0x1f5   : > { %11718 = vmatpush3.msra.mxu1 %v15268_v60  ;;  %11673 = vmatprep.subr.mxu0 %v15243_v19 }
 0x1f6   : > { %11719 = vmatprep.subr.mxu1 %v15285_v32  ;;  %11674 = vmatpush3.msra.mxu0 %v15243_v19 }
 0x1f7   : > { %11720 = vmatpush3.msra.mxu1 %v15285_v32  ;;  %11675 = vmatprep.subr.mxu0 %v15266_v13 }
 0x1f8   : > { %11721 = vmatprep.subr.mxu1 %v15308_v33  ;;  %11676 = vmatpush3.msra.mxu0 %v15266_v13 }
 0x1f9   : > { %11722 = vmatpush3.msra.mxu1 %v15308_v33  ;;  %11677 = vmatprep.subr.mxu0 %v15283_v63 }
 0x1fa   : > { %11723 = vmatprep.subr.mxu1 %v15324_v14  ;;  %11678 = vmatpush3.msra.mxu0 %v15283_v63 }
 0x1fb   : > { %11724 = vmatpush3.msra.mxu1 %v15324_v14  ;;  %11679 = vmatprep.subr.mxu0 %v15306_v53 }
 0x1fc   : > { %11726 = vmatmul.mubr.f32.vlgmr.msra.gmra.mxu1 %v3829_v5  ;;  %11769 = vmatprep.subr.mxu1 %v15032_v52  ;;  %v18765_v5 = vld [vmem:[#allocation168_spill] sm:$0xff] }
 0x1fd   : > { %11680 = vmatpush3.msra.mxu0 %v15306_v53  ;;  %11728 = vmatprep.mubr.f32.mxu1 %v18762_v20  ;;  %v18774_v20 = vld [vmem:[#allocation212_spill] sm:$0xff]  ;;  %v15759_v53 = vpop.f32.mrf.mxu1 }
 0x1fe   : > { %11770 = vmatpush3.msra.mxu1 %v15032_v52  ;;  %11681 = vmatprep.subr.mxu0 %v15322_v47  ;;  %18798 = vst [vmem:[#allocation252_spill] sm:$0xff] %v15759_v53 }
 0x1ff   : > { %11771 = vmatprep.subr.mxu1 %v15040_v36  ;;  %11682 = vmatpush3.msra.mxu0 %v15322_v47 }
 0x200   : > { %11772 = vmatpush3.msra.mxu1 %v15040_v36  ;;  %11683 = vmatprep.subr.mxu0 %v15342_v54 }
 0x201   : > { %11729 = vmatmul.mubr.f32.gmra.mxu1 %v3849_v3  ;;  %11773 = vmatprep.subr.mxu1 %v15061_v55  ;;  %v18771_v3 = vld [vmem:[#allocation198_spill] sm:$0xff] }
 0x202   : > { %11684 = vmatpush3.msra.mxu0 %v15342_v54  ;;  %11774 = vmatpush3.msra.mxu1 %v15061_v55 }
 0x203   : > { %11801 = vmatprep.mubr.f32.mxu1 %v15459_v7  ;;  %11685 = vmatprep.subr.mxu0 %v15356_v27 }
 0x204   : > { %11775 = vmatprep.subr.mxu1 %v15072_v56  ;;  %11686 = vmatpush3.msra.mxu0 %v15356_v27 }
 0x205   : > { %11776 = vmatpush3.msra.mxu1 %v15072_v56  ;;  %11688 = vmatmul.mubr.f32.vlgmr.msra.gmra.mxu0 %v15485_v2  ;;  %v18764_v2 = vld [vmem:[#allocation166_spill] sm:$0xff] }
 0x206   : > { %11731 = vmatprep.subr.mxu0 %v15077_v18  ;;  %11777 = vmatprep.subr.mxu1 %v15104_v28 }
 0x207   : > { %11690 = vmatprep.mubr.f32.mxu0 %v15514_v58  ;;  %11732 = vmatpush3.msra.mxu0 %v15077_v18  ;;  %v18766_v58 = vld [vmem:[#allocation177_spill] sm:$0xff] }
 0x208   : > { %11778 = vmatpush3.msra.mxu1 %v15104_v28  ;;  %11733 = vmatprep.subr.mxu0 %v18763_v6 }
 0x209   : > { %11779 = vmatprep.subr.mxu1 %v15117_v57  ;;  %11734 = vmatpush3.msra.mxu0 %v18763_v6 }
 0x20a   : > { %11780 = vmatpush3.msra.mxu1 %v15117_v57  ;;  %11691 = vmatmul.mubr.f32.gmra.mxu0 %v15525_v22  ;;  %v18769_v22 = vld [vmem:[#allocation190_spill] sm:$0xff] }
 0x20b   : > { %11735 = vmatprep.subr.mxu0 %v18764_v2  ;;  %11781 = vmatprep.subr.mxu1 %v15143_v34 }
 0x20c   : > { %11736 = vmatpush3.msra.mxu0 %v18764_v2  ;;  %11763 = vmatprep.mubr.f32.mxu0 %v15459_v7  ;;  %v18768_v7 = vld [vmem:[#allocation185_spill] sm:$0xff] }
 0x20d   : > { %11782 = vmatpush3.msra.mxu1 %v15143_v34  ;;  %11737 = vmatprep.subr.mxu0 %v18765_v5 }
 0x20e   : > { %11783 = vmatprep.subr.mxu1 %v15158_v10  ;;  %11738 = vmatpush3.msra.mxu0 %v18765_v5 }
 0x20f   : > { %11784 = vmatpush3.msra.mxu1 %v15158_v10  ;;  %11739 = vmatprep.subr.mxu0 %v18766_v58 }
 0x210   : > { %11785 = vmatprep.subr.mxu1 %v15191_v17  ;;  %11740 = vmatpush3.msra.mxu0 %v18766_v58 }
 0x211   : > { %11786 = vmatpush3.msra.mxu1 %v15191_v17  ;;  %11741 = vmatprep.subr.mxu0 %v18767_v48 }
 0x212   : > { %11787 = vmatprep.subr.mxu1 %v15207_v25  ;;  %11742 = vmatpush3.msra.mxu0 %v18767_v48 }
 0x213   : > { %11788 = vmatpush3.msra.mxu1 %v15207_v25  ;;  %11743 = vmatprep.subr.mxu0 %v18768_v7 }
 0x214   : > { %11789 = vmatprep.subr.mxu1 %v15228_v42  ;;  %11744 = vmatpush3.msra.mxu0 %v18768_v7 }
 0x215   : > { %11790 = vmatpush3.msra.mxu1 %v15228_v42  ;;  %11745 = vmatprep.subr.mxu0 %v18769_v22 }
 0x216   : > { %11791 = vmatprep.subr.mxu1 %v15245_v8  ;;  %11746 = vmatpush3.msra.mxu0 %v18769_v22 }
 0x217   : > { %11792 = vmatpush3.msra.mxu1 %v15245_v8  ;;  %11747 = vmatprep.subr.mxu0 %v18770_v40 }
 0x218   : > { %11793 = vmatprep.subr.mxu1 %v15268_v60  ;;  %11748 = vmatpush3.msra.mxu0 %v18770_v40 }
 0x219   : > { %11794 = vmatpush3.msra.mxu1 %v15268_v60  ;;  %11749 = vmatprep.subr.mxu0 %v18771_v3 }
 0x21a   : > { %11795 = vmatprep.subr.mxu1 %v15285_v32  ;;  %11750 = vmatpush3.msra.mxu0 %v18771_v3 }
 0x21b   : > { %11796 = vmatpush3.msra.mxu1 %v15285_v32  ;;  %11751 = vmatprep.subr.mxu0 %v18772_v26 }
 0x21c   : > { %11797 = vmatprep.subr.mxu1 %v15308_v33  ;;  %11752 = vmatpush3.msra.mxu0 %v18772_v26  ;;  %v10635_v13 = vpop.f32.mrf.mxu1 }
 0x21d   : > { %11798 = vmatpush3.msra.mxu1 %v15308_v33  ;;  %11753 = vmatprep.subr.mxu0 %v18773_v45 }
 0x21e   : > { %11799 = vmatprep.subr.mxu1 %v15324_v14  ;;  %11754 = vmatpush3.msra.mxu0 %v18773_v45  ;;  %v4507_v45 = vld [vmem:[%s17491_s6 + $0x8] sm:$0xff] }
 0x21f   : > { %11800 = vmatpush3.msra.mxu1 %v15324_v14  ;;  %11755 = vmatprep.subr.mxu0 %v18774_v20  ;;  %v15706_v3 = vand.u32 4294901760, %v4507_v45 }
 0x220   : > { %11802 = vmatmul.mubr.f32.vlgmr.msra.gmra.mxu1 %v15477_v0  ;;  %11756 = vmatpush3.msra.mxu0 %v18774_v20 }
 0x221   : > { %11804 = vmatprep.mubr.f32.mxu1 %v15500_v29  ;;  %11757 = vmatprep.subr.mxu0 %v18775_v16  ;;  %18785 = vst [vmem:[#allocation239_spill] sm:$0xff] %v15706_v3  ;;  %v15727_v58 = vsub.f32 %v4507_v45, %v15706_v3 }
 0x222   : > { %11758 = vmatpush3.msra.mxu0 %v18775_v16 }
 0x223   : > { %11759 = vmatprep.subr.mxu0 %v15371_v59  ;;  %18790 = vst [vmem:[#allocation244_spill] sm:$0xff] %v15727_v58  ;;  %v15744_v45 = vand.u32 4294901760, %v15727_v58 }
 0x224   : > { %11805 = vmatmul.mubr.f32.gmra.mxu1 %v15518_v15  ;;  %11760 = vmatpush3.msra.mxu0 %v15371_v59  ;;  %v15677_v59 = vand.u32 4294901760, %v4512_v49 }
 0x225   : > { %11761 = vmatprep.subr.mxu0 %v15382_v51  ;;  %4737 = vmatprep.mubr.f32.mxu1 %v18776_v12  ;;  %18794 = vst [vmem:[#allocation248_spill] sm:$0xff] %v15744_v45  ;;  %v4696_v47 = vsub.f32 %v15727_v58, %v15744_v45 }
 0x226   : > { %11762 = vmatpush3.msra.mxu0 %v15382_v51  ;;  %18778 = vst [vmem:[#allocation145_spill] sm:$0xff] %v15677_v59  ;;  %v4509_v51 = vld [vmem:[%s17491_s6 + $0x18] sm:$0xff]  ;;  %v15692_v16 = vsub.f32 %v4512_v49, %v15677_v59  ;;  %v4506_v49 = vld [vmem:[%s17491_s6] sm:$0xff] }
 0x227   : > { %11764 = vmatmul.mubr.f32.vlgmr.msra.gmra.mxu0 %v15477_v0  ;;  %v4510_v0 = vld [vmem:[%s17491_s6 + $0x20] sm:$0xff]  ;;  %4555 = vmatprep.subr.mxu0 %v15672_v41  ;;  %v15694_v20 = vand.u32 4294901760, %v4509_v51  ;;  %v15718_v7 = vand.u32 4294901760, %v4506_v49  ;;  %v15767_v63 = vand.u32 4294901760, %v4696_v47 }
 0x228   : > { %11766 = vmatprep.mubr.f32.mxu0 %v15500_v29  ;;  %v15683_v29 = vsub.f32 %v4513_v62, %v15672_v41  ;;  %18781 = vst [vmem:[#allocation235_spill] sm:$0xff] %v15692_v16  ;;  %4557 = vmatpush1.msra.mxu0 %v15677_v59  ;;  %v15713_v40 = vand.u32 4294901760, %v15692_v16 }
 0x229   : > { %18782 = vst [vmem:[#allocation236_spill] sm:$0xff] %v15694_v20  ;;  %v15716_v22 = vsub.f32 %v4509_v51, %v15694_v20  ;;  %18788 = vst [vmem:[#allocation242_spill] sm:$0xff] %v15718_v7  ;;  %v15736_v2 = vsub.f32 %v4506_v49, %v15718_v7 }
 0x22a   : > { %18779 = vst [vmem:[#allocation233_spill] sm:$0xff] %v15683_v29  ;;  %v15701_v62 = vand.u32 4294901760, %v15683_v29  ;;  %18786 = vst [vmem:[#allocation240_spill] sm:$0xff] %v15713_v40  ;;  %v4678_v5 = vsub.f32 %v15692_v16, %v15713_v40 }
 0x22b   : > { %11767 = vmatmul.mubr.f32.gmra.mxu0 %v15518_v15  ;;  %v15685_v15 = vand.u32 4294901760, %v4510_v0  ;;  %18787 = vst [vmem:[#allocation241_spill] sm:$0xff] %v15716_v22  ;;  %v15733_v51 = vand.u32 4294901760, %v15716_v22  ;;  %18792 = vst [vmem:[#allocation246_spill] sm:$0xff] %v15736_v2  ;;  %v15752_v49 = vand.u32 4294901760, %v15736_v2 }
 0x22c   : > { %4598 = vmatprep.mubr.f32.mxu0 %v18776_v12  ;;  %18783 = vst [vmem:[#allocation237_spill] sm:$0xff] %v15701_v62  ;;  %v15747_v27 = vand.u32 4294901760, %v4678_v5  ;;  %18800 = vst [vmem:[#allocation254_spill] sm:$0xff] %v15767_v63 }
 0x22d   : > { %18780 = vst [vmem:[#allocation234_spill] sm:$0xff] %v15685_v15  ;;  %v15704_v26 = vsub.f32 %v4510_v0, %v15685_v15  ;;  %4559 = vmatprep.subr.mxu0 %v15685_v15  ;;  %v4672_v0 = vsub.f32 %v15683_v29, %v15701_v62  ;;  %18791 = vst [vmem:[#allocation245_spill] sm:$0xff] %v15733_v51  ;;  %v4690_v54 = vsub.f32 %v15716_v22, %v15733_v51 }
 0x22e   : > { %4561 = vmatpush1.msra.mxu0 %v15694_v20  ;;  %18795 = vst [vmem:[#allocation249_spill] sm:$0xff] %v15747_v27  ;;  %18796 = vst [vmem:[#allocation250_spill] sm:$0xff] %v15752_v49  ;;  %v4702_v5 = vsub.f32 %v15736_v2, %v15752_v49 }
 0x22f   : > { %18784 = vst [vmem:[#allocation238_spill] sm:$0xff] %v15704_v26  ;;  %v15724_v48 = vand.u32 4294901760, %v15704_v26  ;;  %4563 = vmatprep.subr.mxu0 %v15706_v3  ;;  %v15739_v6 = vand.u32 4294901760, %v4672_v0 }
 0x230   : > { %4565 = vmatpush1.msra.mxu0 %v15718_v7 }
 0x231   : > { %18789 = vst [vmem:[#allocation243_spill] sm:$0xff] %v15724_v48  ;;  %18793 = vst [vmem:[#allocation247_spill] sm:$0xff] %v15739_v6  ;;  %v4684_v18 = vsub.f32 %v15704_v26, %v15724_v48  ;;  %4794 = vmatprep.subr.mxu0 %v15683_v29  ;;  %4674 = vmatprep.subr.mxu1 %v15739_v6  ;;  %v15762_v29 = vand.u32 4294901760, %v4690_v54  ;;  %v15773_v6 = vpop.f32.mrf.mxu0  ;;  %v10636_v54 = vpop.f32.mrf.mxu1 }
 0x232   : > { %4680 = vmatpush1.msra.mxu1 %v15747_v27  ;;  %18802 = vst [vmem:[#allocation256_spill] sm:$0xff] %v15773_v6  ;;  %v10637_v58 = vadd.f32 %v10636_v54, %v10635_v13 }
 0x233   : > { %v15755_v0 = vand.u32 4294901760, %v4684_v18  ;;  %18799 = vst [vmem:[#allocation253_spill] sm:$0xff] %v15762_v29  ;;  %v15770_v18 = vand.u32 4294901760, %v4702_v5  ;;  %v10591_v53 = vpop.f32.mrf.mxu0 }
 0x235   : > { %18797 = vst [vmem:[#allocation251_spill] sm:$0xff] %v15755_v0  ;;  %4686 = vmatprep.subr.mxu1 %v15755_v0  ;;  %18801 = vst [vmem:[#allocation255_spill] sm:$0xff] %v15770_v18  ;;  %v10638_v27 = vpop.f32.mrf.mxu1  ;;  %v10592_v19 = vpop.f32.mrf.mxu0 }
 0x236   : > { %4692 = vmatpush1.msra.mxu1 %v15762_v29  ;;  %v10593_v48 = vadd.f32 %v10592_v19, %v10591_v53 }
 0x237   : > { %4698 = vmatprep.subr.mxu1 %v15767_v63  ;;  %v10639_v0 = vpop.f32.mrf.mxu1 }
 0x238   : > { %4704 = vmatpush1.msra.mxu1 %v15770_v18  ;;  %v10640_v62 = vadd.f32 %v10639_v0, %v10638_v27  ;;  %v3092_v3 = vadd.f32 %v10637_v58, %v10593_v48 }
 0x239   : > { %4902 = vmatprep.subr.mxu1 %v15672_v41 }
 0x23c   : > { %v10641_v21 = vpop.f32.mrf.mxu1 }
 0x23e   : > { %v10642_v4 = vpop.f32.mrf.mxu1 }
 0x23f   : > { %v10594_v47 = vpop.f32.mrf.mxu0 }
 0x240   : > { %v10644_v5 = vpop.f32.mrf.mxu1 }
 0x241   : > { %v10595_v31 = vpop.f32.mrf.mxu0 }
 0x242   : > { %v10645_v61 = vpop.f32.mrf.mxu1  ;;  %v10596_v51 = vadd.f32 %v10595_v31, %v10594_v47  ;;  %v10643_v31 = vadd.f32 %v10642_v4, %v10641_v21 }
 0x243   : > { %v10646_v15 = vadd.f32 %v10645_v61, %v10644_v5 }
 0x244   : > { %v10597_v29 = vpop.f32.mrf.mxu0  ;;  %v10723_v23 = vpop.f32.mrf.mxu1  ;;  %v3099_v41 = vadd.f32 %v10640_v62, %v10596_v51 }
 0x246   : > { %v10598_v39 = vpop.f32.mrf.mxu0  ;;  %v10724_v30 = vpop.f32.mrf.mxu1 }
 0x247   : > { %v10599_v59 = vadd.f32 %v10598_v39, %v10597_v29 }
 0x248   : > { %v10600_v63 = vpop.f32.mrf.mxu0 }
 0x24a   : > { %v10601_v6 = vpop.f32.mrf.mxu0  ;;  %v10726_v9 = vpop.f32.mrf.mxu1 }
 0x24b   : > { %v10602_v7 = vadd.f32 %v10601_v6, %v10600_v63 }
 0x24c   : > { %v10727_v14 = vpop.f32.mrf.mxu1 }
 0x24d   : > { %v3113_v53 = vadd.f32 %v10646_v15, %v10602_v7  ;;  %v10728_v0 = vadd.f32 %v10727_v14, %v10726_v9 }
 0x24e   : > { %v10679_v18 = vpop.f32.mrf.mxu0 }
 0x24f   : > { %v10729_v32 = vpop.f32.mrf.mxu1 }
 0x250   : > { %v10680_v46 = vpop.f32.mrf.mxu0 }
 0x251   : > { %v10730_v44 = vpop.f32.mrf.mxu1  ;;  %v10681_v22 = vadd.f32 %v10680_v46, %v10679_v18  ;;  %v3106_v18 = vadd.f32 %v10643_v31, %v10599_v59 }
 0x253   : > { %v3251_v47 = vadd.f32 %v10681_v22, %v3092_v3 }
 0x254   : > { %v10682_v33 = vpop.f32.mrf.mxu0 }
 0x255   : > { %v10732_v37 = vpop.f32.mrf.mxu1 }
 0x256   : > { %v10683_v60 = vpop.f32.mrf.mxu0 }
 0x257   : > { %v10733_v50 = vpop.f32.mrf.mxu1  ;;  %v10684_v2 = vadd.f32 %v10683_v60, %v10682_v33  ;;  %v10725_v60 = vadd.f32 %v10724_v30, %v10723_v23 }
 0x258   : > { %v10734_v61 = vadd.f32 %v10733_v50, %v10732_v37 }
 0x259   : > { %v3260_v12 = vadd.f32 %v10684_v2, %v3099_v41  ;;  %v3386_v6 = vadd.f32 %v10725_v60, %v3251_v47 }
 0x25a   : > { %v10685_v8 = vpop.f32.mrf.mxu0 }
 0x25b   : > { %v3397_v63 = vadd.f32 %v10728_v0, %v3260_v12 }
 0x25c   : > { %v10686_v42 = vpop.f32.mrf.mxu0 }
 0x25d   : > { %v10687_v27 = vadd.f32 %v10686_v42, %v10685_v8 }
 0x25f   : > { %v10688_v25 = vpop.f32.mrf.mxu0  ;;  %v3269_v39 = vadd.f32 %v10687_v27, %v3106_v18 }
 0x261   : > { %v10689_v17 = vpop.f32.mrf.mxu0 }
 0x26d   : > { %v10811_v43 = vpop.f32.mrf.mxu1 }
 0x26f   : > { %v10812_v1 = vpop.f32.mrf.mxu1 }
 0x270   : > { %v10813_v30 = vadd.f32 %v10812_v1, %v10811_v43 }
 0x271   : > { %v10814_v11 = vpop.f32.mrf.mxu1 }
 0x273   : > { %v10815_v24 = vpop.f32.mrf.mxu1 }
 0x274   : > { %v10816_v21 = vadd.f32 %v10815_v24, %v10814_v11 }
 0x276   : > { %v10767_v10 = vpop.f32.mrf.mxu0  ;;  %v15777_v35 = vpop.f32.mrf.mxu1 }
 0x277   : > { %18803 = vst [vmem:[#allocation257_spill] sm:$0xff] %v15777_v35  ;;  %v10690_v35 = vadd.f32 %v10689_v17, %v10688_v25  ;;  %v10731_v25 = vadd.f32 %v10730_v44, %v10729_v32 }
 0x278   : > { %v10768_v34 = vpop.f32.mrf.mxu0  ;;  %v10818_v56 = vpop.f32.mrf.mxu1 }
 0x279   : > { %v3278_v54 = vadd.f32 %v10690_v35, %v3113_v53  ;;  %v10769_v62 = vadd.f32 %v10768_v34, %v10767_v10  ;;  %v3408_v23 = vadd.f32 %v10731_v25, %v3269_v39  ;;  %v18805_v25 = vmov 0.0  }
 0x27b   : > { %v10770_v57 = vpop.f32.mrf.mxu0  ;;  %v3587_v2 = vadd.f32 %v10769_v62, %v3386_v6  ;;  %v3419_v8 = vadd.f32 %v10734_v61, %v3278_v54 }
 0x27c   : > { %v10820_v36 = vpop.f32.mrf.mxu1 }
 0x27d   : > { %v10771_v28 = vpop.f32.mrf.mxu0  ;;  %v3712_v12 = vadd.f32 %v10813_v30, %v3587_v2 }
 0x27e   : > { %v10821_v38 = vpop.f32.mrf.mxu1  ;;  %v10772_v33 = vadd.f32 %v10771_v28, %v10770_v57  ;;  %v18804_v35 = vld [vmem:[#allocation257_spill] sm:$0xff] }
 0x27f   : > { %v10822_v34 = vadd.f32 %v10821_v38, %v10820_v36  ;;  %v10819_v48 = vadd.f32 %v10818_v56, %v18804_v35  ;;  %v18812_v35 = vld [vmem:[#allocation235_spill] sm:$0xff] }
 0x280   : > { %v3594_v41 = vadd.f32 %v10772_v33, %v3397_v63 }
 0x281   : > { %v10773_v55 = vpop.f32.mrf.mxu0 }
 0x282   : > { %v3719_v14 = vadd.f32 %v10816_v21, %v3594_v41 }
 0x283   : > { %v10774_v52 = vpop.f32.mrf.mxu0 }
 0x284   : > { %v10775_v9 = vadd.f32 %v10774_v52, %v10773_v55 }
 0x286   : > { %v10776_v49 = vpop.f32.mrf.mxu0  ;;  %v3601_v10 = vadd.f32 %v10775_v9, %v3408_v23 }
 0x288   : > { %v10777_v40 = vpop.f32.mrf.mxu0  ;;  %v3726_v11 = vadd.f32 %v10819_v48, %v3601_v10 }
 0x289   : > { %v10778_v17 = vadd.f32 %v10777_v40, %v10776_v49 }
 0x28b   : > { %v3608_v57 = vadd.f32 %v10778_v17, %v3419_v8 }
 0x28d   : > { %v3733_v44 = vadd.f32 %v10822_v34, %v3608_v57  ;;  %v18809_v57 = vld [vmem:[#allocation239_spill] sm:$0xff] }
 0x299   : > { %v11651_v45 = vpop.f32.mrf.mxu1 }
 0x29b   : > { %v4004_v26 = vpop.f32.mrf.mxu1 }
 0x2a1   : > { %v11613_v16 = vpop.f32.mrf.mxu0 }
 0x2a2   : > { %v11654_v20 = vpop.f32.mrf.mxu1  ;;  %v3834_v59 = vadd.f32 %v11613_v16, %v3719_v14  ;;  %v18810_v14 = vld [vmem:[#allocation242_spill] sm:$0xff] }
 0x2a3   : > { %v3823_v19 = vpop.f32.mrf.mxu0 }
 0x2a4   : > { %v4016_v13 = vpop.f32.mrf.mxu1  ;;  %v3824_v32 = vadd.f32 %v3823_v19, %v3712_v12  ;;  %v4011_v52 = vadd.f32 %v11651_v45, %v3834_v59 }
 0x2a6   : > { %v4005_v43 = vadd.f32 %v4004_v26, %v3824_v32  ;;  %v18813_v32 = vld [vmem:[#allocation238_spill] sm:$0xff] }
 0x2ab   : > { %v11616_v46 = vpop.f32.mrf.mxu0 }
 0x2ac   : > { %v3854_v24 = vadd.f32 %v11616_v46, %v3733_v44 }
 0x2ad   : > { %v3843_v4 = vpop.f32.mrf.mxu0 }
 0x2ae   : > { %v3844_v22 = vadd.f32 %v3843_v4, %v3726_v11  ;;  %v4023_v36 = vadd.f32 %v11654_v20, %v3854_v24  ;;  %v18806_v4 = vld [vmem:[#allocation145_spill] sm:$0xff] }
 0x2b0   : > { %v4017_v29 = vadd.f32 %v4016_v13, %v3844_v22  ;;  %v18816_v22 = vld [vmem:[#allocation244_spill] sm:$0xff] }
 0x2bc   : > { %v11727_v58 = vpop.f32.mrf.mxu1 }
 0x2be   : > { %v4236_v42 = vpop.f32.mrf.mxu1 }
 0x2c1   : > { %v11730_v50 = vpop.f32.mrf.mxu1 }
 0x2c3   : > { %v4252_v55 = vpop.f32.mrf.mxu1 }
 0x2c5   : > { %v11689_v28 = vpop.f32.mrf.mxu0 }
 0x2c6   : > { %v4134_v1 = vadd.f32 %v11689_v28, %v4011_v52  ;;  %v18808_v28 = vld [vmem:[#allocation236_spill] sm:$0xff]  ;;  %v18815_v52 = vld [vmem:[#allocation241_spill] sm:$0xff] }
 0x2c7   : > { %v4126_v37 = vpop.f32.mrf.mxu0 }
 0x2c8   : > { %v4127_v3 = vadd.f32 %v4126_v37, %v4005_v43  ;;  %v4245_v15 = vadd.f32 %v11727_v58, %v4134_v1  ;;  %v4514_v37 = vld [vmem:[%s17491_s6 + $0x40] sm:$0xff] }
 0x2c9   : > { %v15845_v11 = vand.u32 4294901760, %v4514_v37 }
 0x2ca   : > { %v11692_v7 = vpop.f32.mrf.mxu0  ;;  %v4237_v31 = vadd.f32 %v4236_v42, %v4127_v3  ;;  %v18807_v42 = vld [vmem:[#allocation234_spill] sm:$0xff] }
 0x2cb   : > { %v4148_v16 = vadd.f32 %v11692_v7, %v4023_v36  ;;  %18814 = vst [vmem:[#allocation257_spill] sm:$0xff] %v15845_v11  ;;  %v15861_v43 = vsub.f32 %v4514_v37, %v15845_v11  ;;  %v4508_v36 = vld [vmem:[%s17491_s6 + $0x10] sm:$0xff] }
 0x2cc   : > { %v4140_v38 = vpop.f32.mrf.mxu0  ;;  %v18857_v37 = vld [vmem:[#allocation4_spill] sm:$0xff] }
 0x2cd   : > { %v4141_v56 = vadd.f32 %v4140_v38, %v4017_v29  ;;  %v4261_v53 = vadd.f32 %v11730_v50, %v4148_v16  ;;  %v18811_v50 = vld [vmem:[#allocation141_spill] sm:$0xff]  ;;  %18817 = vst [vmem:[#allocation258_spill] sm:$0xff] %v15861_v43  ;;  %v15878_v29 = vand.u32 4294901760, %v15861_v43 }
 0x2ce   : > { %v18820_v16 = vld [vmem:[#allocation237_spill] sm:$0xff] }
 0x2cf   : > { %v4253_v60 = vadd.f32 %v4252_v55, %v4141_v56  ;;  %v4511_v55 = vld [vmem:[%s17491_s6 + $0x28] sm:$0xff]  ;;  %18821 = vst [vmem:[#allocation260_spill] sm:$0xff] %v15878_v29 }
 0x2d0   : > { %v15864_v3 = vand.u32 4294901760, %v4511_v55 }
 0x2d2   : > { %18819 = vst [vmem:[#allocation259_spill] sm:$0xff] %v15864_v3 }
 0x2e0   : > { %v11803_v40 = vpop.f32.mrf.mxu1 }
 0x2e2   : > { %v4484_v51 = vpop.f32.mrf.mxu1 }
 0x2e4   : > { %v11806_v0 = vpop.f32.mrf.mxu1 }
 0x2e6   : > { %v4496_v63 = vpop.f32.mrf.mxu1 }
 0x2e7   : > { %v11765_v49 = vpop.f32.mrf.mxu0 }
 0x2e8   : > { %v4386_v5 = vadd.f32 %v11765_v49, %v4245_v15  ;;  %v15882_v15 = vsub.f32 %v4511_v55, %v15864_v3  ;;  %v5330_v49 = vsub.f32 %v15861_v43, %v15878_v29  ;;  %v18861_v55 = vld [vmem:[#allocation25_spill] sm:$0xff] }
 0x2e9   : > { %v4379_v47 = vpop.f32.mrf.mxu0 }
 0x2ea   : > { %v4491_v45 = vadd.f32 %v11803_v40, %v4386_v5  ;;  %v4380_v19 = vadd.f32 %v4379_v47, %v4237_v31  ;;  %v18818_v40 = vld [vmem:[#allocation246_spill] sm:$0xff]  ;;  %18822 = vst [vmem:[#allocation261_spill] sm:$0xff] %v15882_v15  ;;  %v15895_v56 = vand.u32 4294901760, %v15882_v15  ;;  %v18826_v31 = vld [vmem:[#allocation240_spill] sm:$0xff]  ;;  %v18827_v47 = vld [vmem:[#allocation243_spill] sm:$0xff] }
 0x2eb   : > { %v11768_v27 = vpop.f32.mrf.mxu0 }
 0x2ec   : > { %v4520_v26 = vsel %vm4515_vm0, %v4491_v45, 0  ;;  %v4485_v33 = vadd.f32 %v4484_v51, %v4380_v19  ;;  %v4398_v20 = vadd.f32 %v11768_v27, %v4261_v53  ;;  %v15884_v51 = vand.u32 4294901760, %v4508_v36  ;;  %18824 = vst [vmem:[#allocation263_spill] sm:$0xff] %v15895_v56  ;;  %v18829_v19 = vld [vmem:[#allocation245_spill] sm:$0xff]  ;;  %v18831_v27 = vld [vmem:[#allocation248_spill] sm:$0xff] }
 0x2ed   : > { %v15781_v46 = vand.u32 4294901760, %v4520_v26  ;;  %v4391_v13 = vpop.f32.mrf.mxu0  ;;  %v15906_v45 = vand.u32 4294901760, %v5330_v49  ;;  %v5337_v53 = vsub.f32 %v15882_v15, %v15895_v56  ;;  %v18866_v49 = vld [vmem:[#allocation108_spill] sm:$0xff] }
 0x2ee   : > { %v4517_v18 = vsel %vm4515_vm0, %v4485_v33, 0  ;;  %v4503_v54 = vadd.f32 %v11806_v0, %v4398_v20  ;;  %v4392_v62 = vadd.f32 %v4391_v13, %v4253_v60  ;;  %18823 = vst [vmem:[#allocation262_spill] sm:$0xff] %v15884_v51  ;;  %v15898_v5 = vsub.f32 %v4508_v36, %v15884_v51  ;;  %v18835_v13 = vld [vmem:[#allocation19_spill] sm:$0xff]  ;;  %v18864_v36 = vld [vmem:[#allocation105_spill] sm:$0xff] }
 0x2ef   : > { %v15785_v6 = vsub.f32 %v4520_v26, %v15781_v46  ;;  %v15787_v58 = vand.u32 4294901760, %v4517_v18  ;;  %18828 = vst [vmem:[#allocation265_spill] sm:$0xff] %v15906_v45  ;;  %v18832_v26 = vld [vmem:[#allocation250_spill] sm:$0xff]  ;;  %v15922_v33 = vand.u32 4294901760, %v5337_v53  ;;  %v18867_v53 = vld [vmem:[#allocation16_spill] sm:$0xff] }
 0x2f0   : > { %v4526_v61 = vsel %vm4515_vm0, %v4503_v54, 0  ;;  %v4497_v39 = vadd.f32 %v4496_v63, %v4392_v62  ;;  %18825 = vst [vmem:[#allocation264_spill] sm:$0xff] %v15898_v5  ;;  %v15913_v0 = vand.u32 4294901760, %v15898_v5  ;;  %v18837_v54 = vld [vmem:[#allocation45_spill] sm:$0xff]  ;;  %v18838_v62 = vld [vmem:[#allocation48_spill] sm:$0xff]  ;;  %v18839_v63 = vld [vmem:[#allocation31_spill] sm:$0xff] }
 0x2f1   : > { %v15791_v41 = vsub.f32 %v4517_v18, %v15787_v58  ;;  %4739 = vmatmul.mubr.f32.vlgmr.msra.gmra.mxu1 %v15787_v58  ;;  %v15800_v2 = vand.u32 4294901760, %v4526_v61  ;;  %v15805_v8 = vand.u32 4294901760, %v15785_v6  ;;  %18833 = vst [vmem:[#allocation267_spill] sm:$0xff] %v15922_v33  ;;  %v18836_v18 = vld [vmem:[#allocation42_spill] sm:$0xff] }
 0x2f2   : > { %v4523_v17 = vsel %vm4515_vm0, %v4497_v39, 0  ;;  %4744 = vmatprep.mubr.f32.mxu1 %v18805_v25  ;;  %4904 = vmatpush1.msra.mxu1 %v18806_v4  ;;  %18830 = vst [vmem:[#allocation266_spill] sm:$0xff] %v15913_v0  ;;  %v5344_v20 = vsub.f32 %v15898_v5, %v15913_v0  ;;  %v18843_v39 = vld [vmem:[#allocation56_spill] sm:$0xff] }
 0x2f3   : > { %v15798_v21 = vand.u32 4294901760, %v15791_v41  ;;  %v15802_v9 = vand.u32 4294901760, %v4523_v17  ;;  %4906 = vmatprep.subr.mxu1 %v18807_v42  ;;  %v15819_v34 = vsub.f32 %v4526_v61, %v15800_v2  ;;  %v4613_v59 = vsub.f32 %v15785_v6, %v15805_v8  ;;  %v18841_v61 = vld [vmem:[#allocation53_spill] sm:$0xff] }
 0x2f4   : > { %4908 = vmatpush1.msra.mxu1 %v18808_v28  ;;  %v15933_v60 = vand.u32 4294901760, %v5344_v20  ;;  %v18868_v20 = vld [vmem:[#allocation111_spill] sm:$0xff] }
 0x2f5   : > { %v15810_v30 = vsub.f32 %v4523_v17, %v15802_v9  ;;  %4746 = vmatmul.mubr.f32.gmra.mxu1 %v15781_v46  ;;  %v4602_v23 = vsub.f32 %v15791_v41, %v15798_v21  ;;  %4910 = vmatprep.subr.mxu1 %v18809_v57  ;;  %v15837_v48 = vand.u32 4294901760, %v4613_v59  ;;  %v15843_v24 = vand.u32 4294901760, %v15819_v34  ;;  %v18846_v17 = vld [vmem:[#allocation62_spill] sm:$0xff]  ;;  %v18855_v59 = vld [vmem:[#allocation17_spill] sm:$0xff] }
 0x2f6   : > { %4751 = vmatprep.mubr.f32.mxu1 %v18805_v25  ;;  %4912 = vmatpush1.msra.mxu1 %v18810_v14  ;;  %18834 = vst [vmem:[#allocation268_spill] sm:$0xff] %v15933_v60 }
 0x2f7   : > { %v15821_v10 = vand.u32 4294901760, %v4602_v23  ;;  %v15826_v12 = vand.u32 4294901760, %v15810_v30  ;;  %5120 = vmatprep.subr.mxu1 %v18811_v50  ;;  %v4635_v1 = vsub.f32 %v15819_v34, %v15843_v24  ;;  %v18851_v23 = vld [vmem:[#allocation15_spill] sm:$0xff] }
 0x2f9   : > { %4604 = vmatmul.mubr.f32.vlgmr.msra.gmra.mxu0 %v15821_v10  ;;  %4753 = vmatmul.mubr.f32.gmra.mxu1 %v15802_v9  ;;  %v4624_v44 = vsub.f32 %v15810_v30, %v15826_v12  ;;  %v15873_v38 = vand.u32 4294901760, %v4635_v1  ;;  %v18863_v1 = vld [vmem:[#allocation26_spill] sm:$0xff] }
 0x2fa   : > { %4797 = vmatpush1.msra.mxu0 %v18812_v35  ;;  %4609 = vmatprep.mubr.f32.mxu0 %v18805_v25 }
 0x2fb   : > { %4758 = vmatprep.mubr.f32.mxu1 %v18805_v25  ;;  %4800 = vmatprep.subr.mxu0 %v18813_v32  ;;  %v15855_v7 = vand.u32 4294901760, %v4624_v44  ;;  %v18859_v44 = vld [vmem:[#allocation22_spill] sm:$0xff] }
 0x2fc   : > { %4803 = vmatpush1.msra.mxu0 %v18815_v52 }
 0x2fd   : > { %4615 = vmatmul.mubr.f32.gmra.mxu0 %v15837_v48  ;;  %4760 = vmatmul.mubr.f32.gmra.mxu1 %v15800_v2 }
 0x2fe   : > { %4620 = vmatprep.mubr.f32.mxu0 %v18805_v25  ;;  %4945 = vmatprep.mubr.f32.mxu1 %v18805_v25 }
 0x2ff   : > { %4806 = vmatprep.subr.mxu0 %v18816_v22 }
 0x300   : > { %4809 = vmatpush1.msra.mxu0 %v18818_v40 }
 0x301   : > { %4626 = vmatmul.mubr.f32.gmra.mxu0 %v15855_v7  ;;  %4949 = vmatmul.mubr.f32.vlgmr.msra.gmra.mxu1 %v15798_v21 }
 0x302   : > { %4631 = vmatprep.mubr.f32.mxu0 %v18805_v25  ;;  %4954 = vmatprep.mubr.f32.mxu1 %v18805_v25 }
 0x303   : > { %5011 = vmatprep.subr.mxu0 %v18820_v16  ;;  %5122 = vmatpush1.msra.mxu1 %v18806_v4 }
 0x304   : > { %5124 = vmatprep.subr.mxu1 %v18807_v42 }
 0x305   : > { %4637 = vmatmul.mubr.f32.gmra.mxu0 %v15873_v38  ;;  %4958 = vmatmul.mubr.f32.gmra.mxu1 %v15805_v8 }
 0x306   : > { %4842 = vmatprep.mubr.f32.mxu0 %v18805_v25  ;;  %4963 = vmatprep.mubr.f32.mxu1 %v18805_v25 }
 0x307   : > { %5126 = vmatpush1.msra.mxu1 %v18808_v28 }
 0x308   : > { %5128 = vmatprep.subr.mxu1 %v18809_v57 }
 0x309   : > { %4845 = vmatmul.mubr.f32.vlgmr.msra.gmra.mxu0 %v15791_v41  ;;  %4967 = vmatmul.mubr.f32.gmra.mxu1 %v15826_v12 }
 0x30a   : > { %5015 = vmatpush1.msra.mxu0 %v18826_v31  ;;  %4850 = vmatprep.mubr.f32.mxu0 %v18805_v25 }
 0x30b   : > { %4972 = vmatprep.mubr.f32.mxu1 %v18805_v25  ;;  %5019 = vmatprep.subr.mxu0 %v18827_v47 }
 0x30c   : > { %5023 = vmatpush1.msra.mxu0 %v18829_v19  ;;  %5130 = vmatpush1.msra.mxu1 %v18810_v14 }
 0x30d   : > { %4853 = vmatmul.mubr.f32.gmra.mxu0 %v15785_v6  ;;  %4976 = vmatmul.mubr.f32.gmra.mxu1 %v15843_v24 }
 0x30e   : > { %4858 = vmatprep.mubr.f32.mxu0 %v18805_v25  ;;  %5163 = vmatprep.mubr.f32.mxu1 %v18805_v25 }
 0x30f   : > { %5027 = vmatprep.subr.mxu0 %v18831_v27  ;;  %11819 = vmatprep.subr.mxu1 %v15906_v45 }
 0x310   : > { %5031 = vmatpush1.msra.mxu0 %v18832_v26 }
 0x311   : > { %4861 = vmatmul.mubr.f32.gmra.mxu0 %v15810_v30  ;;  %5165 = vmatmul.mubr.f32.vlgmr.msra.gmra.mxu1 %v15787_v58 }
 0x312   : > { %4866 = vmatprep.mubr.f32.mxu0 %v18805_v25  ;;  %5170 = vmatprep.mubr.f32.mxu1 %v18805_v25 }
 0x313   : > { %11820 = vmatpush3.msra.mxu1 %v15906_v45  ;;  %11807 = vmatprep.subr.mxu0 %v15845_v11 }
 0x314   : > { %11821 = vmatprep.subr.mxu1 %v15922_v33 }
 0x315   : > { %4869 = vmatmul.mubr.f32.gmra.mxu0 %v15819_v34  ;;  %5172 = vmatmul.mubr.f32.gmra.mxu1 %v15781_v46 }
 0x316   : > { %5064 = vmatprep.mubr.f32.mxu0 %v18805_v25  ;;  %5177 = vmatprep.mubr.f32.mxu1 %v18805_v25 }
 0x317   : > { %11822 = vmatpush3.msra.mxu1 %v15922_v33 }
 0x318   : > { %11823 = vmatprep.subr.mxu1 %v15933_v60 }
 0x319   : > { %5066 = vmatmul.mubr.f32.vlgmr.msra.gmra.mxu0 %v15787_v58  ;;  %5179 = vmatmul.mubr.f32.gmra.mxu1 %v15802_v9 }
 0x31a   : > { %5071 = vmatprep.mubr.f32.mxu0 %v18805_v25  ;;  %5184 = vmatprep.mubr.f32.mxu1 %v18805_v25 }
 0x31b   : > { %11824 = vmatpush3.msra.mxu1 %v15933_v60  ;;  %11808 = vmatpush3.msra.mxu0 %v15845_v11 }
 0x31c   : > { %11843 = vmatprep.subr.mxu1 %v15845_v11  ;;  %11809 = vmatprep.subr.mxu0 %v15864_v3 }
 0x31d   : > { %5073 = vmatmul.mubr.f32.gmra.mxu0 %v15781_v46  ;;  %5186 = vmatmul.mubr.f32.gmra.mxu1 %v15800_v2 }
 0x31e   : > { %11825 = vmatprep.mubr.f32.mxu1 %v15787_v58  ;;  %5078 = vmatprep.mubr.f32.mxu0 %v18805_v25 }
 0x31f   : > { %11810 = vmatpush3.msra.mxu0 %v15864_v3 }
 0x320   : > { %11811 = vmatprep.subr.mxu0 %v15884_v51 }
 0x321   : > { %5080 = vmatmul.mubr.f32.gmra.mxu0 %v15802_v9  ;;  %11826 = vmatmul.mubr.f32.vlgmr.msra.gmra.mxu1 %v15781_v46 }
 0x322   : > { %11828 = vmatprep.mubr.f32.mxu1 %v15802_v9  ;;  %5085 = vmatprep.mubr.f32.mxu0 %v18805_v25 }
 0x323   : > { %11844 = vmatpush3.msra.mxu1 %v15845_v11  ;;  %11812 = vmatpush3.msra.mxu0 %v15884_v51 }
 0x324   : > { %11845 = vmatprep.subr.mxu1 %v15864_v3  ;;  %11831 = vmatprep.subr.mxu0 %v15861_v43 }
 0x325   : > { %5087 = vmatmul.mubr.f32.gmra.mxu0 %v15800_v2  ;;  %11829 = vmatmul.mubr.f32.gmra.mxu1 %v15800_v2 }
 0x326   : > { %11813 = vmatprep.mubr.f32.mxu0 %v15821_v10  ;;  %11846 = vmatpush3.msra.mxu1 %v15864_v3  ;;  %v18854_v10 = vld [vmem:[#allocation75_spill] sm:$0xff] }
 0x327   : > { %11849 = vmatprep.mubr.f32.mxu1 %v15798_v21  ;;  %11847 = vmatprep.subr.mxu1 %v15884_v51  ;;  %v18847_v21 = vld [vmem:[#allocation9_spill] sm:$0xff] }
 0x328   : > { %11848 = vmatpush3.msra.mxu1 %v15884_v51 }
 0x329   : > { %11814 = vmatmul.mubr.f32.vlgmr.msra.gmra.mxu0 %v15837_v48  ;;  %11850 = vmatmul.mubr.f32.vlgmr.msra.gmra.mxu1 %v15805_v8  ;;  %v18849_v8 = vld [vmem:[#allocation2_spill] sm:$0xff]  ;;  %v18858_v48 = vld [vmem:[#allocation85_spill] sm:$0xff] }
 0x32a   : > { %11816 = vmatprep.mubr.f32.mxu0 %v15855_v7  ;;  %11852 = vmatprep.mubr.f32.mxu1 %v15826_v12  ;;  %v18856_v12 = vld [vmem:[#allocation78_spill] sm:$0xff] }
 0x32b   : > { %11867 = vmatprep.subr.mxu1 %v15845_v11  ;;  %11832 = vmatpush3.msra.mxu0 %v15861_v43  ;;  %v18862_v7 = vld [vmem:[#allocation102_spill] sm:$0xff] }
 0x32c   : > { %11868 = vmatpush3.msra.mxu1 %v15845_v11  ;;  %11833 = vmatprep.subr.mxu0 %v15882_v15 }
 0x32d   : > { %11817 = vmatmul.mubr.f32.gmra.mxu0 %v15873_v38  ;;  %11853 = vmatmul.mubr.f32.gmra.mxu1 %v15843_v24  ;;  %v18860_v24 = vld [vmem:[#allocation89_spill] sm:$0xff]  ;;  %v18865_v38 = vld [vmem:[#allocation32_spill] sm:$0xff] }
 0x32e   : > { %11869 = vmatprep.subr.mxu1 %v15864_v3  ;;  %11834 = vmatpush3.msra.mxu0 %v15882_v15 }
 0x32f   : > { %11837 = vmatprep.mubr.f32.mxu0 %v15791_v41  ;;  %11870 = vmatpush3.msra.mxu1 %v15864_v3  ;;  %v18844_v41 = vld [vmem:[#allocation59_spill] sm:$0xff] }
 0x330   : > { %11873 = vmatprep.mubr.f32.mxu1 %v15787_v58  ;;  %11835 = vmatprep.subr.mxu0 %v15898_v5 }
 0x331   : > { %11871 = vmatprep.subr.mxu1 %v15884_v51  ;;  %11836 = vmatpush3.msra.mxu0 %v15898_v5 }
 0x332   : > { %11872 = vmatpush3.msra.mxu1 %v15884_v51  ;;  %11838 = vmatmul.mubr.f32.vlgmr.msra.gmra.mxu0 %v15785_v6  ;;  %v18840_v6 = vld [vmem:[#allocation28_spill] sm:$0xff] }
 0x333   : > { %11874 = vmatmul.mubr.f32.vlgmr.msra.gmra.mxu1 %v15781_v46  ;;  %11840 = vmatprep.mubr.f32.mxu0 %v15810_v30  ;;  %v18850_v30 = vld [vmem:[#allocation68_spill] sm:$0xff] }
 0x334   : > { %11876 = vmatprep.mubr.f32.mxu1 %v15802_v9  ;;  %11855 = vmatprep.subr.mxu0 %v15878_v29 }
 0x335   : > { %11856 = vmatpush3.msra.mxu0 %v15878_v29  ;;  %11029 = vmatprep.subr.mxu1 %v18835_v13  ;;  %v18869_v13 = vld [vmem:[#allocation10_spill] sm:$0xff] }
 0x336   : > { %11841 = vmatmul.mubr.f32.gmra.mxu0 %v15819_v34  ;;  %11857 = vmatprep.subr.mxu0 %v15895_v56  ;;  %v18852_v34 = vld [vmem:[#allocation72_spill] sm:$0xff] }
 0x337   : > { %11877 = vmatmul.mubr.f32.gmra.mxu1 %v15800_v2  ;;  %11858 = vmatpush3.msra.mxu0 %v15895_v56 }
 0x338   : > { %11861 = vmatprep.mubr.f32.mxu0 %v15787_v58  ;;  %11859 = vmatprep.subr.mxu0 %v15913_v0  ;;  %v18842_v58 = vld [vmem:[#allocation8_spill] sm:$0xff] }
 0x339   : > { %11860 = vmatpush3.msra.mxu0 %v15913_v0  ;;  %11030 = vmatpush3.msra.mxu1 %v18836_v18  ;;  %v18870_v18 = vld [vmem:[#allocation114_spill] sm:$0xff]  ;;  %v18899_v0 = vld [vmem:[#allocation7_spill] sm:$0xff] }
 0x33a   : > { %11862 = vmatmul.mubr.f32.vlgmr.msra.gmra.mxu0 %v15781_v46  ;;  %11031 = vmatprep.subr.mxu1 %v18837_v54  ;;  %v18845_v46 = vld [vmem:[#allocation23_spill] sm:$0xff]  ;;  %v18871_v54 = vld [vmem:[#allocation41_spill] sm:$0xff] }
 0x33b   : > { %11864 = vmatprep.mubr.f32.mxu0 %v15802_v9  ;;  %11032 = vmatpush3.msra.mxu1 %v18838_v62  ;;  %v18848_v9 = vld [vmem:[#allocation65_spill] sm:$0xff]  ;;  %v18872_v62 = vld [vmem:[#allocation116_spill] sm:$0xff] }
 0x33c   : > { %11033 = vmatprep.subr.mxu1 %v18839_v63  ;;  %10985 = vmatprep.subr.mxu0 %v18840_v6  ;;  %v18873_v63 = vld [vmem:[#allocation47_spill] sm:$0xff] }
 0x33d   : > { %11034 = vmatpush3.msra.mxu1 %v18841_v61  ;;  %10986 = vmatpush3.msra.mxu0 %v18842_v58  ;;  %v18874_v61 = vld [vmem:[#allocation118_spill] sm:$0xff] }
 0x33e   : > { %11865 = vmatmul.mubr.f32.gmra.mxu0 %v15800_v2  ;;  %11035 = vmatprep.subr.mxu1 %v18843_v39  ;;  %v18853_v2 = vld [vmem:[#allocation37_spill] sm:$0xff]  ;;  %v18875_v39 = vld [vmem:[#allocation55_spill] sm:$0xff] }
 0x33f   : > { %11036 = vmatpush3.msra.mxu1 %v18844_v41  ;;  %10987 = vmatprep.subr.mxu0 %v18845_v46  ;;  %v18876_v41 = vld [vmem:[#allocation120_spill] sm:$0xff] }
 0x340   : > { %11037 = vmatprep.subr.mxu1 %v18846_v17  ;;  %10988 = vmatpush3.msra.mxu0 %v18847_v21  ;;  %v18877_v17 = vld [vmem:[#allocation58_spill] sm:$0xff] }
 0x341   : > { %11038 = vmatpush3.msra.mxu1 %v18848_v9  ;;  %10989 = vmatprep.subr.mxu0 %v18849_v8  ;;  %v18878_v9 = vld [vmem:[#allocation122_spill] sm:$0xff] }
 0x342   : > { %11039 = vmatprep.subr.mxu1 %v18850_v30  ;;  %10990 = vmatpush3.msra.mxu0 %v18851_v23  ;;  %v18879_v30 = vld [vmem:[#allocation61_spill] sm:$0xff] }
 0x343   : > { %11040 = vmatpush3.msra.mxu1 %v18852_v34  ;;  %10991 = vmatprep.subr.mxu0 %v18853_v2  ;;  %v18880_v34 = vld [vmem:[#allocation123_spill] sm:$0xff] }
 0x344   : > { %11041 = vmatprep.subr.mxu1 %v18854_v10  ;;  %10992 = vmatpush3.msra.mxu0 %v18855_v59  ;;  %v18881_v10 = vld [vmem:[#allocation64_spill] sm:$0xff] }
 0x345   : > { %11042 = vmatpush3.msra.mxu1 %v18856_v12  ;;  %10993 = vmatprep.subr.mxu0 %v18857_v37  ;;  %v18882_v12 = vld [vmem:[#allocation124_spill] sm:$0xff] }
 0x346   : > { %11043 = vmatprep.subr.mxu1 %v18858_v48  ;;  %10994 = vmatpush3.msra.mxu0 %v18859_v44  ;;  %v18883_v48 = vld [vmem:[#allocation67_spill] sm:$0xff] }
 0x347   : > { %11044 = vmatpush3.msra.mxu1 %v18860_v24  ;;  %10995 = vmatprep.subr.mxu0 %v18861_v55  ;;  %v18884_v24 = vld [vmem:[#allocation125_spill] sm:$0xff] }
 0x348   : > { %11045 = vmatprep.subr.mxu1 %v18862_v7  ;;  %10996 = vmatpush3.msra.mxu0 %v18863_v1  ;;  %v18885_v7 = vld [vmem:[#allocation71_spill] sm:$0xff] }
 0x349   : > { %11046 = vmatpush3.msra.mxu1 %v18864_v36  ;;  %10997 = vmatprep.subr.mxu0 %v18865_v38  ;;  %v18886_v36 = vld [vmem:[#allocation126_spill] sm:$0xff] }
 0x34a   : > { %11047 = vmatprep.subr.mxu1 %v18866_v49  ;;  %10998 = vmatpush3.msra.mxu0 %v18867_v53  ;;  %v18887_v49 = vld [vmem:[#allocation74_spill] sm:$0xff] }
 0x34b   : > { %11048 = vmatpush3.msra.mxu1 %v18868_v20  ;;  %10999 = vmatprep.subr.mxu0 %v18869_v13  ;;  %v18888_v20 = vld [vmem:[#allocation127_spill] sm:$0xff] }
 0x34c   : > { %11049 = vmatprep.subr.mxu1 %v18870_v18  ;;  %11000 = vmatpush3.msra.mxu0 %v18871_v54  ;;  %v18889_v18 = vld [vmem:[#allocation77_spill] sm:$0xff] }
 0x34d   : > { %11050 = vmatpush3.msra.mxu1 %v18872_v62  ;;  %11001 = vmatprep.subr.mxu0 %v18873_v63  ;;  %v18890_v62 = vld [vmem:[#allocation128_spill] sm:$0xff] }
 0x34e   : > { %11051 = vmatprep.subr.mxu1 %v18874_v61  ;;  %11002 = vmatpush3.msra.mxu0 %v18875_v39  ;;  %v18891_v61 = vld [vmem:[#allocation81_spill] sm:$0xff] }
 0x34f   : > { %11052 = vmatpush3.msra.mxu1 %v18876_v41  ;;  %11003 = vmatprep.subr.mxu0 %v18877_v17  ;;  %v18892_v41 = vld [vmem:[#allocation129_spill] sm:$0xff] }
 0x350   : > { %11053 = vmatprep.subr.mxu1 %v18878_v9  ;;  %11004 = vmatpush3.msra.mxu0 %v18879_v30  ;;  %v18893_v9 = vld [vmem:[#allocation84_spill] sm:$0xff] }
 0x351   : > { %11054 = vmatpush3.msra.mxu1 %v18880_v34  ;;  %11005 = vmatprep.subr.mxu0 %v18881_v10  ;;  %v18894_v34 = vld [vmem:[#allocation88_spill] sm:$0xff] }
 0x352   : > { %11055 = vmatprep.subr.mxu1 %v18882_v12  ;;  %11006 = vmatpush3.msra.mxu0 %v18883_v48  ;;  %v18895_v12 = vld [vmem:[#allocation92_spill] sm:$0xff] }
 0x353   : > { %11056 = vmatpush3.msra.mxu1 %v18884_v24  ;;  %11007 = vmatprep.subr.mxu0 %v18885_v7  ;;  %v18896_v24 = vld [vmem:[#allocation95_spill] sm:$0xff] }
 0x354   : > { %11057 = vmatprep.subr.mxu1 %v18886_v36  ;;  %11008 = vmatpush3.msra.mxu0 %v18887_v49  ;;  %v18897_v36 = vld [vmem:[#allocation98_spill] sm:$0xff] }
 0x355   : > { %11058 = vmatpush3.msra.mxu1 %v18888_v20  ;;  %11009 = vmatprep.subr.mxu0 %v18889_v18  ;;  %v18898_v20 = vld [vmem:[#allocation101_spill] sm:$0xff] }
 0x356   : > { %11059 = vmatprep.subr.mxu1 %v18890_v62  ;;  %11010 = vmatpush3.msra.mxu0 %v18891_v61 }
 0x357   : > { %11060 = vmatpush3.msra.mxu1 %v18892_v41  ;;  %11011 = vmatprep.subr.mxu0 %v18893_v9 }
 0x358   : > { %11117 = vmatprep.subr.mxu1 %v18840_v6  ;;  %11012 = vmatpush3.msra.mxu0 %v18894_v34 }
 0x359   : > { %11013 = vmatprep.subr.mxu0 %v18895_v12 }
 0x35a   : > { %11014 = vmatpush3.msra.mxu0 %v18896_v24 }
 0x35b   : > { %11015 = vmatprep.subr.mxu0 %v18897_v36 }
 0x35c   : > { %11016 = vmatpush3.msra.mxu0 %v18898_v20 }
 0x35d   : > { %11073 = vmatprep.subr.mxu0 %v18899_v0 }
 0x3b1   : > { %v4740_v62 = vpop.f32.mrf.mxu1 }
 0x3b3   : > { %v4742_v56 = vpop.f32.mrf.mxu1 }
 0x3b5   : > { %v4747_v29 = vpop.f32.mrf.mxu1 }
 0x3b7   : > { %v4749_v41 = vpop.f32.mrf.mxu1 }
 0x3b9   : > { %v4605_v5 = vpop.f32.mrf.mxu0  ;;  %v4754_v15 = vpop.f32.mrf.mxu1 }
 0x3ba   : > { %v4741_v50 = vadd.f32 %v4740_v62, %v4605_v5 }
 0x3bb   : > { %v4607_v43 = vpop.f32.mrf.mxu0  ;;  %v4756_v51 = vpop.f32.mrf.mxu1 }
 0x3bc   : > { %v4743_v20 = vadd.f32 %v4742_v56, %v4607_v43 }
 0x3bd   : > { %v4616_v3 = vpop.f32.mrf.mxu0  ;;  %v4761_v60 = vpop.f32.mrf.mxu1 }
 0x3be   : > { %v4748_v34 = vadd.f32 %v4747_v29, %v4616_v3  ;;  %v18900_v29 = vld [vmem:[#allocation135_spill] sm:$0xff] }
 0x3bf   : > { %v4618_v33 = vpop.f32.mrf.mxu0  ;;  %v4763_v11 = vpop.f32.mrf.mxu1 }
 0x3c0   : > { %v4750_v18 = vadd.f32 %v4749_v41, %v4618_v33  ;;  %v18908_v41 = vld [vmem:[#allocation143_spill] sm:$0xff] }
 0x3c1   : > { %v4627_v26 = vpop.f32.mrf.mxu0  ;;  %v4950_v45 = vpop.f32.mrf.mxu1 }
 0x3c2   : > { %v4755_v63 = vadd.f32 %v4754_v15, %v4627_v26 }
 0x3c3   : > { %v4629_v27 = vpop.f32.mrf.mxu0  ;;  %v4952_v19 = vpop.f32.mrf.mxu1 }
 0x3c4   : > { %v4757_v54 = vadd.f32 %v4756_v51, %v4629_v27 }
 0x3c5   : > { %v4638_v47 = vpop.f32.mrf.mxu0  ;;  %v4959_v31 = vpop.f32.mrf.mxu1 }
 0x3c7   : > { %v4640_v16 = vpop.f32.mrf.mxu0  ;;  %v4961_v0 = vpop.f32.mrf.mxu1 }
 0x3c9   : > { %v4846_v40 = vpop.f32.mrf.mxu0  ;;  %v4968_v22 = vpop.f32.mrf.mxu1 }
 0x3ca   : > { %v4847_v36 = vadd.f32 %v4846_v40, %v4741_v50  ;;  %v4762_v50 = vadd.f32 %v4761_v60, %v4638_v47 }
 0x3cb   : > { %v4848_v52 = vpop.f32.mrf.mxu0  ;;  %v4970_v32 = vpop.f32.mrf.mxu1 }
 0x3cc   : > { %v4849_v9 = vadd.f32 %v4848_v52, %v4743_v20  ;;  %v4951_v7 = vadd.f32 %v4950_v45, %v4847_v36 }
 0x3cd   : > { %v4854_v35 = vpop.f32.mrf.mxu0  ;;  %v4977_v14 = vpop.f32.mrf.mxu1 }
 0x3ce   : > { %v4855_v49 = vadd.f32 %v4854_v35, %v4748_v34  ;;  %v4953_v39 = vadd.f32 %v4952_v19, %v4849_v9 }
 0x3cf   : > { %v4856_v57 = vpop.f32.mrf.mxu0  ;;  %v16071_v28 = vpop.f32.mrf.mxu1 }
 0x3d0   : > { %v4857_v30 = vadd.f32 %v4856_v57, %v4750_v18  ;;  %v4960_v43 = vadd.f32 %v4959_v31, %v4855_v49  ;;  %v4764_v57 = vadd.f32 %v4763_v11, %v4640_v16  ;;  %v18904_v16 = vld [vmem:[#allocation139_spill] sm:$0xff] }
 0x3d1   : > { %v4862_v42 = vpop.f32.mrf.mxu0  ;;  %v5166_v4 = vpop.f32.mrf.mxu1 }
 0x3d2   : > { %v4863_v40 = vadd.f32 %v4862_v42, %v4755_v63  ;;  %v4962_v34 = vadd.f32 %v4961_v0, %v4857_v30 }
 0x3d3   : > { %v4864_v25 = vpop.f32.mrf.mxu0  ;;  %v5168_v6 = vpop.f32.mrf.mxu1 }
 0x3d4   : > { %v4865_v56 = vadd.f32 %v4864_v25, %v4757_v54  ;;  %v4969_v27 = vadd.f32 %v4968_v22, %v4863_v40 }
 0x3d5   : > { %v4870_v24 = vpop.f32.mrf.mxu0  ;;  %v5173_v12 = vpop.f32.mrf.mxu1 }
 0x3d6   : > { %v4971_v60 = vadd.f32 %v4970_v32, %v4865_v56 }
 0x3d7   : > { %v4872_v61 = vpop.f32.mrf.mxu0  ;;  %v5175_v48 = vpop.f32.mrf.mxu1 }
 0x3d8   : > { %v4873_v25 = vadd.f32 %v4872_v61, %v4764_v57 }
 0x3d9   : > { %v5067_v10 = vpop.f32.mrf.mxu0  ;;  %v5180_v3 = vpop.f32.mrf.mxu1 }
 0x3da   : > { %v5068_v17 = vadd.f32 %v5067_v10, %v4951_v7  ;;  %v4871_v10 = vadd.f32 %v4870_v24, %v4762_v50  ;;  %v18906_v7 = vld [vmem:[#allocation140_spill] sm:$0xff] }
 0x3db   : > { %v5069_v5 = vpop.f32.mrf.mxu0  ;;  %v5182_v47 = vpop.f32.mrf.mxu1  ;;  %v18910_v50 = vld [vmem:[#allocation144_spill] sm:$0xff] }
 0x3dc   : > { %v5167_v62 = vadd.f32 %v5166_v4, %v5068_v17  ;;  %v5070_v13 = vadd.f32 %v5069_v5, %v4953_v39  ;;  %v18902_v4 = vld [vmem:[#allocation136_spill] sm:$0xff]  ;;  %v4978_v17 = vadd.f32 %v4977_v14, %v4871_v10  ;;  %v18912_v10 = vld [vmem:[#allocation146_spill] sm:$0xff] }
 0x3dd   : > { %v5074_v52 = vpop.f32.mrf.mxu0  ;;  %v5187_v18 = vpop.f32.mrf.mxu1 }
 0x3de   : > { %v16074_v33 = vsub.f32 %v18900_v29, %v5167_v62  ;;  %v5169_v35 = vadd.f32 %v5168_v6, %v5070_v13  ;;  %v5075_v45 = vadd.f32 %v5074_v52, %v4960_v43 }
 0x3df   : > { %v5076_v19 = vpop.f32.mrf.mxu0 }
 0x3e0   : > { %18901 = vst [vmem:[#allocation19_spill] sm:$0xff] %v16074_v33  ;;  %v5805_v15 = vmul.f32 %v16074_v33, %v16074_v33  ;;  %v16079_v51 = vsub.f32 %v18902_v4, %v5169_v35  ;;  %v5174_v31 = vadd.f32 %v5173_v12, %v5075_v45  ;;  %v5077_v42 = vadd.f32 %v5076_v19, %v4962_v34 }
 0x3e1   : > { %v5081_v26 = vpop.f32.mrf.mxu0 }
 0x3e2   : > { %18903 = vst [vmem:[#allocation42_spill] sm:$0xff] %v16079_v51  ;;  %v16081_v54 = vand.u32 4294901760, %v5805_v15  ;;  %v5806_v11 = vmul.f32 %v16079_v51, %v16079_v51  ;;  %v16086_v6 = vsub.f32 %v18904_v16, %v5174_v31  ;;  %v5176_v13 = vadd.f32 %v5175_v48, %v5077_v42 }
 0x3e3   : > { %v5082_v63 = vadd.f32 %v5081_v26, %v4969_v27  ;;  %v5083_v39 = vpop.f32.mrf.mxu0  ;;  %v4980_v48 = vadd.f32 %v16071_v28, %v4873_v25 }
 0x3e4   : > { %18905 = vst [vmem:[#allocation45_spill] sm:$0xff] %v16086_v6  ;;  %v16089_v30 = vsub.f32 %v5805_v15, %v16081_v54  ;;  %v5808_v22 = vmul.f32 %v16086_v6, %v16086_v6  ;;  %v16094_v32 = vsub.f32 %v18906_v7, %v5176_v13  ;;  %v5084_v49 = vadd.f32 %v5083_v39, %v4971_v60 }
 0x3e5   : > { %v5181_v61 = vadd.f32 %v5180_v3, %v5082_v63  ;;  %v5088_v9 = vpop.f32.mrf.mxu0  ;;  %v16096_v12 = vand.u32 4294901760, %v5806_v11  ;;  %v5189_v3 = vpop.f32.mrf.mxu1 }
 0x3e6   : > { %18907 = vst [vmem:[#allocation48_spill] sm:$0xff] %v16094_v32  ;;  %v5921_v24 = vand.u32 4294901760, %v16089_v30  ;;  %v5809_v14 = vmul.f32 %v16094_v32, %v16094_v32  ;;  %v5183_v36 = vadd.f32 %v5182_v47, %v5084_v49  ;;  %v5089_v20 = vadd.f32 %v5088_v9, %v4978_v17  ;;  %v18914_v47 = vld [vmem:[#allocation147_spill] sm:$0xff] }
 0x3e7   : > { %v16103_v0 = vsub.f32 %v18908_v41, %v5181_v61  ;;  %6199 = vmatprep.mubr.f32.mxu1 %v16096_v12  ;;  %v5090_v5 = vpop.f32.mrf.mxu0  ;;  %v16106_v62 = vand.u32 4294901760, %v5808_v22  ;;  %v16109_v43 = vsub.f32 %v5806_v11, %v16096_v12  ;;  %v18916_v9 = vld [vmem:[#allocation11_spill] sm:$0xff]  ;;  %v18918_v41 = vld [vmem:[#allocation14_spill] sm:$0xff] }
 0x3e8   : > { %v16112_v28 = vsub.f32 %v18910_v50, %v5183_v36  ;;  %v5188_v40 = vadd.f32 %v5187_v18, %v5089_v20  ;;  %v5091_v56 = vadd.f32 %v5090_v5, %v4980_v48  ;;  %6201 = vmatmul.mubr.f32.vlgmr.msra.gmra.mxu1 %v16081_v54  ;;  %v16118_v29 = vand.u32 4294901760, %v5809_v14 }
 0x3e9   : > { %18909 = vst [vmem:[#allocation31_spill] sm:$0xff] %v16103_v0  ;;  %v5811_v52 = vmul.f32 %v16103_v0, %v16103_v0  ;;  %11118 = vmatpush3.msra.mxu1 %v18842_v58  ;;  %v5915_v35 = vand.u32 4294901760, %v16109_v43  ;;  %v16122_v45 = vsub.f32 %v5808_v22, %v16106_v62  ;;  %v5922_v34 = vsub.f32 %v16089_v30, %v5921_v24 }
 0x3ea   : > { %18911 = vst [vmem:[#allocation53_spill] sm:$0xff] %v16112_v28  ;;  %v5812_v57 = vmul.f32 %v16112_v28, %v16112_v28  ;;  %v16130_v19 = vsub.f32 %v18912_v10, %v5188_v40  ;;  %v5190_v15 = vadd.f32 %v5189_v3, %v5091_v56  ;;  %11119 = vmatprep.subr.mxu1 %v18845_v46  ;;  %v18919_v3 = vld [vmem:[#allocation20_spill] sm:$0xff] }
 0x3eb   : > { %11120 = vmatpush3.msra.mxu1 %v18847_v21  ;;  %6206 = vmatprep.mubr.f32.mxu1 %v16118_v29  ;;  %v5916_v4 = vsub.f32 %v16109_v43, %v5915_v35  ;;  %v16138_v31 = vand.u32 4294901760, %v5811_v52  ;;  %v16141_v42 = vsub.f32 %v5809_v14, %v16118_v29  ;;  %v18123_v16 = vand.u32 4294901760, %v16122_v45  ;;  %v18917_v14 = vld [vmem:[#allocation13_spill] sm:$0xff] }
 0x3ec   : > { %18913 = vst [vmem:[#allocation8_spill] sm:$0xff] %v16130_v19  ;;  %v5814_v25 = vmul.f32 %v16130_v19, %v16130_v19  ;;  %v16146_v27 = vsub.f32 %v18914_v47, %v5190_v15  ;;  %11121 = vmatprep.subr.mxu1 %v18849_v8  ;;  %6208 = vmatmul.mubr.f32.gmra.mxu1 %v16106_v62  ;;  %v16150_v26 = vand.u32 4294901760, %v5812_v57  ;;  %v5923_v13 = vand.u32 4294901760, %v5922_v34  ;;  %v18920_v34 = vld [vmem:[#allocation21_spill] sm:$0xff]  ;;  %v18921_v15 = vld [vmem:[#allocation6_spill] sm:$0xff] }
 0x3ed   : > { %11122 = vmatpush3.msra.mxu1 %v18851_v23  ;;  %v5917_v60 = vand.u32 4294901760, %v5916_v4  ;;  %v5930_v11 = vand.u32 4294901760, %v16141_v42  ;;  %v16163_v17 = vsub.f32 %v5811_v52, %v16138_v31  ;;  %v5937_v18 = vsub.f32 %v16122_v45, %v18123_v16  ;;  %v18923_v47 = vld [vmem:[#allocation30_spill] sm:$0xff] }
 0x3ee   : > { %18915 = vst [vmem:[#allocation56_spill] sm:$0xff] %v16146_v27  ;;  %v5815_v63 = vmul.f32 %v16146_v27, %v16146_v27  ;;  %11123 = vmatprep.subr.mxu1 %v18853_v2  ;;  %6213 = vmatprep.mubr.f32.mxu1 %v16150_v26  ;;  %v16160_v39 = vsub.f32 %v5812_v57, %v16150_v26  ;;  %v16169_v7 = vand.u32 4294901760, %v5814_v25  ;;  %v18959_v16 = vld [vmem:[#allocation94_spill] sm:$0xff] }
 0x3ef   : > { %11124 = vmatpush3.msra.mxu1 %v18855_v59  ;;  %5918 = vmatprep.mubr.f32.mxu0 %v5917_v60  ;;  %v5931_v22 = vsub.f32 %v16141_v42, %v5930_v11  ;;  %v18121_v36 = vand.u32 4294901760, %v16163_v17  ;;  %v5938_v40 = vand.u32 4294901760, %v5937_v18  ;;  %v18924_v60 = vld [vmem:[#allocation41_spill] sm:$0xff]  ;;  %v18926_v18 = vld [vmem:[#allocation47_spill] sm:$0xff] }
 0x3f0   : > { %11125 = vmatprep.subr.mxu1 %v18857_v37  ;;  %5924 = vmatmul.mubr.f32.vlgmr.msra.gmra.mxu0 %v5923_v13  ;;  %v16172_v49 = vand.u32 4294901760, %v5815_v63  ;;  %v18122_v61 = vand.u32 4294901760, %v16160_v39  ;;  %v16192_v50 = vsub.f32 %v5814_v25, %v16169_v7  ;;  %v18922_v25 = vld [vmem:[#allocation10_spill] sm:$0xff] }
 0x3f1   : > { %6215 = vmatmul.mubr.f32.gmra.mxu1 %v16138_v31  ;;  %11074 = vmatpush3.msra.mxu0 %v18916_v9  ;;  %v5932_v48 = vand.u32 4294901760, %v5931_v22  ;;  %v5952_v52 = vsub.f32 %v16163_v17, %v18121_v36 }
 0x3f2   : > { %11126 = vmatpush3.msra.mxu1 %v18859_v44  ;;  %11075 = vmatprep.subr.mxu0 %v18917_v14  ;;  %v16184_v20 = vsub.f32 %v5815_v63, %v16172_v49  ;;  %v5946_v5 = vsub.f32 %v16160_v39, %v18122_v61  ;;  %v18119_v10 = vand.u32 4294901760, %v16192_v50  ;;  %v18925_v63 = vld [vmem:[#allocation36_spill] sm:$0xff]  ;;  %v18928_v14 = vld [vmem:[#allocation55_spill] sm:$0xff] }
 0x3f3   : > { %11127 = vmatprep.subr.mxu1 %v18861_v55  ;;  %11076 = vmatpush3.msra.mxu0 %v18918_v41  ;;  %v5953_v13 = vand.u32 4294901760, %v5952_v52  ;;  %v18930_v41 = vld [vmem:[#allocation58_spill] sm:$0xff]  ;;  %v18933_v52 = vld [vmem:[#allocation29_spill] sm:$0xff]  ;;  %v18957_v61 = vld [vmem:[#allocation91_spill] sm:$0xff] }
 0x3f4   : > { %11128 = vmatpush3.msra.mxu1 %v18863_v1  ;;  %5933 = vmatprep.mubr.f32.mxu0 %v5932_v48  ;;  %v18120_v56 = vand.u32 4294901760, %v16184_v20  ;;  %v5947_v57 = vand.u32 4294901760, %v5946_v5  ;;  %v5967_v22 = vsub.f32 %v16192_v50, %v18119_v10  ;;  %v18927_v48 = vld [vmem:[#allocation38_spill] sm:$0xff]  ;;  %v18931_v5 = vld [vmem:[#allocation27_spill] sm:$0xff] }
 0x3f5   : > { %6220 = vmatprep.mubr.f32.mxu1 %v16172_v49  ;;  %11077 = vmatprep.subr.mxu0 %v18919_v3  ;;  %v18952_v10 = vld [vmem:[#allocation95_spill] sm:$0xff] }
 0x3f6   : > { %11129 = vmatprep.subr.mxu1 %v18865_v38  ;;  %5939 = vmatmul.mubr.f32.gmra.mxu0 %v5938_v40  ;;  %v5961_v4 = vsub.f32 %v16184_v20, %v18120_v56  ;;  %v18932_v40 = vld [vmem:[#allocation61_spill] sm:$0xff]  ;;  %v5968_v3 = vand.u32 4294901760, %v5967_v22  ;;  %v18954_v56 = vld [vmem:[#allocation98_spill] sm:$0xff] }
 0x3f7   : > { %6222 = vmatmul.mubr.f32.gmra.mxu1 %v16169_v7  ;;  %11078 = vmatpush3.msra.mxu0 %v18920_v34  ;;  %v18934_v34 = vld [vmem:[#allocation64_spill] sm:$0xff]  ;;  %v18941_v22 = vld [vmem:[#allocation57_spill] sm:$0xff] }
 0x3f8   : > { %11130 = vmatpush3.msra.mxu1 %v18867_v53  ;;  %11079 = vmatprep.subr.mxu0 %v18921_v15  ;;  %v5962_v9 = vand.u32 4294901760, %v5961_v4  ;;  %v18936_v15 = vld [vmem:[#allocation67_spill] sm:$0xff]  ;;  %v18937_v4 = vld [vmem:[#allocation50_spill] sm:$0xff] }
 0x3f9   : > { %11131 = vmatprep.subr.mxu1 %v18922_v25  ;;  %6491 = vmatprep.mubr.f32.mxu1 %v5915_v35  ;;  %v18929_v35 = vld [vmem:[#allocation3_spill] sm:$0xff] }
 0x3fa   : > { %11080 = vmatpush3.msra.mxu0 %v18923_v47  ;;  %11132 = vmatpush3.msra.mxu1 %v18924_v60  ;;  %v18938_v47 = vld [vmem:[#allocation71_spill] sm:$0xff] }
 0x3fb   : > { %5948 = vmatprep.mubr.f32.mxu0 %v5947_v57  ;;  %11081 = vmatprep.subr.mxu0 %v18925_v63  ;;  %v18935_v57 = vld [vmem:[#allocation44_spill] sm:$0xff]  ;;  %v18940_v63 = vld [vmem:[#allocation74_spill] sm:$0xff] }
 0x3fc   : > { %11133 = vmatprep.subr.mxu1 %v18926_v18  ;;  %5954 = vmatmul.mubr.f32.gmra.mxu0 %v5953_v13  ;;  %v18939_v13 = vld [vmem:[#allocation52_spill] sm:$0xff] }
 0x3fd   : > { %11082 = vmatpush3.msra.mxu0 %v18927_v48  ;;  %11134 = vmatpush3.msra.mxu1 %v18928_v14  ;;  %v18943_v48 = vld [vmem:[#allocation66_spill] sm:$0xff] }
 0x3fe   : > { %11083 = vmatprep.subr.mxu0 %v18929_v35  ;;  %11135 = vmatprep.subr.mxu1 %v18930_v41  ;;  %v18944_v35 = vld [vmem:[#allocation81_spill] sm:$0xff] }
 0x3ff   : > { %11084 = vmatpush3.msra.mxu0 %v18931_v5  ;;  %11136 = vmatpush3.msra.mxu1 %v18932_v40  ;;  %v18945_v5 = vld [vmem:[#allocation70_spill] sm:$0xff] }
 0x400   : > { %5963 = vmatprep.mubr.f32.mxu0 %v5962_v9  ;;  %11085 = vmatprep.subr.mxu0 %v18933_v52  ;;  %v18942_v9 = vld [vmem:[#allocation77_spill] sm:$0xff] }
 0x401   : > { %11137 = vmatprep.subr.mxu1 %v18934_v34  ;;  %5969 = vmatmul.mubr.f32.gmra.mxu0 %v5968_v3  ;;  %v18946_v3 = vld [vmem:[#allocation84_spill] sm:$0xff]  ;;  %v18947_v52 = vld [vmem:[#allocation73_spill] sm:$0xff] }
 0x402   : > { %11086 = vmatpush3.msra.mxu0 %v18935_v57  ;;  %11138 = vmatpush3.msra.mxu1 %v18936_v15  ;;  %v18948_v57 = vld [vmem:[#allocation88_spill] sm:$0xff] }
 0x403   : > { %11087 = vmatprep.subr.mxu0 %v18937_v4  ;;  %6357 = vmatprep.mubr.f32.mxu0 %v16109_v43  ;;  %v16242_v43 = vpop.f32.mrf.mxu0  ;;  %v18949_v4 = vld [vmem:[#allocation76_spill] sm:$0xff] }
 0x404   : > { %11139 = vmatprep.subr.mxu1 %v18938_v47  ;;  %11088 = vmatpush3.msra.mxu0 %v18939_v13  ;;  %v18950_v13 = vld [vmem:[#allocation92_spill] sm:$0xff] }
 0x405   : > { %11140 = vmatpush3.msra.mxu1 %v18940_v63  ;;  %11089 = vmatprep.subr.mxu0 %v18941_v22  ;;  %v18951_v22 = vld [vmem:[#allocation80_spill] sm:$0xff]  ;;  %v16252_v36 = vpop.f32.mrf.mxu0 }
 0x406   : > { %11141 = vmatprep.subr.mxu1 %v18942_v9  ;;  %11090 = vmatpush3.msra.mxu0 %v18943_v48  ;;  %v18953_v48 = vld [vmem:[#allocation83_spill] sm:$0xff] }
 0x407   : > { %11142 = vmatpush3.msra.mxu1 %v18944_v35  ;;  %11091 = vmatprep.subr.mxu0 %v18945_v5  ;;  %v18955_v5 = vld [vmem:[#allocation87_spill] sm:$0xff] }
 0x408   : > { %11143 = vmatprep.subr.mxu1 %v18946_v3  ;;  %11092 = vmatpush3.msra.mxu0 %v18947_v52  ;;  %v18956_v52 = vld [vmem:[#allocation101_spill] sm:$0xff] }
 0x409   : > { %11144 = vmatpush3.msra.mxu1 %v18948_v57  ;;  %11093 = vmatprep.subr.mxu0 %v18949_v4  ;;  %v18958_v4 = vld [vmem:[#allocation28_spill] sm:$0xff] }
 0x40a   : > { %11145 = vmatprep.subr.mxu1 %v18950_v13  ;;  %11094 = vmatpush3.msra.mxu0 %v18951_v22  ;;  %v16259_v22 = vpop.f32.mrf.mxu1 }
 0x40b   : > { %11146 = vmatpush3.msra.mxu1 %v18952_v10  ;;  %11095 = vmatprep.subr.mxu0 %v18953_v48  ;;  %v18960_v48 = vld [vmem:[#allocation97_spill] sm:$0xff] }
 0x40c   : > { %11147 = vmatprep.subr.mxu1 %v18954_v56  ;;  %11096 = vmatpush3.msra.mxu0 %v18955_v5  ;;  %v16266_v5 = vpop.f32.mrf.mxu0 }
 0x40d   : > { %11148 = vmatpush3.msra.mxu1 %v18956_v52  ;;  %11097 = vmatprep.subr.mxu0 %v18957_v61  ;;  %v18961_v61 = vld [vmem:[#allocation100_spill] sm:$0xff] }
 0x40e   : > { %6495 = vmatmul.mubr.f32.vlgmr.msra.gmra.mxu1 %v5921_v24  ;;  %11205 = vmatprep.subr.mxu1 %v18958_v4  ;;  %v18962_v24 = vld [vmem:[#allocation104_spill] sm:$0xff]  ;;  %v5382_v4 = vpop.f32.mrf.mxu1 }
 0x40f   : > { %11098 = vmatpush3.msra.mxu0 %v18959_v16  ;;  %6502 = vmatprep.mubr.f32.mxu1 %v5930_v11  ;;  %v18963_v16 = vand.u32 4294901760, %v16122_v45  ;;  %v18964_v11 = vld [vmem:[#allocation107_spill] sm:$0xff] }
 0x410   : > { %11206 = vmatpush3.msra.mxu1 %v18842_v58  ;;  %11099 = vmatprep.subr.mxu0 %v18960_v48  ;;  %v18965_v58 = vand.u32 4294901760, %v16160_v39  ;;  %v16278_v48 = vpop.f32.mrf.mxu0 }
 0x411   : > { %11207 = vmatprep.subr.mxu1 %v18845_v46  ;;  %11100 = vmatpush3.msra.mxu0 %v18961_v61  ;;  %v18966_v46 = vld [vmem:[#allocation110_spill] sm:$0xff]  ;;  %v16284_v61 = vpop.f32.mrf.mxu1 }
 0x412   : > { %11208 = vmatpush3.msra.mxu1 %v18847_v21  ;;  %11101 = vmatprep.subr.mxu0 %v18962_v24  ;;  %v18967_v21 = vld [vmem:[#allocation113_spill] sm:$0xff]  ;;  %v18969_v24 = vld [vmem:[#allocation12_spill] sm:$0xff] }
 0x413   : > { %6506 = vmatmul.mubr.f32.gmra.mxu1 %v18963_v16  ;;  %11209 = vmatprep.subr.mxu1 %v18849_v8  ;;  %v18968_v8 = vand.u32 4294901760, %v16163_v17  ;;  %v16291_v16 = vpop.f32.mrf.mxu0 }
 0x414   : > { %11102 = vmatpush3.msra.mxu0 %v18964_v11  ;;  %6513 = vmatprep.mubr.f32.mxu1 %v18965_v58  ;;  %v16298_v11 = vpop.f32.mrf.mxu1 }
 0x415   : > { %11210 = vmatpush3.msra.mxu1 %v18851_v23  ;;  %11103 = vmatprep.subr.mxu0 %v18966_v46  ;;  %v18970_v23 = vand.u32 4294901760, %v16184_v20  ;;  %v5478_v58 = vpop.f32.mrf.mxu0 }
 0x416   : > { %11211 = vmatprep.subr.mxu1 %v18853_v2  ;;  %11104 = vmatpush3.msra.mxu0 %v18967_v21  ;;  %v18971_v2 = vld [vmem:[#allocation18_spill] sm:$0xff]  ;;  %v16309_v46 = vpop.f32.mrf.mxu1 }
 0x417   : > { %11212 = vmatpush3.msra.mxu1 %v18855_v59  ;;  %6360 = vmatmul.mubr.f32.vlgmr.msra.gmra.mxu0 %v16089_v30  ;;  %v18972_v59 = vld [vmem:[#allocation5_spill] sm:$0xff]  ;;  %v18973_v30 = vld [vmem:[#allocation34_spill] sm:$0xff] }
 0x418   : > { %6517 = vmatmul.mubr.f32.gmra.mxu1 %v18968_v8  ;;  %11161 = vmatprep.subr.mxu0 %v18969_v24  ;;  %v5575_v21 = vpop.f32.mrf.mxu1  ;;  %v18984_v24 = vld [vmem:[#allocation54_spill] sm:$0xff] }
 0x419   : > { %11213 = vmatprep.subr.mxu1 %v18857_v37  ;;  %6366 = vmatprep.mubr.f32.mxu0 %v16141_v42  ;;  %v18974_v37 = vand.u32 4294901760, %v16192_v50  ;;  %v18975_v42 = vld [vmem:[#allocation33_spill] sm:$0xff] }
 0x41a   : > { %6524 = vmatprep.mubr.f32.mxu1 %v18970_v23  ;;  %11162 = vmatpush3.msra.mxu0 %v18971_v2  ;;  %v16331_v8 = vpop.f32.mrf.mxu1  ;;  %v18988_v23 = vld [vmem:[#allocation79_spill] sm:$0xff] }
 0x41b   : > { %11214 = vmatpush3.msra.mxu1 %v18859_v44  ;;  %11163 = vmatprep.subr.mxu0 %v18972_v59  ;;  %v18976_v44 = vld [vmem:[#allocation35_spill] sm:$0xff] }
 0x41c   : > { %11215 = vmatprep.subr.mxu1 %v18861_v55  ;;  %11164 = vmatpush3.msra.mxu0 %v18973_v30  ;;  %v16315_v55 = vpop.f32.mrf.mxu0  ;;  %v18993_v30 = vld [vmem:[#allocation96_spill] sm:$0xff] }
 0x41d   : > { %11216 = vmatpush3.msra.mxu1 %v18863_v1  ;;  %6369 = vmatmul.mubr.f32.gmra.mxu0 %v16122_v45  ;;  %v18977_v1 = vld [vmem:[#allocation39_spill] sm:$0xff]  ;;  %v18978_v45 = vld [vmem:[#allocation40_spill] sm:$0xff] }
 0x41e   : > { %6528 = vmatmul.mubr.f32.gmra.mxu1 %v18974_v37  ;;  %11165 = vmatprep.subr.mxu0 %v18975_v42  ;;  %v19001_v42 = vld [vmem:[#allocation174_spill] sm:$0xff] }
 0x41f   : > { %11217 = vmatprep.subr.mxu1 %v18865_v38  ;;  %6375 = vmatprep.mubr.f32.mxu0 %v16160_v39  ;;  %v18979_v38 = vld [vmem:[#allocation24_spill] sm:$0xff]  ;;  %v18980_v39 = vld [vmem:[#allocation43_spill] sm:$0xff] }
 0x420   : > { %11166 = vmatpush3.msra.mxu0 %v18976_v44  ;;  %11218 = vmatpush3.msra.mxu1 %v18867_v53  ;;  %v16325_v53 = vpop.f32.mrf.mxu0  ;;  %v19003_v44 = vld [vmem:[#allocation115_spill] sm:$0xff] }
 0x421   : > { %6819 = vmatprep.mubr.f32.mxu1 %v16096_v12  ;;  %11167 = vmatprep.subr.mxu0 %v18977_v1  ;;  %v19004_v1 = vld [vmem:[#allocation179_spill] sm:$0xff] }
 0x422   : > { %11219 = vmatprep.subr.mxu1 %v18922_v25  ;;  %11168 = vmatpush3.msra.mxu0 %v18978_v45  ;;  %v18981_v25 = vld [vmem:[#allocation46_spill] sm:$0xff] }
 0x423   : > { %11220 = vmatpush3.msra.mxu1 %v18924_v60  ;;  %6378 = vmatmul.mubr.f32.gmra.mxu0 %v16163_v17  ;;  %v18982_v60 = vld [vmem:[#allocation49_spill] sm:$0xff]  ;;  %v5383_v17 = vadd.f32 %v5382_v4, %v16252_v36  ;;  %v18985_v36 = vld [vmem:[#allocation60_spill] sm:$0xff] }
 0x424   : > { %11169 = vmatprep.subr.mxu0 %v18979_v38  ;;  %11221 = vmatprep.subr.mxu1 %v18926_v18  ;;  %v16338_v18 = vpop.f32.mrf.mxu0  ;;  %v18987_v4 = vld [vmem:[#allocation69_spill] sm:$0xff]  ;;  %v5389_v38 = vadd.f32 %v16259_v22, %v16242_v43  ;;  %v19009_v43 = vld [vmem:[#allocation151_spill] sm:$0xff] }
 0x425   : > { %6384 = vmatprep.mubr.f32.mxu0 %v16184_v20  ;;  %11170 = vmatpush3.msra.mxu0 %v18980_v39  ;;  %v18983_v20 = vld [vmem:[#allocation51_spill] sm:$0xff] }
 0x426   : > { %11222 = vmatpush3.msra.mxu1 %v18928_v14  ;;  %11171 = vmatprep.subr.mxu0 %v18981_v25  ;;  %v5479_v14 = vadd.f32 %v5478_v58, %v5383_v17  ;;  %v18994_v58 = vld [vmem:[#allocation99_spill] sm:$0xff]  ;;  %v5395_v17 = vadd.f32 %v16298_v11, %v16278_v48  ;;  %v5401_v48 = vadd.f32 %v16284_v61, %v16266_v5 }
 0x427   : > { %11223 = vmatprep.subr.mxu1 %v18930_v41  ;;  %11172 = vmatpush3.msra.mxu0 %v18982_v60  ;;  %v16344_v41 = vpop.f32.mrf.mxu1  ;;  %v19006_v39 = vld [vmem:[#allocation119_spill] sm:$0xff]  ;;  %v19008_v60 = vld [vmem:[#allocation121_spill] sm:$0xff] }
 0x428   : > { %11224 = vmatpush3.msra.mxu1 %v18932_v40  ;;  %6387 = vmatmul.mubr.f32.gmra.mxu0 %v16192_v50  ;;  %v18986_v50 = vld [vmem:[#allocation63_spill] sm:$0xff]  ;;  %v5679_v40 = vpop.f32.mrf.mxu0  ;;  %v5500_v11 = vadd.f32 %v16315_v55, %v5401_v48  ;;  %v19013_v55 = vld [vmem:[#allocation156_spill] sm:$0xff]  ;;  %v19038_v48 = vld [vmem:[#allocation229_spill] sm:$0xff] }
 0x429   : > { %11173 = vmatprep.subr.mxu0 %v18983_v20  ;;  %11225 = vmatprep.subr.mxu1 %v18934_v34  ;;  %v5576_v34 = vadd.f32 %v5575_v21, %v5479_v14  ;;  %v19005_v21 = vld [vmem:[#allocation117_spill] sm:$0xff]  ;;  %v19007_v25 = vld [vmem:[#allocation183_spill] sm:$0xff]  ;;  %v5486_v20 = vadd.f32 %v16291_v16, %v5389_v38  ;;  %v19033_v38 = vld [vmem:[#allocation184_spill] sm:$0xff] }
 0x42a   : > { %11174 = vmatpush3.msra.mxu0 %v18984_v24  ;;  %6694 = vmatprep.mubr.f32.mxu0 %v16096_v12  ;;  %v16354_v12 = vpop.f32.mrf.mxu1  ;;  %v11866_v14 = vpop.f32.mrf.mxu0  ;;  %v5493_v24 = vadd.f32 %v16325_v53, %v5395_v17  ;;  %v19011_v16 = vld [vmem:[#allocation153_spill] sm:$0xff] }
 0x42b   : > { %11226 = vmatpush3.msra.mxu1 %v18936_v15  ;;  %11175 = vmatprep.subr.mxu0 %v18985_v36  ;;  %v18989_v15 = vld [vmem:[#allocation82_spill] sm:$0xff]  ;;  %v5680_v2 = vadd.f32 %v5679_v40, %v5576_v34  ;;  %v19010_v36 = vld [vmem:[#allocation191_spill] sm:$0xff]  ;;  %v5600_v34 = vadd.f32 %v16331_v8, %v5500_v11  ;;  %v19017_v8 = vld [vmem:[#allocation165_spill] sm:$0xff] }
 0x42c   : > { %11227 = vmatprep.subr.mxu1 %v18938_v47  ;;  %11176 = vmatpush3.msra.mxu0 %v18986_v50  ;;  %v18990_v47 = vld [vmem:[#allocation86_spill] sm:$0xff]  ;;  %v5771_v59 = vpop.f32.mrf.mxu1  ;;  %v5691_v53 = vpop.f32.mrf.mxu0  ;;  %v5592_v61 = vadd.f32 %v16344_v41, %v5493_v24  ;;  %v19035_v17 = vld [vmem:[#allocation189_spill] sm:$0xff] }
 0x42d   : > { %11228 = vmatpush3.msra.mxu1 %v18940_v63  ;;  %11177 = vmatprep.subr.mxu0 %v18987_v4  ;;  %v18991_v63 = vld [vmem:[#allocation90_spill] sm:$0xff]  ;;  %v19014_v4 = vld [vmem:[#allocation201_spill] sm:$0xff] }
 0x42e   : > { %11229 = vmatprep.subr.mxu1 %v18942_v9  ;;  %11178 = vmatpush3.msra.mxu0 %v18988_v23  ;;  %v18992_v9 = vld [vmem:[#allocation93_spill] sm:$0xff]  ;;  %v19012_v50 = vld [vmem:[#allocation194_spill] sm:$0xff]  ;;  %v5692_v40 = vadd.f32 %v5691_v53, %v5592_v61 }
 0x42f   : > { %11230 = vmatpush3.msra.mxu1 %v18944_v35  ;;  %11179 = vmatprep.subr.mxu0 %v18989_v15  ;;  %v5772_v35 = vadd.f32 %v5771_v59, %v5680_v2  ;;  %v19015_v41 = vld [vmem:[#allocation158_spill] sm:$0xff]  ;;  %v5698_v15 = vadd.f32 %v11866_v14, %v5600_v34  ;;  %v19016_v2 = vld [vmem:[#allocation207_spill] sm:$0xff]  ;;  %v19037_v24 = vld [vmem:[#allocation193_spill] sm:$0xff] }
 0x430   : > { %11231 = vmatprep.subr.mxu1 %v18946_v3  ;;  %11180 = vmatpush3.msra.mxu0 %v18990_v47  ;;  %v18995_v3 = vld [vmem:[#allocation103_spill] sm:$0xff]  ;;  %v19039_v11 = vld [vmem:[#allocation197_spill] sm:$0xff] }
 0x431   : > { %11232 = vmatpush3.msra.mxu1 %v18948_v57  ;;  %11181 = vmatprep.subr.mxu0 %v18991_v63  ;;  %v18996_v57 = vld [vmem:[#allocation170_spill] sm:$0xff]  ;;  %v19018_v47 = vld [vmem:[#allocation211_spill] sm:$0xff] }
 0x432   : > { %11233 = vmatprep.subr.mxu1 %v18950_v13  ;;  %11182 = vmatpush3.msra.mxu0 %v18992_v9  ;;  %v18997_v13 = vld [vmem:[#allocation106_spill] sm:$0xff] }
 0x433   : > { %11234 = vmatpush3.msra.mxu1 %v18952_v10  ;;  %11183 = vmatprep.subr.mxu0 %v18993_v30  ;;  %v18998_v10 = vld [vmem:[#allocation134_spill] sm:$0xff]  ;;  %v19021_v30 = vld [vmem:[#allocation167_spill] sm:$0xff] }
 0x434   : > { %11235 = vmatprep.subr.mxu1 %v18954_v56  ;;  %11184 = vmatpush3.msra.mxu0 %v18994_v58  ;;  %v16375_v37 = vsub.f32 %v18998_v10, %v5772_v35  ;;  %v19000_v56 = vld [vmem:[#allocation109_spill] sm:$0xff]  ;;  %v19019_v63 = vld [vmem:[#allocation138_spill] sm:$0xff] }
 0x435   : > { %11236 = vmatpush3.msra.mxu1 %v18956_v52  ;;  %11185 = vmatprep.subr.mxu0 %v18995_v3  ;;  %v19002_v52 = vld [vmem:[#allocation112_spill] sm:$0xff]  ;;  %v19024_v58 = vld [vmem:[#allocation214_spill] sm:$0xff] }
 0x436   : > { %6821 = vmatmul.mubr.f32.vlgmr.msra.gmra.mxu1 %v16081_v54  ;;  %11917 = vmatprep.subr.mxu1 %v18996_v57  ;;  %18999 = vst [vmem:[#allocation59_spill] sm:$0xff] %v16375_v37  ;;  %v5807_v45 = vmul.f32 %v16375_v37, %v16375_v37  ;;  %v19027_v10 = vld [vmem:[#allocation142_spill] sm:$0xff] }
 0x437   : > { %11186 = vmatpush3.msra.mxu0 %v18997_v13  ;;  %6826 = vmatprep.mubr.f32.mxu1 %v16118_v29  ;;  %v19026_v13 = vld [vmem:[#allocation219_spill] sm:$0xff] }
 0x438   : > { %11918 = vmatpush3.msra.mxu1 %v18996_v57  ;;  %11187 = vmatprep.subr.mxu0 %v19000_v56  ;;  %v16402_v22 = vand.u32 4294901760, %v5807_v45  ;;  %v19025_v57 = vld [vmem:[#allocation171_spill] sm:$0xff] }
 0x439   : > { %11919 = vmatprep.subr.mxu1 %v19001_v42  ;;  %11188 = vmatpush3.msra.mxu0 %v19002_v52  ;;  %v19030_v52 = vld [vmem:[#allocation221_spill] sm:$0xff] }
 0x43a   : > { %11920 = vmatpush3.msra.mxu1 %v19001_v42  ;;  %11189 = vmatprep.subr.mxu0 %v19003_v44 }
 0x43b   : > { %6828 = vmatmul.mubr.f32.gmra.mxu1 %v16106_v62  ;;  %11921 = vmatprep.subr.mxu1 %v19004_v1 }
 0x43c   : > { %11190 = vmatpush3.msra.mxu0 %v19005_v21  ;;  %6833 = vmatprep.mubr.f32.mxu1 %v16150_v26  ;;  %v19032_v21 = vld [vmem:[#allocation224_spill] sm:$0xff] }
 0x43d   : > { %11922 = vmatpush3.msra.mxu1 %v19004_v1  ;;  %11191 = vmatprep.subr.mxu0 %v19006_v39  ;;  %v19031_v1 = vld [vmem:[#allocation181_spill] sm:$0xff] }
 0x43e   : > { %11923 = vmatprep.subr.mxu1 %v19007_v25  ;;  %11192 = vmatpush3.msra.mxu0 %v19008_v60 }
 0x43f   : > { %11924 = vmatpush3.msra.mxu1 %v19007_v25  ;;  %6696 = vmatmul.mubr.f32.vlgmr.msra.gmra.mxu0 %v16081_v54  ;;  %v5584_v54 = vadd.f32 %v16309_v46, %v5486_v20  ;;  %v11878_v46 = vpop.f32.mrf.mxu1  ;;  %v19034_v25 = vld [vmem:[#allocation225_spill] sm:$0xff]  ;;  %v19036_v20 = vld [vmem:[#allocation228_spill] sm:$0xff] }
 0x440   : > { %6835 = vmatmul.mubr.f32.gmra.mxu1 %v16138_v31  ;;  %11879 = vmatprep.subr.mxu0 %v19009_v43  ;;  %v5790_v59 = vadd.f32 %v11878_v46, %v5698_v15  ;;  %v19041_v46 = vld [vmem:[#allocation206_spill] sm:$0xff] }
 0x441   : > { %11925 = vmatprep.subr.mxu1 %v19010_v36  ;;  %6701 = vmatprep.mubr.f32.mxu0 %v16118_v29  ;;  %v16418_v29 = vsub.f32 %v5807_v45, %v16402_v22  ;;  %v5686_v5 = vadd.f32 %v16338_v18, %v5584_v54  ;;  %v5783_v23 = vpop.f32.mrf.mxu1 }
 0x442   : > { %6840 = vmatprep.mubr.f32.mxu1 %v16172_v49  ;;  %11880 = vmatpush3.msra.mxu0 %v19009_v43  ;;  %v16463_v56 = vsub.f32 %v19027_v10, %v5790_v59  ;;  %v19048_v59 = vld [vmem:[#allocation173_spill] sm:$0xff] }
 0x443   : > { %11926 = vmatpush3.msra.mxu1 %v19010_v36  ;;  %11881 = vmatprep.subr.mxu0 %v19011_v16  ;;  %v6930_v18 = vand.u32 4294901760, %v16418_v29  ;;  %v19055_v10 = vld [vmem:[#allocation205_spill] sm:$0xff] }
 0x444   : > { %11927 = vmatprep.subr.mxu1 %v19012_v50  ;;  %11882 = vmatpush3.msra.mxu0 %v19011_v16  ;;  %19028 = vst [vmem:[#allocation9_spill] sm:$0xff] %v16463_v56  ;;  %v5816_v45 = vmul.f32 %v16463_v56, %v16463_v56 }
 0x445   : > { %11928 = vmatpush3.msra.mxu1 %v19012_v50  ;;  %6703 = vmatmul.mubr.f32.gmra.mxu0 %v16106_v62  ;;  %v5778_v62 = vadd.f32 %v16354_v12, %v5686_v5  ;;  %v6931_v12 = vsub.f32 %v16418_v29, %v6930_v18  ;;  %v19040_v5 = vld [vmem:[#allocation200_spill] sm:$0xff] }
 0x446   : > { %6842 = vmatmul.mubr.f32.gmra.mxu1 %v16169_v7  ;;  %11883 = vmatprep.subr.mxu0 %v19013_v55  ;;  %v16493_v14 = vand.u32 4294901760, %v5816_v45 }
 0x447   : > { %11929 = vmatprep.subr.mxu1 %v19014_v4  ;;  %6708 = vmatprep.mubr.f32.mxu0 %v16150_v26  ;;  %v5784_v26 = vadd.f32 %v5783_v23, %v5692_v40  ;;  %v16445_v9 = vsub.f32 %v19019_v63, %v5778_v62  ;;  %v6932_v3 = vand.u32 4294901760, %v6931_v12  ;;  %v19042_v62 = vld [vmem:[#allocation210_spill] sm:$0xff]  ;;  %v19046_v12 = vld [vmem:[#allocation164_spill] sm:$0xff]  ;;  %v19047_v63 = vld [vmem:[#allocation169_spill] sm:$0xff] }
 0x448   : > { %11884 = vmatpush3.msra.mxu0 %v19013_v55  ;;  %11930 = vmatpush3.msra.mxu1 %v19014_v4  ;;  %v16508_v53 = vsub.f32 %v5816_v45, %v16493_v14  ;;  %v19064_v45 = vld [vmem:[#allocation180_spill] sm:$0xff] }
 0x449   : > { %11949 = vmatprep.mubr.f32.mxu1 %v16402_v22  ;;  %11885 = vmatprep.subr.mxu0 %v19015_v41  ;;  %19020 = vst [vmem:[#allocation23_spill] sm:$0xff] %v16445_v9 }
 0x44a   : > { %11931 = vmatprep.subr.mxu1 %v19016_v2  ;;  %11886 = vmatpush3.msra.mxu0 %v19015_v41  ;;  %v6960_v40 = vand.u32 4294901760, %v16508_v53 }
 0x44b   : > { %11932 = vmatpush3.msra.mxu1 %v19016_v2  ;;  %6710 = vmatmul.mubr.f32.gmra.mxu0 %v16138_v31  ;;  %v19022_v31 = vld [vmem:[#allocation137_spill] sm:$0xff]  ;;  %v19043_v2 = vld [vmem:[#allocation155_spill] sm:$0xff] }
 0x44c   : > { %11887 = vmatprep.subr.mxu0 %v19017_v8  ;;  %11933 = vmatprep.subr.mxu1 %v19018_v47  ;;  %v16452_v35 = vsub.f32 %v19022_v31, %v5784_v26  ;;  %v6961_v23 = vsub.f32 %v16508_v53, %v6960_v40  ;;  %v19050_v31 = vld [vmem:[#allocation182_spill] sm:$0xff] }
 0x44d   : > { %6715 = vmatprep.mubr.f32.mxu0 %v16172_v49  ;;  %11888 = vmatpush3.msra.mxu0 %v19017_v8  ;;  %v5810_v49 = vmul.f32 %v16445_v9, %v16445_v9 }
 0x44e   : > { %11934 = vmatpush3.msra.mxu1 %v19018_v47  ;;  %11889 = vmatprep.subr.mxu0 %v19021_v30  ;;  %19023 = vst [vmem:[#allocation62_spill] sm:$0xff] %v16452_v35  ;;  %v5813_v42 = vmul.f32 %v16452_v35, %v16452_v35  ;;  %v6962_v26 = vand.u32 4294901760, %v6961_v23  ;;  %v19045_v47 = vld [vmem:[#allocation161_spill] sm:$0xff] }
 0x44f   : > { %11935 = vmatprep.subr.mxu1 %v19024_v58  ;;  %11890 = vmatpush3.msra.mxu0 %v19021_v30  ;;  %v16472_v44 = vand.u32 4294901760, %v5810_v49 }
 0x450   : > { %11936 = vmatpush3.msra.mxu1 %v19024_v58  ;;  %6717 = vmatmul.mubr.f32.gmra.mxu0 %v16169_v7  ;;  %v19029_v7 = vld [vmem:[#allocation175_spill] sm:$0xff]  ;;  %v16482_v39 = vand.u32 4294901760, %v5813_v42  ;;  %v19051_v58 = vld [vmem:[#allocation188_spill] sm:$0xff] }
 0x451   : > { %11891 = vmatprep.subr.mxu0 %v19025_v57  ;;  %11937 = vmatprep.subr.mxu1 %v19026_v13  ;;  %v16487_v60 = vsub.f32 %v5810_v49, %v16472_v44  ;;  %v19053_v49 = vld [vmem:[#allocation196_spill] sm:$0xff] }
 0x452   : > { %11892 = vmatpush3.msra.mxu0 %v19025_v57  ;;  %11911 = vmatprep.mubr.f32.mxu0 %v6932_v3  ;;  %v16498_v36 = vsub.f32 %v5813_v42, %v16482_v39  ;;  %v19052_v3 = vld [vmem:[#allocation192_spill] sm:$0xff]  ;;  %v19056_v42 = vld [vmem:[#allocation209_spill] sm:$0xff] }
 0x453   : > { %11938 = vmatpush3.msra.mxu1 %v19026_v13  ;;  %11893 = vmatprep.subr.mxu0 %v19029_v7  ;;  %v6940_v54 = vand.u32 4294901760, %v16487_v60  ;;  %v19054_v13 = vld [vmem:[#allocation199_spill] sm:$0xff] }
 0x454   : > { %11939 = vmatprep.subr.mxu1 %v19030_v52  ;;  %11894 = vmatpush3.msra.mxu0 %v19029_v7  ;;  %v6950_v50 = vand.u32 4294901760, %v16498_v36 }
 0x455   : > { %11940 = vmatpush3.msra.mxu1 %v19030_v52  ;;  %11895 = vmatprep.subr.mxu0 %v19031_v1  ;;  %v6941_v61 = vsub.f32 %v16487_v60, %v6940_v54  ;;  %v19057_v52 = vld [vmem:[#allocation213_spill] sm:$0xff] }
 0x456   : > { %11941 = vmatprep.subr.mxu1 %v19032_v21  ;;  %11896 = vmatpush3.msra.mxu0 %v19031_v1  ;;  %v6951_v4 = vsub.f32 %v16498_v36, %v6950_v50 }
 0x457   : > { %11942 = vmatpush3.msra.mxu1 %v19032_v21  ;;  %11897 = vmatprep.subr.mxu0 %v19033_v38  ;;  %v6942_v34 = vand.u32 4294901760, %v6941_v61  ;;  %v19069_v21 = vld [vmem:[#allocation204_spill] sm:$0xff]  ;;  %v19083_v61 = vld [vmem:[#allocation145_spill] sm:$0xff] }
 0x458   : > { %11943 = vmatprep.subr.mxu1 %v19034_v25  ;;  %11898 = vmatpush3.msra.mxu0 %v19033_v38  ;;  %v6952_v15 = vand.u32 4294901760, %v6951_v4  ;;  %v19088_v4 = vld [vmem:[#allocation233_spill] sm:$0xff] }
 0x459   : > { %11944 = vmatpush3.msra.mxu1 %v19034_v25  ;;  %11899 = vmatprep.subr.mxu0 %v19035_v17  ;;  %v19071_v25 = vld [vmem:[#allocation212_spill] sm:$0xff] }
 0x45a   : > { %11945 = vmatprep.subr.mxu1 %v19036_v20  ;;  %11900 = vmatpush3.msra.mxu0 %v19035_v17 }
 0x45b   : > { %11946 = vmatpush3.msra.mxu1 %v19036_v20  ;;  %11901 = vmatprep.subr.mxu0 %v19037_v24  ;;  %v19074_v20 = vld [vmem:[#allocation220_spill] sm:$0xff] }
 0x45c   : > { %11947 = vmatprep.subr.mxu1 %v19038_v48  ;;  %11902 = vmatpush3.msra.mxu0 %v19037_v24 }
 0x45d   : > { %11948 = vmatpush3.msra.mxu1 %v19038_v48  ;;  %11903 = vmatprep.subr.mxu0 %v19039_v11  ;;  %v19077_v48 = vld [vmem:[#allocation251_spill] sm:$0xff] }
 0x45e   : > { %11950 = vmatmul.mubr.f32.vlgmr.msra.gmra.mxu1 %v16472_v44  ;;  %11993 = vmatprep.subr.mxu1 %v19009_v43 }
 0x45f   : > { %11904 = vmatpush3.msra.mxu0 %v19039_v11  ;;  %11952 = vmatprep.mubr.f32.mxu1 %v16482_v39 }
 0x460   : > { %11994 = vmatpush3.msra.mxu1 %v19009_v43  ;;  %11905 = vmatprep.subr.mxu0 %v19040_v5 }
 0x461   : > { %11995 = vmatprep.subr.mxu1 %v19011_v16  ;;  %11906 = vmatpush3.msra.mxu0 %v19040_v5 }
 0x462   : > { %11996 = vmatpush3.msra.mxu1 %v19011_v16  ;;  %11907 = vmatprep.subr.mxu0 %v19041_v46 }
 0x463   : > { %11953 = vmatmul.mubr.f32.gmra.mxu1 %v16493_v14  ;;  %11997 = vmatprep.subr.mxu1 %v19013_v55 }
 0x464   : > { %11908 = vmatpush3.msra.mxu0 %v19041_v46  ;;  %11998 = vmatpush3.msra.mxu1 %v19013_v55 }
 0x465   : > { %12025 = vmatprep.mubr.f32.mxu1 %v6930_v18  ;;  %11909 = vmatprep.subr.mxu0 %v19042_v62  ;;  %v19044_v18 = vld [vmem:[#allocation157_spill] sm:$0xff] }
 0x466   : > { %11999 = vmatprep.subr.mxu1 %v19015_v41  ;;  %11910 = vmatpush3.msra.mxu0 %v19042_v62 }
 0x467   : > { %12000 = vmatpush3.msra.mxu1 %v19015_v41  ;;  %11912 = vmatmul.mubr.f32.vlgmr.msra.gmra.mxu0 %v6942_v34 }
 0x468   : > { %11955 = vmatprep.subr.mxu0 %v19043_v2  ;;  %12001 = vmatprep.subr.mxu1 %v19017_v8 }
 0x469   : > { %11914 = vmatprep.mubr.f32.mxu0 %v6952_v15  ;;  %11956 = vmatpush3.msra.mxu0 %v19043_v2 }
 0x46a   : > { %12002 = vmatpush3.msra.mxu1 %v19017_v8  ;;  %11957 = vmatprep.subr.mxu0 %v19044_v18 }
 0x46b   : > { %12003 = vmatprep.subr.mxu1 %v19021_v30  ;;  %11958 = vmatpush3.msra.mxu0 %v19044_v18 }
 0x46c   : > { %12004 = vmatpush3.msra.mxu1 %v19021_v30  ;;  %11915 = vmatmul.mubr.f32.gmra.mxu0 %v6962_v26 }
 0x46d   : > { %11959 = vmatprep.subr.mxu0 %v19045_v47  ;;  %12005 = vmatprep.subr.mxu1 %v19025_v57 }
 0x46e   : > { %11960 = vmatpush3.msra.mxu0 %v19045_v47  ;;  %11987 = vmatprep.mubr.f32.mxu0 %v16418_v29  ;;  %v19049_v29 = vld [vmem:[#allocation178_spill] sm:$0xff] }
 0x46f   : > { %12006 = vmatpush3.msra.mxu1 %v19025_v57  ;;  %11961 = vmatprep.subr.mxu0 %v19046_v12 }
 0x470   : > { %12007 = vmatprep.subr.mxu1 %v19029_v7  ;;  %11962 = vmatpush3.msra.mxu0 %v19046_v12 }
 0x471   : > { %12008 = vmatpush3.msra.mxu1 %v19029_v7  ;;  %11963 = vmatprep.subr.mxu0 %v19047_v63 }
 0x472   : > { %12009 = vmatprep.subr.mxu1 %v19031_v1  ;;  %11964 = vmatpush3.msra.mxu0 %v19047_v63 }
 0x473   : > { %12010 = vmatpush3.msra.mxu1 %v19031_v1  ;;  %11965 = vmatprep.subr.mxu0 %v19048_v59 }
 0x474   : > { %12011 = vmatprep.subr.mxu1 %v19033_v38  ;;  %11966 = vmatpush3.msra.mxu0 %v19048_v59 }
 0x475   : > { %12012 = vmatpush3.msra.mxu1 %v19033_v38  ;;  %11967 = vmatprep.subr.mxu0 %v19049_v29 }
 0x476   : > { %12013 = vmatprep.subr.mxu1 %v19035_v17  ;;  %11968 = vmatpush3.msra.mxu0 %v19049_v29 }
 0x477   : > { %12014 = vmatpush3.msra.mxu1 %v19035_v17  ;;  %11969 = vmatprep.subr.mxu0 %v19050_v31 }
 0x478   : > { %12015 = vmatprep.subr.mxu1 %v19037_v24  ;;  %11970 = vmatpush3.msra.mxu0 %v19050_v31 }
 0x479   : > { %12016 = vmatpush3.msra.mxu1 %v19037_v24  ;;  %11971 = vmatprep.subr.mxu0 %v19051_v58 }
 0x47a   : > { %12017 = vmatprep.subr.mxu1 %v19039_v11  ;;  %11972 = vmatpush3.msra.mxu0 %v19051_v58 }
 0x47b   : > { %12018 = vmatpush3.msra.mxu1 %v19039_v11  ;;  %11973 = vmatprep.subr.mxu0 %v19052_v3 }
 0x47c   : > { %12019 = vmatprep.subr.mxu1 %v19040_v5  ;;  %11974 = vmatpush3.msra.mxu0 %v19052_v3 }
 0x47d   : > { %12020 = vmatpush3.msra.mxu1 %v19040_v5  ;;  %11975 = vmatprep.subr.mxu0 %v19053_v49 }
 0x47e   : > { %12021 = vmatprep.subr.mxu1 %v19041_v46  ;;  %11976 = vmatpush3.msra.mxu0 %v19053_v49 }
 0x47f   : > { %12022 = vmatpush3.msra.mxu1 %v19041_v46  ;;  %11977 = vmatprep.subr.mxu0 %v19054_v13 }
 0x480   : > { %12023 = vmatprep.subr.mxu1 %v19042_v62  ;;  %11978 = vmatpush3.msra.mxu0 %v19054_v13 }
 0x481   : > { %12024 = vmatpush3.msra.mxu1 %v19042_v62  ;;  %11979 = vmatprep.subr.mxu0 %v19055_v10 }
 0x482   : > { %12026 = vmatmul.mubr.f32.vlgmr.msra.gmra.mxu1 %v6940_v54  ;;  %12069 = vmatprep.subr.mxu1 %v19009_v43  ;;  %v19078_v54 = vld [vmem:[#allocation253_spill] sm:$0xff] }
 0x483   : > { %11980 = vmatpush3.msra.mxu0 %v19055_v10  ;;  %12028 = vmatprep.mubr.f32.mxu1 %v6950_v50  ;;  %v19081_v50 = vmov 0.0  }
 0x484   : > { %12070 = vmatpush3.msra.mxu1 %v19009_v43  ;;  %11981 = vmatprep.subr.mxu0 %v19056_v42  ;;  %v19058_v43 = vld [vmem:[#allocation216_spill] sm:$0xff] }
 0x485   : > { %12071 = vmatprep.subr.mxu1 %v19011_v16  ;;  %11982 = vmatpush3.msra.mxu0 %v19056_v42 }
 0x486   : > { %12072 = vmatpush3.msra.mxu1 %v19011_v16  ;;  %11983 = vmatprep.subr.mxu0 %v19057_v52  ;;  %v19059_v16 = vld [vmem:[#allocation159_spill] sm:$0xff] }
 0x487   : > { %12029 = vmatmul.mubr.f32.gmra.mxu1 %v6960_v40  ;;  %12073 = vmatprep.subr.mxu1 %v19013_v55  ;;  %v19085_v40 = vld [vmem:[#allocation236_spill] sm:$0xff] }
 0x488   : > { %11984 = vmatpush3.msra.mxu0 %v19057_v52  ;;  %12074 = vmatpush3.msra.mxu1 %v19013_v55  ;;  %v19060_v55 = vld [vmem:[#allocation162_spill] sm:$0xff] }
 0x489   : > { %12101 = vmatprep.mubr.f32.mxu1 %v16402_v22  ;;  %11985 = vmatprep.subr.mxu0 %v19058_v43 }
 0x48a   : > { %12075 = vmatprep.subr.mxu1 %v19015_v41  ;;  %11986 = vmatpush3.msra.mxu0 %v19058_v43 }
 0x48b   : > { %12076 = vmatpush3.msra.mxu1 %v19015_v41  ;;  %11988 = vmatmul.mubr.f32.vlgmr.msra.gmra.mxu0 %v16487_v60  ;;  %v19061_v41 = vld [vmem:[#allocation166_spill] sm:$0xff]  ;;  %v19072_v60 = vld [vmem:[#allocation215_spill] sm:$0xff] }
 0x48c   : > { %12031 = vmatprep.subr.mxu0 %v19059_v16  ;;  %12077 = vmatprep.subr.mxu1 %v19017_v8 }
 0x48d   : > { %11990 = vmatprep.mubr.f32.mxu0 %v16498_v36  ;;  %12032 = vmatpush3.msra.mxu0 %v19059_v16  ;;  %v19076_v36 = vld [vmem:[#allocation222_spill] sm:$0xff] }
 0x48e   : > { %12078 = vmatpush3.msra.mxu1 %v19017_v8  ;;  %12033 = vmatprep.subr.mxu0 %v19060_v55  ;;  %v19062_v8 = vld [vmem:[#allocation168_spill] sm:$0xff] }
 0x48f   : > { %12079 = vmatprep.subr.mxu1 %v19021_v30  ;;  %12034 = vmatpush3.msra.mxu0 %v19060_v55 }
 0x490   : > { %12080 = vmatpush3.msra.mxu1 %v19021_v30  ;;  %11991 = vmatmul.mubr.f32.gmra.mxu0 %v16508_v53  ;;  %v19063_v30 = vld [vmem:[#allocation177_spill] sm:$0xff]  ;;  %v19080_v53 = vld [vmem:[#allocation255_spill] sm:$0xff] }
 0x491   : > { %12035 = vmatprep.subr.mxu0 %v19061_v41  ;;  %12081 = vmatprep.subr.mxu1 %v19025_v57 }
 0x492   : > { %12036 = vmatpush3.msra.mxu0 %v19061_v41  ;;  %12063 = vmatprep.mubr.f32.mxu0 %v16402_v22  ;;  %v19065_v22 = vld [vmem:[#allocation185_spill] sm:$0xff] }
 0x493   : > { %12082 = vmatpush3.msra.mxu1 %v19025_v57  ;;  %12037 = vmatprep.subr.mxu0 %v19062_v8  ;;  %v19066_v57 = vld [vmem:[#allocation190_spill] sm:$0xff] }
 0x494   : > { %12083 = vmatprep.subr.mxu1 %v19029_v7  ;;  %12038 = vmatpush3.msra.mxu0 %v19062_v8 }
 0x495   : > { %12084 = vmatpush3.msra.mxu1 %v19029_v7  ;;  %12039 = vmatprep.subr.mxu0 %v19063_v30  ;;  %v19067_v7 = vld [vmem:[#allocation195_spill] sm:$0xff] }
 0x496   : > { %12085 = vmatprep.subr.mxu1 %v19031_v1  ;;  %12040 = vmatpush3.msra.mxu0 %v19063_v30 }
 0x497   : > { %12086 = vmatpush3.msra.mxu1 %v19031_v1  ;;  %12041 = vmatprep.subr.mxu0 %v19064_v45  ;;  %v19068_v1 = vld [vmem:[#allocation198_spill] sm:$0xff] }
 0x498   : > { %12087 = vmatprep.subr.mxu1 %v19033_v38  ;;  %12042 = vmatpush3.msra.mxu0 %v19064_v45 }
 0x499   : > { %12088 = vmatpush3.msra.mxu1 %v19033_v38  ;;  %12043 = vmatprep.subr.mxu0 %v19065_v22  ;;  %v19070_v38 = vld [vmem:[#allocation208_spill] sm:$0xff] }
 0x49a   : > { %12089 = vmatprep.subr.mxu1 %v19035_v17  ;;  %12044 = vmatpush3.msra.mxu0 %v19065_v22 }
 0x49b   : > { %12090 = vmatpush3.msra.mxu1 %v19035_v17  ;;  %12045 = vmatprep.subr.mxu0 %v19066_v57  ;;  %v19073_v17 = vld [vmem:[#allocation247_spill] sm:$0xff] }
 0x49c   : > { %12091 = vmatprep.subr.mxu1 %v19037_v24  ;;  %12046 = vmatpush3.msra.mxu0 %v19066_v57 }
 0x49d   : > { %12092 = vmatpush3.msra.mxu1 %v19037_v24  ;;  %12047 = vmatprep.subr.mxu0 %v19067_v7  ;;  %v19075_v24 = vld [vmem:[#allocation249_spill] sm:$0xff] }
 0x49e   : > { %12093 = vmatprep.subr.mxu1 %v19039_v11  ;;  %12048 = vmatpush3.msra.mxu0 %v19067_v7 }
 0x49f   : > { %12094 = vmatpush3.msra.mxu1 %v19039_v11  ;;  %12049 = vmatprep.subr.mxu0 %v19068_v1  ;;  %v19079_v11 = vld [vmem:[#allocation254_spill] sm:$0xff] }
 0x4a0   : > { %12095 = vmatprep.subr.mxu1 %v19040_v5  ;;  %12050 = vmatpush3.msra.mxu0 %v19068_v1 }
 0x4a1   : > { %12096 = vmatpush3.msra.mxu1 %v19040_v5  ;;  %12051 = vmatprep.subr.mxu0 %v19069_v21  ;;  %v19082_v5 = vld [vmem:[#allocation141_spill] sm:$0xff] }
 0x4a2   : > { %12097 = vmatprep.subr.mxu1 %v19041_v46  ;;  %12052 = vmatpush3.msra.mxu0 %v19069_v21 }
 0x4a3   : > { %12098 = vmatpush3.msra.mxu1 %v19041_v46  ;;  %12053 = vmatprep.subr.mxu0 %v19070_v38  ;;  %v19084_v46 = vld [vmem:[#allocation234_spill] sm:$0xff] }
 0x4a4   : > { %12099 = vmatprep.subr.mxu1 %v19042_v62  ;;  %12054 = vmatpush3.msra.mxu0 %v19070_v38 }
 0x4a5   : > { %12100 = vmatpush3.msra.mxu1 %v19042_v62  ;;  %12055 = vmatprep.subr.mxu0 %v19071_v25 }
 0x4a6   : > { %12102 = vmatmul.mubr.f32.vlgmr.msra.gmra.mxu1 %v16472_v44  ;;  %12056 = vmatpush3.msra.mxu0 %v19071_v25 }
 0x4a7   : > { %12104 = vmatprep.mubr.f32.mxu1 %v16482_v39  ;;  %12057 = vmatprep.subr.mxu0 %v19072_v60 }
 0x4a8   : > { %12058 = vmatpush3.msra.mxu0 %v19072_v60  ;;  %7775 = vmatprep.subr.mxu1 %v19073_v17  ;;  %v11061_v34 = vpop.f32.mrf.mxu1 }
 0x4a9   : > { %12059 = vmatprep.subr.mxu0 %v19074_v20  ;;  %7781 = vmatpush1.msra.mxu1 %v19075_v24 }
 0x4aa   : > { %12105 = vmatmul.mubr.f32.gmra.mxu1 %v16493_v14  ;;  %12060 = vmatpush3.msra.mxu0 %v19074_v20  ;;  %v11062_v62 = vpop.f32.mrf.mxu1 }
 0x4ab   : > { %12061 = vmatprep.subr.mxu0 %v19076_v36  ;;  %7787 = vmatprep.subr.mxu1 %v19077_v48  ;;  %v11063_v51 = vadd.f32 %v11062_v62, %v11061_v34 }
 0x4ac   : > { %12062 = vmatpush3.msra.mxu0 %v19076_v36  ;;  %7793 = vmatpush1.msra.mxu1 %v19078_v54  ;;  %v11064_v15 = vpop.f32.mrf.mxu1 }
 0x4ad   : > { %12064 = vmatmul.mubr.f32.vlgmr.msra.gmra.mxu0 %v16472_v44  ;;  %7799 = vmatprep.subr.mxu1 %v19079_v11  ;;  %v19086_v44 = vld [vmem:[#allocation239_spill] sm:$0xff] }
 0x4ae   : > { %12066 = vmatprep.mubr.f32.mxu0 %v16482_v39  ;;  %7805 = vmatpush1.msra.mxu1 %v19080_v53  ;;  %v19087_v39 = vld [vmem:[#allocation242_spill] sm:$0xff]  ;;  %v11065_v18 = vpop.f32.mrf.mxu1 }
 0x4af   : > { %7838 = vmatprep.mubr.f32.mxu1 %v19081_v50  ;;  %7656 = vmatprep.subr.mxu0 %v19082_v5  ;;  %v11066_v32 = vadd.f32 %v11065_v18, %v11064_v15 }
 0x4b0   : > { %7658 = vmatpush1.msra.mxu0 %v19083_v61  ;;  %8003 = vmatprep.subr.mxu1 %v19082_v5  ;;  %v11017_v23 = vpop.f32.mrf.mxu0 }
 0x4b1   : > { %12067 = vmatmul.mubr.f32.gmra.mxu0 %v16493_v14  ;;  %7660 = vmatprep.subr.mxu0 %v19084_v46  ;;  %v11067_v14 = vpop.f32.mrf.mxu1 }
 0x4b2   : > { %7662 = vmatpush1.msra.mxu0 %v19085_v40  ;;  %7699 = vmatprep.mubr.f32.mxu0 %v19081_v50  ;;  %v11018_v2 = vpop.f32.mrf.mxu0 }
 0x4b3   : > { %7664 = vmatprep.subr.mxu0 %v19086_v44  ;;  %v11068_v12 = vpop.f32.mrf.mxu1  ;;  %v11019_v19 = vadd.f32 %v11018_v2, %v11017_v23 }
 0x4b4   : > { %7666 = vmatpush1.msra.mxu0 %v19087_v39 }
 0x4b5   : > { %7895 = vmatprep.subr.mxu0 %v19088_v4  ;;  %v6203_v44 = vadd.f32 %v11063_v51, %v11019_v19 }
 0x4b6   : > { %v11020_v26 = vpop.f32.mrf.mxu0 }
 0x4b7   : > { %v11070_v59 = vpop.f32.mrf.mxu1 }
 0x4b8   : > { %v11021_v47 = vpop.f32.mrf.mxu0 }
 0x4b9   : > { %v11071_v31 = vpop.f32.mrf.mxu1  ;;  %v11022_v27 = vadd.f32 %v11021_v47, %v11020_v26  ;;  %v11069_v47 = vadd.f32 %v11068_v12, %v11067_v14 }
 0x4ba   : > { %v11072_v61 = vadd.f32 %v11071_v31, %v11070_v59 }
 0x4bb   : > { %v6210_v5 = vadd.f32 %v11066_v32, %v11022_v27 }
 0x4bc   : > { %v11023_v63 = vpop.f32.mrf.mxu0 }
 0x4be   : > { %v11024_v29 = vpop.f32.mrf.mxu0 }
 0x4bf   : > { %v11025_v50 = vadd.f32 %v11024_v29, %v11023_v63 }
 0x4c1   : > { %v11026_v58 = vpop.f32.mrf.mxu0 }
 0x4c3   : > { %v11027_v49 = vpop.f32.mrf.mxu0 }
 0x4c4   : > { %v11028_v39 = vadd.f32 %v11027_v49, %v11026_v58 }
 0x4c6   : > { %v6224_v23 = vadd.f32 %v11072_v61, %v11028_v39 }
 0x4ce   : > { %v11149_v3 = vpop.f32.mrf.mxu1 }
 0x4d0   : > { %v11150_v13 = vpop.f32.mrf.mxu1 }
 0x4d3   : > { %v11152_v42 = vpop.f32.mrf.mxu1 }
 0x4d5   : > { %v11153_v43 = vpop.f32.mrf.mxu1 }
 0x4d6   : > { %v11154_v15 = vadd.f32 %v11153_v43, %v11152_v42 }
 0x4d7   : > { %v11105_v10 = vpop.f32.mrf.mxu0 }
 0x4d8   : > { %v11155_v55 = vpop.f32.mrf.mxu1 }
 0x4d9   : > { %v11106_v52 = vpop.f32.mrf.mxu0 }
 0x4da   : > { %v11156_v8 = vpop.f32.mrf.mxu1  ;;  %v11107_v33 = vadd.f32 %v11106_v52, %v11105_v10  ;;  %v6217_v10 = vadd.f32 %v11069_v47, %v11025_v50 }
 0x4dc   : > { %v6362_v2 = vadd.f32 %v11107_v33, %v6203_v44 }
 0x4dd   : > { %v11108_v16 = vpop.f32.mrf.mxu0 }
 0x4de   : > { %v11158_v45 = vpop.f32.mrf.mxu1 }
 0x4df   : > { %v11109_v41 = vpop.f32.mrf.mxu0 }
 0x4e0   : > { %v11159_v57 = vpop.f32.mrf.mxu1  ;;  %v11110_v6 = vadd.f32 %v11109_v41, %v11108_v16  ;;  %v11151_v41 = vadd.f32 %v11150_v13, %v11149_v3 }
 0x4e1   : > { %v11160_v58 = vadd.f32 %v11159_v57, %v11158_v45 }
 0x4e2   : > { %v6497_v51 = vadd.f32 %v11151_v41, %v6362_v2 }
 0x4e3   : > { %v11111_v30 = vpop.f32.mrf.mxu0 }
 0x4e5   : > { %v11112_v22 = vpop.f32.mrf.mxu0 }
 0x4e6   : > { %v11113_v18 = vadd.f32 %v11112_v22, %v11111_v30 }
 0x4e8   : > { %v11114_v7 = vpop.f32.mrf.mxu0  ;;  %v6380_v59 = vadd.f32 %v11113_v18, %v6217_v10 }
 0x4ea   : > { %v11115_v21 = vpop.f32.mrf.mxu0 }
 0x4eb   : > { %v11116_v26 = vadd.f32 %v11115_v21, %v11114_v7 }
 0x4ed   : > { %v6389_v52 = vadd.f32 %v11116_v26, %v6224_v23 }
 0x4ef   : > { %v6530_v39 = vadd.f32 %v11160_v58, %v6389_v52 }
 0x4f6   : > { %v11237_v1 = vpop.f32.mrf.mxu1 }
 0x4f8   : > { %v11238_v38 = vpop.f32.mrf.mxu1 }
 0x4f9   : > { %v11239_v31 = vadd.f32 %v11238_v38, %v11237_v1 }
 0x4fb   : > { %v11240_v60 = vpop.f32.mrf.mxu1 }
 0x4fd   : > { %v11241_v20 = vpop.f32.mrf.mxu1 }
 0x4fe   : > { %v11242_v33 = vadd.f32 %v11241_v20, %v11240_v60 }
 0x4ff   : > { %v11193_v25 = vpop.f32.mrf.mxu0 }
 0x500   : > { %v16693_v36 = vpop.f32.mrf.mxu1 }
 0x501   : > { %v11194_v17 = vpop.f32.mrf.mxu0  ;;  %19089 = vst [vmem:[#allocation65_spill] sm:$0xff] %v16693_v36  ;;  %v6371_v36 = vadd.f32 %v11110_v6, %v6210_v5  ;;  %v11157_v5 = vadd.f32 %v11156_v8, %v11155_v55 }
 0x502   : > { %v11244_v54 = vpop.f32.mrf.mxu1  ;;  %v11195_v32 = vadd.f32 %v11194_v17, %v11193_v25 }
 0x503   : > { %v6508_v27 = vadd.f32 %v11154_v15, %v6371_v36  ;;  %v6519_v3 = vadd.f32 %v11157_v5, %v6380_v59  ;;  %v19091_v5 = vmov 0.0  }
 0x504   : > { %v6698_v61 = vadd.f32 %v11195_v32, %v6497_v51 }
 0x505   : > { %v11196_v24 = vpop.f32.mrf.mxu0 }
 0x506   : > { %v11246_v53 = vpop.f32.mrf.mxu1  ;;  %v6823_v30 = vadd.f32 %v11239_v31, %v6698_v61 }
 0x507   : > { %v11197_v48 = vpop.f32.mrf.mxu0 }
 0x508   : > { %v11247_v35 = vpop.f32.mrf.mxu1  ;;  %v11198_v16 = vadd.f32 %v11197_v48, %v11196_v24  ;;  %v19090_v57 = vld [vmem:[#allocation65_spill] sm:$0xff] }
 0x509   : > { %v11248_v13 = vadd.f32 %v11247_v35, %v11246_v53 }
 0x50a   : > { %v6705_v63 = vadd.f32 %v11198_v16, %v6508_v27 }
 0x50b   : > { %v11199_v11 = vpop.f32.mrf.mxu0 }
 0x50c   : > { %v6830_v49 = vadd.f32 %v11242_v33, %v6705_v63 }
 0x50d   : > { %v11200_v4 = vpop.f32.mrf.mxu0 }
 0x50e   : > { %v11201_v44 = vadd.f32 %v11200_v4, %v11199_v11 }
 0x510   : > { %v11202_v56 = vpop.f32.mrf.mxu0  ;;  %v6712_v42 = vadd.f32 %v11201_v44, %v6519_v3 }
 0x512   : > { %v11203_v9 = vpop.f32.mrf.mxu0 }
 0x513   : > { %v11204_v6 = vadd.f32 %v11203_v9, %v11202_v56  ;;  %v11245_v9 = vadd.f32 %v11244_v54, %v19090_v57 }
 0x515   : > { %v6719_v50 = vadd.f32 %v11204_v6, %v6530_v39  ;;  %v6837_v7 = vadd.f32 %v11245_v9, %v6712_v42  ;;  %v19099_v9 = vld [vmem:[#allocation238_spill] sm:$0xff] }
 0x517   : > { %v6844_v55 = vadd.f32 %v11248_v13, %v6719_v50  ;;  %v19095_v50 = vld [vmem:[#allocation239_spill] sm:$0xff] }
 0x51e   : > { %v11951_v37 = vpop.f32.mrf.mxu1 }
 0x520   : > { %v7115_v28 = vpop.f32.mrf.mxu1 }
 0x523   : > { %v11954_v40 = vpop.f32.mrf.mxu1 }
 0x525   : > { %v7127_v34 = vpop.f32.mrf.mxu1 }
 0x527   : > { %v11913_v0 = vpop.f32.mrf.mxu0 }
 0x528   : > { %v6945_v43 = vadd.f32 %v11913_v0, %v6830_v49  ;;  %v19096_v49 = vld [vmem:[#allocation242_spill] sm:$0xff] }
 0x529   : > { %v6934_v46 = vpop.f32.mrf.mxu0 }
 0x52a   : > { %v6935_v56 = vadd.f32 %v6934_v46, %v6823_v30  ;;  %v7122_v21 = vadd.f32 %v11951_v37, %v6945_v43 }
 0x52c   : > { %v11916_v62 = vpop.f32.mrf.mxu0  ;;  %v7116_v38 = vadd.f32 %v7115_v28, %v6935_v56 }
 0x52d   : > { %v6965_v8 = vadd.f32 %v11916_v62, %v6844_v55 }
 0x52e   : > { %v6954_v14 = vpop.f32.mrf.mxu0 }
 0x52f   : > { %v6955_v17 = vadd.f32 %v6954_v14, %v6837_v7  ;;  %v7134_v35 = vadd.f32 %v11954_v40, %v6965_v8  ;;  %v19092_v14 = vld [vmem:[#allocation145_spill] sm:$0xff] }
 0x530   : > { %v19100_v8 = vld [vmem:[#allocation241_spill] sm:$0xff] }
 0x531   : > { %v7128_v48 = vadd.f32 %v7127_v34, %v6955_v17 }
 0x542   : > { %v12027_v19 = vpop.f32.mrf.mxu1 }
 0x544   : > { %v7347_v12 = vpop.f32.mrf.mxu1 }
 0x547   : > { %v12030_v45 = vpop.f32.mrf.mxu1 }
 0x549   : > { %v7363_v25 = vpop.f32.mrf.mxu1 }
 0x54b   : > { %v11989_v29 = vpop.f32.mrf.mxu0 }
 0x54c   : > { %v7245_v1 = vadd.f32 %v11989_v29, %v7122_v21  ;;  %v19094_v29 = vld [vmem:[#allocation236_spill] sm:$0xff] }
 0x54d   : > { %v7237_v22 = vpop.f32.mrf.mxu0  ;;  %v19101_v21 = vld [vmem:[#allocation244_spill] sm:$0xff] }
 0x54e   : > { %v7238_v24 = vadd.f32 %v7237_v22, %v7116_v38  ;;  %v7356_v11 = vadd.f32 %v12027_v19, %v7245_v1  ;;  %v19098_v22 = vld [vmem:[#allocation235_spill] sm:$0xff]  ;;  %v19103_v1 = vld [vmem:[#allocation237_spill] sm:$0xff]  ;;  %v19104_v38 = vld [vmem:[#allocation240_spill] sm:$0xff] }
 0x550   : > { %v11992_v60 = vpop.f32.mrf.mxu0  ;;  %v7348_v26 = vadd.f32 %v7347_v12, %v7238_v24  ;;  %v19093_v12 = vld [vmem:[#allocation234_spill] sm:$0xff]  ;;  %v19106_v24 = vld [vmem:[#allocation245_spill] sm:$0xff] }
 0x551   : > { %v7259_v0 = vadd.f32 %v11992_v60, %v7134_v35  ;;  %v19102_v60 = vld [vmem:[#allocation246_spill] sm:$0xff]  ;;  %v19107_v35 = vld [vmem:[#allocation248_spill] sm:$0xff] }
 0x552   : > { %v7251_v36 = vpop.f32.mrf.mxu0 }
 0x553   : > { %v7252_v54 = vadd.f32 %v7251_v36, %v7128_v48  ;;  %v7372_v23 = vadd.f32 %v12030_v45, %v7259_v0  ;;  %v19097_v45 = vld [vmem:[#allocation141_spill] sm:$0xff]  ;;  %v19109_v0 = vld [vmem:[#allocation250_spill] sm:$0xff] }
 0x554   : > { %v19108_v36 = vld [vmem:[#allocation265_spill] sm:$0xff] }
 0x555   : > { %v7364_v40 = vadd.f32 %v7363_v25, %v7252_v54  ;;  %v19110_v48 = vld [vmem:[#allocation257_spill] sm:$0xff]  ;;  %v19114_v54 = vld [vmem:[#allocation262_spill] sm:$0xff] }
 0x566   : > { %v12103_v20 = vpop.f32.mrf.mxu1 }
 0x568   : > { %v7595_v53 = vpop.f32.mrf.mxu1 }
 0x56a   : > { %v12106_v15 = vpop.f32.mrf.mxu1 }
 0x56c   : > { %v7607_v27 = vpop.f32.mrf.mxu1 }
 0x56d   : > { %v12065_v4 = vpop.f32.mrf.mxu0 }
 0x56e   : > { %v7497_v46 = vadd.f32 %v12065_v4, %v7356_v11  ;;  %v19111_v11 = vld [vmem:[#allocation267_spill] sm:$0xff] }
 0x56f   : > { %v7490_v47 = vpop.f32.mrf.mxu0  ;;  %v19113_v4 = vld [vmem:[#allocation259_spill] sm:$0xff] }
 0x570   : > { %v7602_v2 = vadd.f32 %v12103_v20, %v7497_v46  ;;  %v7491_v37 = vadd.f32 %v7490_v47, %v7348_v26  ;;  %v19105_v20 = vld [vmem:[#allocation243_spill] sm:$0xff]  ;;  %v19115_v46 = vld [vmem:[#allocation258_spill] sm:$0xff]  ;;  %v19116_v26 = vld [vmem:[#allocation261_spill] sm:$0xff] }
 0x571   : > { %v12068_v18 = vpop.f32.mrf.mxu0  ;;  %v19117_v47 = vld [vmem:[#allocation264_spill] sm:$0xff] }
 0x572   : > { %v7621_v28 = vsel %vm4515_vm0, %v7602_v2, 0  ;;  %v7596_v16 = vadd.f32 %v7595_v53, %v7491_v37  ;;  %v7509_v41 = vadd.f32 %v12068_v18, %v7372_v23  ;;  %v19112_v53 = vld [vmem:[#allocation268_spill] sm:$0xff]  ;;  %v19119_v37 = vld [vmem:[#allocation263_spill] sm:$0xff]  ;;  %v19120_v23 = vld [vmem:[#allocation266_spill] sm:$0xff] }
 0x573   : > { %v16697_v62 = vand.u32 4294901760, %v7621_v28  ;;  %v7502_v34 = vpop.f32.mrf.mxu0  ;;  %v19118_v2 = vld [vmem:[#allocation260_spill] sm:$0xff] }
 0x574   : > { %v7618_v10 = vsel %vm4515_vm0, %v7596_v16, 0  ;;  %v7614_v52 = vadd.f32 %v12106_v15, %v7509_v41  ;;  %v7503_v32 = vadd.f32 %v7502_v34, %v7364_v40  ;;  %v8995_v15 = vld [vmem:[%s17494_s9 + $0x78] sm:$0xff]  ;;  %v8993_v40 = vld [vmem:[%s17494_s9 + $0x68] sm:$0xff] }
 0x575   : > { %v16701_v51 = vsub.f32 %v7621_v28, %v16697_v62  ;;  %v16703_v19 = vand.u32 4294901760, %v7618_v10  ;;  %v16879_v18 = vand.u32 4294901760, %v8995_v15  ;;  %v8994_v28 = vld [vmem:[%s17494_s9 + $0x70] sm:$0xff] }
 0x576   : > { %v7627_v58 = vsel %vm4515_vm0, %v7614_v52, 0  ;;  %v7608_v59 = vadd.f32 %v7607_v27, %v7503_v32  ;;  %v16887_v41 = vand.u32 4294901760, %v8994_v28  ;;  %v8992_v52 = vld [vmem:[%s17494_s9 + $0x60] sm:$0xff] }
 0x577   : > { %v16707_v63 = vsub.f32 %v7618_v10, %v16703_v19  ;;  %7840 = vmatmul.mubr.f32.vlgmr.msra.gmra.mxu1 %v16703_v19  ;;  %v16716_v61 = vand.u32 4294901760, %v7627_v58  ;;  %v16721_v39 = vand.u32 4294901760, %v16701_v51  ;;  %v16885_v16 = vsub.f32 %v8995_v15, %v16879_v18 }
 0x578   : > { %v7624_v6 = vsel %vm4515_vm0, %v7608_v59, 0  ;;  %7845 = vmatprep.mubr.f32.mxu1 %v19091_v5  ;;  %8005 = vmatpush1.msra.mxu1 %v19092_v14  ;;  %v16898_v34 = vsub.f32 %v8994_v28, %v16887_v41  ;;  %v16900_v10 = vand.u32 4294901760, %v8993_v40 }
 0x579   : > { %v16714_v33 = vand.u32 4294901760, %v16707_v63  ;;  %v16718_v44 = vand.u32 4294901760, %v7624_v6  ;;  %8007 = vmatprep.subr.mxu1 %v19093_v12  ;;  %v16737_v42 = vsub.f32 %v7627_v58, %v16716_v61  ;;  %v7714_v43 = vsub.f32 %v16701_v51, %v16721_v39  ;;  %v8991_v58 = vld [vmem:[%s17494_s9 + $0x58] sm:$0xff] }
 0x57a   : > { %8009 = vmatpush1.msra.mxu1 %v19094_v29  ;;  %v16910_v27 = vand.u32 4294901760, %v16898_v34 }
 0x57b   : > { %v7703_v31 = vsub.f32 %v16707_v63, %v16714_v33  ;;  %v16728_v3 = vsub.f32 %v7624_v6, %v16718_v44  ;;  %7847 = vmatmul.mubr.f32.gmra.mxu1 %v16697_v62  ;;  %8011 = vmatprep.subr.mxu1 %v19095_v50  ;;  %v16750_v57 = vand.u32 4294901760, %v7714_v43  ;;  %v16756_v55 = vand.u32 4294901760, %v16737_v42  ;;  %v8988_v43 = vld [vmem:[%s17494_s9 + $0x40] sm:$0xff] }
 0x57c   : > { %7852 = vmatprep.mubr.f32.mxu1 %v19091_v5  ;;  %8013 = vmatpush1.msra.mxu1 %v19096_v49  ;;  %19122 = vst [vmem:[#allocation68_spill] sm:$0xff] %v16910_v27 }
 0x57d   : > { %v16734_v13 = vand.u32 4294901760, %v7703_v31  ;;  %v16742_v30 = vand.u32 4294901760, %v16728_v3  ;;  %8221 = vmatprep.subr.mxu1 %v19097_v45  ;;  %v7736_v25 = vsub.f32 %v16737_v42, %v16756_v55  ;;  %v8989_v31 = vld [vmem:[%s17494_s9 + $0x48] sm:$0xff] }
 0x57f   : > { %7705 = vmatmul.mubr.f32.vlgmr.msra.gmra.mxu0 %v16734_v13  ;;  %7854 = vmatmul.mubr.f32.gmra.mxu1 %v16718_v44  ;;  %v7725_v56 = vsub.f32 %v16728_v3, %v16742_v30  ;;  %v16773_v17 = vand.u32 4294901760, %v7736_v25 }
 0x580   : > { %7898 = vmatpush1.msra.mxu0 %v19098_v22  ;;  %7710 = vmatprep.mubr.f32.mxu0 %v19091_v5 }
 0x581   : > { %7859 = vmatprep.mubr.f32.mxu1 %v19091_v5  ;;  %7901 = vmatprep.subr.mxu0 %v19099_v9  ;;  %v16763_v7 = vand.u32 4294901760, %v7725_v56  ;;  %v8987_v56 = vld [vmem:[%s17494_s9 + $0x38] sm:$0xff] }
 0x582   : > { %7904 = vmatpush1.msra.mxu0 %v19100_v8 }
 0x583   : > { %7716 = vmatmul.mubr.f32.gmra.mxu0 %v16750_v57  ;;  %7861 = vmatmul.mubr.f32.gmra.mxu1 %v16716_v61 }
 0x584   : > { %7721 = vmatprep.mubr.f32.mxu0 %v19091_v5  ;;  %8046 = vmatprep.mubr.f32.mxu1 %v19091_v5 }
 0x585   : > { %7907 = vmatprep.subr.mxu0 %v19101_v21  ;;  %v16989_v21 = vand.u32 4294901760, %v8987_v56 }
 0x586   : > { %7910 = vmatpush1.msra.mxu0 %v19102_v60  ;;  %v8986_v60 = vld [vmem:[%s17494_s9 + $0x30] sm:$0xff] }
 0x587   : > { %7727 = vmatmul.mubr.f32.gmra.mxu0 %v16763_v7  ;;  %8050 = vmatmul.mubr.f32.vlgmr.msra.gmra.mxu1 %v16714_v33  ;;  %19131 = vst [vmem:[#allocation22_spill] sm:$0xff] %v16989_v21 }
 0x588   : > { %7732 = vmatprep.mubr.f32.mxu0 %v19091_v5  ;;  %8055 = vmatprep.mubr.f32.mxu1 %v19091_v5 }
 0x589   : > { %8112 = vmatprep.subr.mxu0 %v19103_v1  ;;  %8223 = vmatpush1.msra.mxu1 %v19092_v14  ;;  %v16931_v14 = vand.u32 4294901760, %v8991_v58 }
 0x58a   : > { %8225 = vmatprep.subr.mxu1 %v19093_v12 }
 0x58b   : > { %7738 = vmatmul.mubr.f32.gmra.mxu0 %v16773_v17  ;;  %8059 = vmatmul.mubr.f32.gmra.mxu1 %v16721_v39 }
 0x58c   : > { %7943 = vmatprep.mubr.f32.mxu0 %v19091_v5  ;;  %8064 = vmatprep.mubr.f32.mxu1 %v19091_v5 }
 0x58d   : > { %8227 = vmatpush1.msra.mxu1 %v19094_v29  ;;  %v16945_v29 = vsub.f32 %v8991_v58, %v16931_v14 }
 0x58e   : > { %8229 = vmatprep.subr.mxu1 %v19095_v50 }
 0x58f   : > { %7946 = vmatmul.mubr.f32.vlgmr.msra.gmra.mxu0 %v16707_v63  ;;  %8068 = vmatmul.mubr.f32.gmra.mxu1 %v16742_v30 }
 0x590   : > { %8116 = vmatpush1.msra.mxu0 %v19104_v38  ;;  %7951 = vmatprep.mubr.f32.mxu0 %v19091_v5 }
 0x591   : > { %8073 = vmatprep.mubr.f32.mxu1 %v19091_v5  ;;  %8120 = vmatprep.subr.mxu0 %v19105_v20  ;;  %v17002_v20 = vsub.f32 %v8987_v56, %v16989_v21 }
 0x592   : > { %8124 = vmatpush1.msra.mxu0 %v19106_v24  ;;  %8231 = vmatpush1.msra.mxu1 %v19096_v49  ;;  %v17005_v24 = vand.u32 4294901760, %v8986_v60 }
 0x593   : > { %7954 = vmatmul.mubr.f32.gmra.mxu0 %v16701_v51  ;;  %8077 = vmatmul.mubr.f32.gmra.mxu1 %v16756_v55  ;;  %19133 = vst [vmem:[#allocation25_spill] sm:$0xff] %v17002_v20 }
 0x594   : > { %7959 = vmatprep.mubr.f32.mxu0 %v19091_v5  ;;  %8264 = vmatprep.mubr.f32.mxu1 %v19091_v5  ;;  %19134 = vst [vmem:[#allocation102_spill] sm:$0xff] %v17005_v24 }
 0x595   : > { %8128 = vmatprep.subr.mxu0 %v19107_v35  ;;  %12119 = vmatprep.subr.mxu1 %v19108_v36  ;;  %v8985_v35 = vld [vmem:[%s17494_s9 + $0x28] sm:$0xff] }
 0x596   : > { %8132 = vmatpush1.msra.mxu0 %v19109_v0 }
 0x597   : > { %7962 = vmatmul.mubr.f32.gmra.mxu0 %v16728_v3  ;;  %8266 = vmatmul.mubr.f32.vlgmr.msra.gmra.mxu1 %v16703_v19 }
 0x598   : > { %7967 = vmatprep.mubr.f32.mxu0 %v19091_v5  ;;  %8271 = vmatprep.mubr.f32.mxu1 %v19091_v5 }
 0x599   : > { %12120 = vmatpush3.msra.mxu1 %v19108_v36  ;;  %12107 = vmatprep.subr.mxu0 %v19110_v48 }
 0x59a   : > { %12121 = vmatprep.subr.mxu1 %v19111_v11 }
 0x59b   : > { %7970 = vmatmul.mubr.f32.gmra.mxu0 %v16737_v42  ;;  %8273 = vmatmul.mubr.f32.gmra.mxu1 %v16697_v62 }
 0x59c   : > { %8165 = vmatprep.mubr.f32.mxu0 %v19091_v5  ;;  %8278 = vmatprep.mubr.f32.mxu1 %v19091_v5 }
 0x59d   : > { %12122 = vmatpush3.msra.mxu1 %v19111_v11  ;;  %v17016_v11 = vand.u32 4294901760, %v8985_v35 }
 0x59e   : > { %12123 = vmatprep.subr.mxu1 %v19112_v53 }
 0x59f   : > { %8167 = vmatmul.mubr.f32.vlgmr.msra.gmra.mxu0 %v16703_v19  ;;  %8280 = vmatmul.mubr.f32.gmra.mxu1 %v16718_v44  ;;  %19136 = vst [vmem:[#allocation105_spill] sm:$0xff] %v17016_v11 }
 0x5a0   : > { %8172 = vmatprep.mubr.f32.mxu0 %v19091_v5  ;;  %8285 = vmatprep.mubr.f32.mxu1 %v19091_v5 }
 0x5a1   : > { %12124 = vmatpush3.msra.mxu1 %v19112_v53  ;;  %12108 = vmatpush3.msra.mxu0 %v19110_v48  ;;  %v17020_v53 = vsub.f32 %v8986_v60, %v17005_v24 }
 0x5a2   : > { %12143 = vmatprep.subr.mxu1 %v19110_v48  ;;  %12109 = vmatprep.subr.mxu0 %v19113_v4 }
 0x5a3   : > { %8174 = vmatmul.mubr.f32.gmra.mxu0 %v16697_v62  ;;  %8287 = vmatmul.mubr.f32.gmra.mxu1 %v16716_v61  ;;  %19137 = vst [vmem:[#allocation32_spill] sm:$0xff] %v17020_v53 }
 0x5a4   : > { %12125 = vmatprep.mubr.f32.mxu1 %v16703_v19  ;;  %8179 = vmatprep.mubr.f32.mxu0 %v19091_v5 }
 0x5a5   : > { %12110 = vmatpush3.msra.mxu0 %v19113_v4 }
 0x5a6   : > { %12111 = vmatprep.subr.mxu0 %v19114_v54 }
 0x5a7   : > { %8181 = vmatmul.mubr.f32.gmra.mxu0 %v16718_v44  ;;  %12126 = vmatmul.mubr.f32.vlgmr.msra.gmra.mxu1 %v16697_v62 }
 0x5a8   : > { %12128 = vmatprep.mubr.f32.mxu1 %v16718_v44  ;;  %8186 = vmatprep.mubr.f32.mxu0 %v19091_v5 }
 0x5a9   : > { %12144 = vmatpush3.msra.mxu1 %v19110_v48  ;;  %12112 = vmatpush3.msra.mxu0 %v19114_v54 }
 0x5aa   : > { %12145 = vmatprep.subr.mxu1 %v19113_v4  ;;  %12131 = vmatprep.subr.mxu0 %v19115_v46 }
 0x5ab   : > { %8188 = vmatmul.mubr.f32.gmra.mxu0 %v16716_v61  ;;  %12129 = vmatmul.mubr.f32.gmra.mxu1 %v16716_v61 }
 0x5ac   : > { %12113 = vmatprep.mubr.f32.mxu0 %v16734_v13  ;;  %12146 = vmatpush3.msra.mxu1 %v19113_v4  ;;  %v16956_v13 = vand.u32 4294901760, %v8989_v31 }
 0x5ad   : > { %12149 = vmatprep.mubr.f32.mxu1 %v16714_v33  ;;  %12147 = vmatprep.subr.mxu1 %v19114_v54  ;;  %v8990_v33 = vld [vmem:[%s17494_s9 + $0x50] sm:$0xff] }
 0x5ae   : > { %12148 = vmatpush3.msra.mxu1 %v19114_v54  ;;  %v16942_v12 = vand.u32 4294901760, %v8990_v33  ;;  %v16970_v22 = vsub.f32 %v8989_v31, %v16956_v13 }
 0x5af   : > { %12114 = vmatmul.mubr.f32.vlgmr.msra.gmra.mxu0 %v16750_v57  ;;  %12150 = vmatmul.mubr.f32.vlgmr.msra.gmra.mxu1 %v16721_v39  ;;  %v16972_v57 = vand.u32 4294901760, %v8988_v43 }
 0x5b0   : > { %12116 = vmatprep.mubr.f32.mxu0 %v16763_v7  ;;  %12152 = vmatprep.mubr.f32.mxu1 %v16742_v30  ;;  %v16954_v49 = vsub.f32 %v8990_v33, %v16942_v12  ;;  %19128 = vst [vmem:[#allocation78_spill] sm:$0xff] %v16970_v22  ;;  %v16984_v8 = vand.u32 4294901760, %v16970_v22 }
 0x5b1   : > { %12167 = vmatprep.subr.mxu1 %v19110_v48  ;;  %12132 = vmatpush3.msra.mxu0 %v19115_v46  ;;  %v16987_v7 = vsub.f32 %v8988_v43, %v16972_v57 }
 0x5b2   : > { %12168 = vmatpush3.msra.mxu1 %v19110_v48  ;;  %12133 = vmatprep.subr.mxu0 %v19116_v26  ;;  %19125 = vst [vmem:[#allocation37_spill] sm:$0xff] %v16954_v49  ;;  %v16967_v45 = vand.u32 4294901760, %v16954_v49  ;;  %19129 = vst [vmem:[#allocation4_spill] sm:$0xff] %v16984_v8  ;;  %v9163_v1 = vsub.f32 %v16970_v22, %v16984_v8  ;;  %v17014_v48 = vand.u32 4294901760, %v17002_v20 }
 0x5b3   : > { %12117 = vmatmul.mubr.f32.gmra.mxu0 %v16773_v17  ;;  %12153 = vmatmul.mubr.f32.gmra.mxu1 %v16756_v55  ;;  %19130 = vst [vmem:[#allocation85_spill] sm:$0xff] %v16987_v7  ;;  %v16999_v38 = vand.u32 4294901760, %v16987_v7 }
 0x5b4   : > { %12169 = vmatprep.subr.mxu1 %v19113_v4  ;;  %12134 = vmatpush3.msra.mxu0 %v19116_v26  ;;  %19127 = vst [vmem:[#allocation17_spill] sm:$0xff] %v16967_v45  ;;  %v9156_v55 = vsub.f32 %v16954_v49, %v16967_v45  ;;  %v9164_v36 = vand.u32 4294901760, %v9163_v1  ;;  %19135 = vst [vmem:[#allocation26_spill] sm:$0xff] %v17014_v48  ;;  %v9177_v46 = vsub.f32 %v17002_v20, %v17014_v48 }
 0x5b5   : > { %12137 = vmatprep.mubr.f32.mxu0 %v16707_v63  ;;  %12170 = vmatpush3.msra.mxu1 %v19113_v4  ;;  %v9128_v63 = vsub.f32 %v16898_v34, %v16910_v27  ;;  %19132 = vst [vmem:[#allocation89_spill] sm:$0xff] %v16999_v38  ;;  %v9170_v0 = vsub.f32 %v16987_v7, %v16999_v38  ;;  %v8984_v4 = vld [vmem:[%s17494_s9 + $0x20] sm:$0xff] }
 0x5b6   : > { %12173 = vmatprep.mubr.f32.mxu1 %v16703_v19  ;;  %12135 = vmatprep.subr.mxu0 %v19117_v47  ;;  %v9157_v17 = vand.u32 4294901760, %v9156_v55  ;;  %v17029_v26 = vsub.f32 %v8985_v35, %v17016_v11 }
 0x5b7   : > { %12171 = vmatprep.subr.mxu1 %v19114_v54  ;;  %12136 = vmatpush3.msra.mxu0 %v19117_v47  ;;  %v17031_v47 = vand.u32 4294901760, %v8984_v4 }
 0x5b8   : > { %12172 = vmatpush3.msra.mxu1 %v19114_v54  ;;  %12138 = vmatmul.mubr.f32.vlgmr.msra.gmra.mxu0 %v16701_v51  ;;  %v16913_v51 = vsub.f32 %v8993_v40, %v16900_v10  ;;  %v9171_v54 = vand.u32 4294901760, %v9170_v0  ;;  %19138 = vst [vmem:[#allocation108_spill] sm:$0xff] %v17029_v26  ;;  %v17042_v15 = vand.u32 4294901760, %v17029_v26 }
 0x5b9   : > { %12174 = vmatmul.mubr.f32.vlgmr.msra.gmra.mxu1 %v16697_v62  ;;  %12140 = vmatprep.mubr.f32.mxu0 %v16728_v3  ;;  %19139 = vst [vmem:[#allocation16_spill] sm:$0xff] %v17031_v47  ;;  %v17045_v28 = vsub.f32 %v8984_v4, %v17031_v47 }
 0x5ba   : > { %12176 = vmatprep.mubr.f32.mxu1 %v16718_v44  ;;  %12155 = vmatprep.subr.mxu0 %v19118_v2  ;;  %v16925_v6 = vand.u32 4294901760, %v16913_v51  ;;  %19141 = vst [vmem:[#allocation114_spill] sm:$0xff] %v17042_v15  ;;  %v9191_v58 = vsub.f32 %v17029_v26, %v17042_v15 }
 0x5bb   : > { %12156 = vmatpush3.msra.mxu0 %v19118_v2  ;;  %v17035_v2 = vand.u32 4294901760, %v17020_v53  ;;  %19142 = vst [vmem:[#allocation116_spill] sm:$0xff] %v17045_v28 }
 0x5bc   : > { %12141 = vmatmul.mubr.f32.gmra.mxu0 %v16737_v42  ;;  %12157 = vmatprep.subr.mxu0 %v19119_v37  ;;  %19123 = vst [vmem:[#allocation15_spill] sm:$0xff] %v16925_v6  ;;  %v16960_v42 = vand.u32 4294901760, %v16945_v29  ;;  %v9192_v31 = vand.u32 4294901760, %v9191_v58 }
 0x5bd   : > { %12177 = vmatmul.mubr.f32.gmra.mxu1 %v16716_v61  ;;  %12158 = vmatpush3.msra.mxu0 %v19119_v37  ;;  %19140 = vst [vmem:[#allocation111_spill] sm:$0xff] %v17035_v2  ;;  %v8983_v37 = vld [vmem:[%s17494_s9 + $0x18] sm:$0xff] }
 0x5be   : > { %12161 = vmatprep.mubr.f32.mxu0 %v16703_v19  ;;  %12159 = vmatprep.subr.mxu0 %v19120_v23  ;;  %v16915_v19 = vand.u32 4294901760, %v8992_v52  ;;  %19126 = vst [vmem:[#allocation75_spill] sm:$0xff] %v16960_v42  ;;  %v9149_v9 = vsub.f32 %v16945_v29, %v16960_v42  ;;  %v17047_v40 = vand.u32 4294901760, %v8983_v37 }
 0x5bf   : > { %12160 = vmatpush3.msra.mxu0 %v19120_v23  ;;  %v9178_v23 = vand.u32 4294901760, %v9177_v46 }
 0x5c0   : > { %12162 = vmatmul.mubr.f32.vlgmr.msra.gmra.mxu0 %v16697_v62  ;;  %12179 = vmatprep.subr.mxu0 %v16879_v18  ;;  %v16895_v62 = vand.u32 4294901760, %v16885_v16  ;;  %v16928_v5 = vsub.f32 %v8992_v52, %v16915_v19  ;;  %v9150_v25 = vand.u32 4294901760, %v9149_v9  ;;  %19143 = vst [vmem:[#allocation118_spill] sm:$0xff] %v17047_v40  ;;  %v9184_v52 = vsub.f32 %v17020_v53, %v17035_v2  ;;  %v8980_v9 = vld [vmem:[%s17494_s9] sm:$0xff] }
 0x5c1   : > { %12164 = vmatprep.mubr.f32.mxu0 %v16718_v44  ;;  %12180 = vmatpush3.msra.mxu0 %v16879_v18  ;;  %v9135_v44 = vsub.f32 %v16913_v51, %v16925_v6  ;;  %v17091_v60 = vand.u32 4294901760, %v8980_v9 }
 0x5c2   : > { %19121 = vst [vmem:[#allocation2_spill] sm:$0xff] %v16895_v62  ;;  %12181 = vmatprep.subr.mxu0 %v16887_v41  ;;  %v9121_v32 = vsub.f32 %v16885_v16, %v16895_v62  ;;  %v16940_v39 = vand.u32 4294901760, %v16928_v5 }
 0x5c3   : > { %12182 = vmatpush3.msra.mxu0 %v16887_v41  ;;  %v9136_v3 = vand.u32 4294901760, %v9135_v44  ;;  %v8981_v44 = vld [vmem:[%s17494_s9 + $0x8] sm:$0xff]  ;;  %19151 = vst [vmem:[#allocation128_spill] sm:$0xff] %v17091_v60 }
 0x5c4   : > { %12165 = vmatmul.mubr.f32.gmra.mxu0 %v16716_v61  ;;  %12183 = vmatprep.subr.mxu0 %v16900_v10  ;;  %v9122_v59 = vand.u32 4294901760, %v9121_v32  ;;  %v9129_v61 = vand.u32 4294901760, %v9128_v63  ;;  %19124 = vst [vmem:[#allocation72_spill] sm:$0xff] %v16940_v39  ;;  %v9142_v50 = vsub.f32 %v16928_v5, %v16940_v39  ;;  %v8982_v32 = vld [vmem:[%s17494_s9 + $0x10] sm:$0xff]  ;;  %v17062_v63 = vsub.f32 %v8983_v37, %v17047_v40 }
 0x5c5   : > { %12184 = vmatpush3.msra.mxu0 %v16900_v10  ;;  %v17064_v33 = vand.u32 4294901760, %v8982_v32 }
 0x5c6   : > { %12185 = vmatprep.subr.mxu0 %v16915_v19  ;;  %12217 = vmatprep.subr.mxu1 %v9122_v59  ;;  %v9143_v30 = vand.u32 4294901760, %v9142_v50  ;;  %19145 = vst [vmem:[#allocation122_spill] sm:$0xff] %v17062_v63  ;;  %v17074_v50 = vand.u32 4294901760, %v17062_v63 }
 0x5c7   : > { %12186 = vmatpush3.msra.mxu0 %v16915_v19  ;;  %12218 = vmatpush3.msra.mxu1 %v9122_v59  ;;  %v17059_v59 = vand.u32 4294901760, %v17045_v28  ;;  %19146 = vst [vmem:[#allocation123_spill] sm:$0xff] %v17064_v33  ;;  %v17077_v43 = vsub.f32 %v8982_v32, %v17064_v33 }
 0x5c8   : > { %12187 = vmatprep.subr.mxu0 %v16931_v14  ;;  %12219 = vmatprep.subr.mxu1 %v9129_v61  ;;  %19147 = vst [vmem:[#allocation124_spill] sm:$0xff] %v17074_v50  ;;  %v9205_v55 = vsub.f32 %v17062_v63, %v17074_v50 }
 0x5c9   : > { %12188 = vmatpush3.msra.mxu0 %v16931_v14  ;;  %12220 = vmatpush3.msra.mxu1 %v9129_v61  ;;  %19144 = vst [vmem:[#allocation120_spill] sm:$0xff] %v17059_v59  ;;  %v9185_v61 = vand.u32 4294901760, %v9184_v52  ;;  %19148 = vst [vmem:[#allocation125_spill] sm:$0xff] %v17077_v43 }
 0x5ca   : > { %12189 = vmatprep.subr.mxu0 %v16942_v12  ;;  %12221 = vmatprep.subr.mxu1 %v9136_v3  ;;  %v9206_v1 = vand.u32 4294901760, %v9205_v55 }
 0x5cb   : > { %12190 = vmatpush3.msra.mxu0 %v16942_v12  ;;  %12222 = vmatpush3.msra.mxu1 %v9136_v3  ;;  %v9198_v3 = vsub.f32 %v17045_v28, %v17059_v59 }
 0x5cc   : > { %12191 = vmatprep.subr.mxu0 %v16956_v13  ;;  %12223 = vmatprep.subr.mxu1 %v9143_v30 }
 0x5cd   : > { %12192 = vmatpush3.msra.mxu0 %v16956_v13  ;;  %12224 = vmatpush3.msra.mxu1 %v9143_v30  ;;  %v17080_v30 = vand.u32 4294901760, %v8981_v44  ;;  %v9199_v56 = vand.u32 4294901760, %v9198_v3 }
 0x5ce   : > { %12193 = vmatprep.subr.mxu0 %v16972_v57  ;;  %12225 = vmatprep.subr.mxu1 %v9150_v25 }
 0x5cf   : > { %12194 = vmatpush3.msra.mxu0 %v16972_v57  ;;  %12226 = vmatpush3.msra.mxu1 %v9150_v25  ;;  %19149 = vst [vmem:[#allocation126_spill] sm:$0xff] %v17080_v30  ;;  %v17089_v25 = vand.u32 4294901760, %v17077_v43 }
 0x5d0   : > { %12195 = vmatprep.subr.mxu0 %v16989_v21  ;;  %12227 = vmatprep.subr.mxu1 %v9157_v17 }
 0x5d1   : > { %12196 = vmatpush3.msra.mxu0 %v16989_v21  ;;  %12228 = vmatpush3.msra.mxu1 %v9157_v17  ;;  %19150 = vst [vmem:[#allocation127_spill] sm:$0xff] %v17089_v25  ;;  %v17095_v17 = vsub.f32 %v8981_v44, %v17080_v30  ;;  %v9212_v35 = vsub.f32 %v17077_v43, %v17089_v25 }
 0x5d2   : > { %12197 = vmatprep.subr.mxu0 %v17005_v24  ;;  %12229 = vmatprep.subr.mxu1 %v9164_v36 }
 0x5d3   : > { %12198 = vmatpush3.msra.mxu0 %v17005_v24  ;;  %12230 = vmatpush3.msra.mxu1 %v9164_v36  ;;  %19152 = vst [vmem:[#allocation129_spill] sm:$0xff] %v17095_v17  ;;  %v17101_v36 = vsub.f32 %v8980_v9, %v17091_v60  ;;  %v17105_v0 = vand.u32 4294901760, %v17095_v17  ;;  %v9213_v4 = vand.u32 4294901760, %v9212_v35 }
 0x5d4   : > { %12199 = vmatprep.subr.mxu0 %v17016_v11  ;;  %12231 = vmatprep.subr.mxu1 %v9171_v54 }
 0x5d5   : > { %12200 = vmatpush3.msra.mxu0 %v17016_v11  ;;  %12232 = vmatpush3.msra.mxu1 %v9171_v54  ;;  %19153 = vst [vmem:[#allocation7_spill] sm:$0xff] %v17101_v36  ;;  %19154 = vst [vmem:[#allocation135_spill] sm:$0xff] %v17105_v0  ;;  %v17109_v54 = vand.u32 4294901760, %v17101_v36  ;;  %v9219_v46 = vsub.f32 %v17095_v17, %v17105_v0 }
 0x5d6   : > { %12201 = vmatprep.subr.mxu0 %v17031_v47  ;;  %12233 = vmatprep.subr.mxu1 %v9178_v23 }
 0x5d7   : > { %12202 = vmatpush3.msra.mxu0 %v17031_v47  ;;  %12234 = vmatpush3.msra.mxu1 %v9178_v23  ;;  %19155 = vst [vmem:[#allocation136_spill] sm:$0xff] %v17109_v54  ;;  %v9226_v37 = vsub.f32 %v17101_v36, %v17109_v54  ;;  %v9220_v23 = vand.u32 4294901760, %v9219_v46 }
 0x5d8   : > { %12203 = vmatprep.subr.mxu0 %v17047_v40  ;;  %12235 = vmatprep.subr.mxu1 %v9185_v61 }
 0x5d9   : > { %12204 = vmatpush3.msra.mxu0 %v17047_v40  ;;  %12236 = vmatpush3.msra.mxu1 %v9185_v61  ;;  %v9227_v52 = vand.u32 4294901760, %v9226_v37 }
 0x5da   : > { %12205 = vmatprep.subr.mxu0 %v17064_v33  ;;  %12237 = vmatprep.subr.mxu1 %v9192_v31 }
 0x5db   : > { %12206 = vmatpush3.msra.mxu0 %v17064_v33  ;;  %12238 = vmatpush3.msra.mxu1 %v9192_v31 }
 0x5dc   : > { %12207 = vmatprep.subr.mxu0 %v17080_v30  ;;  %12239 = vmatprep.subr.mxu1 %v9199_v56 }
 0x5dd   : > { %12208 = vmatpush3.msra.mxu0 %v17080_v30  ;;  %12240 = vmatpush3.msra.mxu1 %v9199_v56 }
 0x5de   : > { %12209 = vmatprep.subr.mxu0 %v17091_v60  ;;  %12241 = vmatprep.subr.mxu1 %v9206_v1 }
 0x5df   : > { %12210 = vmatpush3.msra.mxu0 %v17091_v60  ;;  %12242 = vmatpush3.msra.mxu1 %v9206_v1 }
 0x5e0   : > { %12255 = vmatprep.subr.mxu0 %v16885_v16  ;;  %12243 = vmatprep.subr.mxu1 %v9213_v4 }
 0x5e1   : > { %12244 = vmatpush3.msra.mxu1 %v9213_v4 }
 0x5e2   : > { %12245 = vmatprep.subr.mxu1 %v9220_v23 }
 0x5e3   : > { %12246 = vmatpush3.msra.mxu1 %v9220_v23 }
 0x5e4   : > { %12247 = vmatprep.subr.mxu1 %v9227_v52 }
 0x5e5   : > { %12248 = vmatpush3.msra.mxu1 %v9227_v52 }
 0x5e6   : > { %12293 = vmatprep.subr.mxu1 %v16879_v18 }
 0x637   : > { %v7841_v32 = vpop.f32.mrf.mxu1 }
 0x639   : > { %v7843_v58 = vpop.f32.mrf.mxu1 }
 0x63b   : > { %v7848_v61 = vpop.f32.mrf.mxu1 }
 0x63d   : > { %v7850_v44 = vpop.f32.mrf.mxu1 }
 0x63f   : > { %v7706_v31 = vpop.f32.mrf.mxu0  ;;  %v7855_v3 = vpop.f32.mrf.mxu1 }
 0x640   : > { %v7707_v45 = vadd.f32 1e-05, %v7706_v31 }
 0x641   : > { %v7708_v9 = vpop.f32.mrf.mxu0  ;;  %v7857_v56 = vpop.f32.mrf.mxu1 }
 0x642   : > { %v7709_v6 = vadd.f32 1e-05, %v7708_v9  ;;  %v7842_v17 = vadd.f32 %v7841_v32, %v7707_v45 }
 0x643   : > { %v7717_v55 = vpop.f32.mrf.mxu0  ;;  %v7862_v1 = vpop.f32.mrf.mxu1 }
 0x644   : > { %v7718_v36 = vadd.f32 1e-05, %v7717_v55  ;;  %v7844_v30 = vadd.f32 %v7843_v58, %v7709_v6 }
 0x645   : > { %v7719_v35 = vpop.f32.mrf.mxu0  ;;  %v7864_v46 = vpop.f32.mrf.mxu1 }
 0x646   : > { %v7720_v60 = vadd.f32 1e-05, %v7719_v35  ;;  %v7849_v20 = vadd.f32 %v7848_v61, %v7718_v36 }
 0x647   : > { %v7728_v4 = vpop.f32.mrf.mxu0  ;;  %v8051_v37 = vpop.f32.mrf.mxu1 }
 0x648   : > { %v7729_v26 = vadd.f32 1e-05, %v7728_v4  ;;  %v7851_v11 = vadd.f32 %v7850_v44, %v7720_v60 }
 0x649   : > { %v7730_v54 = vpop.f32.mrf.mxu0  ;;  %v8053_v23 = vpop.f32.mrf.mxu1 }
 0x64a   : > { %v7731_v47 = vadd.f32 1e-05, %v7730_v54  ;;  %v7856_v24 = vadd.f32 %v7855_v3, %v7729_v26 }
 0x64b   : > { %v7739_v0 = vpop.f32.mrf.mxu0  ;;  %v8060_v52 = vpop.f32.mrf.mxu1 }
 0x64c   : > { %v7740_v9 = vadd.f32 1e-05, %v7739_v0  ;;  %v7858_v6 = vadd.f32 %v7857_v56, %v7731_v47 }
 0x64d   : > { %v7741_v25 = vpop.f32.mrf.mxu0  ;;  %v8062_v50 = vpop.f32.mrf.mxu1 }
 0x64e   : > { %v7742_v35 = vadd.f32 1e-05, %v7741_v25  ;;  %v7863_v36 = vadd.f32 %v7862_v1, %v7740_v9  ;;  %v19158_v9 = vld [vmem:[#allocation19_spill] sm:$0xff] }
 0x64f   : > { %v7947_v59 = vpop.f32.mrf.mxu0  ;;  %v8069_v15 = vpop.f32.mrf.mxu1 }
 0x650   : > { %v7948_v28 = vadd.f32 %v7947_v59, %v7842_v17  ;;  %v7865_v60 = vadd.f32 %v7864_v46, %v7742_v35  ;;  %v19156_v46 = vld [vmem:[#allocation132_spill] sm:$0xff] }
 0x651   : > { %v7949_v2 = vpop.f32.mrf.mxu0  ;;  %v8071_v48 = vpop.f32.mrf.mxu1 }
 0x652   : > { %v7950_v40 = vadd.f32 %v7949_v2, %v7844_v30  ;;  %v8052_v22 = vadd.f32 %v8051_v37, %v7948_v28 }
 0x653   : > { %v7955_v38 = vpop.f32.mrf.mxu0  ;;  %v17118_v8 = vpop.f32.mrf.mxu1 }
 0x654   : > { %v7956_v7 = vadd.f32 %v7955_v38, %v7849_v20  ;;  %v8054_v21 = vadd.f32 %v8053_v23, %v7950_v40 }
 0x655   : > { %v7957_v42 = vpop.f32.mrf.mxu0  ;;  %v17120_v39 = vpop.f32.mrf.mxu1 }
 0x656   : > { %v7958_v45 = vadd.f32 %v7957_v42, %v7851_v11  ;;  %v8061_v2 = vadd.f32 %v8060_v52, %v7956_v7  ;;  %v19157_v52 = vld [vmem:[#allocation133_spill] sm:$0xff] }
 0x657   : > { %v7963_v27 = vpop.f32.mrf.mxu0  ;;  %v8267_v62 = vpop.f32.mrf.mxu1 }
 0x658   : > { %v7964_v59 = vadd.f32 %v7963_v27, %v7856_v24  ;;  %v8063_v26 = vadd.f32 %v8062_v50, %v7958_v45 }
 0x659   : > { %v7965_v43 = vpop.f32.mrf.mxu0  ;;  %v8269_v63 = vpop.f32.mrf.mxu1 }
 0x65a   : > { %v7966_v30 = vadd.f32 %v7965_v43, %v7858_v6  ;;  %v8070_v42 = vadd.f32 %v8069_v15, %v7964_v59 }
 0x65b   : > { %v7971_v33 = vpop.f32.mrf.mxu0  ;;  %v8274_v53 = vpop.f32.mrf.mxu1 }
 0x65d   : > { %v7973_v31 = vpop.f32.mrf.mxu0  ;;  %v8276_v49 = vpop.f32.mrf.mxu1 }
 0x65f   : > { %v8168_v55 = vpop.f32.mrf.mxu0  ;;  %v8281_v54 = vpop.f32.mrf.mxu1 }
 0x660   : > { %v8169_v32 = vadd.f32 %v8168_v55, %v8052_v22  ;;  %v7972_v22 = vadd.f32 %v7971_v33, %v7863_v36 }
 0x661   : > { %v8170_v17 = vpop.f32.mrf.mxu0  ;;  %v8283_v24 = vpop.f32.mrf.mxu1 }
 0x662   : > { %v8268_v58 = vadd.f32 %v8267_v62, %v8169_v32  ;;  %v8171_v4 = vadd.f32 %v8170_v17, %v8054_v21  ;;  %v8072_v62 = vadd.f32 %v8071_v48, %v7966_v30  ;;  %v7974_v21 = vadd.f32 %v7973_v31, %v7865_v60  ;;  %v17127_v48 = vld [vmem:[%s17492_s7] sm:$0x7] }
 0x663   : > { %v8175_v38 = vpop.f32.mrf.mxu0  ;;  %v8079_v50 = vadd.f32 %v17118_v8, %v7972_v22  ;;  %v8288_v61 = vpop.f32.mrf.mxu1  ;;  %v8923_v8 = vrot.slane %v17127_v48, %v19156_v46  ;;  %v8927_v31 = vrot.slane %v17127_v48, %v19157_v52  ;;  %v19159_v32 = vld [vmem:[#allocation42_spill] sm:$0xff]  ;;  %v19162_v22 = vld [vmem:[#allocation31_spill] sm:$0xff] }
 0x664   : > { %12519 = vrsqrt.f32 %v8268_v58  ;;  %v8270_v20 = vadd.f32 %v8269_v63, %v8171_v4  ;;  %v8176_v28 = vadd.f32 %v8175_v38, %v8061_v2  ;;  %v19160_v4 = vld [vmem:[#allocation45_spill] sm:$0xff]  ;;  %v19161_v38 = vld [vmem:[#allocation48_spill] sm:$0xff] }
 0x665   : > { %v8177_v0 = vpop.f32.mrf.mxu0  ;;  %v8290_v1 = vpop.f32.mrf.mxu1 }
 0x666   : > { %12521 = vrsqrt.f32 %v8270_v20  ;;  %v8275_v11 = vadd.f32 %v8274_v53, %v8176_v28  ;;  %v8178_v27 = vadd.f32 %v8177_v0, %v8063_v26  ;;  %v8081_v53 = vadd.f32 %v17120_v39, %v7974_v21  ;;  %v17134_v39 = vld [vmem:[%s17493_s8] sm:$0x7]  ;;  %v19163_v21 = vld [vmem:[#allocation53_spill] sm:$0xff] }
 0x667   : > { %v8182_v47 = vpop.f32.mrf.mxu0  ;;  %v8952_v6 = vrot.slane %v17134_v39, %v19156_v46  ;;  %v8956_v17 = vrot.slane %v17134_v39, %v19157_v52 }
 0x668   : > { %12523 = vrsqrt.f32 %v8275_v11  ;;  %v8277_v7 = vadd.f32 %v8276_v49, %v8178_v27  ;;  %v8183_v40 = vadd.f32 %v8182_v47, %v8070_v42 }
 0x669   : > { %v8184_v43 = vpop.f32.mrf.mxu0 }
 0x66a   : > { %12525 = vrsqrt.f32 %v8277_v7  ;;  %v8282_v25 = vadd.f32 %v8281_v54, %v8183_v40  ;;  %v8185_v63 = vadd.f32 %v8184_v43, %v8072_v62 }
 0x66b   : > { %v8189_v44 = vpop.f32.mrf.mxu0 }
 0x66c   : > { %12527 = vrsqrt.f32 %v8282_v25  ;;  %v8284_v15 = vadd.f32 %v8283_v24, %v8185_v63  ;;  %v8190_v33 = vadd.f32 %v8189_v44, %v8079_v50 }
 0x66d   : > { %v8191_v49 = vpop.f32.mrf.mxu0 }
 0x66e   : > { %12529 = vrsqrt.f32 %v8284_v15  ;;  %v8289_v3 = vadd.f32 %v8288_v61, %v8190_v33  ;;  %v8192_v56 = vadd.f32 %v8191_v49, %v8081_v53  ;;  %v19164_v15 = vld [vmem:[#allocation8_spill] sm:$0xff] }
 0x670   : > { %12531 = vrsqrt.f32 %v8289_v3  ;;  %v8291_v37 = vadd.f32 %v8290_v1, %v8192_v56  ;;  %v19165_v56 = vld [vmem:[#allocation56_spill] sm:$0xff] }
 0x671   : > { %v12520_v23 = vpop.eup %12519 }
 0x672   : > { %12533 = vrsqrt.f32 %v8291_v37  ;;  %v8906_v55 = vmul.f32 %v12520_v23, %v19158_v9 }
 0x673   : > { %v12522_v45 = vpop.eup %12521 }
 0x674   : > { %v8907_v35 = vmul.f32 %v12522_v45, %v19159_v32  ;;  %v8935_v59 = vmul.f32 %v8923_v8, %v8906_v55 }
 0x675   : > { %v12524_v58 = vpop.eup %12523 }
 0x676   : > { %v8909_v2 = vmul.f32 %v12524_v58, %v19160_v4  ;;  %v8936_v30 = vmul.f32 %v8927_v31, %v8907_v35  ;;  %v8964_v28 = vadd.f32 %v8952_v6, %v8935_v59 }
 0x677   : > { %v12526_v36 = vpop.eup %12525 }
 0x678   : > { %v8938_v54 = vmul.f32 %v8923_v8, %v8909_v2  ;;  %v8910_v20 = vmul.f32 %v12526_v36, %v19161_v38  ;;  %v8965_v26 = vadd.f32 %v8956_v17, %v8936_v30 }
 0x679   : > { %v12528_v60 = vpop.eup %12527 }
 0x67a   : > { %v8939_v0 = vmul.f32 %v8927_v31, %v8910_v20  ;;  %v8976_v42 = vmul.f32 %v8965_v26, %v8964_v28  ;;  %v8912_v11 = vmul.f32 %v12528_v60, %v19162_v22  ;;  %v8967_v24 = vadd.f32 %v8952_v6, %v8938_v54  ;;  %v19168_v20 = vld [vmem:[#allocation102_spill] sm:$0xff]  ;;  %v19170_v28 = vld [vmem:[#allocation105_spill] sm:$0xff]  ;;  %v19172_v26 = vld [vmem:[#allocation16_spill] sm:$0xff] }
 0x67b   : > { %v12530_v27 = vpop.eup %12529  ;;  %v19173_v60 = vld [vmem:[#allocation25_spill] sm:$0xff]  ;;  %v19176_v22 = vld [vmem:[#allocation123_spill] sm:$0xff] }
 0x67c   : > { %v17147_v47 = vand.u32 4294901760, %v8976_v42  ;;  %v8968_v62 = vadd.f32 %v8956_v17, %v8939_v0  ;;  %v8913_v7 = vmul.f32 %v12530_v27, %v19163_v21  ;;  %v8941_v40 = vmul.f32 %v8923_v8, %v8912_v11  ;;  %v19174_v0 = vld [vmem:[#allocation118_spill] sm:$0xff]  ;;  %v19177_v11 = vld [vmem:[#allocation108_spill] sm:$0xff] }
 0x67d   : > { %v12532_v43 = vpop.eup %12531  ;;  %v19178_v27 = vld [vmem:[#allocation126_spill] sm:$0xff] }
 0x67e   : > { %12249 = vmatprep.mubr.f32.mxu1 %v17147_v47  ;;  %v8977_v25 = vmul.f32 %v8968_v62, %v8967_v24  ;;  %v17152_v63 = vsub.f32 %v8976_v42, %v17147_v47  ;;  %v8942_v50 = vmul.f32 %v8927_v31, %v8913_v7  ;;  %v8970_v44 = vadd.f32 %v8952_v6, %v8941_v40  ;;  %v19175_v42 = vld [vmem:[#allocation32_spill] sm:$0xff]  ;;  %v19181_v21 = vld [vmem:[#allocation122_spill] sm:$0xff]  ;;  %v19182_v7 = vld [vmem:[#allocation125_spill] sm:$0xff] }
 0x67f   : > { %v12534_v61 = vpop.eup %12533  ;;  %v8915_v33 = vmul.f32 %v12532_v43, %v19164_v15  ;;  %v19179_v24 = vld [vmem:[#allocation116_spill] sm:$0xff]  ;;  %v19183_v40 = vld [vmem:[#allocation129_spill] sm:$0xff]  ;;  %v19199_v15 = vld [vmem:[#allocation135_spill] sm:$0xff] }
 0x680   : > { %v17155_v53 = vand.u32 4294901760, %v8977_v25  ;;  %v9079_v49 = vand.u32 4294901760, %v17152_v63  ;;  %v8971_v3 = vadd.f32 %v8956_v17, %v8942_v50  ;;  %v8916_v1 = vmul.f32 %v12534_v61, %v19165_v56  ;;  %v19180_v62 = vld [vmem:[#allocation128_spill] sm:$0xff]  ;;  %v19190_v43 = vld [vmem:[#allocation17_spill] sm:$0xff] }
 0x681   : > { %v8944_v46 = vmul.f32 %v8923_v8, %v8915_v33  ;;  %v19196_v50 = vld [vmem:[#allocation120_spill] sm:$0xff] }
 0x682   : > { %v17160_v37 = vsub.f32 %v8977_v25, %v17155_v53  ;;  %12250 = vmatmul.mubr.f32.vlgmr.msra.gmra.mxu1 %v17155_v53  ;;  %v9080_v23 = vsub.f32 %v17152_v63, %v9079_v49  ;;  %v8978_v52 = vmul.f32 %v8971_v3, %v8970_v44  ;;  %v8945_v9 = vmul.f32 %v8927_v31, %v8916_v1  ;;  %v19194_v25 = vld [vmem:[#allocation111_spill] sm:$0xff]  ;;  %v19197_v61 = vld [vmem:[#allocation124_spill] sm:$0xff] }
 0x683   : > { %12294 = vmatpush3.msra.mxu1 %v16879_v18  ;;  %v8973_v55 = vadd.f32 %v8952_v6, %v8944_v46  ;;  %v19198_v44 = vld [vmem:[#allocation127_spill] sm:$0xff]  ;;  %v19200_v33 = vld [vmem:[#allocation136_spill] sm:$0xff] }
 0x684   : > { %12295 = vmatprep.subr.mxu1 %v16887_v41  ;;  %v9081_v45 = vand.u32 4294901760, %v9080_v23  ;;  %v17166_v32 = vand.u32 4294901760, %v8978_v52  ;;  %v9089_v35 = vand.u32 4294901760, %v17160_v37  ;;  %v8974_v8 = vadd.f32 %v8956_v17, %v8945_v9  ;;  %v12127_v23 = vpop.f32.mrf.mxu1  ;;  %v12115_v9 = vpop.f32.mrf.mxu0 }
 0x685   : > { %12296 = vmatpush3.msra.mxu1 %v16887_v41 }
 0x686   : > { %12297 = vmatprep.subr.mxu1 %v16900_v10  ;;  %12211 = vmatprep.mubr.f32.mxu0 %v9081_v45  ;;  %v9090_v31 = vsub.f32 %v17160_v37, %v9089_v35  ;;  %v8979_v59 = vmul.f32 %v8974_v8, %v8973_v55  ;;  %v17175_v6 = vsub.f32 %v8978_v52, %v17166_v32  ;;  %v8483_v52 = vpop.f32.mrf.mxu1  ;;  %v8367_v45 = vpop.f32.mrf.mxu0 }
 0x687   : > { %12252 = vmatprep.mubr.f32.mxu1 %v17166_v32  ;;  %12298 = vmatpush3.msra.mxu1 %v16900_v10 }
 0x688   : > { %12299 = vmatprep.subr.mxu1 %v16915_v19  ;;  %v9091_v17 = vand.u32 4294901760, %v9090_v31  ;;  %v17180_v58 = vand.u32 4294901760, %v8979_v59  ;;  %v9099_v4 = vand.u32 4294901760, %v17175_v6  ;;  %v12130_v55 = vpop.f32.mrf.mxu1 }
 0x689   : > { %12300 = vmatpush3.msra.mxu1 %v16915_v19 }
 0x68a   : > { %12301 = vmatprep.subr.mxu1 %v16931_v14  ;;  %12212 = vmatmul.mubr.f32.vlgmr.msra.gmra.mxu0 %v9091_v17  ;;  %v17186_v2 = vsub.f32 %v8979_v59, %v17180_v58  ;;  %v9100_v30 = vsub.f32 %v17175_v6, %v9099_v4 }
 0x68b   : > { %12253 = vmatmul.mubr.f32.gmra.mxu1 %v17180_v58  ;;  %12256 = vmatpush3.msra.mxu0 %v16885_v16 }
 0x68c   : > { %12302 = vmatpush3.msra.mxu1 %v16931_v14  ;;  %12257 = vmatprep.subr.mxu0 %v16898_v34  ;;  %v9101_v36 = vand.u32 4294901760, %v9100_v30  ;;  %v9109_v54 = vand.u32 4294901760, %v17186_v2 }
 0x68d   : > { %12303 = vmatprep.subr.mxu1 %v16942_v12  ;;  %12325 = vmatprep.mubr.f32.mxu1 %v9079_v49  ;;  %v9770_v49 = vld [vmem:[%s17495_s10] sm:$0xff] }
 0x68e   : > { %12258 = vmatpush3.msra.mxu0 %v16898_v34  ;;  %12304 = vmatpush3.msra.mxu1 %v16942_v12  ;;  %v9110_v38 = vsub.f32 %v17186_v2, %v9109_v54  ;;  %v19166_v34 = vld [vmem:[#allocation22_spill] sm:$0xff]  ;;  %v9800_v3 = vsel %vm9798_vm1, %v9770_v49, 0 }
 0x68f   : > { %12259 = vmatprep.subr.mxu0 %v16913_v51  ;;  %12305 = vmatprep.subr.mxu1 %v16956_v13  ;;  %v17332_v56 = vand.u32 4294901760, %v9800_v3 }
 0x690   : > { %12214 = vmatprep.mubr.f32.mxu0 %v9101_v36  ;;  %12260 = vmatpush3.msra.mxu0 %v16913_v51  ;;  %v9111_v16 = vand.u32 4294901760, %v9110_v38  ;;  %v19167_v51 = vld [vmem:[#allocation37_spill] sm:$0xff]  ;;  %v8368_v38 = vadd.f32 1e-05, %v8367_v45 }
 0x691   : > { %12306 = vmatpush3.msra.mxu1 %v16956_v13  ;;  %12261 = vmatprep.subr.mxu0 %v16928_v5  ;;  %v17335_v1 = vsub.f32 %v9800_v3, %v17332_v56 }
 0x692   : > { %12307 = vmatprep.subr.mxu1 %v16972_v57  ;;  %12262 = vmatpush3.msra.mxu0 %v16928_v5  ;;  %v19169_v5 = vld [vmem:[#allocation78_spill] sm:$0xff] }
 0x693   : > { %12308 = vmatpush3.msra.mxu1 %v16972_v57  ;;  %12263 = vmatprep.subr.mxu0 %v16945_v29 }
 0x694   : > { %12309 = vmatprep.subr.mxu1 %v19166_v34  ;;  %12215 = vmatmul.mubr.f32.gmra.mxu0 %v9111_v16 }
 0x695   : > { %12264 = vmatpush3.msra.mxu0 %v16945_v29  ;;  %12310 = vmatpush3.msra.mxu1 %v19166_v34  ;;  %v19171_v29 = vld [vmem:[#allocation85_spill] sm:$0xff] }
 0x696   : > { %12265 = vmatprep.subr.mxu0 %v19167_v51  ;;  %12287 = vmatprep.mubr.f32.mxu0 %v17152_v63  ;;  %v19195_v63 = vld [vmem:[#allocation114_spill] sm:$0xff] }
 0x697   : > { %12311 = vmatprep.subr.mxu1 %v19168_v20  ;;  %12266 = vmatpush3.msra.mxu0 %v19167_v51 }
 0x698   : > { %12312 = vmatpush3.msra.mxu1 %v19168_v20  ;;  %12267 = vmatprep.subr.mxu0 %v19169_v5 }
 0x699   : > { %12313 = vmatprep.subr.mxu1 %v19170_v28  ;;  %12268 = vmatpush3.msra.mxu0 %v19169_v5 }
 0x69a   : > { %12314 = vmatpush3.msra.mxu1 %v19170_v28  ;;  %12269 = vmatprep.subr.mxu0 %v19171_v29 }
 0x69b   : > { %12315 = vmatprep.subr.mxu1 %v19172_v26  ;;  %12270 = vmatpush3.msra.mxu0 %v19171_v29  ;;  %v8484_v29 = vadd.f32 %v8483_v52, %v8368_v38 }
 0x69c   : > { %12316 = vmatpush3.msra.mxu1 %v19172_v26  ;;  %12271 = vmatprep.subr.mxu0 %v19173_v60 }
 0x69d   : > { %12317 = vmatprep.subr.mxu1 %v19174_v0  ;;  %12272 = vmatpush3.msra.mxu0 %v19173_v60 }
 0x69e   : > { %12318 = vmatpush3.msra.mxu1 %v19174_v0  ;;  %12273 = vmatprep.subr.mxu0 %v19175_v42 }
 0x69f   : > { %12319 = vmatprep.subr.mxu1 %v19176_v22  ;;  %12274 = vmatpush3.msra.mxu0 %v19175_v42 }
 0x6a0   : > { %12320 = vmatpush3.msra.mxu1 %v19176_v22  ;;  %12275 = vmatprep.subr.mxu0 %v19177_v11 }
 0x6a1   : > { %12321 = vmatprep.subr.mxu1 %v19178_v27  ;;  %12276 = vmatpush3.msra.mxu0 %v19177_v11 }
 0x6a2   : > { %12322 = vmatpush3.msra.mxu1 %v19178_v27  ;;  %12277 = vmatprep.subr.mxu0 %v19179_v24 }
 0x6a3   : > { %12323 = vmatprep.subr.mxu1 %v19180_v62  ;;  %12278 = vmatpush3.msra.mxu0 %v19179_v24 }
 0x6a4   : > { %12324 = vmatpush3.msra.mxu1 %v19180_v62  ;;  %12279 = vmatprep.subr.mxu0 %v19181_v21 }
 0x6a5   : > { %12326 = vmatmul.mubr.f32.vlgmr.msra.gmra.mxu1 %v9089_v35  ;;  %12369 = vmatprep.subr.mxu1 %v16879_v18  ;;  %v12118_v35 = vpop.f32.mrf.mxu0 }
 0x6a6   : > { %12280 = vmatpush3.msra.mxu0 %v19181_v21  ;;  %12328 = vmatprep.mubr.f32.mxu1 %v9099_v4  ;;  %v8398_v51 = vadd.f32 1e-05, %v12118_v35 }
 0x6a7   : > { %12370 = vmatpush3.msra.mxu1 %v16879_v18  ;;  %12281 = vmatprep.subr.mxu0 %v19182_v7  ;;  %v19184_v18 = vld [vmem:[#allocation7_spill] sm:$0xff]  ;;  %v8387_v31 = vpop.f32.mrf.mxu0 }
 0x6a8   : > { %12371 = vmatprep.subr.mxu1 %v16887_v41  ;;  %12282 = vmatpush3.msra.mxu0 %v19182_v7  ;;  %v8388_v5 = vadd.f32 1e-05, %v8387_v31  ;;  %v8502_v42 = vadd.f32 %v12130_v55, %v8398_v51 }
 0x6a9   : > { %12372 = vmatpush3.msra.mxu1 %v16887_v41  ;;  %12283 = vmatprep.subr.mxu0 %v19183_v40  ;;  %v19185_v41 = vld [vmem:[#allocation2_spill] sm:$0xff] }
 0x6aa   : > { %12329 = vmatmul.mubr.f32.gmra.mxu1 %v9109_v54  ;;  %12373 = vmatprep.subr.mxu1 %v16900_v10  ;;  %v8378_v54 = vadd.f32 1e-05, %v12115_v9 }
 0x6ab   : > { %12284 = vmatpush3.msra.mxu0 %v19183_v40  ;;  %12374 = vmatpush3.msra.mxu1 %v16900_v10  ;;  %v19186_v10 = vld [vmem:[#allocation68_spill] sm:$0xff] }
 0x6ac   : > { %12401 = vmatprep.mubr.f32.mxu1 %v17147_v47  ;;  %12285 = vmatprep.subr.mxu0 %v19184_v18 }
 0x6ad   : > { %12375 = vmatprep.subr.mxu1 %v16915_v19  ;;  %12286 = vmatpush3.msra.mxu0 %v19184_v18 }
 0x6ae   : > { %12376 = vmatpush3.msra.mxu1 %v16915_v19  ;;  %12288 = vmatmul.mubr.f32.vlgmr.msra.gmra.mxu0 %v17160_v37  ;;  %v19187_v19 = vld [vmem:[#allocation15_spill] sm:$0xff] }
 0x6af   : > { %12331 = vmatprep.subr.mxu0 %v19185_v41  ;;  %12377 = vmatprep.subr.mxu1 %v16931_v14 }
 0x6b0   : > { %12290 = vmatprep.mubr.f32.mxu0 %v17175_v6  ;;  %12332 = vmatpush3.msra.mxu0 %v19185_v41  ;;  %v12139_v6 = vpop.f32.mrf.mxu0 }
 0x6b1   : > { %12378 = vmatpush3.msra.mxu1 %v16931_v14  ;;  %12333 = vmatprep.subr.mxu0 %v19186_v10  ;;  %v19188_v14 = vld [vmem:[#allocation72_spill] sm:$0xff] }
 0x6b2   : > { %12379 = vmatprep.subr.mxu1 %v16942_v12  ;;  %12334 = vmatpush3.msra.mxu0 %v19186_v10 }
 0x6b3   : > { %12380 = vmatpush3.msra.mxu1 %v16942_v12  ;;  %12291 = vmatmul.mubr.f32.gmra.mxu0 %v17186_v2  ;;  %v19189_v12 = vld [vmem:[#allocation75_spill] sm:$0xff] }
 0x6b4   : > { %12335 = vmatprep.subr.mxu0 %v19187_v19  ;;  %12381 = vmatprep.subr.mxu1 %v16956_v13 }
 0x6b5   : > { %12336 = vmatpush3.msra.mxu0 %v19187_v19  ;;  %12363 = vmatprep.mubr.f32.mxu0 %v17147_v47  ;;  %v19193_v47 = vld [vmem:[#allocation26_spill] sm:$0xff] }
 0x6b6   : > { %12382 = vmatpush3.msra.mxu1 %v16956_v13  ;;  %12337 = vmatprep.subr.mxu0 %v19188_v14  ;;  %v19191_v13 = vld [vmem:[#allocation4_spill] sm:$0xff] }
 0x6b7   : > { %12383 = vmatprep.subr.mxu1 %v16972_v57  ;;  %12338 = vmatpush3.msra.mxu0 %v19188_v14 }
 0x6b8   : > { %12384 = vmatpush3.msra.mxu1 %v16972_v57  ;;  %12339 = vmatprep.subr.mxu0 %v19189_v12  ;;  %v19192_v57 = vld [vmem:[#allocation89_spill] sm:$0xff] }
 0x6b9   : > { %12385 = vmatprep.subr.mxu1 %v19166_v34  ;;  %12340 = vmatpush3.msra.mxu0 %v19189_v12 }
 0x6ba   : > { %12386 = vmatpush3.msra.mxu1 %v19166_v34  ;;  %12341 = vmatprep.subr.mxu0 %v19190_v43 }
 0x6bb   : > { %12387 = vmatprep.subr.mxu1 %v19168_v20  ;;  %12342 = vmatpush3.msra.mxu0 %v19190_v43 }
 0x6bc   : > { %12388 = vmatpush3.msra.mxu1 %v19168_v20  ;;  %12343 = vmatprep.subr.mxu0 %v19191_v13  ;;  %v8490_v20 = vadd.f32 %v12127_v23, %v8378_v54 }
 0x6bd   : > { %12389 = vmatprep.subr.mxu1 %v19170_v28  ;;  %12344 = vmatpush3.msra.mxu0 %v19191_v13 }
 0x6be   : > { %12390 = vmatpush3.msra.mxu1 %v19170_v28  ;;  %12345 = vmatprep.subr.mxu0 %v19192_v57  ;;  %v8587_v28 = vadd.f32 %v12139_v6, %v8490_v20 }
 0x6bf   : > { %12391 = vmatprep.subr.mxu1 %v19172_v26  ;;  %12346 = vmatpush3.msra.mxu0 %v19192_v57 }
 0x6c0   : > { %12392 = vmatpush3.msra.mxu1 %v19172_v26  ;;  %12347 = vmatprep.subr.mxu0 %v19193_v47 }
 0x6c1   : > { %12393 = vmatprep.subr.mxu1 %v19174_v0  ;;  %12348 = vmatpush3.msra.mxu0 %v19193_v47 }
 0x6c2   : > { %12394 = vmatpush3.msra.mxu1 %v19174_v0  ;;  %12349 = vmatprep.subr.mxu0 %v19194_v25 }
 0x6c3   : > { %12395 = vmatprep.subr.mxu1 %v19176_v22  ;;  %12350 = vmatpush3.msra.mxu0 %v19194_v25 }
 0x6c4   : > { %12396 = vmatpush3.msra.mxu1 %v19176_v22  ;;  %12351 = vmatprep.subr.mxu0 %v19195_v63 }
 0x6c5   : > { %12397 = vmatprep.subr.mxu1 %v19178_v27  ;;  %12352 = vmatpush3.msra.mxu0 %v19195_v63 }
 0x6c6   : > { %12398 = vmatpush3.msra.mxu1 %v19178_v27  ;;  %12353 = vmatprep.subr.mxu0 %v19196_v50 }
 0x6c7   : > { %12399 = vmatprep.subr.mxu1 %v19180_v62  ;;  %12354 = vmatpush3.msra.mxu0 %v19196_v50 }
 0x6c8   : > { %12400 = vmatpush3.msra.mxu1 %v19180_v62  ;;  %12355 = vmatprep.subr.mxu0 %v19197_v61 }
 0x6c9   : > { %12402 = vmatmul.mubr.f32.vlgmr.msra.gmra.mxu1 %v17155_v53  ;;  %12356 = vmatpush3.msra.mxu0 %v19197_v61 }
 0x6ca   : > { %12404 = vmatprep.mubr.f32.mxu1 %v17166_v32  ;;  %12357 = vmatprep.subr.mxu0 %v19198_v44 }
 0x6cb   : > { %12358 = vmatpush3.msra.mxu0 %v19198_v44 }
 0x6cc   : > { %12359 = vmatprep.subr.mxu0 %v19199_v15 }
 0x6cd   : > { %12405 = vmatmul.mubr.f32.gmra.mxu1 %v17180_v58  ;;  %12360 = vmatpush3.msra.mxu0 %v19199_v15 }
 0x6ce   : > { %12361 = vmatprep.subr.mxu0 %v19200_v33  ;;  %12429 = vmatprep.mubr.f32.mxu1 %v17332_v56 }
 0x6cf   : > { %12362 = vmatpush3.msra.mxu0 %v19200_v33 }
 0x6d0   : > { %12364 = vmatmul.mubr.f32.vlgmr.msra.gmra.mxu0 %v17155_v53  ;;  %v9882_v53 = vand.u32 4294901760, %v17335_v1 }
 0x6d1   : > { %12366 = vmatprep.mubr.f32.mxu0 %v17166_v32  ;;  %v8495_v32 = vpop.f32.mrf.mxu1 }
 0x6d2   : > { %v9883_v46 = vsub.f32 %v17335_v1, %v9882_v53  ;;  %v8496_v11 = vadd.f32 %v8495_v32, %v8388_v5 }
 0x6d3   : > { %v12151_v8 = vpop.f32.mrf.mxu1 }
 0x6d4   : > { %12367 = vmatmul.mubr.f32.gmra.mxu0 %v17180_v58  ;;  %v9884_v37 = vand.u32 4294901760, %v9883_v46  ;;  %v8579_v58 = vpop.f32.mrf.mxu0  ;;  %v8685_v24 = vadd.f32 %v12151_v8, %v8587_v28  ;;  %v19201_v8 = vld [vmem:[#allocation23_spill] sm:$0xff]  ;;  %v19204_v28 = vld [vmem:[#allocation9_spill] sm:$0xff] }
 0x6d5   : > { %v8676_v59 = vpop.f32.mrf.mxu1  ;;  %v8580_v0 = vadd.f32 %v8579_v58, %v8484_v29 }
 0x6d6   : > { %12415 = vmatprep.mubr.f32.mxu0 %v9884_v37  ;;  %v12142_v2 = vpop.f32.mrf.mxu0 }
 0x6d7   : > { %v12154_v17 = vpop.f32.mrf.mxu1  ;;  %v8601_v22 = vadd.f32 %v12142_v2, %v8502_v42  ;;  %v8677_v40 = vadd.f32 %v8676_v59, %v8580_v0  ;;  %v19202_v59 = vld [vmem:[#allocation130_spill] sm:$0xff] }
 0x6d8   : > { %v8593_v36 = vpop.f32.mrf.mxu0  ;;  %v8931_v6 = vrot.slane %v17127_v48, %v19202_v59  ;;  %v8960_v48 = vrot.slane %v17134_v39, %v19202_v59  ;;  %v9773_v39 = vld [vmem:[%s17495_s10 + $0x18] sm:$0xff] }
 0x6d9   : > { %v8692_v4 = vpop.f32.mrf.mxu1  ;;  %v8594_v21 = vadd.f32 %v8593_v36, %v8496_v11  ;;  %v8701_v10 = vadd.f32 %v12154_v17, %v8601_v22  ;;  %v9771_v17 = vld [vmem:[%s17495_s10 + $0x8] sm:$0xff] }
 0x6da   : > { %v12163_v34 = vpop.f32.mrf.mxu0  ;;  %v19203_v36 = vld [vmem:[#allocation59_spill] sm:$0xff]  ;;  %v9803_v51 = vsel %vm9798_vm1, %v9771_v17, 0 }
 0x6db   : > { %v12175_v30 = vpop.f32.mrf.mxu1  ;;  %v8787_v7 = vadd.f32 %v12163_v34, %v8685_v24  ;;  %v8693_v43 = vadd.f32 %v8692_v4, %v8594_v21  ;;  %v19205_v24 = vld [vmem:[#allocation62_spill] sm:$0xff]  ;;  %v17357_v21 = vand.u32 4294901760, %v9803_v51 }
 0x6dc   : > { %v8780_v60 = vpop.f32.mrf.mxu0 }
 0x6dd   : > { %v8872_v16 = vpop.f32.mrf.mxu1  ;;  %v8781_v41 = vadd.f32 %v8780_v60, %v8677_v40  ;;  %v8879_v14 = vadd.f32 %v12175_v30, %v8787_v7 }
 0x6de   : > { %v12166_v62 = vpop.f32.mrf.mxu0 }
 0x6df   : > { %v12178_v26 = vpop.f32.mrf.mxu1  ;;  %v8799_v12 = vadd.f32 %v12166_v62, %v8701_v10  ;;  %v8873_v47 = vadd.f32 %v8872_v16, %v8781_v41  ;;  %12535 = vrsqrt.f32 %v8879_v14 }
 0x6e0   : > { %v8792_v19 = vpop.f32.mrf.mxu0 }
 0x6e1   : > { %v8884_v27 = vpop.f32.mrf.mxu1  ;;  %v8793_v25 = vadd.f32 %v8792_v19, %v8693_v43  ;;  %v8891_v50 = vadd.f32 %v12178_v26, %v8799_v12  ;;  %12537 = vrsqrt.f32 %v8873_v47  ;;  %v9772_v26 = vld [vmem:[%s17495_s10 + $0x10] sm:$0xff] }
 0x6e2   : > { %v9806_v41 = vsel %vm9798_vm1, %v9772_v26, 0 }
 0x6e3   : > { %v8885_v44 = vadd.f32 %v8884_v27, %v8793_v25  ;;  %12539 = vrsqrt.f32 %v8891_v50 }
 0x6e5   : > { %12541 = vrsqrt.f32 %v8885_v44  ;;  %v17367_v44 = vand.u32 4294901760, %v9806_v41 }
 0x6ec   : > { %v12536_v9 = vpop.eup %12535 }
 0x6ed   : > { %v8911_v31 = vmul.f32 %v12536_v9, %v19201_v8  ;;  %v17374_v8 = vsub.f32 %v9806_v41, %v17367_v44 }
 0x6ee   : > { %v12538_v55 = vpop.eup %12537 }
 0x6ef   : > { %v8908_v54 = vmul.f32 %v12538_v55, %v19203_v36  ;;  %v8940_v5 = vmul.f32 %v8931_v6, %v8911_v31  ;;  %v9902_v36 = vand.u32 4294901760, %v17374_v8 }
 0x6f0   : > { %v12540_v58 = vpop.eup %12539 }
 0x6f1   : > { %v8917_v29 = vmul.f32 %v12540_v58, %v19204_v28  ;;  %v8937_v27 = vmul.f32 %v8931_v6, %v8908_v54  ;;  %v8969_v10 = vadd.f32 %v8960_v48, %v8940_v5 }
 0x6f2   : > { %v12542_v38 = vpop.eup %12541 }
 0x6f3   : > { %v8914_v62 = vmul.f32 %v12542_v38, %v19205_v24  ;;  %v8946_v14 = vmul.f32 %v8931_v6, %v8917_v29  ;;  %v8966_v25 = vadd.f32 %v8960_v48, %v8937_v27 }
 0x6f5   : > { %v8943_v50 = vmul.f32 %v8931_v6, %v8914_v62 }
 0x6f7   : > { %v8972_v59 = vadd.f32 %v8960_v48, %v8943_v50 }
 0x742   : > { %v12251_v18 = vpop.f32.mrf.mxu1 }
 0x744   : > { %v9264_v13 = vpop.f32.mrf.mxu1 }
 0x74a   : > { %v12213_v57 = vpop.f32.mrf.mxu0 }
 0x74b   : > { %v12254_v63 = vpop.f32.mrf.mxu1  ;;  %v9271_v45 = vadd.f32 %v12251_v18, %v12213_v57  ;;  %v9809_v57 = vsel %vm9798_vm1, %v9773_v39, 0 }
 0x74c   : > { %v9083_v61 = vpop.f32.mrf.mxu0 }
 0x74d   : > { %v9276_v15 = vpop.f32.mrf.mxu1  ;;  %v9265_v4 = vadd.f32 %v9264_v13, %v9083_v61  ;;  %v17365_v61 = vsub.f32 %v9803_v51, %v17357_v21 }
 0x74f   : > { %v9892_v17 = vand.u32 4294901760, %v17365_v61 }
 0x754   : > { %v12216_v33 = vpop.f32.mrf.mxu0 }
 0x755   : > { %v9283_v16 = vadd.f32 %v12254_v63, %v12216_v33 }
 0x756   : > { %v9103_v3 = vpop.f32.mrf.mxu0 }
 0x757   : > { %v9277_v60 = vadd.f32 %v9276_v15, %v9103_v3 }
 0x765   : > { %v12327_v49 = vpop.f32.mrf.mxu1 }
 0x767   : > { %v9496_v46 = vpop.f32.mrf.mxu1 }
 0x76a   : > { %v12330_v23 = vpop.f32.mrf.mxu1 }
 0x76c   : > { %v9512_v32 = vpop.f32.mrf.mxu1 }
 0x76e   : > { %v12289_v37 = vpop.f32.mrf.mxu0 }
 0x76f   : > { %v9394_v2 = vadd.f32 %v12289_v37, %v9271_v45  ;;  %v17369_v37 = vand.u32 4294901760, %v9809_v57 }
 0x770   : > { %v9386_v52 = vpop.f32.mrf.mxu0 }
 0x771   : > { %v9387_v34 = vadd.f32 %v9386_v52, %v9265_v4  ;;  %v9505_v42 = vadd.f32 %v12327_v49, %v9394_v2 }
 0x773   : > { %v12292_v35 = vpop.f32.mrf.mxu0  ;;  %v9497_v18 = vadd.f32 %v9496_v46, %v9387_v34 }
 0x774   : > { %v9408_v0 = vadd.f32 %v12292_v35, %v9283_v16  ;;  %v9893_v16 = vsub.f32 %v17365_v61, %v9892_v17 }
 0x775   : > { %v9400_v20 = vpop.f32.mrf.mxu0 }
 0x776   : > { %v9401_v7 = vadd.f32 %v9400_v20, %v9277_v60  ;;  %v9521_v13 = vadd.f32 %v12330_v23, %v9408_v0  ;;  %v8975_v23 = vadd.f32 %v8960_v48, %v8946_v14  ;;  %v9903_v48 = vsub.f32 %v17374_v8, %v9902_v36 }
 0x777   : > { %v9894_v29 = vand.u32 4294901760, %v9893_v16 }
 0x778   : > { %v9513_v3 = vadd.f32 %v9512_v32, %v9401_v7  ;;  %v17380_v32 = vsub.f32 %v9809_v57, %v17369_v37  ;;  %v9904_v27 = vand.u32 4294901760, %v9903_v48 }
 0x77a   : > { %v9912_v51 = vand.u32 4294901760, %v17380_v32 }
 0x77c   : > { %v9913_v0 = vsub.f32 %v17380_v32, %v9912_v51 }
 0x77e   : > { %v9914_v39 = vand.u32 4294901760, %v9913_v0 }
 0x789   : > { %v12403_v30 = vpop.f32.mrf.mxu1 }
 0x78b   : > { %v9744_v22 = vpop.f32.mrf.mxu1 }
 0x78d   : > { %v12406_v47 = vpop.f32.mrf.mxu1 }
 0x78f   : > { %v9756_v45 = vpop.f32.mrf.mxu1 }
 0x790   : > { %v12365_v11 = vpop.f32.mrf.mxu0 }
 0x791   : > { %v9646_v40 = vadd.f32 %v12365_v11, %v9505_v42 }
 0x792   : > { %v9639_v19 = vpop.f32.mrf.mxu0 }
 0x793   : > { %v9751_v12 = vadd.f32 %v12403_v30, %v9646_v40  ;;  %v9640_v43 = vadd.f32 %v9639_v19, %v9497_v18 }
 0x794   : > { %v12368_v63 = vpop.f32.mrf.mxu0 }
 0x795   : > { %v9767_v15 = vmul.f32 %v9751_v12, %v8969_v10  ;;  %v9745_v33 = vadd.f32 %v9744_v22, %v9640_v43  ;;  %v9658_v49 = vadd.f32 %v12368_v63, %v9521_v13  ;;  %v9786_v43 = vpop.permute.xlu1 %9785 }
 0x796   : > { %v9651_v46 = vpop.f32.mrf.mxu0 }
 0x797   : > { %v9766_v52 = vmul.f32 %v9745_v33, %v8966_v25  ;;  %v9763_v9 = vadd.f32 %v12406_v47, %v9658_v49  ;;  %v9652_v55 = vadd.f32 %v9651_v46, %v9513_v3  ;;  %v17371_v35 = vand.u32 4294901760, %v9767_v15  ;;  %v9781_v47 = vpop.permute.xlu0 %9780  ;;  %v19206_v46 = vld [vmem:[#allocation149_spill] sm:$0xff] }
 0x799   : > { %v9769_v31 = vmul.f32 %v9763_v9, %v8975_v23  ;;  %v9757_v6 = vadd.f32 %v9756_v45, %v9652_v55  ;;  %v17377_v58 = vand.u32 4294901760, %v9766_v52  ;;  %v9960_v30 = vsub.f32 %v9767_v15, %v17371_v35 }
 0x79b   : > { %v17382_v4 = vand.u32 4294901760, %v9769_v31  ;;  %v9768_v2 = vmul.f32 %v9757_v6, %v8972_v59  ;;  %v9967_v34 = vsub.f32 %v9766_v52, %v17377_v58  ;;  %v9961_v28 = vand.u32 4294901760, %v9960_v30  ;;  %v9791_v3 = vpop.permute.xlu0 %9790  ;;  %v19210_v6 = vld [vmem:[#allocation186_spill] sm:$0xff] }
 0x79d   : > { %v9946_v54 = vsub.f32 %v9769_v31, %v17382_v4  ;;  %v17387_v38 = vand.u32 4294901760, %v9768_v2  ;;  %12407 = vmatprep.subr.mxu0 %v17382_v4  ;;  %v9968_v42 = vand.u32 4294901760, %v9967_v34  ;;  %v9962_v24 = vsub.f32 %v9960_v30, %v9961_v28  ;;  %v19209_v31 = vld [vmem:[#allocation150_spill] sm:$0xff] }
 0x79e   : > { %12408 = vmatpush3.msra.mxu0 %v17382_v4 }
 0x79f   : > { %v9953_v20 = vsub.f32 %v9768_v2, %v17387_v38  ;;  %12409 = vmatprep.subr.mxu0 %v17387_v38  ;;  %v9947_v5 = vand.u32 4294901760, %v9946_v54  ;;  %v9969_v7 = vsub.f32 %v9967_v34, %v9968_v42  ;;  %v9963_v40 = vand.u32 4294901760, %v9962_v24  ;;  %v19219_v24 = vld [vmem:[#allocation227_spill] sm:$0xff] }
 0x7a0   : > { %12410 = vmatpush3.msra.mxu0 %v17387_v38 }
 0x7a1   : > { %12411 = vmatprep.subr.mxu0 %v17371_v35  ;;  %v9948_v26 = vsub.f32 %v9946_v54, %v9947_v5  ;;  %v9954_v60 = vand.u32 4294901760, %v9953_v20  ;;  %v9970_v18 = vand.u32 4294901760, %v9969_v7 }
 0x7a2   : > { %12412 = vmatpush3.msra.mxu0 %v17371_v35 }
 0x7a3   : > { %12413 = vmatprep.subr.mxu0 %v17377_v58  ;;  %v9949_v22 = vand.u32 4294901760, %v9948_v26  ;;  %v9955_v11 = vsub.f32 %v9953_v20, %v9954_v60 }
 0x7a4   : > { %12414 = vmatpush3.msra.mxu0 %v17377_v58 }
 0x7a5   : > { %12416 = vmatmul.mubr.f32.vlgmr.msra.gmra.mxu0 %v9894_v29  ;;  %12421 = vmatprep.subr.mxu1 %v9949_v22  ;;  %v9956_v62 = vand.u32 4294901760, %v9955_v11  ;;  %v19216_v29 = vld [vmem:[#allocation163_spill] sm:$0xff] }
 0x7a6   : > { %12435 = vmatprep.subr.mxu0 %v9946_v54  ;;  %12422 = vmatpush3.msra.mxu1 %v9949_v22 }
 0x7a7   : > { %12436 = vmatpush3.msra.mxu0 %v9946_v54  ;;  %12423 = vmatprep.subr.mxu1 %v9956_v62  ;;  %v19212_v54 = vld [vmem:[#allocation160_spill] sm:$0xff] }
 0x7a8   : > { %12437 = vmatprep.subr.mxu0 %v9953_v20  ;;  %12418 = vmatprep.mubr.f32.mxu0 %v9904_v27 }
 0x7a9   : > { %12424 = vmatpush3.msra.mxu1 %v9956_v62  ;;  %12438 = vmatpush3.msra.mxu0 %v9953_v20 }
 0x7aa   : > { %12419 = vmatmul.mubr.f32.gmra.mxu0 %v9914_v39  ;;  %12425 = vmatprep.subr.mxu1 %v9963_v40 }
 0x7ab   : > { %12439 = vmatprep.subr.mxu0 %v9960_v30  ;;  %12426 = vmatpush3.msra.mxu1 %v9963_v40 }
 0x7ac   : > { %12440 = vmatpush3.msra.mxu0 %v9960_v30  ;;  %12427 = vmatprep.subr.mxu1 %v9970_v18  ;;  %v19211_v30 = vld [vmem:[#allocation172_spill] sm:$0xff] }
 0x7ad   : > { %12441 = vmatprep.subr.mxu0 %v9967_v34  ;;  %12428 = vmatpush3.msra.mxu1 %v9970_v18  ;;  %v19220_v18 = vld [vmem:[#allocation202_spill] sm:$0xff] }
 0x7ae   : > { %12442 = vmatpush3.msra.mxu0 %v9967_v34  ;;  %12430 = vmatmul.mubr.f32.vlgmr.msra.gmra.mxu1 %v17357_v21 }
 0x7af   : > { %12443 = vmatprep.mubr.f32.mxu0 %v17335_v1  ;;  %12449 = vmatprep.subr.mxu1 %v17382_v4 }
 0x7b0   : > { %12463 = vmatprep.subr.mxu0 %v9947_v5  ;;  %12444 = vmatmul.mubr.f32.vlgmr.msra.gmra.mxu0 %v17365_v61  ;;  %v9796_v61 = vpop.permute.xlu1 %9795 }
 0x7b1   : > { %12450 = vmatpush3.msra.mxu1 %v17382_v4  ;;  %12464 = vmatpush3.msra.mxu0 %v9947_v5 }
 0x7b2   : > { %12451 = vmatprep.subr.mxu1 %v17387_v38  ;;  %12465 = vmatprep.subr.mxu0 %v9954_v60 }
 0x7b3   : > { %12432 = vmatprep.mubr.f32.mxu1 %v17367_v44  ;;  %12452 = vmatpush3.msra.mxu1 %v17387_v38 }
 0x7b4   : > { %12466 = vmatpush3.msra.mxu0 %v9954_v60  ;;  %12433 = vmatmul.mubr.f32.gmra.mxu1 %v17369_v37  ;;  %v19217_v60 = vld [vmem:[#allocation187_spill] sm:$0xff] }
 0x7b5   : > { %12453 = vmatprep.subr.mxu1 %v17371_v35  ;;  %12467 = vmatprep.subr.mxu0 %v9961_v28 }
 0x7b6   : > { %12446 = vmatprep.mubr.f32.mxu0 %v17374_v8  ;;  %12454 = vmatpush3.msra.mxu1 %v17371_v35  ;;  %v19208_v8 = vld [vmem:[#allocation148_spill] sm:$0xff] }
 0x7b7   : > { %12468 = vmatpush3.msra.mxu0 %v9961_v28  ;;  %12455 = vmatprep.subr.mxu1 %v17377_v58  ;;  %v1926_v59 = vadd.f32 %v19209_v31, %v19208_v8  ;;  %v19215_v28 = vld [vmem:[#allocation152_spill] sm:$0xff] }
 0x7b8   : > { %12447 = vmatmul.mubr.f32.gmra.mxu0 %v17380_v32  ;;  %12469 = vmatprep.subr.mxu0 %v9968_v42  ;;  %v1940_v26 = vadd.f32 %v19216_v29, %v19215_v28  ;;  %v19229_v31 = vld [vmem:[#allocation232_spill] sm:$0xff] }
 0x7b9   : > { %12456 = vmatpush3.msra.mxu1 %v17377_v58  ;;  %12457 = vmatprep.mubr.f32.mxu1 %v9882_v53 }
 0x7ba   : > { %12470 = vmatpush3.msra.mxu0 %v9968_v42  ;;  %12458 = vmatmul.mubr.f32.vlgmr.msra.gmra.mxu1 %v9892_v17  ;;  %v19218_v42 = vld [vmem:[#allocation217_spill] sm:$0xff] }
 0x7bb   : > { %12477 = vmatprep.subr.mxu1 %v17382_v4  ;;  %12471 = vmatprep.mubr.f32.mxu0 %v17332_v56 }
 0x7bc   : > { %12478 = vmatpush3.msra.mxu1 %v17382_v4  ;;  %12472 = vmatmul.mubr.f32.vlgmr.msra.gmra.mxu0 %v17357_v21 }
 0x7bd   : > { %12479 = vmatprep.subr.mxu1 %v17387_v38  ;;  %12460 = vmatprep.mubr.f32.mxu1 %v9902_v36  ;;  %v2084_v36 = vadd.f32 %v19211_v30, %v1926_v59 }
 0x7be   : > { %12480 = vmatpush3.msra.mxu1 %v17387_v38  ;;  %12474 = vmatprep.mubr.f32.mxu0 %v17367_v44  ;;  %v19213_v38 = vld [vmem:[#allocation176_spill] sm:$0xff] }
 0x7bf   : > { %12461 = vmatmul.mubr.f32.gmra.mxu1 %v9912_v51  ;;  %12481 = vmatprep.subr.mxu1 %v17371_v35  ;;  %v1947_v16 = vadd.f32 %v19213_v38, %v19212_v54  ;;  %v19214_v51 = vld [vmem:[#allocation203_spill] sm:$0xff]  ;;  %v2214_v0 = vadd.f32 %v19217_v60, %v2084_v36 }
 0x7c0   : > { %12482 = vmatpush3.msra.mxu1 %v17371_v35  ;;  %12475 = vmatmul.mubr.f32.gmra.mxu0 %v17369_v37 }
 0x7c1   : > { %12483 = vmatprep.subr.mxu1 %v17377_v58  ;;  %12485 = vmatprep.mubr.f32.mxu1 %v17332_v56  ;;  %v2108_v22 = vadd.f32 %v19218_v42, %v1947_v16 }
 0x7c2   : > { %12484 = vmatpush3.msra.mxu1 %v17377_v58 }
 0x7c3   : > { %12486 = vmatmul.mubr.f32.vlgmr.msra.gmra.mxu1 %v17357_v21 }
 0x7c4   : > { %12488 = vmatprep.mubr.f32.mxu1 %v17367_v44 }
 0x7c7   : > { %12489 = vmatmul.mubr.f32.gmra.mxu1 %v17369_v37  ;;  %v19207_v37 = vld [vmem:[#allocation154_spill] sm:$0xff] }
 0x7c8   : > { %v1933_v52 = vadd.f32 %v19207_v37, %v19206_v46  ;;  %v19227_v46 = vld [vmem:[#allocation131_spill] sm:$0xff] }
 0x7ca   : > { %v2092_v17 = vadd.f32 %v19210_v6, %v1933_v52 }
 0x7cc   : > { %v2223_v20 = vadd.f32 %v19214_v51, %v2092_v17 }
 0x7ce   : > { %v2416_v62 = vadd.f32 %v19219_v24, %v2223_v20 }
 0x865   : > { %v12417_v1 = vpop.f32.mrf.mxu0 }
 0x866   : > { %v9897_v56 = vadd.f32 %v12417_v1, %v9786_v43  ;;  %v2100_v1 = vadd.f32 %v19220_v18, %v1940_v26 }
 0x867   : > { %v9886_v53 = vpop.f32.mrf.mxu0 }
 0x868   : > { %v9887_v63 = vadd.f32 %v9886_v53, %v9781_v47  ;;  %v19221_v53 = vld [vmem:[#allocation226_spill] sm:$0xff] }
 0x86a   : > { %v12420_v41 = vpop.f32.mrf.mxu0 }
 0x86b   : > { %v9917_v44 = vadd.f32 %v12420_v41, %v9796_v61  ;;  %v2241_v41 = vadd.f32 %v19221_v53, %v2108_v22 }
 0x86c   : > { %v9906_v10 = vpop.f32.mrf.mxu0 }
 0x86d   : > { %v9907_v23 = vadd.f32 %v9906_v10, %v9791_v3  ;;  %v19222_v10 = vld [vmem:[#allocation223_spill] sm:$0xff] }
 0x86e   : > { %v12431_v19 = vpop.f32.mrf.mxu1 }
 0x86f   : > { %v10014_v50 = vadd.f32 %v12431_v19, %v9897_v56  ;;  %v2409_v19 = vadd.f32 %v19222_v10, %v2214_v0  ;;  %v19224_v56 = vld [vmem:[#allocation218_spill] sm:$0xff] }
 0x870   : > { %v10007_v14 = vpop.f32.mrf.mxu1  ;;  %v12445_v12 = vpop.f32.mrf.mxu0 }
 0x871   : > { %v10008_v15 = vadd.f32 %v10007_v14, %v9887_v63  ;;  %v10113_v9 = vadd.f32 %v12445_v12, %v10014_v50  ;;  %v19223_v12 = vld [vmem:[#allocation231_spill] sm:$0xff]  ;;  %v19225_v63 = vld [vmem:[#allocation230_spill] sm:$0xff] }
 0x872   : > { %v10105_v57 = vpop.f32.mrf.mxu0  ;;  %v2541_v43 = vadd.f32 %v19223_v12, %v2416_v62  ;;  %v2534_v50 = vadd.f32 %v19225_v63, %v2409_v19 }
 0x873   : > { %v10106_v58 = vadd.f32 %v10105_v57, %v10008_v15 }
 0x874   : > { %v12434_v13 = vpop.f32.mrf.mxu1 }
 0x875   : > { %v10026_v55 = vadd.f32 %v12434_v13, %v9917_v44  ;;  %v19226_v44 = vld [vmem:[#allocation256_spill] sm:$0xff] }
 0x876   : > { %v10019_v25 = vpop.f32.mrf.mxu1  ;;  %v2430_v15 = vadd.f32 %v19226_v44, %v2241_v41 }
 0x877   : > { %v10020_v32 = vadd.f32 %v10019_v25, %v9907_v23  ;;  %v2232_v25 = vadd.f32 %v19224_v56, %v2100_v1  ;;  %v19228_v23 = vld [vmem:[#allocation252_spill] sm:$0xff] }
 0x878   : > { %v12448_v21 = vpop.f32.mrf.mxu0 }
 0x879   : > { %v10127_v5 = vadd.f32 %v12448_v21, %v10026_v55  ;;  %v2423_v37 = vadd.f32 %v19227_v46, %v2232_v25 }
 0x87a   : > { %v10119_v33 = vpop.f32.mrf.mxu0  ;;  %v12459_v49 = vpop.f32.mrf.mxu1 }
 0x87b   : > { %v10212_v4 = vadd.f32 %v12459_v49, %v10113_v9  ;;  %v10120_v39 = vadd.f32 %v10119_v33, %v10020_v32  ;;  %v2555_v9 = vadd.f32 %v19228_v23, %v2430_v15  ;;  %v2548_v59 = vadd.f32 %v19229_v31, %v2423_v37 }
 0x87c   : > { %v10203_v45 = vpop.f32.mrf.mxu1  ;;  %v12473_v35 = vpop.f32.mrf.mxu0 }
 0x87d   : > { %v10204_v48 = vadd.f32 %v10203_v45, %v10106_v58  ;;  %v10317_v7 = vadd.f32 %v12473_v35, %v10212_v4 }
 0x87e   : > { %v10310_v2 = vpop.f32.mrf.mxu0 }
 0x87f   : > { %v12462_v34 = vpop.f32.mrf.mxu1  ;;  %v10311_v13 = vadd.f32 %v10310_v2, %v10204_v48 }
 0x880   : > { %v12476_v27 = vpop.f32.mrf.mxu0  ;;  %v10228_v40 = vadd.f32 %v12462_v34, %v10127_v5 }
 0x881   : > { %v10219_v11 = vpop.f32.mrf.mxu1 }
 0x882   : > { %v10220_v57 = vadd.f32 %v10219_v11, %v10120_v39  ;;  %v10322_v21 = vpop.f32.mrf.mxu0  ;;  %v10329_v33 = vadd.f32 %v12476_v27, %v10228_v40 }
 0x883   : > { %v12487_v14 = vpop.f32.mrf.mxu1 }
 0x884   : > { %v10410_v47 = vadd.f32 %v12487_v14, %v10317_v7  ;;  %v10323_v55 = vadd.f32 %v10322_v21, %v10220_v57 }
 0x885   : > { %v10403_v61 = vpop.f32.mrf.mxu1 }
 0x886   : > { %v10426_v49 = vadd.f32 %v10410_v47, %v2541_v43  ;;  %v10404_v3 = vadd.f32 %v10403_v61, %v10311_v13 }
 0x887   : > { %v12490_v52 = vpop.f32.mrf.mxu1 }
 0x888   : > { %10430 = vst [vmem:[%s484_s17 + $0x8] sm:$0xff] %v10426_v49  ;;  %v10425_v45 = vadd.f32 %v10404_v3, %v2534_v50  ;;  %v10422_v35 = vadd.f32 %v12490_v52, %v10329_v33 }
 0x889   : > { %v10415_v8 = vpop.f32.mrf.mxu1 }
 0x88a   : > { %10429 = vst [vmem:[%s484_s17] sm:$0xff] %v10425_v45  ;;  %v10428_v6 = vadd.f32 %v10422_v35, %v2555_v9  ;;  %v10416_v17 = vadd.f32 %v10415_v8, %v10323_v55 }
 0x88c   : > { %10432 = vst [vmem:[%s484_s17 + $0x18] sm:$0xff] %v10428_v6  ;;  %v10427_v58 = vadd.f32 %v10416_v17, %v2548_v59 }
 0x88e   : > { %10431 = vst [vmem:[%s484_s17 + $0x10] sm:$0xff] %v10427_v58 }
 0x88f PF: > { %s22_s23 = sadd.s32 1, %s12565_s23   ;;  %s19230_s21 = smov %s12561_s22 }
 0x890   : > { %p19_p5 = scmp.ge.s32.totalorder %s22_s23, 4   ;;  %s19231_s22 = smov %s19233_s24 }
 0x892   :  { %21 = sbr.rel (!%p19_p5) target bundleno = 2 (0x2), region = 104 }

</bundles_post_ra>
